<compile_context>
chip_gen: v6e
topology: v6e:2x2x1
jax: 0.10.0
libtpu: 0.0.40
codegen_flags: <defaults>
</compile_context>

<pallas_src>
import jax
import jax.numpy as jnp
from jax import lax
from jax.experimental import pallas as pl
from jax.experimental.pallas import tpu as pltpu


_VMEM_LIMIT = 48 * 1024 * 1024  # safe on v5e/v6e (128 MiB) and v7x (64 MiB)


def _pick_row_block(n, cap=512):
    """Largest row-block that divides n, is a multiple of 8 (or == n)."""
    if n <= cap:
        return n
    start = cap - (cap % 8)
    for tr in range(start, 7, -8):
        if n % tr == 0:
            return tr
    return n


# -----------------------------------------------------------------------------
# Kernel 1: fused bi-directional input->gates projection (the FLOPs hot spot)
#   x2d [N, F] (bf16)  @  w_in [F, 8*Hp] (bf16)  + b_in [1, 8*Hp] (f32)
#   -> gx2d [N, 8*Hp] (f32), N = S*B, gridded over rows ("parallel").
# -----------------------------------------------------------------------------
def input_proj_kernel(x_ref, w_ref, b_ref, gx_ref):
    gx_ref[...] = (
        jnp.dot(x_ref[...], w_ref[...], preferred_element_type=jnp.float32)
        + b_ref[...]
    )


def input_projection(x2d, w_in, b_in):
    N, F = x2d.shape
    G = w_in.shape[1]
    tr = _pick_row_block(N)
    return pl.pallas_call(
        input_proj_kernel,
        out_shape=jax.ShapeDtypeStruct((N, G), jnp.float32),
        grid=(N // tr,),
        in_specs=[
            pl.BlockSpec((tr, F), lambda i: (i, 0)),
            pl.BlockSpec((F, G), lambda i: (0, 0)),
            pl.BlockSpec((1, G), lambda i: (0, 0)),
        ],
        out_specs=pl.BlockSpec((tr, G), lambda i: (i, 0)),
        compiler_params=pltpu.CompilerParams(
            dimension_semantics=("parallel",),
            vmem_limit_bytes=_VMEM_LIMIT,
        ),
        cost_estimate=pl.CostEstimate(
            flops=2 * N * F * G,
            transcendentals=0,
            bytes_accessed=N * F * 2 + F * G * 2 + G * 4 + N * G * 4,
        ),
    )(x2d, w_in, b_in)


# -----------------------------------------------------------------------------
# Kernel 2: BiLSTM recurrence only (lightweight per-step work).
#   gx [S, B, 8*Hp] : precomputed gate pre-activations (fwd gates | bwd gates)
#   whh_f/whh_b [Hp, 4*Hp] : recurrent weights, each gate on its own 128-lane block
#   outputs hf/hb [S, B, Hp] : per-direction hidden states
# Gate order follows nn.LSTM: i, f, g, o.  Padded lanes stay exactly 0 because
# their weights/biases are zero-padded (c=0 -> h = 0.5*tanh(0) = 0).
# TODO(synk): for production-scale S*B the [S,B,8Hp] gate buffer should be
# streamed (grid over S, h/c carried in scratch) instead of whole-in-VMEM;
# demo shapes fit comfortably.
# -----------------------------------------------------------------------------
def bilstm_recurrence_kernel(gx_ref, whh_f_ref, whh_b_ref, hf_ref, hb_ref):
    S, B, _ = gx_ref.shape
    Hp = whh_f_ref.shape[0]
    G4 = 4 * Hp

    def cell(g_pre, h, c, whh):
        gates = g_pre + jnp.dot(h, whh, preferred_element_type=jnp.float32)
        i_g = jax.nn.sigmoid(gates[:, 0:Hp])
        f_g = jax.nn.sigmoid(gates[:, Hp:2 * Hp])
        g_g = jnp.tanh(gates[:, 2 * Hp:3 * Hp])
        o_g = jax.nn.sigmoid(gates[:, 3 * Hp:4 * Hp])
        c_new = f_g * c + i_g * g_g
        h_new = o_g * jnp.tanh(c_new)
        return h_new, c_new

    h0 = jnp.zeros((B, Hp), jnp.float32)
    unroll = True if S <= 16 else 8

    # ---- forward direction ----
    def fwd_body(t, carry):
        h, c = carry
        g_t = gx_ref[t]                       # [B, 8*Hp]
        h, c = cell(g_t[:, :G4], h, c, whh_f_ref[...])
        hf_ref[t] = h
        return (h, c)

    lax.fori_loop(0, S, fwd_body, (h0, h0), unroll=unroll)

    # ---- backward direction ----
    def bwd_body(s, carry):
        t = S - 1 - s
        h, c = carry
        g_t = gx_ref[t]
        h, c = cell(g_t[:, G4:], h, c, whh_b_ref[...])
        hb_ref[t] = h
        return (h, c)

    lax.fori_loop(0, S, bwd_body, (h0, h0), unroll=unroll)


def bilstm_recurrence(gx, whh_f, whh_b):
    S, B, G = gx.shape
    Hp = whh_f.shape[0]
    return pl.pallas_call(
        bilstm_recurrence_kernel,
        out_shape=(
            jax.ShapeDtypeStruct((S, B, Hp), jnp.float32),
            jax.ShapeDtypeStruct((S, B, Hp), jnp.float32),
        ),
        in_specs=[pl.BlockSpec(memory_space=pltpu.MemorySpace.VMEM)] * 3,
        out_specs=(
            pl.BlockSpec(memory_space=pltpu.MemorySpace.VMEM),
            pl.BlockSpec(memory_space=pltpu.MemorySpace.VMEM),
        ),
        compiler_params=pltpu.CompilerParams(vmem_limit_bytes=_VMEM_LIMIT),
        cost_estimate=pl.CostEstimate(
            flops=2 * (2 * S * B * Hp * 4 * Hp) + 10 * S * B * Hp,
            transcendentals=2 * 5 * S * B * Hp,
            bytes_accessed=S * B * G * 4 + 2 * Hp * 4 * Hp * 4 + 2 * S * B * Hp * 4,
        ),
    )(gx, whh_f, whh_b)


# -----------------------------------------------------------------------------
# Kernel 3: batched hidden2tag projection with lane-padded (Tp=128k) output.
#   tags2d [N, Tp] = hf2d [N, Hp] @ wt_f [Hp, Tp] + hb2d [N, Hp] @ wt_b [Hp, Tp] + b
# -----------------------------------------------------------------------------
def tag_proj_kernel(hf_ref, hb_ref, wtf_ref, wtb_ref, b_ref, tags_ref):
    tags_ref[...] = (
        jnp.dot(hf_ref[...], wtf_ref[...], preferred_element_type=jnp.float32)
        + jnp.dot(hb_ref[...], wtb_ref[...], preferred_element_type=jnp.float32)
        + b_ref[...]
    )


def tag_projection(hf2d, hb2d, wt_f, wt_b, btag):
    N, Hp = hf2d.shape
    Tp = wt_f.shape[1]
    tr = _pick_row_block(N)
    return pl.pallas_call(
        tag_proj_kernel,
        out_shape=jax.ShapeDtypeStruct((N, Tp), jnp.float32),
        grid=(N // tr,),
        in_specs=[
            pl.BlockSpec((tr, Hp), lambda i: (i, 0)),
            pl.BlockSpec((tr, Hp), lambda i: (i, 0)),
            pl.BlockSpec((Hp, Tp), lambda i: (0, 0)),
            pl.BlockSpec((Hp, Tp), lambda i: (0, 0)),
            pl.BlockSpec((1, Tp), lambda i: (0, 0)),
        ],
        out_specs=pl.BlockSpec((tr, Tp), lambda i: (i, 0)),
        compiler_params=pltpu.CompilerParams(
            dimension_semantics=("parallel",),
            vmem_limit_bytes=_VMEM_LIMIT,
        ),
        cost_estimate=pl.CostEstimate(
            flops=2 * 2 * N * Hp * Tp,
            transcendentals=0,
            bytes_accessed=2 * N * Hp * 4 + 2 * Hp * Tp * 4 + N * Tp * 4,
        ),
    )(hf2d, hb2d, wt_f, wt_b, btag)


# -----------------------------------------------------------------------------
# CRF Viterbi decode (torchcrf semantics, batch_first=True).
# TODO(synk): data-dependent variable-length backtrace has no clean Pallas
# equivalent; implemented in plain JAX (tiny T x T DP).  Output is a fixed
# [B, S] int array, valid where mask == 1.
# -----------------------------------------------------------------------------
def crf_decode(emissions, mask, start_trans, end_trans, trans):
    em = jnp.transpose(emissions, (1, 0, 2))          # [S, B, T]
    m = jnp.transpose(mask, (1, 0)).astype(bool)      # [S, B]
    S, B, T = em.shape

    score = start_trans[None, :] + em[0]              # [B, T]

    def step(score, inp):
        em_t, m_t = inp
        broadcast = score[:, :, None] + trans[None, :, :] + em_t[:, None, :]
        next_score = jnp.max(broadcast, axis=1)
        indices = jnp.argmax(broadcast, axis=1).astype(jnp.int32)
        score = jnp.where(m_t[:, None], next_score, score)
        return score, indices

    score, history = lax.scan(step, score, (em[1:], m[1:]))
    score = score + end_trans[None, :]
    best_last = jnp.argmax(score, axis=1).astype(jnp.int32)

    seq_end = jnp.sum(m.astype(jnp.int32), axis=0) - 1
    hist_full = jnp.concatenate(
        [history, jnp.zeros((1, B, T), jnp.int32)], axis=0)

    def back(tag, pos):
        tag_from_hist = jnp.take_along_axis(hist_full[pos], tag[:, None], axis=1)[:, 0]
        new_tag = jnp.where(pos == seq_end, best_last, tag_from_hist)
        return new_tag, new_tag

    _, decoded_rev = lax.scan(back, jnp.zeros((B,), jnp.int32),
                              jnp.arange(S - 1, -1, -1))
    decoded = decoded_rev[::-1]
    return jnp.transpose(decoded, (1, 0))             # [B, S]


# -----------------------------------------------------------------------------
# Full forward: get_tags + crf.decode
# -----------------------------------------------------------------------------
def multi_feature_forward(params, word_inputs, biword_inputs, mask,
                          batch_bert, bert_mask):
    # embedding lookups (padding_idx=0 rows are zeroed in the tables)
    word_embs = params["word_emb"][word_inputs]        # [B, S, We]
    biword_embs = params["biword_emb"][biword_inputs]  # [B, S, Be]
    feats = jnp.concatenate([word_embs, biword_embs], axis=-1)
    # TODO(synk): nn.Dropout treated as identity (eval-mode forward).

    # TODO(synk): pretrained 12-layer BertModel cannot be reproduced from the
    # module; stubbed as a deterministic frozen token-embedding producing the
    # same [B, S, 768] sliced ([:, 1:-1, :]) feature shape.
    bert_feats = params["bert_tok_emb"][batch_bert][:, 1:-1, :]  # [B, S, 768]
    feats = jnp.concatenate([feats, bert_feats], axis=-1)        # [B, S, F]

    B, S, F = feats.shape
    Hp = params["whhT_f_p"].shape[0]
    Tp = params["btag_p"].shape[1]
    T = params["crf_trans"].shape[0]

    # time-major, flattened rows; bf16 for the MXU (f32 accumulation inside).
    x_sbf = jnp.transpose(feats, (1, 0, 2))                      # [S, B, F]
    x2d = x_sbf.reshape(S * B, F).astype(jnp.bfloat16)

    # 1) hoisted fused input projection for both directions
    gx2d = input_projection(x2d, params["w_in"], params["b_in"])  # [S*B, 8Hp]
    gx = gx2d.reshape(S, B, 8 * Hp)

    # 2) serial BiLSTM recurrence (small per-step work only)
    hf, hb = bilstm_recurrence(gx, params["whhT_f_p"], params["whhT_b_p"])

    # 3) batched lane-dense hidden2tag projection
    tags2d = tag_projection(hf.reshape(S * B, Hp), hb.reshape(S * B, Hp),
                            params["wtagT_f_p"], params["wtagT_b_p"],
                            params["btag_p"])                     # [S*B, Tp]
    tags = tags2d.reshape(S, B, Tp)[:, :, :T]
    tags = jnp.transpose(tags, (1, 0, 2))                         # [B, S, T]

    tag_seq = crf_decode(tags, mask,
                         params["crf_start"], params["crf_end"],
                         params["crf_trans"])
    return tag_seq


# -----------------------------------------------------------------------------
# Deterministic parameter init (shapes follow the PyTorch module __init__)
# -----------------------------------------------------------------------------
def init_params(key, word_vocab, biword_vocab, bert_vocab,
                word_emb_dim, biword_emb_dim, bert_dim, hidden, num_tags):
    F = word_emb_dim + biword_emb_dim + bert_dim
    ks = jax.random.split(key, 16)

    def u(k, shape, scale):
        return jax.random.uniform(k, shape, jnp.float32, -scale, scale)

    word_emb = u(ks[0], (word_vocab, word_emb_dim), 0.5).at[0].set(0.0)
    biword_emb = u(ks[1], (biword_vocab, biword_emb_dim), 0.5).at[0].set(0.0)
    bert_tok_emb = u(ks[2], (bert_vocab, bert_dim), 0.1)

    s = 1.0 / jnp.sqrt(hidden)
    # nn.LSTM: weight_ih [4H, F], weight_hh [4H, H]; stored transposed for MXU.
    wihT_f = u(ks[3], (F, 4 * hidden), s)
    whhT_f = u(ks[4], (hidden, 4 * hidden), s)
    b_f = (u(ks[5], (1, 4 * hidden), s) + u(ks[6], (1, 4 * hidden), s))
    wihT_b = u(ks[7], (F, 4 * hidden), s)
    whhT_b = u(ks[8], (hidden, 4 * hidden), s)
    b_b = (u(ks[9], (1, 4 * hidden), s) + u(ks[10], (1, 4 * hidden), s))

    # hidden2tag: Linear(2H, num_tags) -> weight [T, 2H]; stored transposed.
    st = 1.0 / jnp.sqrt(2.0 * hidden)
    wtagT = u(ks[11], (2 * hidden, num_tags), st)
    btag = u(ks[12], (1, num_tags), st)

    # torchcrf: uniform(-0.1, 0.1)
    crf_start = u(ks[13], (num_tags,), 0.1)
    crf_end = u(ks[14], (num_tags,), 0.1)
    crf_trans = u(ks[15], (num_tags, num_tags), 0.1)

    return dict(word_emb=word_emb, biword_emb=biword_emb, bert_tok_emb=bert_tok_emb,
                wihT_f=wihT_f, whhT_f=whhT_f, b_f=b_f,
                wihT_b=wihT_b, whhT_b=whhT_b, b_b=b_b,
                wtagT=wtagT, btag=btag,
                crf_start=crf_start, crf_end=crf_end, crf_trans=crf_trans)


def prepare_kernel_params(raw, hidden, num_tags):
    """One-time fusion / padding of the LSTM + tag weights into kernel layout:
    each gate is padded to its own 128-lane block (Hp), both directions'
    input projections are fused into one [F, 8*Hp] bf16 matrix, and the tag
    projection is padded to Tp=128k lanes."""
    H = hidden
    T = num_tags
    Hp = ((H + 127) // 128) * 128
    Tp = ((T + 127) // 128) * 128

    def pad_gate_cols(w):
        # [..., 4H] -> [..., 4Hp] with each gate block starting at k*Hp
        blocks = []
        for k in range(4):
            blk = w[..., k * H:(k + 1) * H]
            pad = [(0, 0)] * (w.ndim - 1) + [(0, Hp - H)]
            blocks.append(jnp.pad(blk, pad))
        return jnp.concatenate(blocks, axis=-1)

    wih_f = pad_gate_cols(raw["wihT_f"])                           # [F, 4Hp]
    wih_b = pad_gate_cols(raw["wihT_b"])
    w_in = jnp.concatenate([wih_f, wih_b], axis=-1).astype(jnp.bfloat16)  # [F, 8Hp]
    b_in = jnp.concatenate([pad_gate_cols(raw["b_f"]),
                            pad_gate_cols(raw["b_b"])], axis=-1)   # [1, 8Hp] f32

    whh_f = jnp.pad(pad_gate_cols(raw["whhT_f"]), [(0, Hp - H), (0, 0)])  # [Hp,4Hp]
    whh_b = jnp.pad(pad_gate_cols(raw["whhT_b"]), [(0, Hp - H), (0, 0)])

    wt = raw["wtagT"]                                              # [2H, T]
    wt_f = jnp.pad(wt[:H], [(0, Hp - H), (0, Tp - T)])             # [Hp, Tp]
    wt_b = jnp.pad(wt[H:], [(0, Hp - H), (0, Tp - T)])
    btag = jnp.pad(raw["btag"], [(0, 0), (0, Tp - T)])             # [1, Tp]

    return dict(
        word_emb=raw["word_emb"], biword_emb=raw["biword_emb"],
        bert_tok_emb=raw["bert_tok_emb"],
        w_in=w_in, b_in=b_in,
        whhT_f_p=whh_f, whhT_b_p=whh_b,
        wtagT_f_p=wt_f, wtagT_b_p=wt_b, btag_p=btag,
        crf_start=raw["crf_start"], crf_end=raw["crf_end"],
        crf_trans=raw["crf_trans"])


if __name__ == "__main__":
    B, S = 2, 8
    word_vocab, biword_vocab, bert_vocab = 50, 60, 100
    word_emb_dim, biword_emb_dim, bert_dim = 16, 16, 768
    hidden = 32           # lstm_hidden per direction (bilstm -> 2*hidden)
    num_tags = 8          # data.label_alphabet_size

    key = jax.random.PRNGKey(0)
    kp, k1, k2, k3 = jax.random.split(key, 4)

    raw_params = init_params(kp, word_vocab, biword_vocab, bert_vocab,
                             word_emb_dim, biword_emb_dim, bert_dim,
                             hidden, num_tags)
    params = prepare_kernel_params(raw_params, hidden, num_tags)

    word_inputs = jax.random.randint(k1, (B, S), 1, word_vocab, dtype=jnp.int32)
    biword_inputs = jax.random.randint(k2, (B, S), 1, biword_vocab, dtype=jnp.int32)
    mask = jnp.ones((B, S), jnp.int32)
    batch_bert = jax.random.randint(k3, (B, S + 2), 1, bert_vocab, dtype=jnp.int32)
    bert_mask = jnp.ones((B, S + 2), jnp.int32)

    fwd = jax.jit(multi_feature_forward)
    tag_seq = fwd(params, word_inputs, biword_inputs, mask, batch_bert, bert_mask)
    jax.block_until_ready(tag_seq)
    assert tag_seq.shape == (B, S)
    print("KERNEL_OK")
</pallas_src>

<mosaic_0001>
module attributes {stable_mosaic.version = 11 : i64} {
  func.func @input_proj_kernel(%arg0: i32, %arg1: memref<16x800xbf16, #tpu.memory_space<vmem>>, %arg2: memref<800x1024xbf16, #tpu.memory_space<vmem>>, %arg3: memref<1x1024xf32, #tpu.memory_space<vmem>>, %arg4: memref<16x1024xf32, #tpu.memory_space<vmem>>) attributes {dimension_semantics = [#tpu.dimension_semantics<parallel>], iteration_bounds = array<i64: 1>, scalar_prefetch = 0 : i64, scratch_operands = 0 : i64, tpu.core_type = #tpu.core_type<tc>, window_params = [{transform_indices = @transform_0, window_bounds = array<i64: 16, 800>}, {pipeline_mode = #tpu.pipeline_mode<synchronous>, transform_indices = @transform_1, window_bounds = array<i64: 800, 1024>}, {pipeline_mode = #tpu.pipeline_mode<synchronous>, transform_indices = @transform_2, window_bounds = array<i64: 1, 1024>}, {transform_indices = @transform_3, window_bounds = array<i64: 16, 1024>}]} {
    %c0 = arith.constant 0 : index
    %c0_0 = arith.constant 0 : index
    %0 = vector.load %arg1[%c0, %c0_0] : memref<16x800xbf16, #tpu.memory_space<vmem>>, vector<16x800xbf16>
    %c0_1 = arith.constant 0 : index
    %c0_2 = arith.constant 0 : index
    %1 = vector.load %arg2[%c0_1, %c0_2] : memref<800x1024xbf16, #tpu.memory_space<vmem>>, vector<800x1024xbf16>
    %cst = arith.constant dense<0.000000e+00> : vector<16x1024xf32>
    %2 = tpu.matmul %0, %1, %cst {dimension_numbers = #tpu.dot_dimension_numbers<[1], [0], [0], [1], [0, 0, 1, 1], [], []>} : vector<16x800xbf16>, vector<800x1024xbf16>, vector<16x1024xf32> -> vector<16x1024xf32>
    %c0_3 = arith.constant 0 : index
    %c0_4 = arith.constant 0 : index
    %3 = vector.load %arg3[%c0_3, %c0_4] : memref<1x1024xf32, #tpu.memory_space<vmem>>, vector<1x1024xf32>
    %4 = vector.broadcast %3 : vector<1x1024xf32> to vector<16x1024xf32>
    %5 = arith.addf %2, %4 : vector<16x1024xf32>
    %c0_5 = arith.constant 0 : index
    %c0_6 = arith.constant 0 : index
    %6 = vector.load %arg4[%c0_5, %c0_6] : memref<16x1024xf32, #tpu.memory_space<vmem>>, vector<16x1024xf32>
    tpu.vector_store %arg4[%c0_5, %c0_6], %5 {strides = array<i32>} : memref<16x1024xf32, #tpu.memory_space<vmem>>, vector<16x1024xf32>,
    return
  }
  func.func @transform_0(%arg0: i32) -> (i32, i32) {
    %c0_i32 = arith.constant 0 : i32
    %c0_i32_0 = arith.constant 0 : i32
    return %arg0, %c0_i32 : i32, i32
  }
  func.func @transform_1(%arg0: i32) -> (i32, i32) {
    %c0_i32 = arith.constant 0 : i32
    %c0_i32_0 = arith.constant 0 : i32
    %c0_i32_1 = arith.constant 0 : i32
    return %c0_i32, %c0_i32_0 : i32, i32
  }
  func.func @transform_2(%arg0: i32) -> (i32, i32) {
    %c0_i32 = arith.constant 0 : i32
    %c0_i32_0 = arith.constant 0 : i32
    %c0_i32_1 = arith.constant 0 : i32
    return %c0_i32, %c0_i32_0 : i32, i32
  }
  func.func @transform_3(%arg0: i32) -> (i32, i32) {
    %c0_i32 = arith.constant 0 : i32
    %c0_i32_0 = arith.constant 0 : i32
    return %arg0, %c0_i32 : i32, i32
  }
}

module attributes {stable_mosaic.version = 11 : i64} {
  func.func @tag_proj_kernel(%arg0: i32, %arg1: memref<16x128xf32, #tpu.memory_space<vmem>>, %arg2: memref<16x128xf32, #tpu.memory_space<vmem>>, %arg3: memref<128x128xf32, #tpu.memory_space<vmem>>, %arg4: memref<128x128xf32, #tpu.memory_space<vmem>>, %arg5: memref<1x128xf32, #tpu.memory_space<vmem>>, %arg6: memref<16x128xf32, #tpu.memory_space<vmem>>) attributes {dimension_semantics = [#tpu.dimension_semantics<parallel>], iteration_bounds = array<i64: 1>, scalar_prefetch = 0 : i64, scratch_operands = 0 : i64, tpu.core_type = #tpu.core_type<tc>, window_params = [{transform_indices = @transform_0, window_bounds = array<i64: 16, 128>}, {transform_indices = @transform_1, window_bounds = array<i64: 16, 128>}, {pipeline_mode = #tpu.pipeline_mode<synchronous>, transform_indices = @transform_2, window_bounds = array<i64: 128, 128>}, {pipeline_mode = #tpu.pipeline_mode<synchronous>, transform_indices = @transform_3, window_bounds = array<i64: 128, 128>}, {pipeline_mode = #tpu.pipeline_mode<synchronous>, transform_indices = @transform_4, window_bounds = array<i64: 1, 128>}, {transform_indices = @transform_5, window_bounds = array<i64: 16, 128>}]} {
    %c0 = arith.constant 0 : index
    %c0_0 = arith.constant 0 : index
    %0 = vector.load %arg1[%c0, %c0_0] : memref<16x128xf32, #tpu.memory_space<vmem>>, vector<16x128xf32>
    %c0_1 = arith.constant 0 : index
    %c0_2 = arith.constant 0 : index
    %1 = vector.load %arg3[%c0_1, %c0_2] : memref<128x128xf32, #tpu.memory_space<vmem>>, vector<128x128xf32>
    %cst = arith.constant dense<0.000000e+00> : vector<16x128xf32>
    %2 = tpu.matmul %0, %1, %cst {dimension_numbers = #tpu.dot_dimension_numbers<[1], [0], [0], [1], [0, 0, 1, 1], [], []>} : vector<16x128xf32>, vector<128x128xf32>, vector<16x128xf32> -> vector<16x128xf32>
    %c0_3 = arith.constant 0 : index
    %c0_4 = arith.constant 0 : index
    %3 = vector.load %arg2[%c0_3, %c0_4] : memref<16x128xf32, #tpu.memory_space<vmem>>, vector<16x128xf32>
    %c0_5 = arith.constant 0 : index
    %c0_6 = arith.constant 0 : index
    %4 = vector.load %arg4[%c0_5, %c0_6] : memref<128x128xf32, #tpu.memory_space<vmem>>, vector<128x128xf32>
    %cst_7 = arith.constant dense<0.000000e+00> : vector<16x128xf32>
    %5 = tpu.matmul %3, %4, %cst_7 {dimension_numbers = #tpu.dot_dimension_numbers<[1], [0], [0], [1], [0, 0, 1, 1], [], []>} : vector<16x128xf32>, vector<128x128xf32>, vector<16x128xf32> -> vector<16x128xf32>
    %6 = arith.addf %2, %5 : vector<16x128xf32>
    %c0_8 = arith.constant 0 : index
    %c0_9 = arith.constant 0 : index
    %7 = vector.load %arg5[%c0_8, %c0_9] : memref<1x128xf32, #tpu.memory_space<vmem>>, vector<1x128xf32>
    %8 = vector.broadcast %7 : vector<1x128xf32> to vector<16x128xf32>
    %9 = arith.addf %6, %8 : vector<16x128xf32>
    %c0_10 = arith.constant 0 : index
    %c0_11 = arith.constant 0 : index
    %10 = vector.load %arg6[%c0_10, %c0_11] : memref<16x128xf32, #tpu.memory_space<vmem>>, vector<16x128xf32>
    tpu.vector_store %arg6[%c0_10, %c0_11], %9 {strides = array<i32>} : memref<16x128xf32, #tpu.memory_space<vmem>>, vector<16x128xf32>,
    return
  }
  func.func @transform_0(%arg0: i32) -> (i32, i32) {
    %c0_i32 = arith.constant 0 : i32
    %c0_i32_0 = arith.constant 0 : i32
    return %arg0, %c0_i32 : i32, i32
  }
  func.func @transform_1(%arg0: i32) -> (i32, i32) {
    %c0_i32 = arith.constant 0 : i32
    %c0_i32_0 = arith.constant 0 : i32
    return %arg0, %c0_i32 : i32, i32
  }
  func.func @transform_2(%arg0: i32) -> (i32, i32) {
    %c0_i32 = arith.constant 0 : i32
    %c0_i32_0 = arith.constant 0 : i32
    %c0_i32_1 = arith.constant 0 : i32
    return %c0_i32, %c0_i32_0 : i32, i32
  }
  func.func @transform_3(%arg0: i32) -> (i32, i32) {
    %c0_i32 = arith.constant 0 : i32
    %c0_i32_0 = arith.constant 0 : i32
    %c0_i32_1 = arith.constant 0 : i32
    return %c0_i32, %c0_i32_0 : i32, i32
  }
  func.func @transform_4(%arg0: i32) -> (i32, i32) {
    %c0_i32 = arith.constant 0 : i32
    %c0_i32_0 = arith.constant 0 : i32
    %c0_i32_1 = arith.constant 0 : i32
    return %c0_i32, %c0_i32_0 : i32, i32
  }
  func.func @transform_5(%arg0: i32) -> (i32, i32) {
    %c0_i32 = arith.constant 0 : i32
    %c0_i32_0 = arith.constant 0 : i32
    return %arg0, %c0_i32 : i32, i32
  }
}

module attributes {stable_mosaic.version = 11 : i64} {
  func.func @bilstm_recurrence_kernel(%arg0: memref<8x2x1024xf32, #tpu.memory_space<vmem>>, %arg1: memref<128x512xf32, #tpu.memory_space<vmem>>, %arg2: memref<128x512xf32, #tpu.memory_space<vmem>>, %arg3: memref<8x2x128xf32, #tpu.memory_space<vmem>>, %arg4: memref<8x2x128xf32, #tpu.memory_space<vmem>>) attributes {dimension_semantics = [], scalar_prefetch = 0 : i64, scratch_operands = 0 : i64, tpu.core_type = #tpu.core_type<tc>} {
    %cst = arith.constant 0.000000e+00 : f32
    %0 = vector.broadcast %cst : f32 to vector<2x128xf32>
    %c0_i32 = arith.constant 0 : i32
    %1 = arith.index_cast %c0_i32 : i32 to index
    %c0 = arith.constant 0 : index
    %c0_0 = arith.constant 0 : index
    %2 = vector.load %arg0[%1, %c0, %c0_0] : memref<8x2x1024xf32, #tpu.memory_space<vmem>>, vector<1x2x1024xf32>
    %3 = vector.shape_cast %2 : vector<1x2x1024xf32> to vector<2x1024xf32>
    %4 = vector.extract_strided_slice %3 {offsets = [0, 0], sizes = [2, 512], strides = [1, 1]} : vector<2x1024xf32> to vector<2x512xf32>
    %c0_1 = arith.constant 0 : index
    %c0_2 = arith.constant 0 : index
    %5 = vector.load %arg1[%c0_1, %c0_2] : memref<128x512xf32, #tpu.memory_space<vmem>>, vector<128x512xf32>
    %cst_3 = arith.constant dense<0.000000e+00> : vector<2x512xf32>
    %6 = tpu.matmul %0, %5, %cst_3 {dimension_numbers = #tpu.dot_dimension_numbers<[1], [0], [0], [1], [0, 0, 1, 1], [], []>} : vector<2x128xf32>, vector<128x512xf32>, vector<2x512xf32> -> vector<2x512xf32>
    %7 = arith.addf %4, %6 : vector<2x512xf32>
    %8 = vector.extract_strided_slice %7 {offsets = [0, 0], sizes = [2, 128], strides = [1, 1]} : vector<2x512xf32> to vector<2x128xf32>
    %9 = arith.negf %8 : vector<2x128xf32>
    %10 = math.exp %9 : vector<2x128xf32>
    %cst_4 = arith.constant 1.000000e+00 : f32
    %11 = vector.broadcast %cst_4 : f32 to vector<2x128xf32>
    %12 = arith.addf %11, %10 : vector<2x128xf32>
    %13 = arith.divf %11, %12 : vector<2x128xf32>
    %14 = vector.extract_strided_slice %7 {offsets = [0, 128], sizes = [2, 128], strides = [1, 1]} : vector<2x512xf32> to vector<2x128xf32>
    %15 = arith.negf %14 : vector<2x128xf32>
    %16 = math.exp %15 : vector<2x128xf32>
    %cst_5 = arith.constant 1.000000e+00 : f32
    %17 = vector.broadcast %cst_5 : f32 to vector<2x128xf32>
    %18 = arith.addf %17, %16 : vector<2x128xf32>
    %19 = arith.divf %17, %18 : vector<2x128xf32>
    %20 = vector.extract_strided_slice %7 {offsets = [0, 256], sizes = [2, 128], strides = [1, 1]} : vector<2x512xf32> to vector<2x128xf32>
    %21 = math.tanh %20 : vector<2x128xf32>
    %22 = vector.extract_strided_slice %7 {offsets = [0, 384], sizes = [2, 128], strides = [1, 1]} : vector<2x512xf32> to vector<2x128xf32>
    %23 = arith.negf %22 : vector<2x128xf32>
    %24 = math.exp %23 : vector<2x128xf32>
    %cst_6 = arith.constant 1.000000e+00 : f32
    %25 = vector.broadcast %cst_6 : f32 to vector<2x128xf32>
    %26 = arith.addf %25, %24 : vector<2x128xf32>
    %27 = arith.divf %25, %26 : vector<2x128xf32>
    %28 = arith.mulf %19, %0 : vector<2x128xf32>
    %29 = arith.mulf %13, %21 : vector<2x128xf32>
    %30 = arith.addf %28, %29 : vector<2x128xf32>
    %31 = math.tanh %30 : vector<2x128xf32>
    %32 = arith.mulf %27, %31 : vector<2x128xf32>
    %33 = arith.index_cast %c0_i32 : i32 to index
    %c0_7 = arith.constant 0 : index
    %c0_8 = arith.constant 0 : index
    %34 = vector.load %arg3[%33, %c0_7, %c0_8] : memref<8x2x128xf32, #tpu.memory_space<vmem>>, vector<1x2x128xf32>
    %35 = vector.shape_cast %34 : vector<1x2x128xf32> to vector<2x128xf32>
    %36 = vector.shape_cast %32 : vector<2x128xf32> to vector<1x2x128xf32>
    tpu.vector_store %arg3[%33, %c0_7, %c0_8], %36 {strides = array<i32>} : memref<8x2x128xf32, #tpu.memory_space<vmem>>, vector<1x2x128xf32>,
    %c1_i32 = arith.constant 1 : i32
    %37 = arith.index_cast %c1_i32 : i32 to index
    %c0_9 = arith.constant 0 : index
    %c0_10 = arith.constant 0 : index
    %38 = vector.load %arg0[%37, %c0_9, %c0_10] : memref<8x2x1024xf32, #tpu.memory_space<vmem>>, vector<1x2x1024xf32>
    %39 = vector.shape_cast %38 : vector<1x2x1024xf32> to vector<2x1024xf32>
    %40 = vector.extract_strided_slice %39 {offsets = [0, 0], sizes = [2, 512], strides = [1, 1]} : vector<2x1024xf32> to vector<2x512xf32>
    %c0_11 = arith.constant 0 : index
    %c0_12 = arith.constant 0 : index
    %41 = vector.load %arg1[%c0_11, %c0_12] : memref<128x512xf32, #tpu.memory_space<vmem>>, vector<128x512xf32>
    %cst_13 = arith.constant dense<0.000000e+00> : vector<2x512xf32>
    %42 = tpu.matmul %32, %41, %cst_13 {dimension_numbers = #tpu.dot_dimension_numbers<[1], [0], [0], [1], [0, 0, 1, 1], [], []>} : vector<2x128xf32>, vector<128x512xf32>, vector<2x512xf32> -> vector<2x512xf32>
    %43 = arith.addf %40, %42 : vector<2x512xf32>
    %44 = vector.extract_strided_slice %43 {offsets = [0, 0], sizes = [2, 128], strides = [1, 1]} : vector<2x512xf32> to vector<2x128xf32>
    %45 = arith.negf %44 : vector<2x128xf32>
    %46 = math.exp %45 : vector<2x128xf32>
    %cst_14 = arith.constant 1.000000e+00 : f32
    %47 = vector.broadcast %cst_14 : f32 to vector<2x128xf32>
    %48 = arith.addf %47, %46 : vector<2x128xf32>
    %49 = arith.divf %47, %48 : vector<2x128xf32>
    %50 = vector.extract_strided_slice %43 {offsets = [0, 128], sizes = [2, 128], strides = [1, 1]} : vector<2x512xf32> to vector<2x128xf32>
    %51 = arith.negf %50 : vector<2x128xf32>
    %52 = math.exp %51 : vector<2x128xf32>
    %cst_15 = arith.constant 1.000000e+00 : f32
    %53 = vector.broadcast %cst_15 : f32 to vector<2x128xf32>
    %54 = arith.addf %53, %52 : vector<2x128xf32>
    %55 = arith.divf %53, %54 : vector<2x128xf32>
    %56 = vector.extract_strided_slice %43 {offsets = [0, 256], sizes = [2, 128], strides = [1, 1]} : vector<2x512xf32> to vector<2x128xf32>
    %57 = math.tanh %56 : vector<2x128xf32>
    %58 = vector.extract_strided_slice %43 {offsets = [0, 384], sizes = [2, 128], strides = [1, 1]} : vector<2x512xf32> to vector<2x128xf32>
    %59 = arith.negf %58 : vector<2x128xf32>
    %60 = math.exp %59 : vector<2x128xf32>
    %cst_16 = arith.constant 1.000000e+00 : f32
    %61 = vector.broadcast %cst_16 : f32 to vector<2x128xf32>
    %62 = arith.addf %61, %60 : vector<2x128xf32>
    %63 = arith.divf %61, %62 : vector<2x128xf32>
    %64 = arith.mulf %55, %30 : vector<2x128xf32>
    %65 = arith.mulf %49, %57 : vector<2x128xf32>
    %66 = arith.addf %64, %65 : vector<2x128xf32>
    %67 = math.tanh %66 : vector<2x128xf32>
    %68 = arith.mulf %63, %67 : vector<2x128xf32>
    %69 = arith.index_cast %c1_i32 : i32 to index
    %c0_17 = arith.constant 0 : index
    %c0_18 = arith.constant 0 : index
    %70 = vector.load %arg3[%69, %c0_17, %c0_18] : memref<8x2x128xf32, #tpu.memory_space<vmem>>, vector<1x2x128xf32>
    %71 = vector.shape_cast %70 : vector<1x2x128xf32> to vector<2x128xf32>
    %72 = vector.shape_cast %68 : vector<2x128xf32> to vector<1x2x128xf32>
    tpu.vector_store %arg3[%69, %c0_17, %c0_18], %72 {strides = array<i32>} : memref<8x2x128xf32, #tpu.memory_space<vmem>>, vector<1x2x128xf32>,
    %c2_i32 = arith.constant 2 : i32
    %73 = arith.index_cast %c2_i32 : i32 to index
    %c0_19 = arith.constant 0 : index
    %c0_20 = arith.constant 0 : index
    %74 = vector.load %arg0[%73, %c0_19, %c0_20] : memref<8x2x1024xf32, #tpu.memory_space<vmem>>, vector<1x2x1024xf32>
    %75 = vector.shape_cast %74 : vector<1x2x1024xf32> to vector<2x1024xf32>
    %76 = vector.extract_strided_slice %75 {offsets = [0, 0], sizes = [2, 512], strides = [1, 1]} : vector<2x1024xf32> to vector<2x512xf32>
    %c0_21 = arith.constant 0 : index
    %c0_22 = arith.constant 0 : index
    %77 = vector.load %arg1[%c0_21, %c0_22] : memref<128x512xf32, #tpu.memory_space<vmem>>, vector<128x512xf32>
    %cst_23 = arith.constant dense<0.000000e+00> : vector<2x512xf32>
    %78 = tpu.matmul %68, %77, %cst_23 {dimension_numbers = #tpu.dot_dimension_numbers<[1], [0], [0], [1], [0, 0, 1, 1], [], []>} : vector<2x128xf32>, vector<128x512xf32>, vector<2x512xf32> -> vector<2x512xf32>
    %79 = arith.addf %76, %78 : vector<2x512xf32>
    %80 = vector.extract_strided_slice %79 {offsets = [0, 0], sizes = [2, 128], strides = [1, 1]} : vector<2x512xf32> to vector<2x128xf32>
    %81 = arith.negf %80 : vector<2x128xf32>
    %82 = math.exp %81 : vector<2x128xf32>
    %cst_24 = arith.constant 1.000000e+00 : f32
    %83 = vector.broadcast %cst_24 : f32 to vector<2x128xf32>
    %84 = arith.addf %83, %82 : vector<2x128xf32>
    %85 = arith.divf %83, %84 : vector<2x128xf32>
    %86 = vector.extract_strided_slice %79 {offsets = [0, 128], sizes = [2, 128], strides = [1, 1]} : vector<2x512xf32> to vector<2x128xf32>
    %87 = arith.negf %86 : vector<2x128xf32>
    %88 = math.exp %87 : vector<2x128xf32>
    %cst_25 = arith.constant 1.000000e+00 : f32
    %89 = vector.broadcast %cst_25 : f32 to vector<2x128xf32>
    %90 = arith.addf %89, %88 : vector<2x128xf32>
    %91 = arith.divf %89, %90 : vector<2x128xf32>
    %92 = vector.extract_strided_slice %79 {offsets = [0, 256], sizes = [2, 128], strides = [1, 1]} : vector<2x512xf32> to vector<2x128xf32>
    %93 = math.tanh %92 : vector<2x128xf32>
    %94 = vector.extract_strided_slice %79 {offsets = [0, 384], sizes = [2, 128], strides = [1, 1]} : vector<2x512xf32> to vector<2x128xf32>
    %95 = arith.negf %94 : vector<2x128xf32>
    %96 = math.exp %95 : vector<2x128xf32>
    %cst_26 = arith.constant 1.000000e+00 : f32
    %97 = vector.broadcast %cst_26 : f32 to vector<2x128xf32>
    %98 = arith.addf %97, %96 : vector<2x128xf32>
    %99 = arith.divf %97, %98 : vector<2x128xf32>
    %100 = arith.mulf %91, %66 : vector<2x128xf32>
    %101 = arith.mulf %85, %93 : vector<2x128xf32>
    %102 = arith.addf %100, %101 : vector<2x128xf32>
    %103 = math.tanh %102 : vector<2x128xf32>
    %104 = arith.mulf %99, %103 : vector<2x128xf32>
    %105 = arith.index_cast %c2_i32 : i32 to index
    %c0_27 = arith.constant 0 : index
    %c0_28 = arith.constant 0 : index
    %106 = vector.load %arg3[%105, %c0_27, %c0_28] : memref<8x2x128xf32, #tpu.memory_space<vmem>>, vector<1x2x128xf32>
    %107 = vector.shape_cast %106 : vector<1x2x128xf32> to vector<2x128xf32>
    %108 = vector.shape_cast %104 : vector<2x128xf32> to vector<1x2x128xf32>
    tpu.vector_store %arg3[%105, %c0_27, %c0_28], %108 {strides = array<i32>} : memref<8x2x128xf32, #tpu.memory_space<vmem>>, vector<1x2x128xf32>,
    %c3_i32 = arith.constant 3 : i32
    %109 = arith.index_cast %c3_i32 : i32 to index
    %c0_29 = arith.constant 0 : index
    %c0_30 = arith.constant 0 : index
    %110 = vector.load %arg0[%109, %c0_29, %c0_30] : memref<8x2x1024xf32, #tpu.memory_space<vmem>>, vector<1x2x1024xf32>
    %111 = vector.shape_cast %110 : vector<1x2x1024xf32> to vector<2x1024xf32>
    %112 = vector.extract_strided_slice %111 {offsets = [0, 0], sizes = [2, 512], strides = [1, 1]} : vector<2x1024xf32> to vector<2x512xf32>
    %c0_31 = arith.constant 0 : index
    %c0_32 = arith.constant 0 : index
    %113 = vector.load %arg1[%c0_31, %c0_32] : memref<128x512xf32, #tpu.memory_space<vmem>>, vector<128x512xf32>
    %cst_33 = arith.constant dense<0.000000e+00> : vector<2x512xf32>
    %114 = tpu.matmul %104, %113, %cst_33 {dimension_numbers = #tpu.dot_dimension_numbers<[1], [0], [0], [1], [0, 0, 1, 1], [], []>} : vector<2x128xf32>, vector<128x512xf32>, vector<2x512xf32> -> vector<2x512xf32>
    %115 = arith.addf %112, %114 : vector<2x512xf32>
    %116 = vector.extract_strided_slice %115 {offsets = [0, 0], sizes = [2, 128], strides = [1, 1]} : vector<2x512xf32> to vector<2x128xf32>
    %117 = arith.negf %116 : vector<2x128xf32>
    %118 = math.exp %117 : vector<2x128xf32>
    %cst_34 = arith.constant 1.000000e+00 : f32
    %119 = vector.broadcast %cst_34 : f32 to vector<2x128xf32>
    %120 = arith.addf %119, %118 : vector<2x128xf32>
    %121 = arith.divf %119, %120 : vector<2x128xf32>
    %122 = vector.extract_strided_slice %115 {offsets = [0, 128], sizes = [2, 128], strides = [1, 1]} : vector<2x512xf32> to vector<2x128xf32>
    %123 = arith.negf %122 : vector<2x128xf32>
    %124 = math.exp %123 : vector<2x128xf32>
    %cst_35 = arith.constant 1.000000e+00 : f32
    %125 = vector.broadcast %cst_35 : f32 to vector<2x128xf32>
    %126 = arith.addf %125, %124 : vector<2x128xf32>
    %127 = arith.divf %125, %126 : vector<2x128xf32>
    %128 = vector.extract_strided_slice %115 {offsets = [0, 256], sizes = [2, 128], strides = [1, 1]} : vector<2x512xf32> to vector<2x128xf32>
    %129 = math.tanh %128 : vector<2x128xf32>
    %130 = vector.extract_strided_slice %115 {offsets = [0, 384], sizes = [2, 128], strides = [1, 1]} : vector<2x512xf32> to vector<2x128xf32>
    %131 = arith.negf %130 : vector<2x128xf32>
    %132 = math.exp %131 : vector<2x128xf32>
    %cst_36 = arith.constant 1.000000e+00 : f32
    %133 = vector.broadcast %cst_36 : f32 to vector<2x128xf32>
    %134 = arith.addf %133, %132 : vector<2x128xf32>
    %135 = arith.divf %133, %134 : vector<2x128xf32>
    %136 = arith.mulf %127, %102 : vector<2x128xf32>
    %137 = arith.mulf %121, %129 : vector<2x128xf32>
    %138 = arith.addf %136, %137 : vector<2x128xf32>
    %139 = math.tanh %138 : vector<2x128xf32>
    %140 = arith.mulf %135, %139 : vector<2x128xf32>
    %141 = arith.index_cast %c3_i32 : i32 to index
    %c0_37 = arith.constant 0 : index
    %c0_38 = arith.constant 0 : index
    %142 = vector.load %arg3[%141, %c0_37, %c0_38] : memref<8x2x128xf32, #tpu.memory_space<vmem>>, vector<1x2x128xf32>
    %143 = vector.shape_cast %142 : vector<1x2x128xf32> to vector<2x128xf32>
    %144 = vector.shape_cast %140 : vector<2x128xf32> to vector<1x2x128xf32>
    tpu.vector_store %arg3[%141, %c0_37, %c0_38], %144 {strides = array<i32>} : memref<8x2x128xf32, #tpu.memory_space<vmem>>, vector<1x2x128xf32>,
    %c4_i32 = arith.constant 4 : i32
    %145 = arith.index_cast %c4_i32 : i32 to index
    %c0_39 = arith.constant 0 : index
    %c0_40 = arith.constant 0 : index
    %146 = vector.load %arg0[%145, %c0_39, %c0_40] : memref<8x2x1024xf32, #tpu.memory_space<vmem>>, vector<1x2x1024xf32>
    %147 = vector.shape_cast %146 : vector<1x2x1024xf32> to vector<2x1024xf32>
    %148 = vector.extract_strided_slice %147 {offsets = [0, 0], sizes = [2, 512], strides = [1, 1]} : vector<2x1024xf32> to vector<2x512xf32>
    %c0_41 = arith.constant 0 : index
    %c0_42 = arith.constant 0 : index
    %149 = vector.load %arg1[%c0_41, %c0_42] : memref<128x512xf32, #tpu.memory_space<vmem>>, vector<128x512xf32>
    %cst_43 = arith.constant dense<0.000000e+00> : vector<2x512xf32>
    %150 = tpu.matmul %140, %149, %cst_43 {dimension_numbers = #tpu.dot_dimension_numbers<[1], [0], [0], [1], [0, 0, 1, 1], [], []>} : vector<2x128xf32>, vector<128x512xf32>, vector<2x512xf32> -> vector<2x512xf32>
    %151 = arith.addf %148, %150 : vector<2x512xf32>
    %152 = vector.extract_strided_slice %151 {offsets = [0, 0], sizes = [2, 128], strides = [1, 1]} : vector<2x512xf32> to vector<2x128xf32>
    %153 = arith.negf %152 : vector<2x128xf32>
    %154 = math.exp %153 : vector<2x128xf32>
    %cst_44 = arith.constant 1.000000e+00 : f32
    %155 = vector.broadcast %cst_44 : f32 to vector<2x128xf32>
    %156 = arith.addf %155, %154 : vector<2x128xf32>
    %157 = arith.divf %155, %156 : vector<2x128xf32>
    %158 = vector.extract_strided_slice %151 {offsets = [0, 128], sizes = [2, 128], strides = [1, 1]} : vector<2x512xf32> to vector<2x128xf32>
    %159 = arith.negf %158 : vector<2x128xf32>
    %160 = math.exp %159 : vector<2x128xf32>
    %cst_45 = arith.constant 1.000000e+00 : f32
    %161 = vector.broadcast %cst_45 : f32 to vector<2x128xf32>
    %162 = arith.addf %161, %160 : vector<2x128xf32>
    %163 = arith.divf %161, %162 : vector<2x128xf32>
    %164 = vector.extract_strided_slice %151 {offsets = [0, 256], sizes = [2, 128], strides = [1, 1]} : vector<2x512xf32> to vector<2x128xf32>
    %165 = math.tanh %164 : vector<2x128xf32>
    %166 = vector.extract_strided_slice %151 {offsets = [0, 384], sizes = [2, 128], strides = [1, 1]} : vector<2x512xf32> to vector<2x128xf32>
    %167 = arith.negf %166 : vector<2x128xf32>
    %168 = math.exp %167 : vector<2x128xf32>
    %cst_46 = arith.constant 1.000000e+00 : f32
    %169 = vector.broadcast %cst_46 : f32 to vector<2x128xf32>
    %170 = arith.addf %169, %168 : vector<2x128xf32>
    %171 = arith.divf %169, %170 : vector<2x128xf32>
    %172 = arith.mulf %163, %138 : vector<2x128xf32>
    %173 = arith.mulf %157, %165 : vector<2x128xf32>
    %174 = arith.addf %172, %173 : vector<2x128xf32>
    %175 = math.tanh %174 : vector<2x128xf32>
    %176 = arith.mulf %171, %175 : vector<2x128xf32>
    %177 = arith.index_cast %c4_i32 : i32 to index
    %c0_47 = arith.constant 0 : index
    %c0_48 = arith.constant 0 : index
    %178 = vector.load %arg3[%177, %c0_47, %c0_48] : memref<8x2x128xf32, #tpu.memory_space<vmem>>, vector<1x2x128xf32>
    %179 = vector.shape_cast %178 : vector<1x2x128xf32> to vector<2x128xf32>
    %180 = vector.shape_cast %176 : vector<2x128xf32> to vector<1x2x128xf32>
    tpu.vector_store %arg3[%177, %c0_47, %c0_48], %180 {strides = array<i32>} : memref<8x2x128xf32, #tpu.memory_space<vmem>>, vector<1x2x128xf32>,
    %c5_i32 = arith.constant 5 : i32
    %181 = arith.index_cast %c5_i32 : i32 to index
    %c0_49 = arith.constant 0 : index
    %c0_50 = arith.constant 0 : index
    %182 = vector.load %arg0[%181, %c0_49, %c0_50] : memref<8x2x1024xf32, #tpu.memory_space<vmem>>, vector<1x2x1024xf32>
    %183 = vector.shape_cast %182 : vector<1x2x1024xf32> to vector<2x1024xf32>
    %184 = vector.extract_strided_slice %183 {offsets = [0, 0], sizes = [2, 512], strides = [1, 1]} : vector<2x1024xf32> to vector<2x512xf32>
    %c0_51 = arith.constant 0 : index
    %c0_52 = arith.constant 0 : index
    %185 = vector.load %arg1[%c0_51, %c0_52] : memref<128x512xf32, #tpu.memory_space<vmem>>, vector<128x512xf32>
    %cst_53 = arith.constant dense<0.000000e+00> : vector<2x512xf32>
    %186 = tpu.matmul %176, %185, %cst_53 {dimension_numbers = #tpu.dot_dimension_numbers<[1], [0], [0], [1], [0, 0, 1, 1], [], []>} : vector<2x128xf32>, vector<128x512xf32>, vector<2x512xf32> -> vector<2x512xf32>
    %187 = arith.addf %184, %186 : vector<2x512xf32>
    %188 = vector.extract_strided_slice %187 {offsets = [0, 0], sizes = [2, 128], strides = [1, 1]} : vector<2x512xf32> to vector<2x128xf32>
    %189 = arith.negf %188 : vector<2x128xf32>
    %190 = math.exp %189 : vector<2x128xf32>
    %cst_54 = arith.constant 1.000000e+00 : f32
    %191 = vector.broadcast %cst_54 : f32 to vector<2x128xf32>
    %192 = arith.addf %191, %190 : vector<2x128xf32>
    %193 = arith.divf %191, %192 : vector<2x128xf32>
    %194 = vector.extract_strided_slice %187 {offsets = [0, 128], sizes = [2, 128], strides = [1, 1]} : vector<2x512xf32> to vector<2x128xf32>
    %195 = arith.negf %194 : vector<2x128xf32>
    %196 = math.exp %195 : vector<2x128xf32>
    %cst_55 = arith.constant 1.000000e+00 : f32
    %197 = vector.broadcast %cst_55 : f32 to vector<2x128xf32>
    %198 = arith.addf %197, %196 : vector<2x128xf32>
    %199 = arith.divf %197, %198 : vector<2x128xf32>
    %200 = vector.extract_strided_slice %187 {offsets = [0, 256], sizes = [2, 128], strides = [1, 1]} : vector<2x512xf32> to vector<2x128xf32>
    %201 = math.tanh %200 : vector<2x128xf32>
    %202 = vector.extract_strided_slice %187 {offsets = [0, 384], sizes = [2, 128], strides = [1, 1]} : vector<2x512xf32> to vector<2x128xf32>
    %203 = arith.negf %202 : vector<2x128xf32>
    %204 = math.exp %203 : vector<2x128xf32>
    %cst_56 = arith.constant 1.000000e+00 : f32
    %205 = vector.broadcast %cst_56 : f32 to vector<2x128xf32>
    %206 = arith.addf %205, %204 : vector<2x128xf32>
    %207 = arith.divf %205, %206 : vector<2x128xf32>
    %208 = arith.mulf %199, %174 : vector<2x128xf32>
    %209 = arith.mulf %193, %201 : vector<2x128xf32>
    %210 = arith.addf %208, %209 : vector<2x128xf32>
    %211 = math.tanh %210 : vector<2x128xf32>
    %212 = arith.mulf %207, %211 : vector<2x128xf32>
    %213 = arith.index_cast %c5_i32 : i32 to index
    %c0_57 = arith.constant 0 : index
    %c0_58 = arith.constant 0 : index
    %214 = vector.load %arg3[%213, %c0_57, %c0_58] : memref<8x2x128xf32, #tpu.memory_space<vmem>>, vector<1x2x128xf32>
    %215 = vector.shape_cast %214 : vector<1x2x128xf32> to vector<2x128xf32>
    %216 = vector.shape_cast %212 : vector<2x128xf32> to vector<1x2x128xf32>
    tpu.vector_store %arg3[%213, %c0_57, %c0_58], %216 {strides = array<i32>} : memref<8x2x128xf32, #tpu.memory_space<vmem>>, vector<1x2x128xf32>,
    %c6_i32 = arith.constant 6 : i32
    %217 = arith.index_cast %c6_i32 : i32 to index
    %c0_59 = arith.constant 0 : index
    %c0_60 = arith.constant 0 : index
    %218 = vector.load %arg0[%217, %c0_59, %c0_60] : memref<8x2x1024xf32, #tpu.memory_space<vmem>>, vector<1x2x1024xf32>
    %219 = vector.shape_cast %218 : vector<1x2x1024xf32> to vector<2x1024xf32>
    %220 = vector.extract_strided_slice %219 {offsets = [0, 0], sizes = [2, 512], strides = [1, 1]} : vector<2x1024xf32> to vector<2x512xf32>
    %c0_61 = arith.constant 0 : index
    %c0_62 = arith.constant 0 : index
    %221 = vector.load %arg1[%c0_61, %c0_62] : memref<128x512xf32, #tpu.memory_space<vmem>>, vector<128x512xf32>
    %cst_63 = arith.constant dense<0.000000e+00> : vector<2x512xf32>
    %222 = tpu.matmul %212, %221, %cst_63 {dimension_numbers = #tpu.dot_dimension_numbers<[1], [0], [0], [1], [0, 0, 1, 1], [], []>} : vector<2x128xf32>, vector<128x512xf32>, vector<2x512xf32> -> vector<2x512xf32>
    %223 = arith.addf %220, %222 : vector<2x512xf32>
    %224 = vector.extract_strided_slice %223 {offsets = [0, 0], sizes = [2, 128], strides = [1, 1]} : vector<2x512xf32> to vector<2x128xf32>
    %225 = arith.negf %224 : vector<2x128xf32>
    %226 = math.exp %225 : vector<2x128xf32>
    %cst_64 = arith.constant 1.000000e+00 : f32
    %227 = vector.broadcast %cst_64 : f32 to vector<2x128xf32>
    %228 = arith.addf %227, %226 : vector<2x128xf32>
    %229 = arith.divf %227, %228 : vector<2x128xf32>
    %230 = vector.extract_strided_slice %223 {offsets = [0, 128], sizes = [2, 128], strides = [1, 1]} : vector<2x512xf32> to vector<2x128xf32>
    %231 = arith.negf %230 : vector<2x128xf32>
    %232 = math.exp %231 : vector<2x128xf32>
    %cst_65 = arith.constant 1.000000e+00 : f32
    %233 = vector.broadcast %cst_65 : f32 to vector<2x128xf32>
    %234 = arith.addf %233, %232 : vector<2x128xf32>
    %235 = arith.divf %233, %234 : vector<2x128xf32>
    %236 = vector.extract_strided_slice %223 {offsets = [0, 256], sizes = [2, 128], strides = [1, 1]} : vector<2x512xf32> to vector<2x128xf32>
    %237 = math.tanh %236 : vector<2x128xf32>
    %238 = vector.extract_strided_slice %223 {offsets = [0, 384], sizes = [2, 128], strides = [1, 1]} : vector<2x512xf32> to vector<2x128xf32>
    %239 = arith.negf %238 : vector<2x128xf32>
    %240 = math.exp %239 : vector<2x128xf32>
    %cst_66 = arith.constant 1.000000e+00 : f32
    %241 = vector.broadcast %cst_66 : f32 to vector<2x128xf32>
    %242 = arith.addf %241, %240 : vector<2x128xf32>
    %243 = arith.divf %241, %242 : vector<2x128xf32>
    %244 = arith.mulf %235, %210 : vector<2x128xf32>
    %245 = arith.mulf %229, %237 : vector<2x128xf32>
    %246 = arith.addf %244, %245 : vector<2x128xf32>
    %247 = math.tanh %246 : vector<2x128xf32>
    %248 = arith.mulf %243, %247 : vector<2x128xf32>
    %249 = arith.index_cast %c6_i32 : i32 to index
    %c0_67 = arith.constant 0 : index
    %c0_68 = arith.constant 0 : index
    %250 = vector.load %arg3[%249, %c0_67, %c0_68] : memref<8x2x128xf32, #tpu.memory_space<vmem>>, vector<1x2x128xf32>
    %251 = vector.shape_cast %250 : vector<1x2x128xf32> to vector<2x128xf32>
    %252 = vector.shape_cast %248 : vector<2x128xf32> to vector<1x2x128xf32>
    tpu.vector_store %arg3[%249, %c0_67, %c0_68], %252 {strides = array<i32>} : memref<8x2x128xf32, #tpu.memory_space<vmem>>, vector<1x2x128xf32>,
    %c7_i32 = arith.constant 7 : i32
    %253 = arith.index_cast %c7_i32 : i32 to index
    %c0_69 = arith.constant 0 : index
    %c0_70 = arith.constant 0 : index
    %254 = vector.load %arg0[%253, %c0_69, %c0_70] : memref<8x2x1024xf32, #tpu.memory_space<vmem>>, vector<1x2x1024xf32>
    %255 = vector.shape_cast %254 : vector<1x2x1024xf32> to vector<2x1024xf32>
    %256 = vector.extract_strided_slice %255 {offsets = [0, 0], sizes = [2, 512], strides = [1, 1]} : vector<2x1024xf32> to vector<2x512xf32>
    %c0_71 = arith.constant 0 : index
    %c0_72 = arith.constant 0 : index
    %257 = vector.load %arg1[%c0_71, %c0_72] : memref<128x512xf32, #tpu.memory_space<vmem>>, vector<128x512xf32>
    %cst_73 = arith.constant dense<0.000000e+00> : vector<2x512xf32>
    %258 = tpu.matmul %248, %257, %cst_73 {dimension_numbers = #tpu.dot_dimension_numbers<[1], [0], [0], [1], [0, 0, 1, 1], [], []>} : vector<2x128xf32>, vector<128x512xf32>, vector<2x512xf32> -> vector<2x512xf32>
    %259 = arith.addf %256, %258 : vector<2x512xf32>
    %260 = vector.extract_strided_slice %259 {offsets = [0, 0], sizes = [2, 128], strides = [1, 1]} : vector<2x512xf32> to vector<2x128xf32>
    %261 = arith.negf %260 : vector<2x128xf32>
    %262 = math.exp %261 : vector<2x128xf32>
    %cst_74 = arith.constant 1.000000e+00 : f32
    %263 = vector.broadcast %cst_74 : f32 to vector<2x128xf32>
    %264 = arith.addf %263, %262 : vector<2x128xf32>
    %265 = arith.divf %263, %264 : vector<2x128xf32>
    %266 = vector.extract_strided_slice %259 {offsets = [0, 128], sizes = [2, 128], strides = [1, 1]} : vector<2x512xf32> to vector<2x128xf32>
    %267 = arith.negf %266 : vector<2x128xf32>
    %268 = math.exp %267 : vector<2x128xf32>
    %cst_75 = arith.constant 1.000000e+00 : f32
    %269 = vector.broadcast %cst_75 : f32 to vector<2x128xf32>
    %270 = arith.addf %269, %268 : vector<2x128xf32>
    %271 = arith.divf %269, %270 : vector<2x128xf32>
    %272 = vector.extract_strided_slice %259 {offsets = [0, 256], sizes = [2, 128], strides = [1, 1]} : vector<2x512xf32> to vector<2x128xf32>
    %273 = math.tanh %272 : vector<2x128xf32>
    %274 = vector.extract_strided_slice %259 {offsets = [0, 384], sizes = [2, 128], strides = [1, 1]} : vector<2x512xf32> to vector<2x128xf32>
    %275 = arith.negf %274 : vector<2x128xf32>
    %276 = math.exp %275 : vector<2x128xf32>
    %cst_76 = arith.constant 1.000000e+00 : f32
    %277 = vector.broadcast %cst_76 : f32 to vector<2x128xf32>
    %278 = arith.addf %277, %276 : vector<2x128xf32>
    %279 = arith.divf %277, %278 : vector<2x128xf32>
    %280 = arith.mulf %271, %246 : vector<2x128xf32>
    %281 = arith.mulf %265, %273 : vector<2x128xf32>
    %282 = arith.addf %280, %281 : vector<2x128xf32>
    %283 = math.tanh %282 : vector<2x128xf32>
    %284 = arith.mulf %279, %283 : vector<2x128xf32>
    %285 = arith.index_cast %c7_i32 : i32 to index
    %c0_77 = arith.constant 0 : index
    %c0_78 = arith.constant 0 : index
    %286 = vector.load %arg3[%285, %c0_77, %c0_78] : memref<8x2x128xf32, #tpu.memory_space<vmem>>, vector<1x2x128xf32>
    %287 = vector.shape_cast %286 : vector<1x2x128xf32> to vector<2x128xf32>
    %288 = vector.shape_cast %284 : vector<2x128xf32> to vector<1x2x128xf32>
    tpu.vector_store %arg3[%285, %c0_77, %c0_78], %288 {strides = array<i32>} : memref<8x2x128xf32, #tpu.memory_space<vmem>>, vector<1x2x128xf32>,
    %c8_i32 = arith.constant 8 : i32
    %c0_i32_79 = arith.constant 0 : i32
    %c7_i32_80 = arith.constant 7 : i32
    %289 = arith.subi %c7_i32_80, %c0_i32_79 : i32
    %290 = arith.index_cast %289 : i32 to index
    %c0_81 = arith.constant 0 : index
    %c0_82 = arith.constant 0 : index
    %291 = vector.load %arg0[%290, %c0_81, %c0_82] : memref<8x2x1024xf32, #tpu.memory_space<vmem>>, vector<1x2x1024xf32>
    %292 = vector.shape_cast %291 : vector<1x2x1024xf32> to vector<2x1024xf32>
    %293 = vector.extract_strided_slice %292 {offsets = [0, 512], sizes = [2, 512], strides = [1, 1]} : vector<2x1024xf32> to vector<2x512xf32>
    %c0_83 = arith.constant 0 : index
    %c0_84 = arith.constant 0 : index
    %294 = vector.load %arg2[%c0_83, %c0_84] : memref<128x512xf32, #tpu.memory_space<vmem>>, vector<128x512xf32>
    %cst_85 = arith.constant dense<0.000000e+00> : vector<2x512xf32>
    %295 = tpu.matmul %0, %294, %cst_85 {dimension_numbers = #tpu.dot_dimension_numbers<[1], [0], [0], [1], [0, 0, 1, 1], [], []>} : vector<2x128xf32>, vector<128x512xf32>, vector<2x512xf32> -> vector<2x512xf32>
    %296 = arith.addf %293, %295 : vector<2x512xf32>
    %297 = vector.extract_strided_slice %296 {offsets = [0, 0], sizes = [2, 128], strides = [1, 1]} : vector<2x512xf32> to vector<2x128xf32>
    %298 = arith.negf %297 : vector<2x128xf32>
    %299 = math.exp %298 : vector<2x128xf32>
    %cst_86 = arith.constant 1.000000e+00 : f32
    %300 = vector.broadcast %cst_86 : f32 to vector<2x128xf32>
    %301 = arith.addf %300, %299 : vector<2x128xf32>
    %302 = arith.divf %300, %301 : vector<2x128xf32>
    %303 = vector.extract_strided_slice %296 {offsets = [0, 128], sizes = [2, 128], strides = [1, 1]} : vector<2x512xf32> to vector<2x128xf32>
    %304 = arith.negf %303 : vector<2x128xf32>
    %305 = math.exp %304 : vector<2x128xf32>
    %cst_87 = arith.constant 1.000000e+00 : f32
    %306 = vector.broadcast %cst_87 : f32 to vector<2x128xf32>
    %307 = arith.addf %306, %305 : vector<2x128xf32>
    %308 = arith.divf %306, %307 : vector<2x128xf32>
    %309 = vector.extract_strided_slice %296 {offsets = [0, 256], sizes = [2, 128], strides = [1, 1]} : vector<2x512xf32> to vector<2x128xf32>
    %310 = math.tanh %309 : vector<2x128xf32>
    %311 = vector.extract_strided_slice %296 {offsets = [0, 384], sizes = [2, 128], strides = [1, 1]} : vector<2x512xf32> to vector<2x128xf32>
    %312 = arith.negf %311 : vector<2x128xf32>
    %313 = math.exp %312 : vector<2x128xf32>
    %cst_88 = arith.constant 1.000000e+00 : f32
    %314 = vector.broadcast %cst_88 : f32 to vector<2x128xf32>
    %315 = arith.addf %314, %313 : vector<2x128xf32>
    %316 = arith.divf %314, %315 : vector<2x128xf32>
    %317 = arith.mulf %308, %0 : vector<2x128xf32>
    %318 = arith.mulf %302, %310 : vector<2x128xf32>
    %319 = arith.addf %317, %318 : vector<2x128xf32>
    %320 = math.tanh %319 : vector<2x128xf32>
    %321 = arith.mulf %316, %320 : vector<2x128xf32>
    %322 = arith.index_cast %289 : i32 to index
    %c0_89 = arith.constant 0 : index
    %c0_90 = arith.constant 0 : index
    %323 = vector.load %arg4[%322, %c0_89, %c0_90] : memref<8x2x128xf32, #tpu.memory_space<vmem>>, vector<1x2x128xf32>
    %324 = vector.shape_cast %323 : vector<1x2x128xf32> to vector<2x128xf32>
    %325 = vector.shape_cast %321 : vector<2x128xf32> to vector<1x2x128xf32>
    tpu.vector_store %arg4[%322, %c0_89, %c0_90], %325 {strides = array<i32>} : memref<8x2x128xf32, #tpu.memory_space<vmem>>, vector<1x2x128xf32>,
    %c1_i32_91 = arith.constant 1 : i32
    %c7_i32_92 = arith.constant 7 : i32
    %326 = arith.subi %c7_i32_92, %c1_i32_91 : i32
    %327 = arith.index_cast %326 : i32 to index
    %c0_93 = arith.constant 0 : index
    %c0_94 = arith.constant 0 : index
    %328 = vector.load %arg0[%327, %c0_93, %c0_94] : memref<8x2x1024xf32, #tpu.memory_space<vmem>>, vector<1x2x1024xf32>
    %329 = vector.shape_cast %328 : vector<1x2x1024xf32> to vector<2x1024xf32>
    %330 = vector.extract_strided_slice %329 {offsets = [0, 512], sizes = [2, 512], strides = [1, 1]} : vector<2x1024xf32> to vector<2x512xf32>
    %c0_95 = arith.constant 0 : index
    %c0_96 = arith.constant 0 : index
    %331 = vector.load %arg2[%c0_95, %c0_96] : memref<128x512xf32, #tpu.memory_space<vmem>>, vector<128x512xf32>
    %cst_97 = arith.constant dense<0.000000e+00> : vector<2x512xf32>
    %332 = tpu.matmul %321, %331, %cst_97 {dimension_numbers = #tpu.dot_dimension_numbers<[1], [0], [0], [1], [0, 0, 1, 1], [], []>} : vector<2x128xf32>, vector<128x512xf32>, vector<2x512xf32> -> vector<2x512xf32>
    %333 = arith.addf %330, %332 : vector<2x512xf32>
    %334 = vector.extract_strided_slice %333 {offsets = [0, 0], sizes = [2, 128], strides = [1, 1]} : vector<2x512xf32> to vector<2x128xf32>
    %335 = arith.negf %334 : vector<2x128xf32>
    %336 = math.exp %335 : vector<2x128xf32>
    %cst_98 = arith.constant 1.000000e+00 : f32
    %337 = vector.broadcast %cst_98 : f32 to vector<2x128xf32>
    %338 = arith.addf %337, %336 : vector<2x128xf32>
    %339 = arith.divf %337, %338 : vector<2x128xf32>
    %340 = vector.extract_strided_slice %333 {offsets = [0, 128], sizes = [2, 128], strides = [1, 1]} : vector<2x512xf32> to vector<2x128xf32>
    %341 = arith.negf %340 : vector<2x128xf32>
    %342 = math.exp %341 : vector<2x128xf32>
    %cst_99 = arith.constant 1.000000e+00 : f32
    %343 = vector.broadcast %cst_99 : f32 to vector<2x128xf32>
    %344 = arith.addf %343, %342 : vector<2x128xf32>
    %345 = arith.divf %343, %344 : vector<2x128xf32>
    %346 = vector.extract_strided_slice %333 {offsets = [0, 256], sizes = [2, 128], strides = [1, 1]} : vector<2x512xf32> to vector<2x128xf32>
    %347 = math.tanh %346 : vector<2x128xf32>
    %348 = vector.extract_strided_slice %333 {offsets = [0, 384], sizes = [2, 128], strides = [1, 1]} : vector<2x512xf32> to vector<2x128xf32>
    %349 = arith.negf %348 : vector<2x128xf32>
    %350 = math.exp %349 : vector<2x128xf32>
    %cst_100 = arith.constant 1.000000e+00 : f32
    %351 = vector.broadcast %cst_100 : f32 to vector<2x128xf32>
    %352 = arith.addf %351, %350 : vector<2x128xf32>
    %353 = arith.divf %351, %352 : vector<2x128xf32>
    %354 = arith.mulf %345, %319 : vector<2x128xf32>
    %355 = arith.mulf %339, %347 : vector<2x128xf32>
    %356 = arith.addf %354, %355 : vector<2x128xf32>
    %357 = math.tanh %356 : vector<2x128xf32>
    %358 = arith.mulf %353, %357 : vector<2x128xf32>
    %359 = arith.index_cast %326 : i32 to index
    %c0_101 = arith.constant 0 : index
    %c0_102 = arith.constant 0 : index
    %360 = vector.load %arg4[%359, %c0_101, %c0_102] : memref<8x2x128xf32, #tpu.memory_space<vmem>>, vector<1x2x128xf32>
    %361 = vector.shape_cast %360 : vector<1x2x128xf32> to vector<2x128xf32>
    %362 = vector.shape_cast %358 : vector<2x128xf32> to vector<1x2x128xf32>
    tpu.vector_store %arg4[%359, %c0_101, %c0_102], %362 {strides = array<i32>} : memref<8x2x128xf32, #tpu.memory_space<vmem>>, vector<1x2x128xf32>,
    %c2_i32_103 = arith.constant 2 : i32
    %c7_i32_104 = arith.constant 7 : i32
    %363 = arith.subi %c7_i32_104, %c2_i32_103 : i32
    %364 = arith.index_cast %363 : i32 to index
    %c0_105 = arith.constant 0 : index
    %c0_106 = arith.constant 0 : index
    %365 = vector.load %arg0[%364, %c0_105, %c0_106] : memref<8x2x1024xf32, #tpu.memory_space<vmem>>, vector<1x2x1024xf32>
    %366 = vector.shape_cast %365 : vector<1x2x1024xf32> to vector<2x1024xf32>
    %367 = vector.extract_strided_slice %366 {offsets = [0, 512], sizes = [2, 512], strides = [1, 1]} : vector<2x1024xf32> to vector<2x512xf32>
    %c0_107 = arith.constant 0 : index
    %c0_108 = arith.constant 0 : index
    %368 = vector.load %arg2[%c0_107, %c0_108] : memref<128x512xf32, #tpu.memory_space<vmem>>, vector<128x512xf32>
    %cst_109 = arith.constant dense<0.000000e+00> : vector<2x512xf32>
    %369 = tpu.matmul %358, %368, %cst_109 {dimension_numbers = #tpu.dot_dimension_numbers<[1], [0], [0], [1], [0, 0, 1, 1], [], []>} : vector<2x128xf32>, vector<128x512xf32>, vector<2x512xf32> -> vector<2x512xf32>
    %370 = arith.addf %367, %369 : vector<2x512xf32>
    %371 = vector.extract_strided_slice %370 {offsets = [0, 0], sizes = [2, 128], strides = [1, 1]} : vector<2x512xf32> to vector<2x128xf32>
    %372 = arith.negf %371 : vector<2x128xf32>
    %373 = math.exp %372 : vector<2x128xf32>
    %cst_110 = arith.constant 1.000000e+00 : f32
    %374 = vector.broadcast %cst_110 : f32 to vector<2x128xf32>
    %375 = arith.addf %374, %373 : vector<2x128xf32>
    %376 = arith.divf %374, %375 : vector<2x128xf32>
    %377 = vector.extract_strided_slice %370 {offsets = [0, 128], sizes = [2, 128], strides = [1, 1]} : vector<2x512xf32> to vector<2x128xf32>
    %378 = arith.negf %377 : vector<2x128xf32>
    %379 = math.exp %378 : vector<2x128xf32>
    %cst_111 = arith.constant 1.000000e+00 : f32
    %380 = vector.broadcast %cst_111 : f32 to vector<2x128xf32>
    %381 = arith.addf %380, %379 : vector<2x128xf32>
    %382 = arith.divf %380, %381 : vector<2x128xf32>
    %383 = vector.extract_strided_slice %370 {offsets = [0, 256], sizes = [2, 128], strides = [1, 1]} : vector<2x512xf32> to vector<2x128xf32>
    %384 = math.tanh %383 : vector<2x128xf32>
    %385 = vector.extract_strided_slice %370 {offsets = [0, 384], sizes = [2, 128], strides = [1, 1]} : vector<2x512xf32> to vector<2x128xf32>
    %386 = arith.negf %385 : vector<2x128xf32>
    %387 = math.exp %386 : vector<2x128xf32>
    %cst_112 = arith.constant 1.000000e+00 : f32
    %388 = vector.broadcast %cst_112 : f32 to vector<2x128xf32>
    %389 = arith.addf %388, %387 : vector<2x128xf32>
    %390 = arith.divf %388, %389 : vector<2x128xf32>
    %391 = arith.mulf %382, %356 : vector<2x128xf32>
    %392 = arith.mulf %376, %384 : vector<2x128xf32>
    %393 = arith.addf %391, %392 : vector<2x128xf32>
    %394 = math.tanh %393 : vector<2x128xf32>
    %395 = arith.mulf %390, %394 : vector<2x128xf32>
    %396 = arith.index_cast %363 : i32 to index
    %c0_113 = arith.constant 0 : index
    %c0_114 = arith.constant 0 : index
    %397 = vector.load %arg4[%396, %c0_113, %c0_114] : memref<8x2x128xf32, #tpu.memory_space<vmem>>, vector<1x2x128xf32>
    %398 = vector.shape_cast %397 : vector<1x2x128xf32> to vector<2x128xf32>
    %399 = vector.shape_cast %395 : vector<2x128xf32> to vector<1x2x128xf32>
    tpu.vector_store %arg4[%396, %c0_113, %c0_114], %399 {strides = array<i32>} : memref<8x2x128xf32, #tpu.memory_space<vmem>>, vector<1x2x128xf32>,
    %c3_i32_115 = arith.constant 3 : i32
    %c7_i32_116 = arith.constant 7 : i32
    %400 = arith.subi %c7_i32_116, %c3_i32_115 : i32
    %401 = arith.index_cast %400 : i32 to index
    %c0_117 = arith.constant 0 : index
    %c0_118 = arith.constant 0 : index
    %402 = vector.load %arg0[%401, %c0_117, %c0_118] : memref<8x2x1024xf32, #tpu.memory_space<vmem>>, vector<1x2x1024xf32>
    %403 = vector.shape_cast %402 : vector<1x2x1024xf32> to vector<2x1024xf32>
    %404 = vector.extract_strided_slice %403 {offsets = [0, 512], sizes = [2, 512], strides = [1, 1]} : vector<2x1024xf32> to vector<2x512xf32>
    %c0_119 = arith.constant 0 : index
    %c0_120 = arith.constant 0 : index
    %405 = vector.load %arg2[%c0_119, %c0_120] : memref<128x512xf32, #tpu.memory_space<vmem>>, vector<128x512xf32>
    %cst_121 = arith.constant dense<0.000000e+00> : vector<2x512xf32>
    %406 = tpu.matmul %395, %405, %cst_121 {dimension_numbers = #tpu.dot_dimension_numbers<[1], [0], [0], [1], [0, 0, 1, 1], [], []>} : vector<2x128xf32>, vector<128x512xf32>, vector<2x512xf32> -> vector<2x512xf32>
    %407 = arith.addf %404, %406 : vector<2x512xf32>
    %408 = vector.extract_strided_slice %407 {offsets = [0, 0], sizes = [2, 128], strides = [1, 1]} : vector<2x512xf32> to vector<2x128xf32>
    %409 = arith.negf %408 : vector<2x128xf32>
    %410 = math.exp %409 : vector<2x128xf32>
    %cst_122 = arith.constant 1.000000e+00 : f32
    %411 = vector.broadcast %cst_122 : f32 to vector<2x128xf32>
    %412 = arith.addf %411, %410 : vector<2x128xf32>
    %413 = arith.divf %411, %412 : vector<2x128xf32>
    %414 = vector.extract_strided_slice %407 {offsets = [0, 128], sizes = [2, 128], strides = [1, 1]} : vector<2x512xf32> to vector<2x128xf32>
    %415 = arith.negf %414 : vector<2x128xf32>
    %416 = math.exp %415 : vector<2x128xf32>
    %cst_123 = arith.constant 1.000000e+00 : f32
    %417 = vector.broadcast %cst_123 : f32 to vector<2x128xf32>
    %418 = arith.addf %417, %416 : vector<2x128xf32>
    %419 = arith.divf %417, %418 : vector<2x128xf32>
    %420 = vector.extract_strided_slice %407 {offsets = [0, 256], sizes = [2, 128], strides = [1, 1]} : vector<2x512xf32> to vector<2x128xf32>
    %421 = math.tanh %420 : vector<2x128xf32>
    %422 = vector.extract_strided_slice %407 {offsets = [0, 384], sizes = [2, 128], strides = [1, 1]} : vector<2x512xf32> to vector<2x128xf32>
    %423 = arith.negf %422 : vector<2x128xf32>
    %424 = math.exp %423 : vector<2x128xf32>
    %cst_124 = arith.constant 1.000000e+00 : f32
    %425 = vector.broadcast %cst_124 : f32 to vector<2x128xf32>
    %426 = arith.addf %425, %424 : vector<2x128xf32>
    %427 = arith.divf %425, %426 : vector<2x128xf32>
    %428 = arith.mulf %419, %393 : vector<2x128xf32>
    %429 = arith.mulf %413, %421 : vector<2x128xf32>
    %430 = arith.addf %428, %429 : vector<2x128xf32>
    %431 = math.tanh %430 : vector<2x128xf32>
    %432 = arith.mulf %427, %431 : vector<2x128xf32>
    %433 = arith.index_cast %400 : i32 to index
    %c0_125 = arith.constant 0 : index
    %c0_126 = arith.constant 0 : index
    %434 = vector.load %arg4[%433, %c0_125, %c0_126] : memref<8x2x128xf32, #tpu.memory_space<vmem>>, vector<1x2x128xf32>
    %435 = vector.shape_cast %434 : vector<1x2x128xf32> to vector<2x128xf32>
    %436 = vector.shape_cast %432 : vector<2x128xf32> to vector<1x2x128xf32>
    tpu.vector_store %arg4[%433, %c0_125, %c0_126], %436 {strides = array<i32>} : memref<8x2x128xf32, #tpu.memory_space<vmem>>, vector<1x2x128xf32>,
    %c4_i32_127 = arith.constant 4 : i32
    %c7_i32_128 = arith.constant 7 : i32
    %437 = arith.subi %c7_i32_128, %c4_i32_127 : i32
    %438 = arith.index_cast %437 : i32 to index
    %c0_129 = arith.constant 0 : index
    %c0_130 = arith.constant 0 : index
    %439 = vector.load %arg0[%438, %c0_129, %c0_130] : memref<8x2x1024xf32, #tpu.memory_space<vmem>>, vector<1x2x1024xf32>
    %440 = vector.shape_cast %439 : vector<1x2x1024xf32> to vector<2x1024xf32>
    %441 = vector.extract_strided_slice %440 {offsets = [0, 512], sizes = [2, 512], strides = [1, 1]} : vector<2x1024xf32> to vector<2x512xf32>
    %c0_131 = arith.constant 0 : index
    %c0_132 = arith.constant 0 : index
    %442 = vector.load %arg2[%c0_131, %c0_132] : memref<128x512xf32, #tpu.memory_space<vmem>>, vector<128x512xf32>
    %cst_133 = arith.constant dense<0.000000e+00> : vector<2x512xf32>
    %443 = tpu.matmul %432, %442, %cst_133 {dimension_numbers = #tpu.dot_dimension_numbers<[1], [0], [0], [1], [0, 0, 1, 1], [], []>} : vector<2x128xf32>, vector<128x512xf32>, vector<2x512xf32> -> vector<2x512xf32>
    %444 = arith.addf %441, %443 : vector<2x512xf32>
    %445 = vector.extract_strided_slice %444 {offsets = [0, 0], sizes = [2, 128], strides = [1, 1]} : vector<2x512xf32> to vector<2x128xf32>
    %446 = arith.negf %445 : vector<2x128xf32>
    %447 = math.exp %446 : vector<2x128xf32>
    %cst_134 = arith.constant 1.000000e+00 : f32
    %448 = vector.broadcast %cst_134 : f32 to vector<2x128xf32>
    %449 = arith.addf %448, %447 : vector<2x128xf32>
    %450 = arith.divf %448, %449 : vector<2x128xf32>
    %451 = vector.extract_strided_slice %444 {offsets = [0, 128], sizes = [2, 128], strides = [1, 1]} : vector<2x512xf32> to vector<2x128xf32>
    %452 = arith.negf %451 : vector<2x128xf32>
    %453 = math.exp %452 : vector<2x128xf32>
    %cst_135 = arith.constant 1.000000e+00 : f32
    %454 = vector.broadcast %cst_135 : f32 to vector<2x128xf32>
    %455 = arith.addf %454, %453 : vector<2x128xf32>
    %456 = arith.divf %454, %455 : vector<2x128xf32>
    %457 = vector.extract_strided_slice %444 {offsets = [0, 256], sizes = [2, 128], strides = [1, 1]} : vector<2x512xf32> to vector<2x128xf32>
    %458 = math.tanh %457 : vector<2x128xf32>
    %459 = vector.extract_strided_slice %444 {offsets = [0, 384], sizes = [2, 128], strides = [1, 1]} : vector<2x512xf32> to vector<2x128xf32>
    %460 = arith.negf %459 : vector<2x128xf32>
    %461 = math.exp %460 : vector<2x128xf32>
    %cst_136 = arith.constant 1.000000e+00 : f32
    %462 = vector.broadcast %cst_136 : f32 to vector<2x128xf32>
    %463 = arith.addf %462, %461 : vector<2x128xf32>
    %464 = arith.divf %462, %463 : vector<2x128xf32>
    %465 = arith.mulf %456, %430 : vector<2x128xf32>
    %466 = arith.mulf %450, %458 : vector<2x128xf32>
    %467 = arith.addf %465, %466 : vector<2x128xf32>
    %468 = math.tanh %467 : vector<2x128xf32>
    %469 = arith.mulf %464, %468 : vector<2x128xf32>
    %470 = arith.index_cast %437 : i32 to index
    %c0_137 = arith.constant 0 : index
    %c0_138 = arith.constant 0 : index
    %471 = vector.load %arg4[%470, %c0_137, %c0_138] : memref<8x2x128xf32, #tpu.memory_space<vmem>>, vector<1x2x128xf32>
    %472 = vector.shape_cast %471 : vector<1x2x128xf32> to vector<2x128xf32>
    %473 = vector.shape_cast %469 : vector<2x128xf32> to vector<1x2x128xf32>
    tpu.vector_store %arg4[%470, %c0_137, %c0_138], %473 {strides = array<i32>} : memref<8x2x128xf32, #tpu.memory_space<vmem>>, vector<1x2x128xf32>,
    %c5_i32_139 = arith.constant 5 : i32
    %c7_i32_140 = arith.constant 7 : i32
    %474 = arith.subi %c7_i32_140, %c5_i32_139 : i32
    %475 = arith.index_cast %474 : i32 to index
    %c0_141 = arith.constant 0 : index
    %c0_142 = arith.constant 0 : index
    %476 = vector.load %arg0[%475, %c0_141, %c0_142] : memref<8x2x1024xf32, #tpu.memory_space<vmem>>, vector<1x2x1024xf32>
    %477 = vector.shape_cast %476 : vector<1x2x1024xf32> to vector<2x1024xf32>
    %478 = vector.extract_strided_slice %477 {offsets = [0, 512], sizes = [2, 512], strides = [1, 1]} : vector<2x1024xf32> to vector<2x512xf32>
    %c0_143 = arith.constant 0 : index
    %c0_144 = arith.constant 0 : index
    %479 = vector.load %arg2[%c0_143, %c0_144] : memref<128x512xf32, #tpu.memory_space<vmem>>, vector<128x512xf32>
    %cst_145 = arith.constant dense<0.000000e+00> : vector<2x512xf32>
    %480 = tpu.matmul %469, %479, %cst_145 {dimension_numbers = #tpu.dot_dimension_numbers<[1], [0], [0], [1], [0, 0, 1, 1], [], []>} : vector<2x128xf32>, vector<128x512xf32>, vector<2x512xf32> -> vector<2x512xf32>
    %481 = arith.addf %478, %480 : vector<2x512xf32>
    %482 = vector.extract_strided_slice %481 {offsets = [0, 0], sizes = [2, 128], strides = [1, 1]} : vector<2x512xf32> to vector<2x128xf32>
    %483 = arith.negf %482 : vector<2x128xf32>
    %484 = math.exp %483 : vector<2x128xf32>
    %cst_146 = arith.constant 1.000000e+00 : f32
    %485 = vector.broadcast %cst_146 : f32 to vector<2x128xf32>
    %486 = arith.addf %485, %484 : vector<2x128xf32>
    %487 = arith.divf %485, %486 : vector<2x128xf32>
    %488 = vector.extract_strided_slice %481 {offsets = [0, 128], sizes = [2, 128], strides = [1, 1]} : vector<2x512xf32> to vector<2x128xf32>
    %489 = arith.negf %488 : vector<2x128xf32>
    %490 = math.exp %489 : vector<2x128xf32>
    %cst_147 = arith.constant 1.000000e+00 : f32
    %491 = vector.broadcast %cst_147 : f32 to vector<2x128xf32>
    %492 = arith.addf %491, %490 : vector<2x128xf32>
    %493 = arith.divf %491, %492 : vector<2x128xf32>
    %494 = vector.extract_strided_slice %481 {offsets = [0, 256], sizes = [2, 128], strides = [1, 1]} : vector<2x512xf32> to vector<2x128xf32>
    %495 = math.tanh %494 : vector<2x128xf32>
    %496 = vector.extract_strided_slice %481 {offsets = [0, 384], sizes = [2, 128], strides = [1, 1]} : vector<2x512xf32> to vector<2x128xf32>
    %497 = arith.negf %496 : vector<2x128xf32>
    %498 = math.exp %497 : vector<2x128xf32>
    %cst_148 = arith.constant 1.000000e+00 : f32
    %499 = vector.broadcast %cst_148 : f32 to vector<2x128xf32>
    %500 = arith.addf %499, %498 : vector<2x128xf32>
    %501 = arith.divf %499, %500 : vector<2x128xf32>
    %502 = arith.mulf %493, %467 : vector<2x128xf32>
    %503 = arith.mulf %487, %495 : vector<2x128xf32>
    %504 = arith.addf %502, %503 : vector<2x128xf32>
    %505 = math.tanh %504 : vector<2x128xf32>
    %506 = arith.mulf %501, %505 : vector<2x128xf32>
    %507 = arith.index_cast %474 : i32 to index
    %c0_149 = arith.constant 0 : index
    %c0_150 = arith.constant 0 : index
    %508 = vector.load %arg4[%507, %c0_149, %c0_150] : memref<8x2x128xf32, #tpu.memory_space<vmem>>, vector<1x2x128xf32>
    %509 = vector.shape_cast %508 : vector<1x2x128xf32> to vector<2x128xf32>
    %510 = vector.shape_cast %506 : vector<2x128xf32> to vector<1x2x128xf32>
    tpu.vector_store %arg4[%507, %c0_149, %c0_150], %510 {strides = array<i32>} : memref<8x2x128xf32, #tpu.memory_space<vmem>>, vector<1x2x128xf32>,
    %c6_i32_151 = arith.constant 6 : i32
    %c7_i32_152 = arith.constant 7 : i32
    %511 = arith.subi %c7_i32_152, %c6_i32_151 : i32
    %512 = arith.index_cast %511 : i32 to index
    %c0_153 = arith.constant 0 : index
    %c0_154 = arith.constant 0 : index
    %513 = vector.load %arg0[%512, %c0_153, %c0_154] : memref<8x2x1024xf32, #tpu.memory_space<vmem>>, vector<1x2x1024xf32>
    %514 = vector.shape_cast %513 : vector<1x2x1024xf32> to vector<2x1024xf32>
    %515 = vector.extract_strided_slice %514 {offsets = [0, 512], sizes = [2, 512], strides = [1, 1]} : vector<2x1024xf32> to vector<2x512xf32>
    %c0_155 = arith.constant 0 : index
    %c0_156 = arith.constant 0 : index
    %516 = vector.load %arg2[%c0_155, %c0_156] : memref<128x512xf32, #tpu.memory_space<vmem>>, vector<128x512xf32>
    %cst_157 = arith.constant dense<0.000000e+00> : vector<2x512xf32>
    %517 = tpu.matmul %506, %516, %cst_157 {dimension_numbers = #tpu.dot_dimension_numbers<[1], [0], [0], [1], [0, 0, 1, 1], [], []>} : vector<2x128xf32>, vector<128x512xf32>, vector<2x512xf32> -> vector<2x512xf32>
    %518 = arith.addf %515, %517 : vector<2x512xf32>
    %519 = vector.extract_strided_slice %518 {offsets = [0, 0], sizes = [2, 128], strides = [1, 1]} : vector<2x512xf32> to vector<2x128xf32>
    %520 = arith.negf %519 : vector<2x128xf32>
    %521 = math.exp %520 : vector<2x128xf32>
    %cst_158 = arith.constant 1.000000e+00 : f32
    %522 = vector.broadcast %cst_158 : f32 to vector<2x128xf32>
    %523 = arith.addf %522, %521 : vector<2x128xf32>
    %524 = arith.divf %522, %523 : vector<2x128xf32>
    %525 = vector.extract_strided_slice %518 {offsets = [0, 128], sizes = [2, 128], strides = [1, 1]} : vector<2x512xf32> to vector<2x128xf32>
    %526 = arith.negf %525 : vector<2x128xf32>
    %527 = math.exp %526 : vector<2x128xf32>
    %cst_159 = arith.constant 1.000000e+00 : f32
    %528 = vector.broadcast %cst_159 : f32 to vector<2x128xf32>
    %529 = arith.addf %528, %527 : vector<2x128xf32>
    %530 = arith.divf %528, %529 : vector<2x128xf32>
    %531 = vector.extract_strided_slice %518 {offsets = [0, 256], sizes = [2, 128], strides = [1, 1]} : vector<2x512xf32> to vector<2x128xf32>
    %532 = math.tanh %531 : vector<2x128xf32>
    %533 = vector.extract_strided_slice %518 {offsets = [0, 384], sizes = [2, 128], strides = [1, 1]} : vector<2x512xf32> to vector<2x128xf32>
    %534 = arith.negf %533 : vector<2x128xf32>
    %535 = math.exp %534 : vector<2x128xf32>
    %cst_160 = arith.constant 1.000000e+00 : f32
    %536 = vector.broadcast %cst_160 : f32 to vector<2x128xf32>
    %537 = arith.addf %536, %535 : vector<2x128xf32>
    %538 = arith.divf %536, %537 : vector<2x128xf32>
    %539 = arith.mulf %530, %504 : vector<2x128xf32>
    %540 = arith.mulf %524, %532 : vector<2x128xf32>
    %541 = arith.addf %539, %540 : vector<2x128xf32>
    %542 = math.tanh %541 : vector<2x128xf32>
    %543 = arith.mulf %538, %542 : vector<2x128xf32>
    %544 = arith.index_cast %511 : i32 to index
    %c0_161 = arith.constant 0 : index
    %c0_162 = arith.constant 0 : index
    %545 = vector.load %arg4[%544, %c0_161, %c0_162] : memref<8x2x128xf32, #tpu.memory_space<vmem>>, vector<1x2x128xf32>
    %546 = vector.shape_cast %545 : vector<1x2x128xf32> to vector<2x128xf32>
    %547 = vector.shape_cast %543 : vector<2x128xf32> to vector<1x2x128xf32>
    tpu.vector_store %arg4[%544, %c0_161, %c0_162], %547 {strides = array<i32>} : memref<8x2x128xf32, #tpu.memory_space<vmem>>, vector<1x2x128xf32>,
    %c7_i32_163 = arith.constant 7 : i32
    %c7_i32_164 = arith.constant 7 : i32
    %548 = arith.subi %c7_i32_164, %c7_i32_163 : i32
    %549 = arith.index_cast %548 : i32 to index
    %c0_165 = arith.constant 0 : index
    %c0_166 = arith.constant 0 : index
    %550 = vector.load %arg0[%549, %c0_165, %c0_166] : memref<8x2x1024xf32, #tpu.memory_space<vmem>>, vector<1x2x1024xf32>
    %551 = vector.shape_cast %550 : vector<1x2x1024xf32> to vector<2x1024xf32>
    %552 = vector.extract_strided_slice %551 {offsets = [0, 512], sizes = [2, 512], strides = [1, 1]} : vector<2x1024xf32> to vector<2x512xf32>
    %c0_167 = arith.constant 0 : index
    %c0_168 = arith.constant 0 : index
    %553 = vector.load %arg2[%c0_167, %c0_168] : memref<128x512xf32, #tpu.memory_space<vmem>>, vector<128x512xf32>
    %cst_169 = arith.constant dense<0.000000e+00> : vector<2x512xf32>
    %554 = tpu.matmul %543, %553, %cst_169 {dimension_numbers = #tpu.dot_dimension_numbers<[1], [0], [0], [1], [0, 0, 1, 1], [], []>} : vector<2x128xf32>, vector<128x512xf32>, vector<2x512xf32> -> vector<2x512xf32>
    %555 = arith.addf %552, %554 : vector<2x512xf32>
    %556 = vector.extract_strided_slice %555 {offsets = [0, 0], sizes = [2, 128], strides = [1, 1]} : vector<2x512xf32> to vector<2x128xf32>
    %557 = arith.negf %556 : vector<2x128xf32>
    %558 = math.exp %557 : vector<2x128xf32>
    %cst_170 = arith.constant 1.000000e+00 : f32
    %559 = vector.broadcast %cst_170 : f32 to vector<2x128xf32>
    %560 = arith.addf %559, %558 : vector<2x128xf32>
    %561 = arith.divf %559, %560 : vector<2x128xf32>
    %562 = vector.extract_strided_slice %555 {offsets = [0, 128], sizes = [2, 128], strides = [1, 1]} : vector<2x512xf32> to vector<2x128xf32>
    %563 = arith.negf %562 : vector<2x128xf32>
    %564 = math.exp %563 : vector<2x128xf32>
    %cst_171 = arith.constant 1.000000e+00 : f32
    %565 = vector.broadcast %cst_171 : f32 to vector<2x128xf32>
    %566 = arith.addf %565, %564 : vector<2x128xf32>
    %567 = arith.divf %565, %566 : vector<2x128xf32>
    %568 = vector.extract_strided_slice %555 {offsets = [0, 256], sizes = [2, 128], strides = [1, 1]} : vector<2x512xf32> to vector<2x128xf32>
    %569 = math.tanh %568 : vector<2x128xf32>
    %570 = vector.extract_strided_slice %555 {offsets = [0, 384], sizes = [2, 128], strides = [1, 1]} : vector<2x512xf32> to vector<2x128xf32>
    %571 = arith.negf %570 : vector<2x128xf32>
    %572 = math.exp %571 : vector<2x128xf32>
    %cst_172 = arith.constant 1.000000e+00 : f32
    %573 = vector.broadcast %cst_172 : f32 to vector<2x128xf32>
    %574 = arith.addf %573, %572 : vector<2x128xf32>
    %575 = arith.divf %573, %574 : vector<2x128xf32>
    %576 = arith.mulf %567, %541 : vector<2x128xf32>
    %577 = arith.mulf %561, %569 : vector<2x128xf32>
    %578 = arith.addf %576, %577 : vector<2x128xf32>
    %579 = math.tanh %578 : vector<2x128xf32>
    %580 = arith.mulf %575, %579 : vector<2x128xf32>
    %581 = arith.index_cast %548 : i32 to index
    %c0_173 = arith.constant 0 : index
    %c0_174 = arith.constant 0 : index
    %582 = vector.load %arg4[%581, %c0_173, %c0_174] : memref<8x2x128xf32, #tpu.memory_space<vmem>>, vector<1x2x128xf32>
    %583 = vector.shape_cast %582 : vector<1x2x128xf32> to vector<2x128xf32>
    %584 = vector.shape_cast %580 : vector<2x128xf32> to vector<1x2x128xf32>
    tpu.vector_store %arg4[%581, %c0_173, %c0_174], %584 {strides = array<i32>} : memref<8x2x128xf32, #tpu.memory_space<vmem>>, vector<1x2x128xf32>,
    %c8_i32_175 = arith.constant 8 : i32
    return
  }
}

</mosaic_0001>

<bundles_post_ra>
// kernel: custom-call.10
= control target key start
LH: loop header
LB: loop body
LE: loop exit
PB: predicated region body
PF: predicated region fallthrough
CT: control target
= control target key end

     0   :  { %s6_s0 = inlined_call_operand.vmem [shape: s32[7,2,8], index: 0, kind: output, shape index: {}]  }

// kernel: multi_feature_forward.5
= control target key start
LH: loop header
LB: loop body
LE: loop exit
PB: predicated region body
PF: predicated region fallthrough
CT: control target
= control target key end

     0   :  { %s475_s3 = inlined_call_operand.vmem [shape: f32[128,128], index: 3, kind: input, shape index: {}]   ;;  %s476_s2 = inlined_call_operand.vmem [shape: f32[128,128], index: 2, kind: input, shape index: {}]   ;;  %s477_s1 = inlined_call_operand.vmem [shape: f32[16,128], index: 1, kind: input, shape index: {}]   ;;  %s478_s0 = inlined_call_operand.vmem [shape: f32[16,128], index: 0, kind: input, shape index: {}]   ;;  %s479_s4 = inlined_call_operand.vmem [shape: f32[1,128], index: 4, kind: input, shape index: {}]   ;;  %s480_s5 = inlined_call_operand.vmem [shape: f32[16,128], index: 5, kind: output, shape index: {}]  }
   0x1   :  { %v55_v0 = vld [vmem:[%s475_s3 + $0x78] sm:$0xff]  ;;  %v54_v2 = vld [vmem:[%s475_s3 + $0x70] sm:$0xff]  ;;  %v53_v4 = vld [vmem:[%s475_s3 + $0x68] sm:$0xff] }
   0x2   :  { %v37_v1 = vld [vmem:[%s476_s2 + $0x78] sm:$0xff]  ;;  %258 = vmatprep.subr.mxu0 %v55_v0  ;;  %v36_v3 = vld [vmem:[%s476_s2 + $0x70] sm:$0xff]  ;;  %v35_v5 = vld [vmem:[%s476_s2 + $0x68] sm:$0xff] }
   0x3   :  { %293 = vmatprep.subr.mxu1 %v37_v1  ;;  %259 = vmatpush3.msra.mxu0 %v55_v0  ;;  %v52_v6 = vld [vmem:[%s475_s3 + $0x60] sm:$0xff]  ;;  %v51_v8 = vld [vmem:[%s475_s3 + $0x58] sm:$0xff]  ;;  %v50_v10 = vld [vmem:[%s475_s3 + $0x50] sm:$0xff] }
   0x4   :  { %294 = vmatpush3.msra.mxu1 %v37_v1  ;;  %260 = vmatprep.subr.mxu0 %v54_v2  ;;  %v34_v7 = vld [vmem:[%s476_s2 + $0x60] sm:$0xff]  ;;  %v33_v9 = vld [vmem:[%s476_s2 + $0x58] sm:$0xff]  ;;  %v32_v11 = vld [vmem:[%s476_s2 + $0x50] sm:$0xff] }
   0x5   :  { %295 = vmatprep.subr.mxu1 %v36_v3  ;;  %261 = vmatpush3.msra.mxu0 %v54_v2  ;;  %v49_v12 = vld [vmem:[%s475_s3 + $0x48] sm:$0xff]  ;;  %v48_v14 = vld [vmem:[%s475_s3 + $0x40] sm:$0xff]  ;;  %v47_v16 = vld [vmem:[%s475_s3 + $0x38] sm:$0xff] }
   0x6   :  { %296 = vmatpush3.msra.mxu1 %v36_v3  ;;  %262 = vmatprep.subr.mxu0 %v53_v4  ;;  %v31_v13 = vld [vmem:[%s476_s2 + $0x48] sm:$0xff]  ;;  %v30_v15 = vld [vmem:[%s476_s2 + $0x40] sm:$0xff]  ;;  %v29_v17 = vld [vmem:[%s476_s2 + $0x38] sm:$0xff] }
   0x7   :  { %297 = vmatprep.subr.mxu1 %v35_v5  ;;  %263 = vmatpush3.msra.mxu0 %v53_v4  ;;  %v46_v18 = vld [vmem:[%s475_s3 + $0x30] sm:$0xff]  ;;  %v45_v20 = vld [vmem:[%s475_s3 + $0x28] sm:$0xff]  ;;  %v44_v22 = vld [vmem:[%s475_s3 + $0x20] sm:$0xff] }
   0x8   :  { %298 = vmatpush3.msra.mxu1 %v35_v5  ;;  %264 = vmatprep.subr.mxu0 %v52_v6  ;;  %v28_v19 = vld [vmem:[%s476_s2 + $0x30] sm:$0xff]  ;;  %v27_v21 = vld [vmem:[%s476_s2 + $0x28] sm:$0xff]  ;;  %v26_v23 = vld [vmem:[%s476_s2 + $0x20] sm:$0xff] }
   0x9   :  { %299 = vmatprep.subr.mxu1 %v34_v7  ;;  %265 = vmatpush3.msra.mxu0 %v52_v6  ;;  %v43_v24 = vld [vmem:[%s475_s3 + $0x18] sm:$0xff]  ;;  %v42_v26 = vld [vmem:[%s475_s3 + $0x10] sm:$0xff]  ;;  %v41_v28 = vld [vmem:[%s475_s3 + $0x8] sm:$0xff] }
   0xa   :  { %300 = vmatpush3.msra.mxu1 %v34_v7  ;;  %266 = vmatprep.subr.mxu0 %v51_v8  ;;  %v25_v25 = vld [vmem:[%s476_s2 + $0x18] sm:$0xff]  ;;  %v24_v27 = vld [vmem:[%s476_s2 + $0x10] sm:$0xff]  ;;  %v23_v29 = vld [vmem:[%s476_s2 + $0x8] sm:$0xff] }
   0xb   :  { %301 = vmatprep.subr.mxu1 %v33_v9  ;;  %267 = vmatpush3.msra.mxu0 %v51_v8  ;;  %v40_v30 = vld [vmem:[%s475_s3] sm:$0xff]  ;;  %v39_v34 = vld [vmem:[%s477_s1 + $0x8] sm:$0xff] }
   0xc   :  { %302 = vmatpush3.msra.mxu1 %v33_v9  ;;  %268 = vmatprep.subr.mxu0 %v50_v10  ;;  %v22_v31 = vld [vmem:[%s476_s2] sm:$0xff]  ;;  %v21_v35 = vld [vmem:[%s478_s0 + $0x8] sm:$0xff] }
   0xd   :  { %303 = vmatprep.subr.mxu1 %v32_v11  ;;  %269 = vmatpush3.msra.mxu0 %v50_v10  ;;  %v38_v32 = vld [vmem:[%s477_s1] sm:$0xff] }
   0xe   :  { %304 = vmatpush3.msra.mxu1 %v32_v11  ;;  %270 = vmatprep.subr.mxu0 %v49_v12  ;;  %v20_v33 = vld [vmem:[%s478_s0] sm:$0xff] }
   0xf   :  { %305 = vmatprep.subr.mxu1 %v31_v13  ;;  %271 = vmatpush3.msra.mxu0 %v49_v12  ;;  %v221_v38 = vld [vmem:[%s479_s4] ss:$0 sm:$0xff] }
  0x10   :  { %306 = vmatpush3.msra.mxu1 %v31_v13  ;;  %272 = vmatprep.subr.mxu0 %v48_v14 }
  0x11   :  { %307 = vmatprep.subr.mxu1 %v30_v15  ;;  %273 = vmatpush3.msra.mxu0 %v48_v14 }
  0x12   :  { %308 = vmatpush3.msra.mxu1 %v30_v15  ;;  %274 = vmatprep.subr.mxu0 %v47_v16 }
  0x13   :  { %309 = vmatprep.subr.mxu1 %v29_v17  ;;  %275 = vmatpush3.msra.mxu0 %v47_v16 }
  0x14   :  { %310 = vmatpush3.msra.mxu1 %v29_v17  ;;  %276 = vmatprep.subr.mxu0 %v46_v18 }
  0x15   :  { %311 = vmatprep.subr.mxu1 %v28_v19  ;;  %277 = vmatpush3.msra.mxu0 %v46_v18 }
  0x16   :  { %312 = vmatpush3.msra.mxu1 %v28_v19  ;;  %278 = vmatprep.subr.mxu0 %v45_v20 }
  0x17   :  { %313 = vmatprep.subr.mxu1 %v27_v21  ;;  %279 = vmatpush3.msra.mxu0 %v45_v20 }
  0x18   :  { %314 = vmatpush3.msra.mxu1 %v27_v21  ;;  %280 = vmatprep.subr.mxu0 %v44_v22 }
  0x19   :  { %315 = vmatprep.subr.mxu1 %v26_v23  ;;  %281 = vmatpush3.msra.mxu0 %v44_v22 }
  0x1a   :  { %316 = vmatpush3.msra.mxu1 %v26_v23  ;;  %282 = vmatprep.subr.mxu0 %v43_v24 }
  0x1b   :  { %317 = vmatprep.subr.mxu1 %v25_v25  ;;  %283 = vmatpush3.msra.mxu0 %v43_v24 }
  0x1c   :  { %318 = vmatpush3.msra.mxu1 %v25_v25  ;;  %284 = vmatprep.subr.mxu0 %v42_v26 }
  0x1d   :  { %319 = vmatprep.subr.mxu1 %v24_v27  ;;  %285 = vmatpush3.msra.mxu0 %v42_v26 }
  0x1e   :  { %320 = vmatpush3.msra.mxu1 %v24_v27  ;;  %286 = vmatprep.subr.mxu0 %v41_v28 }
  0x1f   :  { %321 = vmatprep.subr.mxu1 %v23_v29  ;;  %287 = vmatpush3.msra.mxu0 %v41_v28 }
  0x20   :  { %322 = vmatpush3.msra.mxu1 %v23_v29  ;;  %288 = vmatprep.subr.mxu0 %v40_v30 }
  0x21   :  { %323 = vmatprep.subr.mxu1 %v22_v31  ;;  %289 = vmatpush3.msra.mxu0 %v40_v30 }
  0x22   :  { %290 = vmatprep.mubr.f32.mxu0 %v38_v32  ;;  %324 = vmatpush3.msra.mxu1 %v22_v31 }
  0x23   :  { %325 = vmatprep.mubr.f32.mxu1 %v20_v33  ;;  %291 = vmatmul.mubr.f32.vlgmr.msra.gmra.mxu0 %v39_v34 }
  0x24   :  { %326 = vmatmul.mubr.f32.vlgmr.msra.gmra.mxu1 %v21_v35 }
  0xe3   :  { %v292_v36 = vpop.f32.mrf.mxu0 }
  0xe4   :  { %v327_v37 = vpop.f32.mrf.mxu1 }
  0xe5   :  { %v203_v39 = vadd.f32 %v327_v37, %v292_v36  ;;  %v122_v40 = vpop.f32.mrf.mxu0 }
  0xe6   :  { %v197_v41 = vpop.f32.mrf.mxu1 }
  0xe7   :  { %v214_v42 = vadd.f32 %v221_v38, %v203_v39  ;;  %v198_v43 = vadd.f32 %v197_v41, %v122_v40 }
  0xe9   :  { %216 = vst [vmem:[%s480_s5 + $0x8] sm:$0xff] %v214_v42  ;;  %v213_v44 = vadd.f32 %v221_v38, %v198_v43 }
  0xeb   :  { %215 = vst [vmem:[%s480_s5] sm:$0xff] %v213_v44 }

// kernel: custom-call.11
= control target key start
LH: loop header
LB: loop body
LE: loop exit
PB: predicated region body
PF: predicated region fallthrough
CT: control target
= control target key end

     0   :  { %s6_s0 = inlined_call_operand.vmem [shape: s32[8,2], index: 0, kind: output, shape index: {}]  }

// kernel: custom-call.2
= control target key start
LH: loop header
LB: loop body
LE: loop exit
PB: predicated region body
PF: predicated region fallthrough
CT: control target
= control target key end

     0   :  { %s6_s0 = inlined_call_operand.vmem [shape: s32[2], index: 0, kind: output, shape index: {}]  }

// kernel: multi_feature_forward.3
= control target key start
LH: loop header
LB: loop body
LE: loop exit
PB: predicated region body
PF: predicated region fallthrough
CT: control target
= control target key end

     0   :  { %8 = vsyncpa [#allocation3], 0  ;;  %s3931_s0 = inlined_call_operand.vmem [shape: bf16[16,800], index: 0, kind: input, shape index: {}]   ;;  %s3932_s1 = inlined_call_operand.hbm [shape: bf16[800,1024], index: 1, kind: input, shape index: {}]   ;;  %s3933_s2 = inlined_call_operand.hbm [shape: f32[1,1024], index: 2, kind: input, shape index: {}]   ;;  %s3934_s3 = inlined_call_operand.vmem [shape: f32[16,1024], index: 3, kind: output, shape index: {}]  }
   0x1   :  { %9 = vsyncpa [#allocation5], 0  ;;  %s3717_s12 = smov [#allocation2]  }
   0x2   :  { %s17_s13 = sshll.u32 %s3717_s12, 4  ;;  %s18_s13 = int_to_ptr.vmem [resolvable:$true] %s17_s13 }
   0x3   :  { %s3681_s14 = scalar_lea.vmem %s18_s13, 51200  ;;  %p3686_p1 = scmp.lt.s32.totalorder %s18_s13, %s18_s13 }
   0x4   :  { %p3682_p0 = scmp.ne.s32.totalorder %s18_s13, %s3681_s14  ;;  %p3687_p2 = scmp.lt.s32.totalorder %s3681_s14, %s3681_s14 }
   0x6   :  { %p3688_p3 = por %p3687_p2, %p3686_p1 }
   0x8   :  { %p3689_p4 = pnand %p3688_p3, %p3682_p0 }
   0xa   :  { %3692 = shalt.err (!%p3689_p4)
}
   0xb   :  { %s3718_s15 = smov 512   ;;  %s3719_s16 = smov 32  }
   0xc   :  { %23 = dma.hbm_to_vmem [thread:$0]  %s3932_s1, 51200, %s18_s13, [#allocation3], %s3718_s15, %s3718_s15, %s3719_s16  }
   0xd   :  { %s3720_s19 = smov [#allocation4]  }
   0xe   :  { %s30_s20 = sshll.u32 %s3720_s19, 4  ;;  %s31_s20 = int_to_ptr.vmem [resolvable:$true] %s30_s20 }
   0xf   :  { %s3701_s21 = scalar_lea.vmem %s31_s20, 128  ;;  %p3706_p6 = scmp.lt.s32.totalorder %s31_s20, %s31_s20 }
  0x10   :  { %p3702_p5 = scmp.ne.s32.totalorder %s31_s20, %s3701_s21  ;;  %p3707_p7 = scmp.lt.s32.totalorder %s3701_s21, %s3701_s21 }
  0x12   :  { %p3708_p8 = por %p3707_p7, %p3706_p6 }
  0x14   :  { %p3709_p9 = pnand %p3708_p8, %p3702_p5 }
  0x16   :  { %3712 = shalt.err (!%p3709_p9)
}
  0x17   :  { %33 = dma.hbm_to_vmem [thread:$0]  %s3933_s2, 128, %s31_s20, [#allocation5]  }
  0x18   :  { %3713 = dma.done.wait [#allocation3], 51200  }
  0x19   :  { %3714 = vsyncadd [#allocation3], 4294916096 }
  0x1a   :  { %3715 = dma.done.wait [#allocation5], 128  }
  0x1b   :  { %3716 = vsyncadd [#allocation5], 4294967168  ;;  %v105_v0 = vld [vmem:[#allocation2 + $0x1c0] sm:$0xff]  ;;  %v3756_v59 = vld [vmem:[%s3931_s0 + $0xc] ss:$28 sps:$4 sm:$0xff]   ;;  %vm2526_vm0 = vcmask 261120  }
  0x1c   :  { %v109_v1 = vld [vmem:[#allocation2 + $0x1e0] sm:$0xff]  ;;  %2605 = vmatprep.mubr.bf16.mxu1 %v3756_v59 }
  0x1d   :  { %v233_v2 = vld [vmem:[#allocation2 + $0x5c0] sm:$0xff]  ;;  %v3304_v3 = vcombine.high %v105_v0, %v109_v1  ;;  %v3303_v5 = vcombine.low %v105_v0, %v109_v1 }
  0x1e   :  { %v237_v4 = vld [vmem:[#allocation2 + $0x5e0] sm:$0xff] }
  0x1f   :  { %v97_v6 = vld [vmem:[#allocation2 + $0x180] sm:$0xff]  ;;  %v3432_v8 = vcombine.high %v233_v2, %v237_v4  ;;  %v3431_v9 = vcombine.low %v233_v2, %v237_v4  ;;  %2530 = vmatprep.subr.bf16.mxu0 %v3304_v3 }
  0x20   :  { %v101_v7 = vld [vmem:[#allocation2 + $0x1a0] sm:$0xff]  ;;  %2531 = vmatpush1.bf16.msra.mxu0 %v3303_v5 }
  0x21   :  { %v3296_v10 = vcombine.high %v97_v6, %v101_v7  ;;  %v225_v11 = vld [vmem:[#allocation2 + $0x580] sm:$0xff]  ;;  %2573 = vmatprep.subr.bf16.mxu1 %v3432_v8  ;;  %v3295_v18 = vcombine.low %v97_v6, %v101_v7 }
  0x22   :  { %v229_v12 = vld [vmem:[#allocation2 + $0x5a0] sm:$0xff]  ;;  %2574 = vmatpush1.bf16.msra.mxu1 %v3431_v9 }
  0x23   :  { %v89_v13 = vld [vmem:[#allocation2 + $0x140] sm:$0xff]  ;;  %v3424_v14 = vcombine.high %v225_v11, %v229_v12  ;;  %2532 = vmatprep.subr.bf16.mxu0 %v3296_v10  ;;  %v3423_v19 = vcombine.low %v225_v11, %v229_v12 }
  0x24   :  { %v93_v15 = vld [vmem:[#allocation2 + $0x160] sm:$0xff]  ;;  %2533 = vmatpush1.bf16.msra.mxu0 %v3295_v18 }
  0x25   :  { %v217_v16 = vld [vmem:[#allocation2 + $0x540] sm:$0xff]  ;;  %v3288_v20 = vcombine.high %v89_v13, %v93_v15  ;;  %2575 = vmatprep.subr.bf16.mxu1 %v3424_v14  ;;  %v3287_v26 = vcombine.low %v89_v13, %v93_v15 }
  0x26   :  { %v221_v17 = vld [vmem:[#allocation2 + $0x560] sm:$0xff]  ;;  %2576 = vmatpush1.bf16.msra.mxu1 %v3423_v19 }
  0x27   :  { %v3416_v21 = vcombine.high %v217_v16, %v221_v17  ;;  %v81_v22 = vld [vmem:[#allocation2 + $0x100] sm:$0xff]  ;;  %2534 = vmatprep.subr.bf16.mxu0 %v3288_v20  ;;  %v3415_v27 = vcombine.low %v217_v16, %v221_v17 }
  0x28   :  { %v85_v23 = vld [vmem:[#allocation2 + $0x120] sm:$0xff]  ;;  %2535 = vmatpush1.bf16.msra.mxu0 %v3287_v26 }
  0x29   :  { %v209_v24 = vld [vmem:[#allocation2 + $0x500] sm:$0xff]  ;;  %v3280_v28 = vcombine.high %v81_v22, %v85_v23  ;;  %2577 = vmatprep.subr.bf16.mxu1 %v3416_v21  ;;  %v3279_v34 = vcombine.low %v81_v22, %v85_v23 }
  0x2a   :  { %v213_v25 = vld [vmem:[#allocation2 + $0x520] sm:$0xff]  ;;  %2578 = vmatpush1.bf16.msra.mxu1 %v3415_v27 }
  0x2b   :  { %v3408_v29 = vcombine.high %v209_v24, %v213_v25  ;;  %v73_v30 = vld [vmem:[#allocation2 + $0xc0] sm:$0xff]  ;;  %2536 = vmatprep.subr.bf16.mxu0 %v3280_v28  ;;  %v3407_v35 = vcombine.low %v209_v24, %v213_v25 }
  0x2c   :  { %v77_v31 = vld [vmem:[#allocation2 + $0xe0] sm:$0xff]  ;;  %2537 = vmatpush1.bf16.msra.mxu0 %v3279_v34 }
  0x2d   :  { %v201_v32 = vld [vmem:[#allocation2 + $0x4c0] sm:$0xff]  ;;  %v3272_v36 = vcombine.high %v73_v30, %v77_v31  ;;  %2579 = vmatprep.subr.bf16.mxu1 %v3408_v29  ;;  %v3271_v42 = vcombine.low %v73_v30, %v77_v31 }
  0x2e   :  { %v205_v33 = vld [vmem:[#allocation2 + $0x4e0] sm:$0xff]  ;;  %2580 = vmatpush1.bf16.msra.mxu1 %v3407_v35 }
  0x2f   :  { %v3400_v37 = vcombine.high %v201_v32, %v205_v33  ;;  %v65_v38 = vld [vmem:[#allocation2 + $0x80] sm:$0xff]  ;;  %2538 = vmatprep.subr.bf16.mxu0 %v3272_v36  ;;  %v3399_v43 = vcombine.low %v201_v32, %v205_v33 }
  0x30   :  { %v69_v39 = vld [vmem:[#allocation2 + $0xa0] sm:$0xff]  ;;  %2539 = vmatpush1.bf16.msra.mxu0 %v3271_v42 }
  0x31   :  { %v193_v40 = vld [vmem:[#allocation2 + $0x480] sm:$0xff]  ;;  %v3264_v44 = vcombine.high %v65_v38, %v69_v39  ;;  %2581 = vmatprep.subr.bf16.mxu1 %v3400_v37  ;;  %v3263_v50 = vcombine.low %v65_v38, %v69_v39 }
  0x32   :  { %v197_v41 = vld [vmem:[#allocation2 + $0x4a0] sm:$0xff]  ;;  %2582 = vmatpush1.bf16.msra.mxu1 %v3399_v43 }
  0x33   :  { %v3392_v45 = vcombine.high %v193_v40, %v197_v41  ;;  %v57_v46 = vld [vmem:[#allocation2 + $0x40] sm:$0xff]  ;;  %2540 = vmatprep.subr.bf16.mxu0 %v3264_v44  ;;  %v3391_v52 = vcombine.low %v193_v40, %v197_v41 }
  0x34   :  { %v61_v47 = vld [vmem:[#allocation2 + $0x60] sm:$0xff]  ;;  %2541 = vmatpush1.bf16.msra.mxu0 %v3263_v50 }
  0x35   :  { %v185_v48 = vld [vmem:[#allocation2 + $0x440] sm:$0xff]  ;;  %v3256_v53 = vcombine.high %v57_v46, %v61_v47  ;;  %2583 = vmatprep.subr.bf16.mxu1 %v3392_v45  ;;  %v3255_v60 = vcombine.low %v57_v46, %v61_v47 }
  0x36   :  { %v189_v49 = vld [vmem:[#allocation2 + $0x460] sm:$0xff]  ;;  %2584 = vmatpush1.bf16.msra.mxu1 %v3391_v52 }
  0x37   :  { %v49_v51 = vld [vmem:[#allocation2] sm:$0xff]  ;;  %v3384_v55 = vcombine.high %v185_v48, %v189_v49  ;;  %2542 = vmatprep.subr.bf16.mxu0 %v3256_v53  ;;  %v3383_v61 = vcombine.low %v185_v48, %v189_v49 }
  0x38   :  { %v53_v54 = vld [vmem:[#allocation2 + $0x20] sm:$0xff]  ;;  %2543 = vmatpush1.bf16.msra.mxu0 %v3255_v60 }
  0x39   :  { %v3751_v56 = vld [vmem:[%s3931_s0 + $0x4] ss:$28 sps:$4 sm:$0xff]   ;;  %v3248_v62 = vcombine.high %v49_v51, %v53_v54  ;;  %2585 = vmatprep.subr.bf16.mxu1 %v3384_v55  ;;  %v3247_v4 = vcombine.low %v49_v51, %v53_v54 }
  0x3a   :  { %v177_v57 = vld [vmem:[#allocation2 + $0x400] sm:$0xff]  ;;  %2562 = vmatprep.mubr.bf16.mxu0 %v3751_v56  ;;  %2586 = vmatpush1.bf16.msra.mxu1 %v3383_v61 }
  0x3b   :  { %v181_v58 = vld [vmem:[#allocation2 + $0x420] sm:$0xff]  ;;  %2544 = vmatprep.subr.bf16.mxu0 %v3248_v62 }
  0x3c   :  { %v3376_v63 = vcombine.high %v177_v57, %v181_v58  ;;  %v169_v0 = vld [vmem:[#allocation2 + $0x3c0] sm:$0xff]  ;;  %v3375_v5 = vcombine.low %v177_v57, %v181_v58  ;;  %2545 = vmatpush1.bf16.msra.mxu0 %v3247_v4 }
  0x3d   :  { %v173_v1 = vld [vmem:[#allocation2 + $0x3e0] sm:$0xff] }
  0x3e   :  { %v297_v2 = vld [vmem:[#allocation2 + $0x7c0] sm:$0xff]  ;;  %v3368_v6 = vcombine.high %v169_v0, %v173_v1  ;;  %2587 = vmatprep.subr.bf16.mxu1 %v3376_v63  ;;  %v3367_v12 = vcombine.low %v169_v0, %v173_v1 }
  0x3f   :  { %v301_v3 = vld [vmem:[#allocation2 + $0x7e0] sm:$0xff]  ;;  %2588 = vmatpush1.bf16.msra.mxu1 %v3375_v5 }
  0x40   :  { %v3496_v7 = vcombine.high %v297_v2, %v301_v3  ;;  %v161_v8 = vld [vmem:[#allocation2 + $0x380] sm:$0xff]  ;;  %2546 = vmatprep.subr.bf16.mxu0 %v3368_v6  ;;  %v3495_v13 = vcombine.low %v297_v2, %v301_v3 }
  0x41   :  { %v165_v9 = vld [vmem:[#allocation2 + $0x3a0] sm:$0xff]  ;;  %2547 = vmatpush2.bf16.msra.mxu0 %v3367_v12 }
  0x42   :  { %v289_v10 = vld [vmem:[#allocation2 + $0x780] sm:$0xff]  ;;  %v3360_v14 = vcombine.high %v161_v8, %v165_v9  ;;  %2589 = vmatprep.subr.bf16.mxu1 %v3496_v7  ;;  %v3359_v20 = vcombine.low %v161_v8, %v165_v9 }
  0x43   :  { %v293_v11 = vld [vmem:[#allocation2 + $0x7a0] sm:$0xff]  ;;  %2590 = vmatpush2.bf16.msra.mxu1 %v3495_v13 }
  0x44   :  { %v3488_v15 = vcombine.high %v289_v10, %v293_v11  ;;  %v153_v16 = vld [vmem:[#allocation2 + $0x340] sm:$0xff]  ;;  %2548 = vmatprep.subr.bf16.mxu0 %v3360_v14  ;;  %v3487_v21 = vcombine.low %v289_v10, %v293_v11 }
  0x45   :  { %v157_v17 = vld [vmem:[#allocation2 + $0x360] sm:$0xff]  ;;  %2549 = vmatpush2.bf16.msra.mxu0 %v3359_v20 }
  0x46   :  { %v281_v18 = vld [vmem:[#allocation2 + $0x740] sm:$0xff]  ;;  %v3352_v22 = vcombine.high %v153_v16, %v157_v17  ;;  %2591 = vmatprep.subr.bf16.mxu1 %v3488_v15  ;;  %v3351_v28 = vcombine.low %v153_v16, %v157_v17 }
  0x47   :  { %v285_v19 = vld [vmem:[#allocation2 + $0x760] sm:$0xff]  ;;  %2592 = vmatpush2.bf16.msra.mxu1 %v3487_v21 }
  0x48   :  { %v3480_v23 = vcombine.high %v281_v18, %v285_v19  ;;  %v145_v24 = vld [vmem:[#allocation2 + $0x300] sm:$0xff]  ;;  %2550 = vmatprep.subr.bf16.mxu0 %v3352_v22  ;;  %v3479_v29 = vcombine.low %v281_v18, %v285_v19  ;;  %v106_v22 = vld [vmem:[#allocation2 + $0x1c8] sm:$0xff] }
  0x49   :  { %v149_v25 = vld [vmem:[#allocation2 + $0x320] sm:$0xff]  ;;  %2551 = vmatpush2.bf16.msra.mxu0 %v3351_v28  ;;  %v3721_v28 = vmov 0  }
  0x4a   :  { %v273_v26 = vld [vmem:[#allocation2 + $0x700] sm:$0xff]  ;;  %v3344_v30 = vcombine.high %v145_v24, %v149_v25  ;;  %2593 = vmatprep.subr.bf16.mxu1 %v3480_v23  ;;  %v3343_v36 = vcombine.low %v145_v24, %v149_v25  ;;  %v110_v23 = vld [vmem:[#allocation2 + $0x1e8] sm:$0xff]  ;;  %v3774_v24 = vld [vmem:[%s3931_s0 + $0x14] ss:$28 sps:$4 sm:$0xff]  }
  0x4b   :  { %v277_v27 = vld [vmem:[#allocation2 + $0x720] sm:$0xff]  ;;  %2594 = vmatpush2.bf16.msra.mxu1 %v3479_v29  ;;  %v3306_v29 = vcombine.high %v106_v22, %v110_v23 }
  0x4c   :  { %v3472_v31 = vcombine.high %v273_v26, %v277_v27  ;;  %v137_v32 = vld [vmem:[#allocation2 + $0x2c0] sm:$0xff]  ;;  %2552 = vmatprep.subr.bf16.mxu0 %v3344_v30  ;;  %v3471_v37 = vcombine.low %v273_v26, %v277_v27 }
  0x4d   :  { %v141_v33 = vld [vmem:[#allocation2 + $0x2e0] sm:$0xff]  ;;  %2553 = vmatpush2.bf16.msra.mxu0 %v3343_v36  ;;  %v3305_v36 = vcombine.low %v106_v22, %v110_v23 }
  0x4e   :  { %v265_v34 = vld [vmem:[#allocation2 + $0x6c0] sm:$0xff]  ;;  %v3336_v38 = vcombine.high %v137_v32, %v141_v33  ;;  %2595 = vmatprep.subr.bf16.mxu1 %v3472_v31  ;;  %v3335_v44 = vcombine.low %v137_v32, %v141_v33  ;;  %v98_v32 = vld [vmem:[#allocation2 + $0x188] sm:$0xff] }
  0x4f   :  { %v269_v35 = vld [vmem:[#allocation2 + $0x6e0] sm:$0xff]  ;;  %2596 = vmatpush2.bf16.msra.mxu1 %v3471_v37  ;;  %v102_v33 = vld [vmem:[#allocation2 + $0x1a8] sm:$0xff] }
  0x50   :  { %v129_v39 = vld [vmem:[#allocation2 + $0x280] sm:$0xff]  ;;  %v3464_v40 = vcombine.high %v265_v34, %v269_v35  ;;  %2554 = vmatprep.subr.bf16.mxu0 %v3336_v38  ;;  %v3463_v45 = vcombine.low %v265_v34, %v269_v35  ;;  %v3782_v35 = vld [vmem:[%s3931_s0 + $0x18] ss:$28 sps:$4 sm:$0xff]   ;;  %v3298_v38 = vcombine.high %v98_v32, %v102_v33 }
  0x51   :  { %v133_v41 = vld [vmem:[#allocation2 + $0x2a0] sm:$0xff]  ;;  %2555 = vmatpush2.bf16.msra.mxu0 %v3335_v44  ;;  %v3297_v44 = vcombine.low %v98_v32, %v102_v33 }
  0x52   :  { %v257_v42 = vld [vmem:[#allocation2 + $0x680] sm:$0xff]  ;;  %v3328_v46 = vcombine.high %v129_v39, %v133_v41  ;;  %2597 = vmatprep.subr.bf16.mxu1 %v3464_v40  ;;  %v3327_v52 = vcombine.low %v129_v39, %v133_v41  ;;  %v90_v41 = vld [vmem:[#allocation2 + $0x148] sm:$0xff] }
  0x53   :  { %v261_v43 = vld [vmem:[#allocation2 + $0x6a0] sm:$0xff]  ;;  %2598 = vmatpush2.bf16.msra.mxu1 %v3463_v45 }
  0x54   :  { %v3456_v47 = vcombine.high %v257_v42, %v261_v43  ;;  %v121_v48 = vld [vmem:[#allocation2 + $0x240] sm:$0xff]  ;;  %2556 = vmatprep.subr.bf16.mxu0 %v3328_v46  ;;  %v3455_v53 = vcombine.low %v257_v42, %v261_v43  ;;  %v94_v42 = vld [vmem:[#allocation2 + $0x168] sm:$0xff] }
  0x55   :  { %v125_v49 = vld [vmem:[#allocation2 + $0x260] sm:$0xff]  ;;  %2557 = vmatpush2.bf16.msra.mxu0 %v3327_v52  ;;  %v3290_v46 = vcombine.high %v90_v41, %v94_v42  ;;  %v3289_v52 = vcombine.low %v90_v41, %v94_v42 }
  0x56   :  { %v249_v50 = vld [vmem:[#allocation2 + $0x640] sm:$0xff]  ;;  %v3320_v54 = vcombine.high %v121_v48, %v125_v49  ;;  %2599 = vmatprep.subr.bf16.mxu1 %v3456_v47  ;;  %v3319_v62 = vcombine.low %v121_v48, %v125_v49  ;;  %v82_v49 = vld [vmem:[#allocation2 + $0x108] sm:$0xff] }
  0x57   :  { %v253_v51 = vld [vmem:[#allocation2 + $0x660] sm:$0xff]  ;;  %2600 = vmatpush2.bf16.msra.mxu1 %v3455_v53 }
  0x58   :  { %v3448_v55 = vcombine.high %v249_v50, %v253_v51  ;;  %v113_v57 = vld [vmem:[#allocation2 + $0x200] sm:$0xff]  ;;  %2558 = vmatprep.subr.bf16.mxu0 %v3320_v54  ;;  %v3447_v63 = vcombine.low %v249_v50, %v253_v51  ;;  %v86_v50 = vld [vmem:[#allocation2 + $0x128] sm:$0xff] }
  0x59   :  { %v117_v58 = vld [vmem:[#allocation2 + $0x220] sm:$0xff]  ;;  %2559 = vmatpush2.bf16.msra.mxu0 %v3319_v62  ;;  %v3282_v54 = vcombine.high %v82_v49, %v86_v50  ;;  %v3281_v62 = vcombine.low %v82_v49, %v86_v50 }
  0x5a   :  { %v241_v60 = vld [vmem:[#allocation2 + $0x600] sm:$0xff]  ;;  %v3312_v0 = vcombine.high %v113_v57, %v117_v58  ;;  %2601 = vmatprep.subr.bf16.mxu1 %v3448_v55  ;;  %v3311_v6 = vcombine.low %v113_v57, %v117_v58  ;;  %v74_v58 = vld [vmem:[#allocation2 + $0xc8] sm:$0xff] }
  0x5b   :  { %v245_v61 = vld [vmem:[#allocation2 + $0x620] sm:$0xff]  ;;  %2602 = vmatpush2.bf16.msra.mxu1 %v3447_v63 }
  0x5c   :  { %v3440_v1 = vcombine.high %v241_v60, %v245_v61  ;;  %v361_v2 = vld [vmem:[#allocation2 + $0x9c0] sm:$0xff]  ;;  %2560 = vmatprep.subr.bf16.mxu0 %v3312_v0  ;;  %v3439_v7 = vcombine.low %v241_v60, %v245_v61  ;;  %v78_v60 = vld [vmem:[#allocation2 + $0xe8] sm:$0xff] }
  0x5d   :  { %v365_v3 = vld [vmem:[#allocation2 + $0x9e0] sm:$0xff]  ;;  %2561 = vmatpush2.bf16.msra.mxu0 %v3311_v6  ;;  %v3274_v63 = vcombine.high %v74_v58, %v78_v60 }
  0x5e   :  { %v441_v4 = vld [vmem:[#allocation2 + $0xc40] sm:$0xff]  ;;  %v3560_v8 = vcombine.high %v361_v2, %v365_v3  ;;  %2603 = vmatprep.subr.bf16.mxu1 %v3440_v1  ;;  %v3559_v16 = vcombine.low %v361_v2, %v365_v3  ;;  %v66_v2 = vld [vmem:[#allocation2 + $0x88] sm:$0xff] }
  0x5f   :  { %v445_v5 = vld [vmem:[#allocation2 + $0xc60] sm:$0xff]  ;;  %2604 = vmatpush2.bf16.msra.mxu1 %v3439_v7  ;;  %v70_v3 = vld [vmem:[#allocation2 + $0xa8] sm:$0xff] }
  0x60   :  { %v3640_v9 = vcombine.high %v441_v4, %v445_v5  ;;  %v353_v10 = vld [vmem:[#allocation2 + $0x980] sm:$0xff]  ;;  %2616 = vmatprep.subr.bf16.mxu0 %v3560_v8  ;;  %v3639_v17 = vcombine.low %v441_v4, %v445_v5  ;;  %v3273_v5 = vcombine.low %v74_v58, %v78_v60  ;;  %v3266_v7 = vcombine.high %v66_v2, %v70_v3 }
  0x61   :  { %v357_v11 = vld [vmem:[#allocation2 + $0x9a0] sm:$0xff] }
  0x62   :  { %v3763_v12 = vld [vmem:[%s3931_s0] ss:$28 sps:$4 sm:$0xff]   ;;  %v3768_v15 = vld [vmem:[%s3931_s0 + $0x8] ss:$28 sps:$4 sm:$0xff]   ;;  %v3552_v18 = vcombine.high %v353_v10, %v357_v11  ;;  %2671 = vmatprep.subr.bf16.mxu1 %v3640_v9  ;;  %v3551_v25 = vcombine.low %v353_v10, %v357_v11 }
  0x63   :  { %v433_v13 = vld [vmem:[#allocation2 + $0xc00] sm:$0xff]  ;;  %2563 = vmatmul.mubr.bf16.vlgmr.msra.gmra.mxu0 %v3763_v12  ;;  %2606 = vmatmul.mubr.bf16.vlgmr.msra.gmra.mxu1 %v3768_v15  ;;  %v58_v10 = vld [vmem:[#allocation2 + $0x48] sm:$0xff] }
  0x64   :  { %v437_v14 = vld [vmem:[#allocation2 + $0xc20] sm:$0xff]  ;;  %2617 = vmatpush1.bf16.msra.mxu0 %v3559_v16  ;;  %2672 = vmatpush1.bf16.msra.mxu1 %v3639_v17  ;;  %v62_v11 = vld [vmem:[#allocation2 + $0x68] sm:$0xff] }
  0x65   :  { %v3632_v19 = vcombine.high %v433_v13, %v437_v14  ;;  %v345_v20 = vld [vmem:[#allocation2 + $0x940] sm:$0xff]  ;;  %2618 = vmatprep.subr.bf16.mxu0 %v3552_v18  ;;  %v3631_v26 = vcombine.low %v433_v13, %v437_v14  ;;  %2691 = vmatprep.mubr.bf16.mxu1 %v3721_v28  ;;  %v3265_v14 = vcombine.low %v66_v2, %v70_v3 }
  0x66   :  { %v349_v21 = vld [vmem:[#allocation2 + $0x960] sm:$0xff]  ;;  %2648 = vmatprep.mubr.bf16.mxu0 %v3774_v24  ;;  %v3258_v17 = vcombine.high %v58_v10, %v62_v11  ;;  %v3257_v23 = vcombine.low %v58_v10, %v62_v11 }
  0x67   :  { %v3544_v27 = vcombine.high %v345_v20, %v349_v21  ;;  %2673 = vmatprep.subr.bf16.mxu1 %v3632_v19  ;;  %v337_v30 = vld [vmem:[#allocation2 + $0x900] sm:$0xff]  ;;  %v3543_v34 = vcombine.low %v345_v20, %v349_v21  ;;  %v50_v20 = vld [vmem:[#allocation2 + $0x8] sm:$0xff] }
  0x68   :  { %v341_v31 = vld [vmem:[#allocation2 + $0x920] sm:$0xff]  ;;  %2619 = vmatpush1.bf16.msra.mxu0 %v3551_v25  ;;  %2674 = vmatpush1.bf16.msra.mxu1 %v3631_v26  ;;  %v54_v21 = vld [vmem:[#allocation2 + $0x28] sm:$0xff] }
  0x69   :  { %2620 = vmatprep.subr.bf16.mxu0 %v3544_v27  ;;  %v3536_v37 = vcombine.high %v337_v30, %v341_v31  ;;  %2702 = vmatprep.subr.bf16.mxu1 %v3306_v29  ;;  %v329_v39 = vld [vmem:[#allocation2 + $0x8c0] sm:$0xff]  ;;  %v3535_v43 = vcombine.low %v337_v30, %v341_v31  ;;  %v3250_v26 = vcombine.high %v50_v20, %v54_v21  ;;  %v170_v30 = vld [vmem:[#allocation2 + $0x3c8] sm:$0xff] }
  0x6a   :  { %v333_v40 = vld [vmem:[#allocation2 + $0x8e0] sm:$0xff]  ;;  %v174_v31 = vld [vmem:[#allocation2 + $0x3e8] sm:$0xff]  ;;  %v3249_v33 = vcombine.low %v50_v20, %v54_v21 }
  0x6b   :  { %3647 = vmatmul.mubr.msk.bf16.vlgmr.msra.gmra.mxu1 %vm2526_vm0, %v3782_v35  ;;  %v3528_v45 = vcombine.high %v329_v39, %v333_v40  ;;  %v321_v47 = vld [vmem:[#allocation2 + $0x880] sm:$0xff]  ;;  %v3527_v51 = vcombine.low %v329_v39, %v333_v40  ;;  %v162_v39 = vld [vmem:[#allocation2 + $0x388] sm:$0xff]  ;;  %v3369_v42 = vcombine.low %v170_v30, %v174_v31 }
  0x6c   :  { %2621 = vmatpush1.bf16.msra.mxu0 %v3543_v34  ;;  %2703 = vmatpush1.bf16.msra.mxu1 %v3305_v36  ;;  %v325_v48 = vld [vmem:[#allocation2 + $0x8a0] sm:$0xff]  ;;  %v3370_v36 = vcombine.high %v170_v30, %v174_v31  ;;  %v166_v40 = vld [vmem:[#allocation2 + $0x3a8] sm:$0xff] }
  0x6d   :  { %2622 = vmatprep.subr.bf16.mxu0 %v3536_v37  ;;  %2704 = vmatprep.subr.bf16.mxu1 %v3298_v38  ;;  %v3520_v53 = vcombine.high %v321_v47, %v325_v48  ;;  %v313_v55 = vld [vmem:[#allocation2 + $0x840] sm:$0xff]  ;;  %v3519_v61 = vcombine.low %v321_v47, %v325_v48  ;;  %v154_v47 = vld [vmem:[#allocation2 + $0x348] sm:$0xff]  ;;  %v3361_v50 = vcombine.low %v162_v39, %v166_v40 }
  0x6e   :  { %2734 = vmatprep.mubr.bf16.mxu1 %v3751_v56  ;;  %v317_v57 = vld [vmem:[#allocation2 + $0x860] sm:$0xff]  ;;  %v158_v48 = vld [vmem:[#allocation2 + $0x368] sm:$0xff] }
  0x6f   :  { %v3512_v56 = vcombine.high %v313_v55, %v317_v57  ;;  %v305_v0 = vld [vmem:[#allocation2 + $0x800] sm:$0xff]  ;;  %v3511_v4 = vcombine.low %v313_v55, %v317_v57  ;;  %v146_v55 = vld [vmem:[#allocation2 + $0x308] sm:$0xff]  ;;  %v3353_v60 = vcombine.low %v154_v47, %v158_v48 }
  0x70   :  { %2623 = vmatpush1.bf16.msra.mxu0 %v3535_v43  ;;  %2705 = vmatpush1.bf16.msra.mxu1 %v3297_v44  ;;  %v309_v1 = vld [vmem:[#allocation2 + $0x820] sm:$0xff]  ;;  %v3362_v44 = vcombine.high %v162_v39, %v166_v40  ;;  %v150_v57 = vld [vmem:[#allocation2 + $0x328] sm:$0xff] }
  0x71   :  { %2624 = vmatprep.subr.bf16.mxu0 %v3528_v45  ;;  %2706 = vmatprep.subr.bf16.mxu1 %v3290_v46  ;;  %v3504_v6 = vcombine.high %v305_v0, %v309_v1  ;;  %v425_v8 = vld [vmem:[#allocation2 + $0xbc0] sm:$0xff]  ;;  %v3503_v13 = vcombine.low %v305_v0, %v309_v1  ;;  %v138_v0 = vld [vmem:[#allocation2 + $0x2c8] sm:$0xff]  ;;  %v3345_v3 = vcombine.low %v146_v55, %v150_v57 }
  0x72   :  { %v429_v9 = vld [vmem:[#allocation2 + $0xbe0] sm:$0xff]  ;;  %v142_v1 = vld [vmem:[#allocation2 + $0x2e8] sm:$0xff] }
  0x73   :  { %v3624_v16 = vcombine.high %v425_v8, %v429_v9  ;;  %v417_v18 = vld [vmem:[#allocation2 + $0xb80] sm:$0xff]  ;;  %v3623_v22 = vcombine.low %v425_v8, %v429_v9  ;;  %v130_v8 = vld [vmem:[#allocation2 + $0x288] sm:$0xff]  ;;  %v3337_v11 = vcombine.low %v138_v0, %v142_v1 }
  0x74   :  { %2625 = vmatpush1.bf16.msra.mxu0 %v3527_v51  ;;  %2707 = vmatpush1.bf16.msra.mxu1 %v3289_v52  ;;  %v421_v19 = vld [vmem:[#allocation2 + $0xba0] sm:$0xff]  ;;  %v3354_v52 = vcombine.high %v154_v47, %v158_v48  ;;  %v134_v9 = vld [vmem:[#allocation2 + $0x2a8] sm:$0xff] }
  0x75   :  { %2626 = vmatprep.subr.bf16.mxu0 %v3520_v53  ;;  %2708 = vmatprep.subr.bf16.mxu1 %v3282_v54  ;;  %v3616_v25 = vcombine.high %v417_v18, %v421_v19  ;;  %v409_v27 = vld [vmem:[#allocation2 + $0xb40] sm:$0xff]  ;;  %v3615_v32 = vcombine.low %v417_v18, %v421_v19  ;;  %v122_v18 = vld [vmem:[#allocation2 + $0x248] sm:$0xff]  ;;  %v3329_v21 = vcombine.low %v130_v8, %v134_v9 }
  0x76   :  { %v413_v29 = vld [vmem:[#allocation2 + $0xb60] sm:$0xff]  ;;  %v126_v19 = vld [vmem:[#allocation2 + $0x268] sm:$0xff] }
  0x77   :  { %v3608_v34 = vcombine.high %v409_v27, %v413_v29  ;;  %v401_v37 = vld [vmem:[#allocation2 + $0xb00] sm:$0xff]  ;;  %v3607_v41 = vcombine.low %v409_v27, %v413_v29  ;;  %v3790_v27 = vld [vmem:[%s3931_s0 + $0x10] ss:$28 sps:$4 sm:$0xff]  }
  0x78   :  { %2627 = vmatpush1.bf16.msra.mxu0 %v3519_v61  ;;  %2709 = vmatpush1.bf16.msra.mxu1 %v3281_v62  ;;  %v405_v38 = vld [vmem:[#allocation2 + $0xb20] sm:$0xff]  ;;  %v3346_v62 = vcombine.high %v146_v55, %v150_v57  ;;  %v114_v29 = vld [vmem:[#allocation2 + $0x208] sm:$0xff] }
  0x79   :  { %2628 = vmatprep.subr.bf16.mxu0 %v3512_v56  ;;  %2710 = vmatprep.subr.bf16.mxu1 %v3274_v63  ;;  %v3600_v43 = vcombine.high %v401_v37, %v405_v38  ;;  %v393_v45 = vld [vmem:[#allocation2 + $0xac0] sm:$0xff]  ;;  %v3599_v49 = vcombine.low %v401_v37, %v405_v38  ;;  %v118_v30 = vld [vmem:[#allocation2 + $0x228] sm:$0xff] }
  0x7a   :  { %v397_v46 = vld [vmem:[#allocation2 + $0xae0] sm:$0xff]  ;;  %v222_v37 = vld [vmem:[#allocation2 + $0x568] sm:$0xff] }
  0x7b   :  { %v3592_v51 = vcombine.high %v393_v45, %v397_v46  ;;  %v385_v53 = vld [vmem:[#allocation2 + $0xa80] sm:$0xff]  ;;  %v3591_v58 = vcombine.low %v393_v45, %v397_v46  ;;  %v362_v38 = vld [vmem:[#allocation2 + $0x9c8] sm:$0xff] }
  0x7c   :  { %2629 = vmatpush1.bf16.msra.mxu0 %v3511_v4  ;;  %2711 = vmatpush1.bf16.msra.mxu1 %v3273_v5  ;;  %v389_v54 = vld [vmem:[#allocation2 + $0xaa0] sm:$0xff]  ;;  %v3338_v5 = vcombine.high %v138_v0, %v142_v1  ;;  %v366_v39 = vld [vmem:[#allocation2 + $0x9e8] sm:$0xff] }
  0x7d   :  { %2630 = vmatprep.subr.bf16.mxu0 %v3504_v6  ;;  %2712 = vmatprep.subr.bf16.mxu1 %v3266_v7  ;;  %v3584_v61 = vcombine.high %v385_v53, %v389_v54  ;;  %v377_v56 = vld [vmem:[#allocation2 + $0xa40] sm:$0xff]  ;;  %v3583_v2 = vcombine.low %v385_v53, %v389_v54  ;;  %v214_v45 = vld [vmem:[#allocation2 + $0x528] sm:$0xff] }
  0x7e   :  { %v381_v63 = vld [vmem:[#allocation2 + $0xa60] sm:$0xff]  ;;  %v354_v46 = vld [vmem:[#allocation2 + $0x988] sm:$0xff] }
  0x7f   :  { %v3576_v4 = vcombine.high %v377_v56, %v381_v63  ;;  %v369_v6 = vld [vmem:[#allocation2 + $0xa00] sm:$0xff]  ;;  %v3575_v10 = vcombine.low %v377_v56, %v381_v63  ;;  %v358_v47 = vld [vmem:[#allocation2 + $0x9a8] sm:$0xff] }
  0x80   :  { %2631 = vmatpush1.bf16.msra.mxu0 %v3503_v13  ;;  %2713 = vmatpush1.bf16.msra.mxu1 %v3265_v14  ;;  %v373_v7 = vld [vmem:[#allocation2 + $0xa20] sm:$0xff]  ;;  %v3330_v14 = vcombine.high %v130_v8, %v134_v9  ;;  %v346_v53 = vld [vmem:[#allocation2 + $0x948] sm:$0xff]  ;;  %v3553_v57 = vcombine.low %v354_v46, %v358_v47 }
  0x81   :  { %2632 = vmatprep.subr.bf16.mxu0 %v3624_v16  ;;  %2714 = vmatprep.subr.bf16.mxu1 %v3258_v17  ;;  %v3568_v13 = vcombine.high %v369_v6, %v373_v7  ;;  %v234_v16 = vld [vmem:[#allocation2 + $0x5c8] sm:$0xff]  ;;  %v3567_v20 = vcombine.low %v369_v6, %v373_v7 }
  0x82   :  { %v238_v17 = vld [vmem:[#allocation2 + $0x5e8] sm:$0xff] }
  0x83   :  { %v3433_v31 = vcombine.low %v234_v16, %v238_v17  ;;  %v350_v54 = vld [vmem:[#allocation2 + $0x968] sm:$0xff] }
  0x84   :  { %2633 = vmatpush2.bf16.msra.mxu0 %v3623_v22  ;;  %2715 = vmatpush1.bf16.msra.mxu1 %v3257_v23  ;;  %v3434_v22 = vcombine.high %v234_v16, %v238_v17  ;;  %v3322_v23 = vcombine.high %v122_v18, %v126_v19  ;;  %v338_v56 = vld [vmem:[#allocation2 + $0x908] sm:$0xff]  ;;  %v3545_v1 = vcombine.low %v346_v53, %v350_v54 }
  0x85   :  { %2634 = vmatprep.subr.bf16.mxu0 %v3616_v25  ;;  %2716 = vmatprep.subr.bf16.mxu1 %v3250_v26  ;;  %v226_v25 = vld [vmem:[#allocation2 + $0x588] sm:$0xff] }
  0x86   :  { %v230_v26 = vld [vmem:[#allocation2 + $0x5a8] sm:$0xff] }
  0x87   :  { %v3425_v40 = vcombine.low %v226_v25, %v230_v26  ;;  %v342_v63 = vld [vmem:[#allocation2 + $0x928] sm:$0xff] }
  0x88   :  { %2635 = vmatpush2.bf16.msra.mxu0 %v3615_v32  ;;  %2717 = vmatpush1.bf16.msra.mxu1 %v3249_v33  ;;  %v3321_v32 = vcombine.low %v122_v18, %v126_v19  ;;  %v3426_v33 = vcombine.high %v226_v25, %v230_v26  ;;  %v334_v6 = vld [vmem:[#allocation2 + $0x8e8] sm:$0xff]  ;;  %v3537_v8 = vcombine.low %v338_v56, %v342_v63 }
  0x89   :  { %2636 = vmatprep.subr.bf16.mxu0 %v3608_v34  ;;  %2718 = vmatprep.subr.bf16.mxu1 %v3370_v36  ;;  %v3314_v34 = vcombine.high %v114_v29, %v118_v30  ;;  %v218_v36 = vld [vmem:[#allocation2 + $0x548] sm:$0xff] }
  0x8a   :  { %v3417_v48 = vcombine.low %v218_v36, %v222_v37 }
  0x8c   :  { %2637 = vmatpush2.bf16.msra.mxu0 %v3607_v41  ;;  %2719 = vmatpush2.bf16.msra.mxu1 %v3369_v42  ;;  %v3313_v41 = vcombine.low %v114_v29, %v118_v30  ;;  %v3418_v42 = vcombine.high %v218_v36, %v222_v37 }
  0x8d   :  { %2638 = vmatprep.subr.bf16.mxu0 %v3600_v43  ;;  %2720 = vmatprep.subr.bf16.mxu1 %v3362_v44  ;;  %v3562_v43 = vcombine.high %v362_v38, %v366_v39  ;;  %v210_v44 = vld [vmem:[#allocation2 + $0x508] sm:$0xff] }
  0x8e   :  { %v3409_v55 = vcombine.low %v210_v44, %v214_v45 }
  0x90   :  { %2639 = vmatpush2.bf16.msra.mxu0 %v3599_v49  ;;  %2721 = vmatpush2.bf16.msra.mxu1 %v3361_v50  ;;  %v3561_v49 = vcombine.low %v362_v38, %v366_v39  ;;  %v3410_v50 = vcombine.high %v210_v44, %v214_v45 }
  0x91   :  { %2640 = vmatprep.subr.bf16.mxu0 %v3592_v51  ;;  %2722 = vmatprep.subr.bf16.mxu1 %v3354_v52  ;;  %v3554_v51 = vcombine.high %v354_v46, %v358_v47  ;;  %v202_v52 = vld [vmem:[#allocation2 + $0x4c8] sm:$0xff] }
  0x94   :  { %2641 = vmatpush2.bf16.msra.mxu0 %v3591_v58  ;;  %2723 = vmatpush2.bf16.msra.mxu1 %v3353_v60  ;;  %v3546_v60 = vcombine.high %v346_v53, %v350_v54 }
  0x95   :  { %2642 = vmatprep.subr.bf16.mxu0 %v3584_v61  ;;  %2724 = vmatprep.subr.bf16.mxu1 %v3346_v62  ;;  %v194_v61 = vld [vmem:[#allocation2 + $0x488] sm:$0xff] }
  0x96   :  { %v198_v62 = vld [vmem:[#allocation2 + $0x4a8] sm:$0xff] }
  0x97   :  { %v3393_v7 = vcombine.low %v194_v61, %v198_v62 }
  0x98   :  { %2643 = vmatpush2.bf16.msra.mxu0 %v3583_v2  ;;  %2725 = vmatpush2.bf16.msra.mxu1 %v3345_v3  ;;  %v3538_v2 = vcombine.high %v338_v56, %v342_v63  ;;  %v186_v3 = vld [vmem:[#allocation2 + $0x448] sm:$0xff] }
  0x99   :  { %2644 = vmatprep.subr.bf16.mxu0 %v3576_v4  ;;  %2726 = vmatprep.subr.bf16.mxu1 %v3338_v5  ;;  %v190_v4 = vld [vmem:[#allocation2 + $0x468] sm:$0xff] }
  0x9a   :  { %v330_v5 = vld [vmem:[#allocation2 + $0x8c8] sm:$0xff]  ;;  %v3385_v16 = vcombine.low %v186_v3, %v190_v4 }
  0x9b   :  { %v3530_v9 = vcombine.high %v330_v5, %v334_v6  ;;  %v3529_v17 = vcombine.low %v330_v5, %v334_v6 }
  0x9c   :  { %2645 = vmatpush2.bf16.msra.mxu0 %v3575_v10  ;;  %2727 = vmatpush2.bf16.msra.mxu1 %v3337_v11  ;;  %v178_v10 = vld [vmem:[#allocation2 + $0x408] sm:$0xff] }
  0x9d   :  { %2646 = vmatprep.subr.bf16.mxu0 %v3568_v13  ;;  %2728 = vmatprep.subr.bf16.mxu1 %v3330_v14  ;;  %v182_v11 = vld [vmem:[#allocation2 + $0x428] sm:$0xff] }
  0x9e   :  { %v322_v13 = vld [vmem:[#allocation2 + $0x888] sm:$0xff]  ;;  %v3378_v18 = vcombine.high %v178_v10, %v182_v11  ;;  %v3377_v25 = vcombine.low %v178_v10, %v182_v11 }
  0x9f   :  { %v326_v14 = vld [vmem:[#allocation2 + $0x8a8] sm:$0xff] }
  0xa0   :  { %2647 = vmatpush2.bf16.msra.mxu0 %v3567_v20  ;;  %2729 = vmatpush2.bf16.msra.mxu1 %v3329_v21  ;;  %v3522_v19 = vcombine.high %v322_v13, %v326_v14  ;;  %v298_v20 = vld [vmem:[#allocation2 + $0x7c8] sm:$0xff]  ;;  %v3521_v26 = vcombine.low %v322_v13, %v326_v14 }
  0xa1   :  { %2745 = vmatprep.subr.bf16.mxu0 %v3434_v22  ;;  %2730 = vmatprep.subr.bf16.mxu1 %v3322_v23  ;;  %v302_v21 = vld [vmem:[#allocation2 + $0x7e8] sm:$0xff] }
  0xa2   :  { %v314_v22 = vld [vmem:[#allocation2 + $0x848] sm:$0xff]  ;;  %v3498_v29 = vcombine.high %v298_v20, %v302_v21  ;;  %v3497_v36 = vcombine.low %v298_v20, %v302_v21 }
  0xa3   :  { %2649 = vmatmul.mubr.bf16.vlgmr.msra.gmra.mxu0 %v3790_v27  ;;  %v318_v23 = vld [vmem:[#allocation2 + $0x868] sm:$0xff] }
  0xa4   :  { %2746 = vmatpush1.bf16.msra.mxu0 %v3433_v31  ;;  %2777 = vmatprep.mubr.bf16.mxu0 %v3756_v59  ;;  %v206_v59 = vld [vmem:[#allocation2 + $0x4e8] sm:$0xff]  ;;  %v3514_v30 = vcombine.high %v314_v22, %v318_v23  ;;  %v3513_v37 = vcombine.low %v314_v22, %v318_v23 }
  0xa5   :  { %2731 = vmatpush2.bf16.msra.mxu1 %v3321_v32  ;;  %2747 = vmatprep.subr.bf16.mxu0 %v3426_v33  ;;  %v3402_v58 = vcombine.high %v202_v52, %v206_v59  ;;  %v3401_v0 = vcombine.low %v202_v52, %v206_v59  ;;  %v290_v31 = vld [vmem:[#allocation2 + $0x788] sm:$0xff] }
  0xa6   :  { %2732 = vmatprep.subr.bf16.mxu1 %v3314_v34  ;;  %v294_v32 = vld [vmem:[#allocation2 + $0x7a8] sm:$0xff] }
  0xa7   :  { %v306_v33 = vld [vmem:[#allocation2 + $0x808] sm:$0xff]  ;;  %v3490_v38 = vcombine.high %v290_v31, %v294_v32  ;;  %v3489_v44 = vcombine.low %v290_v31, %v294_v32 }
  0xa8   :  { %2748 = vmatpush1.bf16.msra.mxu0 %v3425_v40  ;;  %v310_v34 = vld [vmem:[#allocation2 + $0x828] sm:$0xff] }
  0xa9   :  { %2733 = vmatpush2.bf16.msra.mxu1 %v3313_v41  ;;  %2749 = vmatprep.subr.bf16.mxu0 %v3418_v42  ;;  %v3506_v39 = vcombine.high %v306_v33, %v310_v34  ;;  %v282_v40 = vld [vmem:[#allocation2 + $0x748] sm:$0xff]  ;;  %v3505_v45 = vcombine.low %v306_v33, %v310_v34 }
  0xaa   :  { %2788 = vmatprep.subr.bf16.mxu1 %v3562_v43  ;;  %v286_v41 = vld [vmem:[#allocation2 + $0x768] sm:$0xff] }
  0xab   :  { %v426_v42 = vld [vmem:[#allocation2 + $0xbc8] sm:$0xff]  ;;  %v3482_v46 = vcombine.high %v282_v40, %v286_v41  ;;  %v3481_v52 = vcombine.low %v282_v40, %v286_v41 }
  0xac   :  { %2735 = vmatmul.mubr.bf16.vlgmr.msra.gmra.mxu1 %v3763_v12  ;;  %2750 = vmatpush1.bf16.msra.mxu0 %v3417_v48  ;;  %v3394_v12 = vcombine.high %v194_v61, %v198_v62  ;;  %v430_v43 = vld [vmem:[#allocation2 + $0xbe8] sm:$0xff] }
  0xad   :  { %2789 = vmatpush1.bf16.msra.mxu1 %v3561_v49  ;;  %2751 = vmatprep.subr.bf16.mxu0 %v3410_v50  ;;  %v3626_v47 = vcombine.high %v426_v42, %v430_v43  ;;  %v274_v48 = vld [vmem:[#allocation2 + $0x708] sm:$0xff]  ;;  %v3625_v59 = vcombine.low %v426_v42, %v430_v43 }
  0xae   :  { %2790 = vmatprep.subr.bf16.mxu1 %v3554_v51  ;;  %2820 = vmatprep.mubr.bf16.mxu1 %v3774_v24  ;;  %v3386_v24 = vcombine.high %v186_v3, %v190_v4  ;;  %v278_v49 = vld [vmem:[#allocation2 + $0x728] sm:$0xff] }
  0xaf   :  { %v418_v50 = vld [vmem:[#allocation2 + $0xb88] sm:$0xff]  ;;  %v3474_v53 = vcombine.high %v274_v48, %v278_v49  ;;  %v3473_v61 = vcombine.low %v274_v48, %v278_v49 }
  0xb0   :  { %2752 = vmatpush1.bf16.msra.mxu0 %v3409_v55  ;;  %v422_v51 = vld [vmem:[#allocation2 + $0xba8] sm:$0xff] }
  0xb1   :  { %2791 = vmatpush1.bf16.msra.mxu1 %v3553_v57  ;;  %2753 = vmatprep.subr.bf16.mxu0 %v3402_v58  ;;  %v3618_v54 = vcombine.high %v418_v50, %v422_v51  ;;  %v266_v55 = vld [vmem:[#allocation2 + $0x6c8] sm:$0xff]  ;;  %v3617_v62 = vcombine.low %v418_v50, %v422_v51 }
  0xb2   :  { %2792 = vmatprep.subr.bf16.mxu1 %v3546_v60  ;;  %v270_v57 = vld [vmem:[#allocation2 + $0x6e8] sm:$0xff] }
  0xb3   :  { %v410_v58 = vld [vmem:[#allocation2 + $0xb48] sm:$0xff]  ;;  %v3466_v56 = vcombine.high %v266_v55, %v270_v57  ;;  %v3465_v3 = vcombine.low %v266_v55, %v270_v57 }
  0xb4   :  { %2754 = vmatpush1.bf16.msra.mxu0 %v3401_v0  ;;  %v414_v60 = vld [vmem:[#allocation2 + $0xb68] sm:$0xff] }
  0xb5   :  { %2793 = vmatpush1.bf16.msra.mxu1 %v3545_v1  ;;  %2755 = vmatprep.subr.bf16.mxu0 %v3394_v12  ;;  %v3610_v63 = vcombine.high %v410_v58, %v414_v60  ;;  %v258_v0 = vld [vmem:[#allocation2 + $0x688] sm:$0xff]  ;;  %v3609_v4 = vcombine.low %v410_v58, %v414_v60  ;;  %v91_v60 = vld [vmem:[#allocation2 + $0x150] sm:$0xff] }
  0xb6   :  { %2794 = vmatprep.subr.bf16.mxu1 %v3538_v2  ;;  %v262_v1 = vld [vmem:[#allocation2 + $0x6a8] sm:$0xff] }
  0xb7   :  { %v402_v12 = vld [vmem:[#allocation2 + $0xb08] sm:$0xff]  ;;  %v3458_v5 = vcombine.high %v258_v0, %v262_v1  ;;  %v3457_v10 = vcombine.low %v258_v0, %v262_v1 }
  0xb8   :  { %2756 = vmatpush1.bf16.msra.mxu0 %v3393_v7  ;;  %v406_v2 = vld [vmem:[#allocation2 + $0xb28] sm:$0xff] }
  0xb9   :  { %2795 = vmatpush1.bf16.msra.mxu1 %v3537_v8  ;;  %2757 = vmatprep.subr.bf16.mxu0 %v3386_v24  ;;  %v3602_v6 = vcombine.high %v402_v12, %v406_v2  ;;  %v250_v7 = vld [vmem:[#allocation2 + $0x648] sm:$0xff]  ;;  %v3601_v11 = vcombine.low %v402_v12, %v406_v2  ;;  %v83_v2 = vld [vmem:[#allocation2 + $0x110] sm:$0xff] }
  0xba   :  { %2796 = vmatprep.subr.bf16.mxu1 %v3530_v9  ;;  %v254_v8 = vld [vmem:[#allocation2 + $0x668] sm:$0xff] }
  0xbb   :  { %v394_v24 = vld [vmem:[#allocation2 + $0xac8] sm:$0xff]  ;;  %v3450_v13 = vcombine.high %v250_v7, %v254_v8  ;;  %v3449_v20 = vcombine.low %v250_v7, %v254_v8 }
  0xbc   :  { %2758 = vmatpush1.bf16.msra.mxu0 %v3385_v16  ;;  %v398_v9 = vld [vmem:[#allocation2 + $0xae8] sm:$0xff] }
  0xbd   :  { %2797 = vmatpush1.bf16.msra.mxu1 %v3529_v17  ;;  %2759 = vmatprep.subr.bf16.mxu0 %v3378_v18  ;;  %v3594_v14 = vcombine.high %v394_v24, %v398_v9  ;;  %v242_v16 = vld [vmem:[#allocation2 + $0x608] sm:$0xff]  ;;  %v3593_v21 = vcombine.low %v394_v24, %v398_v9  ;;  %v75_v9 = vld [vmem:[#allocation2 + $0xd0] sm:$0xff] }
  0xbe   :  { %2798 = vmatprep.subr.bf16.mxu1 %v3522_v19  ;;  %v246_v17 = vld [vmem:[#allocation2 + $0x628] sm:$0xff] }
  0xbf   :  { %v386_v18 = vld [vmem:[#allocation2 + $0xa88] sm:$0xff]  ;;  %v3442_v22 = vcombine.high %v242_v16, %v246_v17  ;;  %v3441_v31 = vcombine.low %v242_v16, %v246_v17 }
  0xc0   :  { %2760 = vmatpush1.bf16.msra.mxu0 %v3377_v25  ;;  %v390_v19 = vld [vmem:[#allocation2 + $0xaa8] sm:$0xff] }
  0xc1   :  { %2799 = vmatpush1.bf16.msra.mxu1 %v3521_v26  ;;  %2761 = vmatprep.subr.bf16.mxu0 %v3498_v29  ;;  %v3586_v23 = vcombine.high %v386_v18, %v390_v19  ;;  %v442_v25 = vld [vmem:[#allocation2 + $0xc48] sm:$0xff]  ;;  %v3585_v32 = vcombine.low %v386_v18, %v390_v19  ;;  %v67_v19 = vld [vmem:[#allocation2 + $0x90] sm:$0xff] }
  0xc2   :  { %2800 = vmatprep.subr.bf16.mxu1 %v3514_v30  ;;  %v446_v26 = vld [vmem:[#allocation2 + $0xc68] sm:$0xff] }
  0xc3   :  { %v378_v29 = vld [vmem:[#allocation2 + $0xa48] sm:$0xff]  ;;  %v3642_v33 = vcombine.high %v442_v25, %v446_v26  ;;  %v3641_v40 = vcombine.low %v442_v25, %v446_v26 }
  0xc4   :  { %2762 = vmatpush2.bf16.msra.mxu0 %v3497_v36  ;;  %v382_v30 = vld [vmem:[#allocation2 + $0xa68] sm:$0xff] }
  0xc5   :  { %2801 = vmatpush1.bf16.msra.mxu1 %v3513_v37  ;;  %2763 = vmatprep.subr.bf16.mxu0 %v3490_v38  ;;  %v3578_v34 = vcombine.high %v378_v29, %v382_v30  ;;  %v434_v36 = vld [vmem:[#allocation2 + $0xc08] sm:$0xff]  ;;  %v3577_v41 = vcombine.low %v378_v29, %v382_v30  ;;  %v59_v30 = vld [vmem:[#allocation2 + $0x50] sm:$0xff] }
  0xc6   :  { %2802 = vmatprep.subr.bf16.mxu1 %v3506_v39  ;;  %v438_v37 = vld [vmem:[#allocation2 + $0xc28] sm:$0xff] }
  0xc7   :  { %v370_v38 = vld [vmem:[#allocation2 + $0xa08] sm:$0xff]  ;;  %v3634_v42 = vcombine.high %v434_v36, %v438_v37  ;;  %v3633_v48 = vcombine.low %v434_v36, %v438_v37 }
  0xc8   :  { %2764 = vmatpush2.bf16.msra.mxu0 %v3489_v44  ;;  %v374_v39 = vld [vmem:[#allocation2 + $0xa28] sm:$0xff]  ;;  %v107_v44 = vld [vmem:[#allocation2 + $0x1d0] sm:$0xff] }
  0xc9   :  { %2803 = vmatpush1.bf16.msra.mxu1 %v3505_v45  ;;  %2765 = vmatprep.subr.bf16.mxu0 %v3482_v46  ;;  %v3570_v43 = vcombine.high %v370_v38, %v374_v39  ;;  %v111_v45 = vld [vmem:[#allocation2 + $0x1f0] sm:$0xff]  ;;  %v3569_v49 = vcombine.low %v370_v38, %v374_v39 }
  0xca   :  { %2804 = vmatprep.subr.bf16.mxu1 %v3626_v47  ;;  %v235_v46 = vld [vmem:[#allocation2 + $0x5d0] sm:$0xff]  ;;  %v3308_v50 = vcombine.high %v107_v44, %v111_v45  ;;  %v3307_v55 = vcombine.low %v107_v44, %v111_v45 }
  0xcb   :  { %v239_v47 = vld [vmem:[#allocation2 + $0x5f0] sm:$0xff] }
  0xcc   :  { %2766 = vmatpush2.bf16.msra.mxu0 %v3481_v52  ;;  %v3436_v51 = vcombine.high %v235_v46, %v239_v47  ;;  %v99_v52 = vld [vmem:[#allocation2 + $0x190] sm:$0xff] }
  0xcd   :  { %2805 = vmatpush2.bf16.msra.mxu1 %v3625_v59  ;;  %2767 = vmatprep.subr.bf16.mxu0 %v3474_v53  ;;  %v103_v59 = vld [vmem:[#allocation2 + $0x1b0] sm:$0xff] }
  0xce   :  { %2806 = vmatprep.subr.bf16.mxu1 %v3618_v54  ;;  %v227_v53 = vld [vmem:[#allocation2 + $0x590] sm:$0xff]  ;;  %v3300_v57 = vcombine.high %v99_v52, %v103_v59 }
  0xcf   :  { %v231_v54 = vld [vmem:[#allocation2 + $0x5b0] sm:$0xff] }
  0xd0   :  { %2768 = vmatpush2.bf16.msra.mxu0 %v3473_v61  ;;  %v3428_v58 = vcombine.high %v227_v53, %v231_v54  ;;  %v95_v61 = vld [vmem:[#allocation2 + $0x170] sm:$0xff]  ;;  %v3427_v0 = vcombine.low %v227_v53, %v231_v54 }
  0xd1   :  { %2807 = vmatpush2.bf16.msra.mxu1 %v3617_v62  ;;  %2769 = vmatprep.subr.bf16.mxu0 %v3466_v56  ;;  %v219_v62 = vld [vmem:[#allocation2 + $0x550] sm:$0xff]  ;;  %v3292_v1 = vcombine.high %v91_v60, %v95_v61 }
  0xd2   :  { %2808 = vmatprep.subr.bf16.mxu1 %v3610_v63  ;;  %v223_v56 = vld [vmem:[#allocation2 + $0x570] sm:$0xff]  ;;  %v3299_v63 = vcombine.low %v99_v52, %v103_v59 }
  0xd3   :  { %v3420_v12 = vcombine.high %v219_v62, %v223_v56  ;;  %v3419_v7 = vcombine.low %v219_v62, %v223_v56  ;;  %v51_v39 = vld [vmem:[#allocation2 + $0x10] sm:$0xff] }
  0xd4   :  { %2770 = vmatpush2.bf16.msra.mxu0 %v3465_v3  ;;  %v87_v3 = vld [vmem:[#allocation2 + $0x130] sm:$0xff] }
  0xd5   :  { %2809 = vmatpush2.bf16.msra.mxu1 %v3609_v4  ;;  %2771 = vmatprep.subr.bf16.mxu0 %v3458_v5  ;;  %v3804_v4 = vld [vmem:[%s3931_s0 + $0x4] ss:$28 sps:$4 sm:$0xff]   ;;  %v215_v5 = vld [vmem:[#allocation2 + $0x530] sm:$0xff]  ;;  %v3284_v8 = vcombine.high %v83_v2, %v87_v3 }
  0xd6   :  { %2810 = vmatprep.subr.bf16.mxu1 %v3602_v6  ;;  %v3291_v6 = vcombine.low %v91_v60, %v95_v61  ;;  %v163_v54 = vld [vmem:[#allocation2 + $0x390] sm:$0xff] }
  0xd7   :  { %v155_v56 = vld [vmem:[#allocation2 + $0x350] sm:$0xff] }
  0xd8   :  { %2772 = vmatpush2.bf16.msra.mxu0 %v3457_v10  ;;  %v79_v10 = vld [vmem:[#allocation2 + $0xf0] sm:$0xff] }
  0xd9   :  { %2811 = vmatpush2.bf16.msra.mxu1 %v3601_v11  ;;  %2773 = vmatprep.subr.bf16.mxu0 %v3450_v13  ;;  %v203_v11 = vld [vmem:[#allocation2 + $0x4d0] sm:$0xff]  ;;  %v3276_v17 = vcombine.high %v75_v9, %v79_v10 }
  0xda   :  { %2812 = vmatprep.subr.bf16.mxu1 %v3594_v14  ;;  %v207_v13 = vld [vmem:[#allocation2 + $0x4f0] sm:$0xff]  ;;  %v3283_v14 = vcombine.low %v83_v2, %v87_v3 }
  0xdb   :  { %v3404_v18 = vcombine.high %v203_v11, %v207_v13  ;;  %v3403_v25 = vcombine.low %v203_v11, %v207_v13  ;;  %v139_v13 = vld [vmem:[#allocation2 + $0x2d0] sm:$0xff] }
  0xdc   :  { %2774 = vmatpush2.bf16.msra.mxu0 %v3449_v20  ;;  %v71_v20 = vld [vmem:[#allocation2 + $0xb0] sm:$0xff] }
  0xdd   :  { %2813 = vmatpush2.bf16.msra.mxu1 %v3593_v21  ;;  %2775 = vmatprep.subr.bf16.mxu0 %v3442_v22  ;;  %v195_v21 = vld [vmem:[#allocation2 + $0x490] sm:$0xff]  ;;  %v3268_v26 = vcombine.high %v67_v19, %v71_v20 }
  0xde   :  { %2814 = vmatprep.subr.bf16.mxu1 %v3586_v23  ;;  %v199_v22 = vld [vmem:[#allocation2 + $0x4b0] sm:$0xff]  ;;  %v3275_v23 = vcombine.low %v75_v9, %v79_v10 }
  0xdf   :  { %v3396_v29 = vcombine.high %v195_v21, %v199_v22  ;;  %v3395_v36 = vcombine.low %v195_v21, %v199_v22  ;;  %v131_v22 = vld [vmem:[#allocation2 + $0x290] sm:$0xff] }
  0xe0   :  { %2776 = vmatpush2.bf16.msra.mxu0 %v3441_v31  ;;  %v63_v31 = vld [vmem:[#allocation2 + $0x70] sm:$0xff] }
  0xe1   :  { %2815 = vmatpush2.bf16.msra.mxu1 %v3585_v32  ;;  %2843 = vmatprep.subr.bf16.mxu0 %v3642_v33  ;;  %v187_v32 = vld [vmem:[#allocation2 + $0x450] sm:$0xff]  ;;  %v3260_v37 = vcombine.high %v59_v30, %v63_v31 }
  0xe2   :  { %2816 = vmatprep.subr.bf16.mxu1 %v3578_v34  ;;  %v191_v33 = vld [vmem:[#allocation2 + $0x470] sm:$0xff]  ;;  %v3267_v34 = vcombine.low %v67_v19, %v71_v20 }
  0xe3   :  { %2778 = vmatmul.mubr.bf16.vlgmr.msra.gmra.mxu0 %v3768_v15  ;;  %v3435_v15 = vcombine.low %v235_v46, %v239_v47  ;;  %v3388_v38 = vcombine.high %v187_v32, %v191_v33  ;;  %v3387_v44 = vcombine.low %v187_v32, %v191_v33  ;;  %v171_v47 = vld [vmem:[#allocation2 + $0x3d0] sm:$0xff] }
  0xe4   :  { %2844 = vmatpush1.bf16.msra.mxu0 %v3641_v40  ;;  %2863 = vmatprep.mubr.bf16.mxu0 %v3721_v28  ;;  %v55_v40 = vld [vmem:[#allocation2 + $0x30] sm:$0xff] }
  0xe5   :  { %2817 = vmatpush2.bf16.msra.mxu1 %v3577_v41  ;;  %2845 = vmatprep.subr.bf16.mxu0 %v3634_v42  ;;  %v179_v41 = vld [vmem:[#allocation2 + $0x410] sm:$0xff]  ;;  %v3252_v45 = vcombine.high %v51_v39, %v55_v40 }
  0xe6   :  { %2818 = vmatprep.subr.bf16.mxu1 %v3570_v43  ;;  %v183_v42 = vld [vmem:[#allocation2 + $0x430] sm:$0xff]  ;;  %v3259_v43 = vcombine.low %v59_v30, %v63_v31 }
  0xe7   :  { %v3380_v46 = vcombine.high %v179_v41, %v183_v42  ;;  %v3379_v52 = vcombine.low %v179_v41, %v183_v42  ;;  %v123_v33 = vld [vmem:[#allocation2 + $0x250] sm:$0xff] }
  0xe8   :  { %2846 = vmatpush1.bf16.msra.mxu0 %v3633_v48  ;;  %v175_v48 = vld [vmem:[#allocation2 + $0x3f0] sm:$0xff] }
  0xe9   :  { %2819 = vmatpush2.bf16.msra.mxu1 %v3569_v49  ;;  %2874 = vmatprep.subr.bf16.mxu0 %v3308_v50  ;;  %v299_v49 = vld [vmem:[#allocation2 + $0x7d0] sm:$0xff]  ;;  %v3372_v59 = vcombine.high %v171_v47, %v175_v48 }
  0xea   :  { %2917 = vmatprep.subr.bf16.mxu1 %v3436_v51  ;;  %v303_v50 = vld [vmem:[#allocation2 + $0x7f0] sm:$0xff]  ;;  %v3251_v51 = vcombine.low %v51_v39, %v55_v40 }
  0xeb   :  { %3648 = vmatmul.mubr.msk.bf16.vlgmr.msra.gmra.mxu0 %vm2526_vm0, %v3782_v35  ;;  %v211_v35 = vld [vmem:[#allocation2 + $0x510] sm:$0xff]  ;;  %v3500_v53 = vcombine.high %v299_v49, %v303_v50  ;;  %v3499_v60 = vcombine.low %v299_v49, %v303_v50 }
  0xec   :  { %2821 = vmatmul.mubr.bf16.vlgmr.msra.gmra.mxu1 %v3790_v27  ;;  %2875 = vmatpush1.bf16.msra.mxu0 %v3307_v55  ;;  %v3810_v27 = vld [vmem:[%s3931_s0 + $0xc] ss:$28 sps:$4 sm:$0xff]   ;;  %v3412_v24 = vcombine.high %v211_v35, %v215_v5  ;;  %v3411_v16 = vcombine.low %v211_v35, %v215_v5  ;;  %v167_v55 = vld [vmem:[#allocation2 + $0x3b0] sm:$0xff] }
  0xed   :  { %2918 = vmatpush1.bf16.msra.mxu1 %v3435_v15  ;;  %2876 = vmatprep.subr.bf16.mxu0 %v3300_v57  ;;  %v291_v15 = vld [vmem:[#allocation2 + $0x790] sm:$0xff]  ;;  %v3364_v61 = vcombine.high %v163_v54, %v167_v55 }
  0xee   :  { %2919 = vmatprep.subr.bf16.mxu1 %v3428_v58  ;;  %2906 = vmatprep.mubr.bf16.mxu0 %v3804_v4  ;;  %v295_v57 = vld [vmem:[#allocation2 + $0x7b0] sm:$0xff]  ;;  %v3371_v58 = vcombine.low %v171_v47, %v175_v48 }
  0xef   :  { %2949 = vmatprep.mubr.bf16.mxu1 %v3810_v27  ;;  %v3492_v62 = vcombine.high %v291_v15, %v295_v57  ;;  %v3491_v2 = vcombine.low %v291_v15, %v295_v57  ;;  %v147_v5 = vld [vmem:[#allocation2 + $0x310] sm:$0xff] }
  0xf0   :  { %2877 = vmatpush1.bf16.msra.mxu0 %v3299_v63  ;;  %v159_v63 = vld [vmem:[#allocation2 + $0x370] sm:$0xff] }
  0xf1   :  { %2920 = vmatpush1.bf16.msra.mxu1 %v3427_v0  ;;  %2878 = vmatprep.subr.bf16.mxu0 %v3292_v1  ;;  %v283_v0 = vld [vmem:[#allocation2 + $0x750] sm:$0xff]  ;;  %v3356_v3 = vcombine.high %v155_v56, %v159_v63 }
  0xf2   :  { %2921 = vmatprep.subr.bf16.mxu1 %v3420_v12  ;;  %v287_v1 = vld [vmem:[#allocation2 + $0x770] sm:$0xff]  ;;  %v3363_v12 = vcombine.low %v163_v54, %v167_v55 }
  0xf3   :  { %v3484_v35 = vcombine.high %v283_v0, %v287_v1  ;;  %v3483_v9 = vcombine.low %v283_v0, %v287_v1  ;;  %v115_v42 = vld [vmem:[#allocation2 + $0x210] sm:$0xff] }
  0xf4   :  { %2879 = vmatpush1.bf16.msra.mxu0 %v3291_v6  ;;  %v151_v6 = vld [vmem:[#allocation2 + $0x330] sm:$0xff] }
  0xf5   :  { %2922 = vmatpush1.bf16.msra.mxu1 %v3419_v7  ;;  %2880 = vmatprep.subr.bf16.mxu0 %v3284_v8  ;;  %v275_v7 = vld [vmem:[#allocation2 + $0x710] sm:$0xff]  ;;  %v3348_v10 = vcombine.high %v147_v5, %v151_v6 }
  0xf6   :  { %2923 = vmatprep.subr.bf16.mxu1 %v3412_v24  ;;  %v279_v8 = vld [vmem:[#allocation2 + $0x730] sm:$0xff]  ;;  %v3355_v24 = vcombine.low %v155_v56, %v159_v63 }
  0xf7   :  { %v3476_v11 = vcombine.high %v275_v7, %v279_v8  ;;  %v3475_v19 = vcombine.low %v275_v7, %v279_v8  ;;  %v363_v50 = vld [vmem:[#allocation2 + $0x9d0] sm:$0xff] }
  0xf8   :  { %2881 = vmatpush1.bf16.msra.mxu0 %v3283_v14  ;;  %v143_v14 = vld [vmem:[#allocation2 + $0x2f0] sm:$0xff] }
  0xf9   :  { %2924 = vmatpush1.bf16.msra.mxu1 %v3411_v16  ;;  %2882 = vmatprep.subr.bf16.mxu0 %v3276_v17  ;;  %v267_v16 = vld [vmem:[#allocation2 + $0x6d0] sm:$0xff]  ;;  %v3340_v20 = vcombine.high %v139_v13, %v143_v14 }
  0xfa   :  { %2925 = vmatprep.subr.bf16.mxu1 %v3404_v18  ;;  %v271_v17 = vld [vmem:[#allocation2 + $0x6f0] sm:$0xff]  ;;  %v3347_v18 = vcombine.low %v147_v5, %v151_v6  ;;  %v3822_v5 = vld [vmem:[%s3931_s0 + $0x8] ss:$28 sps:$4 sm:$0xff]  }
  0xfb   :  { %v3468_v21 = vcombine.high %v267_v16, %v271_v17  ;;  %v3467_v30 = vcombine.low %v267_v16, %v271_v17  ;;  %v355_v57 = vld [vmem:[#allocation2 + $0x990] sm:$0xff] }
  0xfc   :  { %2883 = vmatpush1.bf16.msra.mxu0 %v3275_v23  ;;  %v135_v23 = vld [vmem:[#allocation2 + $0x2b0] sm:$0xff] }
  0xfd   :  { %2926 = vmatpush1.bf16.msra.mxu1 %v3403_v25  ;;  %2884 = vmatprep.subr.bf16.mxu0 %v3268_v26  ;;  %v259_v25 = vld [vmem:[#allocation2 + $0x690] sm:$0xff]  ;;  %v3332_v31 = vcombine.high %v131_v22, %v135_v23 }
  0xfe   :  { %2927 = vmatprep.subr.bf16.mxu1 %v3396_v29  ;;  %v263_v26 = vld [vmem:[#allocation2 + $0x6b0] sm:$0xff]  ;;  %v3339_v29 = vcombine.low %v139_v13, %v143_v14  ;;  %v104_v13 = vld [vmem:[#allocation2 + $0x1b8] sm:$0xff] }
  0xff   :  { %v3460_v32 = vcombine.high %v259_v25, %v263_v26  ;;  %v3459_v39 = vcombine.low %v259_v25, %v263_v26  ;;  %v347_v1 = vld [vmem:[#allocation2 + $0x950] sm:$0xff] }
 0x100   :  { %2885 = vmatpush1.bf16.msra.mxu0 %v3267_v34  ;;  %v127_v34 = vld [vmem:[#allocation2 + $0x270] sm:$0xff] }
 0x101   :  { %2928 = vmatpush1.bf16.msra.mxu1 %v3395_v36  ;;  %2886 = vmatprep.subr.bf16.mxu0 %v3260_v37  ;;  %v251_v36 = vld [vmem:[#allocation2 + $0x650] sm:$0xff]  ;;  %v3324_v40 = vcombine.high %v123_v33, %v127_v34 }
 0x102   :  { %2929 = vmatprep.subr.bf16.mxu1 %v3388_v38  ;;  %v255_v37 = vld [vmem:[#allocation2 + $0x670] sm:$0xff]  ;;  %v3331_v38 = vcombine.low %v131_v22, %v135_v23  ;;  %v92_v22 = vld [vmem:[#allocation2 + $0x158] sm:$0xff] }
 0x103   :  { %v3452_v41 = vcombine.high %v251_v36, %v255_v37  ;;  %v3451_v47 = vcombine.low %v251_v36, %v255_v37  ;;  %v3829_v14 = vld [vmem:[%s3931_s0 + $0x14] ss:$28 sps:$4 sm:$0xff]   ;;  %v96_v23 = vld [vmem:[#allocation2 + $0x178] sm:$0xff] }
 0x104   :  { %2887 = vmatpush1.bf16.msra.mxu0 %v3259_v43  ;;  %v119_v43 = vld [vmem:[#allocation2 + $0x230] sm:$0xff]  ;;  %v88_v36 = vld [vmem:[#allocation2 + $0x138] sm:$0xff] }
 0x105   :  { %2930 = vmatpush1.bf16.msra.mxu1 %v3387_v44  ;;  %2888 = vmatprep.subr.bf16.mxu0 %v3252_v45  ;;  %v243_v44 = vld [vmem:[#allocation2 + $0x610] sm:$0xff]  ;;  %v3316_v48 = vcombine.high %v115_v42, %v119_v43 }
 0x106   :  { %2931 = vmatprep.subr.bf16.mxu1 %v3380_v46  ;;  %v247_v45 = vld [vmem:[#allocation2 + $0x630] sm:$0xff]  ;;  %v3323_v46 = vcombine.low %v123_v33, %v127_v34  ;;  %v84_v34 = vld [vmem:[#allocation2 + $0x118] sm:$0xff] }
 0x107   :  { %v3444_v49 = vcombine.high %v243_v44, %v247_v45  ;;  %v3443_v54 = vcombine.low %v243_v44, %v247_v45  ;;  %v3835_v25 = vld [vmem:[%s3931_s0 + $0x18] ss:$28 sps:$4 sm:$0xff]  }
 0x108   :  { %2889 = vmatpush1.bf16.msra.mxu0 %v3251_v51  ;;  %v367_v51 = vld [vmem:[#allocation2 + $0x9f0] sm:$0xff]  ;;  %v80_v44 = vld [vmem:[#allocation2 + $0xf8] sm:$0xff] }
 0x109   :  { %2932 = vmatpush1.bf16.msra.mxu1 %v3379_v52  ;;  %2890 = vmatprep.subr.bf16.mxu0 %v3372_v59  ;;  %v443_v52 = vld [vmem:[#allocation2 + $0xc50] sm:$0xff]  ;;  %v3564_v55 = vcombine.high %v363_v50, %v367_v51 }
 0x10a   :  { %2933 = vmatprep.subr.bf16.mxu1 %v3500_v53  ;;  %v447_v59 = vld [vmem:[#allocation2 + $0xc70] sm:$0xff]  ;;  %v3315_v53 = vcombine.low %v115_v42, %v119_v43  ;;  %v76_v43 = vld [vmem:[#allocation2 + $0xd8] sm:$0xff] }
 0x10b   :  { %v3644_v15 = vcombine.high %v443_v52, %v447_v59  ;;  %v3643_v56 = vcombine.low %v443_v52, %v447_v59  ;;  %v327_v33 = vld [vmem:[#allocation2 + $0x8b0] sm:$0xff]  ;;  %v3277_v59 = vcombine.low %v76_v43, %v80_v44 }
 0x10c   :  { %2891 = vmatpush2.bf16.msra.mxu0 %v3371_v58  ;;  %v359_v58 = vld [vmem:[#allocation2 + $0x9b0] sm:$0xff] }
 0x10d   :  { %2934 = vmatpush2.bf16.msra.mxu1 %v3499_v60  ;;  %2892 = vmatprep.subr.bf16.mxu0 %v3364_v61  ;;  %v435_v60 = vld [vmem:[#allocation2 + $0xc10] sm:$0xff]  ;;  %v3556_v63 = vcombine.high %v355_v57, %v359_v58  ;;  %v3555_v6 = vcombine.low %v355_v57, %v359_v58  ;;  %v60_v57 = vld [vmem:[#allocation2 + $0x58] sm:$0xff] }
 0x10e   :  { %2935 = vmatprep.subr.bf16.mxu1 %v3492_v62  ;;  %v439_v61 = vld [vmem:[#allocation2 + $0xc30] sm:$0xff]  ;;  %v3563_v62 = vcombine.low %v363_v50, %v367_v51  ;;  %v68_v50 = vld [vmem:[#allocation2 + $0x98] sm:$0xff] }
 0x10f   :  { %v3636_v0 = vcombine.high %v435_v60, %v439_v61  ;;  %v3635_v7 = vcombine.low %v435_v60, %v439_v61  ;;  %v319_v42 = vld [vmem:[#allocation2 + $0x870] sm:$0xff]  ;;  %v72_v51 = vld [vmem:[#allocation2 + $0xb8] sm:$0xff] }
 0x110   :  { %2893 = vmatpush2.bf16.msra.mxu0 %v3363_v12  ;;  %v351_v12 = vld [vmem:[#allocation2 + $0x970] sm:$0xff]  ;;  %v64_v58 = vld [vmem:[#allocation2 + $0x78] sm:$0xff]  ;;  %v3269_v61 = vcombine.low %v68_v50, %v72_v51 }
 0x111   :  { %2936 = vmatpush2.bf16.msra.mxu1 %v3491_v2  ;;  %2894 = vmatprep.subr.bf16.mxu0 %v3356_v3  ;;  %v3816_v2 = vld [vmem:[%s3931_s0] ss:$28 sps:$4 sm:$0xff]   ;;  %v3548_v8 = vcombine.high %v347_v1, %v351_v12  ;;  %v3547_v16 = vcombine.low %v347_v1, %v351_v12 }
 0x112   :  { %2937 = vmatprep.subr.bf16.mxu1 %v3484_v35  ;;  %v108_v3 = vld [vmem:[#allocation2 + $0x1d8] sm:$0xff] }
 0x113   :  { %v112_v35 = vld [vmem:[#allocation2 + $0x1f8] sm:$0xff] }
 0x114   :  { %2895 = vmatpush2.bf16.msra.mxu0 %v3355_v24  ;;  %v3310_v24 = vcombine.high %v108_v3, %v112_v35  ;;  %v3309_v17 = vcombine.low %v108_v3, %v112_v35  ;;  %v52_v1 = vld [vmem:[#allocation2 + $0x18] sm:$0xff]  ;;  %v3261_v35 = vcombine.low %v60_v57, %v64_v58 }
 0x115   :  { %2938 = vmatpush2.bf16.msra.mxu1 %v3483_v9  ;;  %2896 = vmatprep.subr.bf16.mxu0 %v3348_v10  ;;  %v339_v9 = vld [vmem:[#allocation2 + $0x910] sm:$0xff]  ;;  %v56_v12 = vld [vmem:[#allocation2 + $0x38] sm:$0xff] }
 0x116   :  { %2939 = vmatprep.subr.bf16.mxu1 %v3476_v11  ;;  %v343_v10 = vld [vmem:[#allocation2 + $0x930] sm:$0xff]  ;;  %v100_v11 = vld [vmem:[#allocation2 + $0x198] sm:$0xff] }
 0x117   :  { %v3539_v26 = vcombine.low %v339_v9, %v343_v10 }
 0x118   :  { %2897 = vmatpush2.bf16.msra.mxu0 %v3347_v18  ;;  %v3540_v18 = vcombine.high %v339_v9, %v343_v10  ;;  %v172_v9 = vld [vmem:[#allocation2 + $0x3d8] sm:$0xff] }
 0x119   :  { %2940 = vmatpush2.bf16.msra.mxu1 %v3475_v19  ;;  %2898 = vmatprep.subr.bf16.mxu0 %v3340_v20  ;;  %v3302_v19 = vcombine.high %v100_v11, %v104_v13  ;;  %v331_v20 = vld [vmem:[#allocation2 + $0x8d0] sm:$0xff]  ;;  %v176_v10 = vld [vmem:[#allocation2 + $0x3f8] sm:$0xff] }
 0x11a   :  { %2941 = vmatprep.subr.bf16.mxu1 %v3468_v21  ;;  %v335_v21 = vld [vmem:[#allocation2 + $0x8f0] sm:$0xff] }
 0x11b   :  { %v3531_v37 = vcombine.low %v331_v20, %v335_v21 }
 0x11c   :  { %2899 = vmatpush2.bf16.msra.mxu0 %v3339_v29  ;;  %v3301_v29 = vcombine.low %v100_v11, %v104_v13  ;;  %v3253_v13 = vcombine.low %v52_v1, %v56_v12 }
 0x11d   :  { %2942 = vmatpush2.bf16.msra.mxu1 %v3467_v30  ;;  %2900 = vmatprep.subr.bf16.mxu0 %v3332_v31  ;;  %v3532_v30 = vcombine.high %v331_v20, %v335_v21  ;;  %v3294_v31 = vcombine.high %v92_v22, %v96_v23  ;;  %v407_v20 = vld [vmem:[#allocation2 + $0xb30] sm:$0xff] }
 0x11e   :  { %2943 = vmatprep.subr.bf16.mxu1 %v3460_v32  ;;  %v323_v32 = vld [vmem:[#allocation2 + $0x890] sm:$0xff] }
 0x11f   :  { %v3523_v45 = vcombine.low %v323_v32, %v327_v33 }
 0x120   :  { %2901 = vmatpush2.bf16.msra.mxu0 %v3331_v38  ;;  %v3293_v38 = vcombine.low %v92_v22, %v96_v23  ;;  %v164_v22 = vld [vmem:[#allocation2 + $0x398] sm:$0xff] }
 0x121   :  { %2944 = vmatpush2.bf16.msra.mxu1 %v3459_v39  ;;  %2902 = vmatprep.subr.bf16.mxu0 %v3324_v40  ;;  %v3524_v39 = vcombine.high %v323_v32, %v327_v33  ;;  %v3286_v40 = vcombine.high %v84_v34, %v88_v36  ;;  %v168_v23 = vld [vmem:[#allocation2 + $0x3b8] sm:$0xff]  ;;  %v395_v33 = vld [vmem:[#allocation2 + $0xad0] sm:$0xff] }
 0x122   :  { %2945 = vmatprep.subr.bf16.mxu1 %v3452_v41  ;;  %v315_v41 = vld [vmem:[#allocation2 + $0x850] sm:$0xff]  ;;  %v3366_v32 = vcombine.high %v164_v22, %v168_v23 }
 0x123   :  { %v3515_v52 = vcombine.low %v315_v41, %v319_v42  ;;  %v3840_v21 = vpop.f32.mrf.mxu1 }
 0x124   :  { %2903 = vmatpush2.bf16.msra.mxu0 %v3323_v46  ;;  %v3285_v46 = vcombine.low %v84_v34, %v88_v36  ;;  %v399_v34 = vld [vmem:[#allocation2 + $0xaf0] sm:$0xff] }
 0x125   :  { %2946 = vmatpush2.bf16.msra.mxu1 %v3451_v47  ;;  %2904 = vmatprep.subr.bf16.mxu0 %v3316_v48  ;;  %v3278_v47 = vcombine.high %v76_v43, %v80_v44  ;;  %v307_v48 = vld [vmem:[#allocation2 + $0x810] sm:$0xff]  ;;  %v3844_v36 = vpop.f32.mrf.mxu1 }
 0x126   :  { %2947 = vmatprep.subr.bf16.mxu1 %v3444_v49  ;;  %v311_v49 = vld [vmem:[#allocation2 + $0x830] sm:$0xff] }
 0x127   :  { %v3507_v60 = vcombine.low %v307_v48, %v311_v49 }
 0x128   :  { %2905 = vmatpush2.bf16.msra.mxu0 %v3315_v53  ;;  %v3508_v53 = vcombine.high %v307_v48, %v311_v49  ;;  %v148_v48 = vld [vmem:[#allocation2 + $0x318] sm:$0xff] }
 0x129   :  { %2948 = vmatpush2.bf16.msra.mxu1 %v3443_v54  ;;  %2960 = vmatprep.subr.bf16.mxu0 %v3564_v55  ;;  %v3270_v54 = vcombine.high %v68_v50, %v72_v51  ;;  %v427_v55 = vld [vmem:[#allocation2 + $0xbd0] sm:$0xff]  ;;  %v152_v49 = vld [vmem:[#allocation2 + $0x338] sm:$0xff]  ;;  %v3595_v51 = vcombine.low %v395_v33, %v399_v34 }
 0x12a   :  { %3015 = vmatprep.subr.bf16.mxu1 %v3644_v15  ;;  %v431_v15 = vld [vmem:[#allocation2 + $0xbf0] sm:$0xff] }
 0x12b   :  { %2907 = vmatmul.mubr.bf16.vlgmr.msra.gmra.mxu0 %v3816_v2  ;;  %v3627_v3 = vcombine.low %v427_v55, %v431_v15 }
 0x12c   :  { %2950 = vmatmul.mubr.bf16.vlgmr.msra.gmra.mxu1 %v3822_v5  ;;  %2961 = vmatpush1.bf16.msra.mxu0 %v3563_v62  ;;  %v3628_v62 = vcombine.high %v427_v55, %v431_v15  ;;  %v3350_v55 = vcombine.high %v148_v48, %v152_v49  ;;  %v379_v15 = vld [vmem:[#allocation2 + $0xa50] sm:$0xff] }
 0x12d   :  { %3016 = vmatpush1.bf16.msra.mxu1 %v3643_v56  ;;  %2962 = vmatprep.subr.bf16.mxu0 %v3556_v63  ;;  %v3262_v56 = vcombine.high %v60_v57, %v64_v58  ;;  %v419_v63 = vld [vmem:[#allocation2 + $0xb90] sm:$0xff] }
 0x12e   :  { %3017 = vmatprep.subr.bf16.mxu1 %v3636_v0  ;;  %3035 = vmatprep.mubr.bf16.mxu1 %v3721_v28  ;;  %v423_v0 = vld [vmem:[#allocation2 + $0xbb0] sm:$0xff] }
 0x12f   :  { %2992 = vmatprep.mubr.bf16.mxu0 %v3829_v14  ;;  %v3619_v11 = vcombine.low %v419_v63, %v423_v0  ;;  %v383_v57 = vld [vmem:[#allocation2 + $0xa70] sm:$0xff] }
 0x130   :  { %2963 = vmatpush1.bf16.msra.mxu0 %v3555_v6  ;;  %v3620_v6 = vcombine.high %v419_v63, %v423_v0  ;;  %v3349_v0 = vcombine.low %v148_v48, %v152_v49  ;;  %v120_v49 = vld [vmem:[#allocation2 + $0x238] sm:$0xff] }
 0x131   :  { %3018 = vmatpush1.bf16.msra.mxu1 %v3635_v7  ;;  %2964 = vmatprep.subr.bf16.mxu0 %v3548_v8  ;;  %v3254_v7 = vcombine.high %v52_v1, %v56_v12  ;;  %v411_v8 = vld [vmem:[#allocation2 + $0xb50] sm:$0xff]  ;;  %v3580_v1 = vcombine.high %v379_v15, %v383_v57 }
 0x132   :  { %3046 = vmatprep.subr.bf16.mxu1 %v3310_v24  ;;  %v415_v24 = vld [vmem:[#allocation2 + $0xb70] sm:$0xff] }
 0x134   :  { %3649 = vmatmul.mubr.msk.bf16.vlgmr.msra.gmra.mxu1 %vm2526_vm0, %v3835_v25  ;;  %2965 = vmatpush1.bf16.msra.mxu0 %v3547_v16  ;;  %v3612_v16 = vcombine.high %v411_v8, %v415_v24 }
 0x135   :  { %3047 = vmatpush1.bf16.msra.mxu1 %v3309_v17  ;;  %2966 = vmatprep.subr.bf16.mxu0 %v3540_v18  ;;  %v451_v17 = vlaneseq  ;;  %v3374_v18 = vcombine.high %v172_v9, %v176_v10 }
 0x136   :  { %3048 = vmatprep.subr.bf16.mxu1 %v3302_v19  ;;  %3078 = vmatprep.mubr.bf16.mxu1 %v3804_v4  ;;  %v3516_v4 = vcombine.high %v315_v41, %v319_v42  ;;  %v403_v19 = vld [vmem:[#allocation2 + $0xb10] sm:$0xff]  ;;  %v3365_v41 = vcombine.low %v164_v22, %v168_v23  ;;  %v3596_v42 = vcombine.high %v395_v33, %v399_v34  ;;  %v240_v22 = vld [vmem:[#allocation2 + $0x5f8] sm:$0xff] }
 0x138   :  { %2967 = vmatpush1.bf16.msra.mxu0 %v3539_v26  ;;  %v3611_v26 = vcombine.low %v411_v8, %v415_v24  ;;  %v132_v8 = vld [vmem:[#allocation2 + $0x298] sm:$0xff] }
 0x139   :  { %3049 = vmatpush1.bf16.msra.mxu1 %v3301_v29  ;;  %2968 = vmatprep.subr.bf16.mxu0 %v3532_v30  ;;  %v3373_v29 = vcombine.low %v172_v9, %v176_v10  ;;  %v3604_v30 = vcombine.high %v403_v19, %v407_v20  ;;  %v136_v24 = vld [vmem:[#allocation2 + $0x2b8] sm:$0xff]  ;;  %v3579_v10 = vcombine.low %v379_v15, %v383_v57 }
 0x13a   :  { %3050 = vmatprep.subr.bf16.mxu1 %v3294_v31  ;;  %v3842_v31 = vshrl.u32 %v451_v17, 7 }
 0x13c   :  { %2969 = vmatpush1.bf16.msra.mxu0 %v3531_v37  ;;  %v156_v37 = vld [vmem:[#allocation2 + $0x358] sm:$0xff]  ;;  %v453_v43 = vsub.s32 0, %v3842_v31  ;;  %v457_v50 = vsub.s32 1, %v3842_v31 }
 0x13d   :  { %3051 = vmatpush1.bf16.msra.mxu1 %v3293_v38  ;;  %2970 = vmatprep.subr.bf16.mxu0 %v3524_v39  ;;  %v160_v38 = vld [vmem:[#allocation2 + $0x378] sm:$0xff]  ;;  %v3603_v39 = vcombine.low %v403_v19, %v407_v20  ;;  %v3334_v19 = vcombine.high %v132_v8, %v136_v24 }
 0x13e   :  { %3052 = vmatprep.subr.bf16.mxu1 %v3286_v40  ;;  %v2564_v40 = vpop.f32.mrf.mxu0  ;;  %v3358_v44 = vcombine.high %v156_v37, %v160_v38  ;;  %v236_v20 = vld [vmem:[#allocation2 + $0x5d8] sm:$0xff] }
 0x140   :  { %2971 = vmatpush1.bf16.msra.mxu0 %v3523_v45  ;;  %v387_v45 = vld [vmem:[#allocation2 + $0xa90] sm:$0xff] }
 0x141   :  { %3053 = vmatpush1.bf16.msra.mxu1 %v3285_v46  ;;  %2972 = vmatprep.subr.bf16.mxu0 %v3516_v4  ;;  %v391_v46 = vld [vmem:[#allocation2 + $0xab0] sm:$0xff]  ;;  %v3847_v4 = vld [vmem:[#allocation4] sm:$0xff] }
 0x142   :  { %3054 = vmatprep.subr.bf16.mxu1 %v3278_v47  ;;  %v3849_v47 = vpop.f32.mrf.mxu1 }
 0x144   :  { %2973 = vmatpush1.bf16.msra.mxu0 %v3515_v52  ;;  %v2566_v52 = vpop.f32.mrf.mxu0  ;;  %v2613_v58 = vpop.f32.mrf.mxu1 }
 0x145   :  { %3055 = vmatpush1.bf16.msra.mxu1 %v3277_v59  ;;  %2974 = vmatprep.subr.bf16.mxu0 %v3508_v53  ;;  %v3357_v59 = vcombine.low %v156_v37, %v160_v38  ;;  %v3588_v53 = vcombine.high %v387_v45, %v391_v46 }
 0x146   :  { %3056 = vmatprep.subr.bf16.mxu1 %v3270_v54  ;;  %v454_v54 = vrot.slane %v3847_v4, %v453_v43  ;;  %v2568_v63 = vpop.f32.mrf.mxu0 }
 0x148   :  { %2975 = vmatpush1.bf16.msra.mxu0 %v3507_v60  ;;  %v140_v60 = vld [vmem:[#allocation2 + $0x2d8] sm:$0xff]  ;;  %v2565_v12 = vadd.f32 %v2564_v40, %v454_v54 }
 0x149   :  { %3057 = vmatpush1.bf16.msra.mxu1 %v3269_v61  ;;  %2976 = vmatprep.subr.bf16.mxu0 %v3628_v62  ;;  %v144_v61 = vld [vmem:[#allocation2 + $0x2f8] sm:$0xff]  ;;  %v458_v62 = vrot.slane %v3847_v4, %v457_v50 }
 0x14a   :  { %3058 = vmatprep.subr.bf16.mxu1 %v3262_v56  ;;  %v3587_v56 = vcombine.low %v387_v45, %v391_v46  ;;  %v2608_v17 = vadd.f32 %v3840_v21, %v2565_v12  ;;  %v3438_v21 = vcombine.high %v236_v20, %v240_v22  ;;  %v232_v45 = vld [vmem:[#allocation2 + $0x5b8] sm:$0xff] }
 0x14b   :  { %v2567_v9 = vadd.f32 %v2566_v52, %v458_v62 }
 0x14c   :  { %2977 = vmatpush2.bf16.msra.mxu0 %v3627_v3  ;;  %v3342_v3 = vcombine.high %v140_v60, %v144_v61 }
 0x14d   :  { %3059 = vmatpush1.bf16.msra.mxu1 %v3261_v35  ;;  %2978 = vmatprep.subr.bf16.mxu0 %v3620_v6  ;;  %v371_v35 = vld [vmem:[#allocation2 + $0xa10] sm:$0xff] }
 0x14e   :  { %3060 = vmatprep.subr.bf16.mxu1 %v3254_v7  ;;  %v375_v6 = vld [vmem:[#allocation2 + $0xa30] sm:$0xff]  ;;  %v2693_v7 = vpop.f32.mrf.mxu1 }
 0x14f   :  { %v3571_v37 = vcombine.low %v371_v35, %v375_v6 }
 0x150   :  { %2979 = vmatpush2.bf16.msra.mxu0 %v3619_v11  ;;  %v2570_v11 = vpop.f32.mrf.mxu0  ;;  %v2695_v23 = vpop.f32.mrf.mxu1 }
 0x151   :  { %3061 = vmatpush1.bf16.msra.mxu1 %v3253_v13  ;;  %2980 = vmatprep.subr.bf16.mxu0 %v3612_v16  ;;  %v3341_v13 = vcombine.low %v140_v60, %v144_v61  ;;  %v3572_v16 = vcombine.high %v371_v35, %v375_v6  ;;  %v2571_v33 = vadd.f32 %v2570_v11, %v458_v62  ;;  %v224_v60 = vld [vmem:[#allocation2 + $0x578] sm:$0xff]  ;;  %v3866_v62 = vld [vmem:[%s3931_s0 + $0x10] ss:$28 sps:$4 sm:$0xff]  }
 0x152   :  { %3062 = vmatprep.subr.bf16.mxu1 %v3374_v18  ;;  %v2569_v18 = vadd.f32 %v2568_v63, %v454_v54  ;;  %v2697_v46 = vpop.f32.mrf.mxu1  ;;  %v368_v63 = vld [vmem:[#allocation2 + $0x9f8] sm:$0xff] }
 0x153   :  { %v2614_v50 = vadd.f32 %v2613_v58, %v2571_v33  ;;  %v220_v58 = vld [vmem:[#allocation2 + $0x558] sm:$0xff] }
 0x154   :  { %2981 = vmatpush2.bf16.msra.mxu0 %v3611_v26  ;;  %v2612_v40 = vadd.f32 %v3849_v47, %v2569_v18  ;;  %v2699_v61 = vpop.f32.mrf.mxu1  ;;  %v212_v6 = vld [vmem:[#allocation2 + $0x518] sm:$0xff] }
 0x155   :  { %3063 = vmatpush2.bf16.msra.mxu1 %v3373_v29  ;;  %2982 = vmatprep.subr.bf16.mxu0 %v3604_v30  ;;  %v124_v29 = vld [vmem:[#allocation2 + $0x258] sm:$0xff] }
 0x156   :  { %3064 = vmatprep.subr.bf16.mxu1 %v3366_v32  ;;  %v128_v30 = vld [vmem:[#allocation2 + $0x278] sm:$0xff]  ;;  %v2610_v32 = vadd.f32 %v3844_v36, %v2567_v9  ;;  %v3421_v9 = vcombine.low %v220_v58, %v224_v60 }
 0x157   :  { %v3326_v43 = vcombine.high %v124_v29, %v128_v30  ;;  %v116_v36 = vld [vmem:[#allocation2 + $0x218] sm:$0xff] }
 0x158   :  { %2983 = vmatpush2.bf16.msra.mxu0 %v3603_v39  ;;  %v3333_v39 = vcombine.low %v132_v8, %v136_v24  ;;  %v3318_v57 = vcombine.high %v116_v36, %v120_v49  ;;  %v3317_v12 = vcombine.low %v116_v36, %v120_v49  ;;  %v356_v8 = vld [vmem:[#allocation2 + $0x998] sm:$0xff] }
 0x159   :  { %3065 = vmatpush2.bf16.msra.mxu1 %v3365_v41  ;;  %2984 = vmatprep.subr.bf16.mxu0 %v3596_v42  ;;  %v360_v24 = vld [vmem:[#allocation2 + $0x9b8] sm:$0xff] }
 0x15a   :  { %3066 = vmatprep.subr.bf16.mxu1 %v3358_v44  ;;  %v228_v44 = vld [vmem:[#allocation2 + $0x598] sm:$0xff]  ;;  %v3558_v11 = vcombine.high %v356_v8, %v360_v24 }
 0x15b   :  { %v3430_v54 = vcombine.high %v228_v44, %v232_v45  ;;  %v352_v18 = vld [vmem:[#allocation2 + $0x978] sm:$0xff] }
 0x15c   :  { %2985 = vmatpush2.bf16.msra.mxu0 %v3595_v51 }
 0x15d   :  { %3067 = vmatpush2.bf16.msra.mxu1 %v3357_v59  ;;  %2986 = vmatprep.subr.bf16.mxu0 %v3588_v53  ;;  %v3437_v59 = vcombine.low %v236_v20, %v240_v22  ;;  %v3325_v53 = vcombine.low %v124_v29, %v128_v30  ;;  %v3557_v20 = vcombine.low %v356_v8, %v360_v24  ;;  %v200_v29 = vld [vmem:[#allocation2 + $0x4b8] sm:$0xff] }
 0x15e   :  { %3068 = vmatprep.subr.bf16.mxu1 %v3350_v55  ;;  %v340_v30 = vld [vmem:[#allocation2 + $0x918] sm:$0xff] }
 0x160   :  { %2987 = vmatpush2.bf16.msra.mxu0 %v3587_v56  ;;  %v364_v56 = vld [vmem:[#allocation2 + $0x9d8] sm:$0xff] }
 0x161   :  { %3069 = vmatpush2.bf16.msra.mxu1 %v3349_v0  ;;  %2988 = vmatprep.subr.bf16.mxu0 %v3580_v1  ;;  %v3429_v1 = vcombine.low %v228_v44, %v232_v45  ;;  %v3566_v35 = vcombine.high %v364_v56, %v368_v63  ;;  %v180_v44 = vld [vmem:[#allocation2 + $0x418] sm:$0xff] }
 0x162   :  { %3070 = vmatprep.subr.bf16.mxu1 %v3342_v3  ;;  %v3422_v3 = vcombine.high %v220_v58, %v224_v60  ;;  %v184_v45 = vld [vmem:[#allocation2 + $0x438] sm:$0xff] }
 0x163   :  { %v2650_v26 = vpop.f32.mrf.mxu0  ;;  %v292_v58 = vld [vmem:[#allocation2 + $0x798] sm:$0xff] }
 0x164   :  { %v2651_v34 = vadd.f32 %v2650_v26, %v2608_v17  ;;  %2989 = vmatpush2.bf16.msra.mxu0 %v3579_v10  ;;  %v3565_v10 = vcombine.low %v364_v56, %v368_v63  ;;  %v348_v17 = vld [vmem:[#allocation2 + $0x958] sm:$0xff] }
 0x165   :  { %3071 = vmatpush2.bf16.msra.mxu1 %v3341_v13  ;;  %v2652_v38 = vpop.f32.mrf.mxu0  ;;  %2990 = vmatprep.subr.bf16.mxu0 %v3572_v16  ;;  %v204_v13 = vld [vmem:[#allocation2 + $0x4d8] sm:$0xff] }
 0x166   :  { %v2694_v41 = vadd.f32 %v2693_v7, %v2651_v34  ;;  %v2653_v42 = vadd.f32 %v2652_v38, %v2610_v32  ;;  %3072 = vmatprep.subr.bf16.mxu1 %v3334_v19  ;;  %v216_v7 = vld [vmem:[#allocation2 + $0x538] sm:$0xff]  ;;  %v3549_v34 = vcombine.low %v348_v17, %v352_v18 }
 0x167   :  { %v2654_v48 = vpop.f32.mrf.mxu0  ;;  %v208_v16 = vld [vmem:[#allocation2 + $0x4f8] sm:$0xff]  ;;  %v3413_v19 = vcombine.low %v212_v6, %v216_v7 }
 0x168   :  { %3218 = vst [vmem:[%s3934_s3] sm:$0xff] %v2694_v41  ;;  %v2696_v51 = vadd.f32 %v2695_v23, %v2653_v42  ;;  %v2655_v52 = vadd.f32 %v2654_v48, %v2612_v40  ;;  %2991 = vmatpush2.bf16.msra.mxu0 %v3571_v37  ;;  %v3406_v22 = vcombine.high %v204_v13, %v208_v16  ;;  %v196_v26 = vld [vmem:[#allocation2 + $0x498] sm:$0xff] }
 0x169   :  { %3073 = vmatpush2.bf16.msra.mxu1 %v3333_v39  ;;  %v2656_v47 = vpop.f32.mrf.mxu0  ;;  %3089 = vmatprep.subr.bf16.mxu0 %v3438_v21  ;;  %v3550_v23 = vcombine.high %v348_v17, %v352_v18  ;;  %v344_v32 = vld [vmem:[#allocation2 + $0x938] sm:$0xff]  ;;  %v3405_v33 = vcombine.low %v204_v13, %v208_v16  ;;  %v3397_v41 = vcombine.low %v196_v26, %v200_v29 }
 0x16a   :  { %3219 = vst [vmem:[%s3934_s3 + $0x8] sm:$0xff] %v2696_v51  ;;  %v2698_v55 = vadd.f32 %v2697_v46, %v2655_v52  ;;  %v2657_v15 = vadd.f32 %v2656_v47, %v2614_v50  ;;  %3074 = vmatprep.subr.bf16.mxu1 %v3326_v43  ;;  %v3542_v37 = vcombine.high %v340_v30, %v344_v32  ;;  %v188_v38 = vld [vmem:[#allocation2 + $0x458] sm:$0xff] }
 0x16b   :  { %2993 = vmatmul.mubr.bf16.vlgmr.msra.gmra.mxu0 %v3866_v62  ;;  %v192_v39 = vld [vmem:[#allocation2 + $0x478] sm:$0xff]  ;;  %v3541_v42 = vcombine.low %v340_v30, %v344_v32  ;;  %v3382_v50 = vcombine.high %v180_v44, %v184_v45 }
 0x16c   :  { %3226 = vst [vmem:[%s3934_s3 + $0x40] sm:$0xff] %v2698_v55  ;;  %v2700_v0 = vadd.f32 %v2699_v61, %v2657_v15  ;;  %3090 = vmatpush1.bf16.msra.mxu0 %v3437_v59  ;;  %3121 = vmatprep.mubr.bf16.mxu0 %v3810_v27  ;;  %v3414_v27 = vcombine.high %v212_v6, %v216_v7  ;;  %v332_v21 = vld [vmem:[#allocation2 + $0x8d8] sm:$0xff] }
 0x16d   :  { %3075 = vmatpush2.bf16.msra.mxu1 %v3325_v53  ;;  %3091 = vmatprep.subr.bf16.mxu0 %v3430_v54  ;;  %v336_v40 = vld [vmem:[#allocation2 + $0x8f8] sm:$0xff]  ;;  %v3389_v36 = vcombine.low %v188_v38, %v192_v39  ;;  %v3381_v54 = vcombine.low %v180_v44, %v184_v45 }
 0x16e   :  { %3227 = vst [vmem:[%s3934_s3 + $0x48] sm:$0xff] %v2700_v0  ;;  %3076 = vmatprep.subr.bf16.mxu1 %v3318_v57  ;;  %v3534_v43 = vcombine.high %v332_v21, %v336_v40  ;;  %v324_v46 = vld [vmem:[#allocation2 + $0x898] sm:$0xff]  ;;  %v3533_v49 = vcombine.low %v332_v21, %v336_v40 }
 0x16f   :  { %v328_v48 = vld [vmem:[#allocation2 + $0x8b8] sm:$0xff] }
 0x170   :  { %3092 = vmatpush1.bf16.msra.mxu0 %v3429_v1  ;;  %v3526_v51 = vcombine.high %v324_v46, %v328_v48  ;;  %v300_v52 = vld [vmem:[#allocation2 + $0x7d8] sm:$0xff]  ;;  %v3525_v55 = vcombine.low %v324_v46, %v328_v48 }
 0x171   :  { %3077 = vmatpush2.bf16.msra.mxu1 %v3317_v12  ;;  %3093 = vmatprep.subr.bf16.mxu0 %v3422_v3  ;;  %v304_v59 = vld [vmem:[#allocation2 + $0x7f8] sm:$0xff] }
 0x172   :  { %3132 = vmatprep.subr.bf16.mxu1 %v3566_v35  ;;  %v316_v47 = vld [vmem:[#allocation2 + $0x858] sm:$0xff]  ;;  %v3502_v15 = vcombine.high %v300_v52, %v304_v59  ;;  %v3501_v63 = vcombine.low %v300_v52, %v304_v59 }
 0x173   :  { %v320_v53 = vld [vmem:[#allocation2 + $0x878] sm:$0xff] }
 0x174   :  { %3079 = vmatmul.mubr.bf16.vlgmr.msra.gmra.mxu1 %v3816_v2  ;;  %3094 = vmatpush1.bf16.msra.mxu0 %v3421_v9  ;;  %v3398_v2 = vcombine.high %v196_v26, %v200_v29  ;;  %v3518_v57 = vcombine.high %v316_v47, %v320_v53  ;;  %v296_v60 = vld [vmem:[#allocation2 + $0x7b8] sm:$0xff]  ;;  %v3517_v0 = vcombine.low %v316_v47, %v320_v53 }
 0x175   :  { %3133 = vmatpush1.bf16.msra.mxu1 %v3565_v10  ;;  %3095 = vmatprep.subr.bf16.mxu0 %v3414_v27  ;;  %v308_v61 = vld [vmem:[#allocation2 + $0x818] sm:$0xff]  ;;  %v3494_v1 = vcombine.high %v292_v58, %v296_v60  ;;  %v3493_v8 = vcombine.low %v292_v58, %v296_v60 }
 0x176   :  { %3134 = vmatprep.subr.bf16.mxu1 %v3558_v11  ;;  %3164 = vmatprep.mubr.bf16.mxu1 %v3829_v14  ;;  %v3390_v14 = vcombine.high %v188_v38, %v192_v39  ;;  %v312_v56 = vld [vmem:[#allocation2 + $0x838] sm:$0xff] }
 0x177   :  { %v3510_v12 = vcombine.high %v308_v61, %v312_v56  ;;  %v284_v3 = vld [vmem:[#allocation2 + $0x758] sm:$0xff]  ;;  %v3509_v24 = vcombine.low %v308_v61, %v312_v56  ;;  %v465_v56 = vsub.s32 3, %v3842_v31 }
 0x178   :  { %3096 = vmatpush1.bf16.msra.mxu0 %v3413_v19  ;;  %v288_v35 = vld [vmem:[#allocation2 + $0x778] sm:$0xff] }
 0x179   :  { %3135 = vmatpush1.bf16.msra.mxu1 %v3557_v20  ;;  %3097 = vmatprep.subr.bf16.mxu0 %v3406_v22  ;;  %v428_v6 = vld [vmem:[#allocation2 + $0xbd8] sm:$0xff]  ;;  %v3486_v9 = vcombine.high %v284_v3, %v288_v35  ;;  %v3485_v17 = vcombine.low %v284_v3, %v288_v35 }
 0x17a   :  { %3136 = vmatprep.subr.bf16.mxu1 %v3550_v23  ;;  %v432_v7 = vld [vmem:[#allocation2 + $0xbf8] sm:$0xff] }
 0x17b   :  { %v3630_v10 = vcombine.high %v428_v6, %v432_v7  ;;  %v276_v27 = vld [vmem:[#allocation2 + $0x718] sm:$0xff]  ;;  %v3629_v18 = vcombine.low %v428_v6, %v432_v7 }
 0x17c   :  { %3098 = vmatpush1.bf16.msra.mxu0 %v3405_v33  ;;  %v280_v11 = vld [vmem:[#allocation2 + $0x738] sm:$0xff] }
 0x17d   :  { %3137 = vmatpush1.bf16.msra.mxu1 %v3549_v34  ;;  %3099 = vmatprep.subr.bf16.mxu0 %v3398_v2  ;;  %v420_v13 = vld [vmem:[#allocation2 + $0xb98] sm:$0xff]  ;;  %v3478_v19 = vcombine.high %v276_v27, %v280_v11  ;;  %v3477_v30 = vcombine.low %v276_v27, %v280_v11  ;;  %v466_v27 = vrot.slane %v3847_v4, %v465_v56 }
 0x17e   :  { %3138 = vmatprep.subr.bf16.mxu1 %v3542_v37  ;;  %v424_v16 = vld [vmem:[#allocation2 + $0xbb8] sm:$0xff] }
 0x17f   :  { %v3622_v20 = vcombine.high %v420_v13, %v424_v16  ;;  %v268_v22 = vld [vmem:[#allocation2 + $0x6d8] sm:$0xff]  ;;  %v3621_v32 = vcombine.low %v420_v13, %v424_v16 }
 0x180   :  { %3100 = vmatpush1.bf16.msra.mxu0 %v3397_v41  ;;  %v272_v23 = vld [vmem:[#allocation2 + $0x6f8] sm:$0xff] }
 0x181   :  { %3139 = vmatpush1.bf16.msra.mxu1 %v3541_v42  ;;  %3101 = vmatprep.subr.bf16.mxu0 %v3390_v14  ;;  %v412_v26 = vld [vmem:[#allocation2 + $0xb58] sm:$0xff]  ;;  %v3470_v33 = vcombine.high %v268_v22, %v272_v23  ;;  %v3469_v21 = vcombine.low %v268_v22, %v272_v23 }
 0x182   :  { %3140 = vmatprep.subr.bf16.mxu1 %v3534_v43  ;;  %v416_v29 = vld [vmem:[#allocation2 + $0xb78] sm:$0xff] }
 0x183   :  { %v3614_v34 = vcombine.high %v412_v26, %v416_v29  ;;  %v260_v2 = vld [vmem:[#allocation2 + $0x698] sm:$0xff]  ;;  %v3613_v40 = vcombine.low %v412_v26, %v416_v29 }
 0x184   :  { %3102 = vmatpush1.bf16.msra.mxu0 %v3389_v36  ;;  %v264_v37 = vld [vmem:[#allocation2 + $0x6b8] sm:$0xff] }
 0x185   :  { %3141 = vmatpush1.bf16.msra.mxu1 %v3533_v49  ;;  %3103 = vmatprep.subr.bf16.mxu0 %v3382_v50  ;;  %v404_v38 = vld [vmem:[#allocation2 + $0xb18] sm:$0xff]  ;;  %v3462_v41 = vcombine.high %v260_v2, %v264_v37  ;;  %v3461_v46 = vcombine.low %v260_v2, %v264_v37  ;;  %v2736_v49 = vpop.f32.mrf.mxu1 }
 0x186   :  { %3142 = vmatprep.subr.bf16.mxu1 %v3526_v51  ;;  %v408_v39 = vld [vmem:[#allocation2 + $0xb38] sm:$0xff] }
 0x187   :  { %v3606_v42 = vcombine.high %v404_v38, %v408_v39  ;;  %v252_v14 = vld [vmem:[#allocation2 + $0x658] sm:$0xff]  ;;  %v3605_v48 = vcombine.low %v404_v38, %v408_v39 }
 0x188   :  { %3104 = vmatpush1.bf16.msra.mxu0 %v3381_v54  ;;  %v256_v43 = vld [vmem:[#allocation2 + $0x678] sm:$0xff]  ;;  %v461_v54 = vsub.s32 2, %v3842_v31 }
 0x189   :  { %3143 = vmatpush1.bf16.msra.mxu1 %v3525_v55  ;;  %3105 = vmatprep.subr.bf16.mxu0 %v3502_v15  ;;  %v396_v44 = vld [vmem:[#allocation2 + $0xad8] sm:$0xff]  ;;  %v3454_v36 = vcombine.high %v252_v14, %v256_v43  ;;  %v3453_v53 = vcombine.low %v252_v14, %v256_v43 }
 0x18a   :  { %3144 = vmatprep.subr.bf16.mxu1 %v3518_v57  ;;  %v400_v45 = vld [vmem:[#allocation2 + $0xaf8] sm:$0xff]  ;;  %v2738_v57 = vpop.f32.mrf.mxu1  ;;  %v462_v3 = vrot.slane %v3847_v4, %v461_v54 }
 0x18b   :  { %v3598_v50 = vcombine.high %v396_v44, %v400_v45  ;;  %v244_v51 = vld [vmem:[#allocation2 + $0x618] sm:$0xff]  ;;  %v3597_v55 = vcombine.low %v396_v44, %v400_v45  ;;  %v2739_v29 = vadd.f32 %v2738_v57, %v466_v27 }
 0x18c   :  { %3106 = vmatpush2.bf16.msra.mxu0 %v3501_v63  ;;  %v248_v52 = vld [vmem:[#allocation2 + $0x638] sm:$0xff] }
 0x18d   :  { %3145 = vmatpush1.bf16.msra.mxu1 %v3517_v0  ;;  %3107 = vmatprep.subr.bf16.mxu0 %v3494_v1  ;;  %v388_v59 = vld [vmem:[#allocation2 + $0xa98] sm:$0xff]  ;;  %v3446_v15 = vcombine.high %v244_v51, %v248_v52 }
 0x18e   :  { %3146 = vmatprep.subr.bf16.mxu1 %v3510_v12  ;;  %v392_v47 = vld [vmem:[#allocation2 + $0xab8] sm:$0xff]  ;;  %v3445_v12 = vcombine.low %v244_v51, %v248_v52 }
 0x18f   :  { %v3590_v58 = vcombine.high %v388_v59, %v392_v47  ;;  %v444_v60 = vld [vmem:[#allocation2 + $0xc58] sm:$0xff]  ;;  %v3589_v6 = vcombine.low %v388_v59, %v392_v47 }
 0x190   :  { %3108 = vmatpush2.bf16.msra.mxu0 %v3493_v8  ;;  %v448_v61 = vld [vmem:[#allocation2 + $0xc78] sm:$0xff]  ;;  %v2740_v8 = vpop.f32.mrf.mxu1 }
 0x191   :  { %3147 = vmatpush1.bf16.msra.mxu1 %v3509_v24  ;;  %3109 = vmatprep.subr.bf16.mxu0 %v3486_v9  ;;  %v380_v0 = vld [vmem:[#allocation2 + $0xa58] sm:$0xff]  ;;  %v3646_v7 = vcombine.high %v444_v60, %v448_v61  ;;  %v2741_v37 = vadd.f32 %v2740_v8, %v462_v3 }
 0x192   :  { %3148 = vmatprep.subr.bf16.mxu1 %v3630_v10  ;;  %v384_v1 = vld [vmem:[#allocation2 + $0xa78] sm:$0xff]  ;;  %v2742_v23 = vpop.f32.mrf.mxu1 }
 0x193   :  { %v3582_v24 = vcombine.high %v380_v0, %v384_v1  ;;  %v436_v9 = vld [vmem:[#allocation2 + $0xc18] sm:$0xff] }
 0x194   :  { %3110 = vmatpush2.bf16.msra.mxu0 %v3485_v17  ;;  %v440_v10 = vld [vmem:[#allocation2 + $0xc38] sm:$0xff]  ;;  %v3645_v17 = vcombine.low %v444_v60, %v448_v61 }
 0x195   :  { %3149 = vmatpush2.bf16.msra.mxu1 %v3629_v18  ;;  %3111 = vmatprep.subr.bf16.mxu0 %v3478_v19  ;;  %v372_v13 = vld [vmem:[#allocation2 + $0xa18] sm:$0xff]  ;;  %v2737_v18 = vadd.f32 %v2736_v49, %v462_v3  ;;  %v3638_v22 = vcombine.high %v436_v9, %v440_v10  ;;  %v3637_v2 = vcombine.low %v436_v9, %v440_v10 }
 0x196   :  { %3150 = vmatprep.subr.bf16.mxu1 %v3622_v20  ;;  %v376_v16 = vld [vmem:[#allocation2 + $0xa38] sm:$0xff]  ;;  %v3581_v20 = vcombine.low %v380_v0, %v384_v1 }
 0x197   :  { %v3574_v26 = vcombine.high %v372_v13, %v376_v16 }
 0x198   :  { %3112 = vmatpush2.bf16.msra.mxu0 %v3477_v30 }
 0x199   :  { %3151 = vmatpush2.bf16.msra.mxu1 %v3621_v32  ;;  %3113 = vmatprep.subr.bf16.mxu0 %v3470_v33 }
 0x19a   :  { %3152 = vmatprep.subr.bf16.mxu1 %v3614_v34  ;;  %v3573_v34 = vcombine.low %v372_v13, %v376_v16 }
 0x19c   :  { %3114 = vmatpush2.bf16.msra.mxu0 %v3469_v21 }
 0x19d   :  { %3153 = vmatpush2.bf16.msra.mxu1 %v3613_v40  ;;  %3115 = vmatprep.subr.bf16.mxu0 %v3462_v41  ;;  %v2743_v41 = vadd.f32 %v2742_v23, %v466_v27 }
 0x19e   :  { %3154 = vmatprep.subr.bf16.mxu1 %v3606_v42 }
 0x1a0   :  { %3116 = vmatpush2.bf16.msra.mxu0 %v3461_v46 }
 0x1a1   :  { %3155 = vmatpush2.bf16.msra.mxu1 %v3605_v48  ;;  %3117 = vmatprep.subr.bf16.mxu0 %v3454_v36 }
 0x1a2   :  { %3156 = vmatprep.subr.bf16.mxu1 %v3598_v50 }
 0x1a3   :  { %v2779_v63 = vpop.f32.mrf.mxu0 }
 0x1a4   :  { %3118 = vmatpush2.bf16.msra.mxu0 %v3453_v53  ;;  %v2780_v30 = vadd.f32 %v2779_v63, %v2737_v18  ;;  %v469_v53 = vsub.s32 4, %v3842_v31 }
 0x1a5   :  { %3157 = vmatpush2.bf16.msra.mxu1 %v3597_v55  ;;  %v2781_v35 = vpop.f32.mrf.mxu0  ;;  %3119 = vmatprep.subr.bf16.mxu0 %v3446_v15 }
 0x1a6   :  { %3158 = vmatprep.subr.bf16.mxu1 %v3590_v58  ;;  %v2782_v38 = vadd.f32 %v2781_v35, %v2739_v29  ;;  %v477_v29 = vsub.s32 6, %v3842_v31 }
 0x1a7   :  { %v2783_v11 = vpop.f32.mrf.mxu0 }
 0x1a8   :  { %3120 = vmatpush2.bf16.msra.mxu0 %v3445_v12  ;;  %v2784_v42 = vadd.f32 %v2783_v11, %v2741_v37 }
 0x1a9   :  { %3159 = vmatpush2.bf16.msra.mxu1 %v3589_v6  ;;  %v2785_v19 = vpop.f32.mrf.mxu0  ;;  %3187 = vmatprep.subr.bf16.mxu0 %v3646_v7 }
 0x1aa   :  { %3160 = vmatprep.subr.bf16.mxu1 %v3582_v24  ;;  %v2786_v45 = vadd.f32 %v2785_v19, %v2743_v41 }
 0x1ab   :  { %v2865_v32 = vpop.f32.mrf.mxu0  ;;  %3122 = vmatmul.mubr.bf16.vlgmr.msra.gmra.mxu0 %v3822_v5 }
 0x1ac   :  { %v2822_v33 = vpop.f32.mrf.mxu1  ;;  %3188 = vmatpush1.bf16.msra.mxu0 %v3645_v17  ;;  %3207 = vmatprep.mubr.bf16.mxu0 %v3721_v28 }
 0x1ad   :  { %v2823_v39 = vadd.f32 %v2822_v33, %v2780_v30  ;;  %3161 = vmatpush2.bf16.msra.mxu1 %v3581_v20  ;;  %v2867_v21 = vpop.f32.mrf.mxu0  ;;  %3189 = vmatprep.subr.bf16.mxu0 %v3638_v22 }
 0x1ae   :  { %v2824_v40 = vpop.f32.mrf.mxu1  ;;  %3162 = vmatprep.subr.bf16.mxu1 %v3574_v26 }
 0x1af   :  { %v2866_v14 = vadd.f32 %v2865_v32, %v2823_v39  ;;  %v2825_v43 = vadd.f32 %v2824_v40, %v2782_v38  ;;  %v2869_v5 = vpop.f32.mrf.mxu0  ;;  %v481_v32 = vsub.s32 7, %v3842_v31 }
 0x1b0   :  { %v2826_v44 = vpop.f32.mrf.mxu1  ;;  %3190 = vmatpush1.bf16.msra.mxu0 %v3637_v2 }
 0x1b1   :  { %3220 = vst [vmem:[%s3934_s3 + $0x10] sm:$0xff] %v2866_v14  ;;  %v2868_v28 = vadd.f32 %v2867_v21, %v2825_v43  ;;  %v2827_v46 = vadd.f32 %v2826_v44, %v2784_v42  ;;  %3163 = vmatpush2.bf16.msra.mxu1 %v3573_v34  ;;  %v2871_v50 = vpop.f32.mrf.mxu0  ;;  %v478_v34 = vrot.slane %v3847_v4, %v477_v29 }
 0x1b2   :  { %v2828_v48 = vpop.f32.mrf.mxu1  ;;  %v482_v38 = vrot.slane %v3847_v4, %v481_v32 }
 0x1b3   :  { %3221 = vst [vmem:[%s3934_s3 + $0x18] sm:$0xff] %v2868_v28  ;;  %v2870_v36 = vadd.f32 %v2869_v5, %v2827_v46  ;;  %v2829_v49 = vadd.f32 %v2828_v48, %v2786_v45  ;;  %3650 = vmatmul.mubr.msk.bf16.vlgmr.msra.gmra.mxu0 %vm2526_vm0, %v3835_v25  ;;  %v473_v25 = vsub.s32 5, %v3842_v31 }
 0x1b4   :  { %3165 = vmatmul.mubr.bf16.vlgmr.msra.gmra.mxu1 %v3866_v62  ;;  %v470_v62 = vrot.slane %v3847_v4, %v469_v53 }
 0x1b5   :  { %3228 = vst [vmem:[%s3934_s3 + $0x50] sm:$0xff] %v2870_v36  ;;  %v2872_v51 = vadd.f32 %v2871_v50, %v2829_v49  ;;  %v474_v57 = vrot.slane %v3847_v4, %v473_v25 }
 0x1b7   :  { %3229 = vst [vmem:[%s3934_s3 + $0x58] sm:$0xff] %v2872_v51 }
 0x1eb   :  { %v2908_v47 = vpop.f32.mrf.mxu0 }
 0x1ec   :  { %v2951_v52 = vpop.f32.mrf.mxu1  ;;  %v2909_v60 = vadd.f32 %v2908_v47, %v470_v62 }
 0x1ed   :  { %v2910_v55 = vpop.f32.mrf.mxu0 }
 0x1ee   :  { %v2953_v59 = vpop.f32.mrf.mxu1  ;;  %v2911_v56 = vadd.f32 %v2910_v55, %v474_v57  ;;  %v2952_v0 = vadd.f32 %v2951_v52, %v2909_v60 }
 0x1ef   :  { %v2912_v58 = vpop.f32.mrf.mxu0 }
 0x1f0   :  { %v2955_v54 = vpop.f32.mrf.mxu1  ;;  %v2913_v1 = vadd.f32 %v2912_v58, %v470_v62  ;;  %v2954_v35 = vadd.f32 %v2953_v59, %v2911_v56 }
 0x1f1   :  { %v2914_v63 = vpop.f32.mrf.mxu0 }
 0x1f2   :  { %v2957_v15 = vpop.f32.mrf.mxu1  ;;  %v2915_v6 = vadd.f32 %v2914_v63, %v474_v57  ;;  %v2956_v24 = vadd.f32 %v2955_v54, %v2913_v1 }
 0x1f4   :  { %v3037_v61 = vpop.f32.mrf.mxu1  ;;  %v2958_v13 = vadd.f32 %v2957_v15, %v2915_v6 }
 0x1f6   :  { %v3039_v12 = vpop.f32.mrf.mxu1 }
 0x1f8   :  { %v3041_v27 = vpop.f32.mrf.mxu1 }
 0x1fa   :  { %v3043_v22 = vpop.f32.mrf.mxu1 }
 0x22b   :  { %v2994_v3 = vpop.f32.mrf.mxu0 }
 0x22c   :  { %v2995_v7 = vadd.f32 %v2994_v3, %v2952_v0 }
 0x22d   :  { %v2996_v8 = vpop.f32.mrf.mxu0 }
 0x22e   :  { %v3038_v9 = vadd.f32 %v3037_v61, %v2995_v7  ;;  %v2997_v10 = vadd.f32 %v2996_v8, %v2954_v35 }
 0x22f   :  { %v2998_v11 = vpop.f32.mrf.mxu0 }
 0x230   :  { %3222 = vst [vmem:[%s3934_s3 + $0x20] sm:$0xff] %v3038_v9  ;;  %v3040_v16 = vadd.f32 %v3039_v12, %v2997_v10  ;;  %v2999_v17 = vadd.f32 %v2998_v11, %v2956_v24 }
 0x231   :  { %v3000_v18 = vpop.f32.mrf.mxu0 }
 0x232   :  { %3223 = vst [vmem:[%s3934_s3 + $0x28] sm:$0xff] %v3040_v16  ;;  %v3042_v19 = vadd.f32 %v3041_v27, %v2999_v17  ;;  %v3001_v20 = vadd.f32 %v3000_v18, %v2958_v13 }
 0x234   :  { %3230 = vst [vmem:[%s3934_s3 + $0x60] sm:$0xff] %v3042_v19  ;;  %v3044_v23 = vadd.f32 %v3043_v22, %v3001_v20  ;;  %v3080_v26 = vpop.f32.mrf.mxu1 }
 0x235   :  { %v3081_v21 = vadd.f32 %v3080_v26, %v478_v34 }
 0x236   :  { %3231 = vst [vmem:[%s3934_s3 + $0x68] sm:$0xff] %v3044_v23  ;;  %v3082_v30 = vpop.f32.mrf.mxu1 }
 0x237   :  { %v3083_v42 = vadd.f32 %v3082_v30, %v482_v38 }
 0x238   :  { %v3084_v37 = vpop.f32.mrf.mxu1 }
 0x239   :  { %v3085_v5 = vadd.f32 %v3084_v37, %v478_v34 }
 0x23a   :  { %v3086_v41 = vpop.f32.mrf.mxu1 }
 0x23b   :  { %v3087_v48 = vadd.f32 %v3086_v41, %v482_v38 }
 0x26b   :  { %v3123_v33 = vpop.f32.mrf.mxu0 }
 0x26c   :  { %v3124_v14 = vadd.f32 %v3123_v33, %v3081_v21 }
 0x26d   :  { %v3125_v2 = vpop.f32.mrf.mxu0 }
 0x26e   :  { %v3126_v45 = vadd.f32 %v3125_v2, %v3083_v42 }
 0x26f   :  { %v3127_v39 = vpop.f32.mrf.mxu0 }
 0x270   :  { %v3128_v36 = vadd.f32 %v3127_v39, %v3085_v5 }
 0x271   :  { %v3129_v40 = vpop.f32.mrf.mxu0 }
 0x272   :  { %v3130_v4 = vadd.f32 %v3129_v40, %v3087_v48 }
 0x273   :  { %v3209_v43 = vpop.f32.mrf.mxu0 }
 0x274   :  { %v3166_v44 = vpop.f32.mrf.mxu1 }
 0x275   :  { %v3167_v28 = vadd.f32 %v3166_v44, %v3124_v14  ;;  %v3211_v46 = vpop.f32.mrf.mxu0 }
 0x276   :  { %v3168_v31 = vpop.f32.mrf.mxu1 }
 0x277   :  { %v3210_v49 = vadd.f32 %v3209_v43, %v3167_v28  ;;  %v3169_v50 = vadd.f32 %v3168_v31, %v3126_v45  ;;  %v3213_v52 = vpop.f32.mrf.mxu0 }
 0x278   :  { %v3170_v51 = vpop.f32.mrf.mxu1 }
 0x279   :  { %3224 = vst [vmem:[%s3934_s3 + $0x30] sm:$0xff] %v3210_v49  ;;  %v3212_v59 = vadd.f32 %v3211_v46, %v3169_v50  ;;  %v3171_v47 = vadd.f32 %v3170_v51, %v3128_v36  ;;  %v3215_v55 = vpop.f32.mrf.mxu0 }
 0x27a   :  { %v3172_v53 = vpop.f32.mrf.mxu1 }
 0x27b   :  { %3225 = vst [vmem:[%s3934_s3 + $0x38] sm:$0xff] %v3212_v59  ;;  %v3214_v54 = vadd.f32 %v3213_v52, %v3171_v47  ;;  %v3173_v25 = vadd.f32 %v3172_v53, %v3130_v4 }
 0x27d   :  { %3232 = vst [vmem:[%s3934_s3 + $0x70] sm:$0xff] %v3214_v54  ;;  %v3216_v62 = vadd.f32 %v3215_v55, %v3173_v25 }
 0x27f   :  { %3233 = vst [vmem:[%s3934_s3 + $0x78] sm:$0xff] %v3216_v62 }
 0x280   :  { %3238 = vsyncpa [#allocation3], 1 }
 0x281   :  { %3239 = vsyncpa [#allocation5], 1 }

// kernel: multi_feature_forward.4
= control target key start
LH: loop header
LB: loop body
LE: loop exit
PB: predicated region body
PF: predicated region fallthrough
CT: control target
= control target key end

     0   :  { %v7253_v3 = vmov 0.0   ;;  %s7248_s1 = inlined_call_operand.vmem [shape: f32[128,512], index: 1, kind: input, shape index: {}]   ;;  %s7249_s0 = inlined_call_operand.vmem [shape: f32[8,2,1024], index: 0, kind: input, shape index: {}]   ;;  %s7250_s3 = inlined_call_operand.vmem [shape: f32[8,2,128], index: 3, kind: output, shape index: {0}]   ;;  %s7251_s2 = inlined_call_operand.vmem [shape: f32[128,512], index: 2, kind: input, shape index: {}]   ;;  %s7252_s4 = inlined_call_operand.vmem [shape: f32[8,2,128], index: 4, kind: output, shape index: {1}]  }
   0x1   :  { %v4601_v0 = vld [vmem:[%s7248_s1 + $0x1e8] sm:$0xff]  ;;  %v4606_v1 = vld [vmem:[%s7248_s1 + $0x1f8] sm:$0xff]  ;;  %v4611_v2 = vld [vmem:[%s7248_s1 + $0x1e0] sm:$0xff]  ;;  %145 = vmatprep.mubr.f32.mxu0 %v7253_v3  ;;  %216 = vmatprep.mubr.f32.mxu1 %v7253_v3 }
   0x2   :  { %7401 = vst [vmem:[#allocation2_spill] sm:$0xff] %v4601_v0  ;;  %7402 = vst [vmem:[#allocation3_spill] sm:$0xff] %v4606_v1  ;;  %81 = vmatprep.subr.mxu0 %v4601_v0  ;;  %152 = vmatprep.subr.mxu1 %v4606_v1  ;;  %v4620_v4 = vld [vmem:[%s7248_s1 + $0x1f0] sm:$0xff]  ;;  %v4625_v5 = vld [vmem:[%s7248_s1 + $0x1c8] sm:$0xff] }
   0x3   :  { %v4630_v6 = vld [vmem:[%s7248_s1 + $0x1d8] sm:$0xff]  ;;  %82 = vmatpush1.msra.mxu0 %v4611_v2  ;;  %153 = vmatpush1.msra.mxu1 %v4620_v4  ;;  %v4637_v7 = vld [vmem:[%s7248_s1 + $0x1c0] sm:$0xff]  ;;  %v4642_v8 = vld [vmem:[%s7248_s1 + $0x1d0] sm:$0xff] }
   0x4   :  { %v4647_v9 = vld [vmem:[%s7248_s1 + $0x1a8] sm:$0xff]  ;;  %83 = vmatprep.subr.mxu0 %v4625_v5  ;;  %154 = vmatprep.subr.mxu1 %v4630_v6  ;;  %v4654_v10 = vld [vmem:[%s7248_s1 + $0x1b8] sm:$0xff]  ;;  %v4659_v11 = vld [vmem:[%s7248_s1 + $0x1a0] sm:$0xff] }
   0x5   :  { %v4664_v12 = vld [vmem:[%s7248_s1 + $0x1b0] sm:$0xff]  ;;  %84 = vmatpush1.msra.mxu0 %v4637_v7  ;;  %155 = vmatpush1.msra.mxu1 %v4642_v8  ;;  %v4671_v13 = vld [vmem:[%s7248_s1 + $0x188] sm:$0xff]  ;;  %v4676_v14 = vld [vmem:[%s7248_s1 + $0x198] sm:$0xff] }
   0x6   :  { %85 = vmatprep.subr.mxu0 %v4647_v9  ;;  %156 = vmatprep.subr.mxu1 %v4654_v10  ;;  %v4683_v15 = vld [vmem:[%s7248_s1 + $0x180] sm:$0xff]  ;;  %v4688_v16 = vld [vmem:[%s7248_s1 + $0x190] sm:$0xff]  ;;  %v4695_v17 = vld [vmem:[%s7248_s1 + $0x168] sm:$0xff] }
   0x7   :  { %86 = vmatpush1.msra.mxu0 %v4659_v11  ;;  %157 = vmatpush1.msra.mxu1 %v4664_v12  ;;  %v4700_v18 = vld [vmem:[%s7248_s1 + $0x178] sm:$0xff]  ;;  %v4707_v19 = vld [vmem:[%s7248_s1 + $0x160] sm:$0xff]  ;;  %v4712_v20 = vld [vmem:[%s7248_s1 + $0x170] sm:$0xff] }
   0x8   :  { %87 = vmatprep.subr.mxu0 %v4671_v13  ;;  %158 = vmatprep.subr.mxu1 %v4676_v14  ;;  %v4719_v21 = vld [vmem:[%s7248_s1 + $0x148] sm:$0xff]  ;;  %v4724_v22 = vld [vmem:[%s7248_s1 + $0x158] sm:$0xff]  ;;  %v4731_v23 = vld [vmem:[%s7248_s1 + $0x140] sm:$0xff] }
   0x9   :  { %88 = vmatpush1.msra.mxu0 %v4683_v15  ;;  %159 = vmatpush1.msra.mxu1 %v4688_v16  ;;  %v4736_v24 = vld [vmem:[%s7248_s1 + $0x150] sm:$0xff]  ;;  %v4743_v25 = vld [vmem:[%s7248_s1 + $0x128] sm:$0xff]  ;;  %v4748_v26 = vld [vmem:[%s7248_s1 + $0x138] sm:$0xff] }
   0xa   :  { %89 = vmatprep.subr.mxu0 %v4695_v17  ;;  %160 = vmatprep.subr.mxu1 %v4700_v18  ;;  %v4755_v27 = vld [vmem:[%s7248_s1 + $0x120] sm:$0xff]  ;;  %v4760_v28 = vld [vmem:[%s7248_s1 + $0x130] sm:$0xff]  ;;  %v4767_v29 = vld [vmem:[%s7248_s1 + $0x108] sm:$0xff] }
   0xb   :  { %90 = vmatpush1.msra.mxu0 %v4707_v19  ;;  %161 = vmatpush1.msra.mxu1 %v4712_v20  ;;  %v4772_v30 = vld [vmem:[%s7248_s1 + $0x118] sm:$0xff]  ;;  %v4779_v31 = vld [vmem:[%s7248_s1 + $0x100] sm:$0xff]  ;;  %v4784_v32 = vld [vmem:[%s7248_s1 + $0x110] sm:$0xff] }
   0xc   :  { %91 = vmatprep.subr.mxu0 %v4719_v21  ;;  %162 = vmatprep.subr.mxu1 %v4724_v22  ;;  %v4791_v33 = vld [vmem:[%s7248_s1 + $0xe8] sm:$0xff]  ;;  %v4796_v34 = vld [vmem:[%s7248_s1 + $0xf8] sm:$0xff]  ;;  %v4803_v35 = vld [vmem:[%s7248_s1 + $0xe0] sm:$0xff] }
   0xd   :  { %92 = vmatpush1.msra.mxu0 %v4731_v23  ;;  %163 = vmatpush1.msra.mxu1 %v4736_v24  ;;  %v4808_v36 = vld [vmem:[%s7248_s1 + $0xf0] sm:$0xff]  ;;  %v4815_v37 = vld [vmem:[%s7248_s1 + $0xc8] sm:$0xff]  ;;  %v4820_v38 = vld [vmem:[%s7248_s1 + $0xd8] sm:$0xff] }
   0xe   :  { %93 = vmatprep.subr.mxu0 %v4743_v25  ;;  %164 = vmatprep.subr.mxu1 %v4748_v26  ;;  %v4827_v39 = vld [vmem:[%s7248_s1 + $0xc0] sm:$0xff]  ;;  %v4832_v40 = vld [vmem:[%s7248_s1 + $0xd0] sm:$0xff]  ;;  %v4839_v41 = vld [vmem:[%s7248_s1 + $0xa8] sm:$0xff] }
   0xf   :  { %94 = vmatpush1.msra.mxu0 %v4755_v27  ;;  %165 = vmatpush1.msra.mxu1 %v4760_v28  ;;  %v4844_v42 = vld [vmem:[%s7248_s1 + $0xb8] sm:$0xff]  ;;  %v4851_v43 = vld [vmem:[%s7248_s1 + $0xa0] sm:$0xff]  ;;  %v4856_v44 = vld [vmem:[%s7248_s1 + $0xb0] sm:$0xff] }
  0x10   :  { %95 = vmatprep.subr.mxu0 %v4767_v29  ;;  %166 = vmatprep.subr.mxu1 %v4772_v30  ;;  %v4863_v45 = vld [vmem:[%s7248_s1 + $0x88] sm:$0xff]  ;;  %v4868_v46 = vld [vmem:[%s7248_s1 + $0x98] sm:$0xff]  ;;  %v4875_v47 = vld [vmem:[%s7248_s1 + $0x80] sm:$0xff] }
  0x11   :  { %96 = vmatpush1.msra.mxu0 %v4779_v31  ;;  %167 = vmatpush1.msra.mxu1 %v4784_v32  ;;  %7403 = vst [vmem:[#allocation4_spill] sm:$0xff] %v4875_v47  ;;  %v4880_v48 = vld [vmem:[%s7248_s1 + $0x90] sm:$0xff]  ;;  %v4887_v49 = vld [vmem:[%s7248_s1 + $0x68] sm:$0xff]  ;;  %v4892_v50 = vld [vmem:[%s7248_s1 + $0x78] sm:$0xff] }
  0x12   :  { %97 = vmatprep.subr.mxu0 %v4791_v33  ;;  %168 = vmatprep.subr.mxu1 %v4796_v34  ;;  %7404 = vst [vmem:[#allocation5_spill] sm:$0xff] %v4880_v48  ;;  %7405 = vst [vmem:[#allocation6_spill] sm:$0xff] %v4887_v49  ;;  %v4899_v51 = vld [vmem:[%s7248_s1 + $0x60] sm:$0xff]  ;;  %v4904_v52 = vld [vmem:[%s7248_s1 + $0x70] sm:$0xff] }
  0x13   :  { %98 = vmatpush1.msra.mxu0 %v4803_v35  ;;  %169 = vmatpush1.msra.mxu1 %v4808_v36  ;;  %7406 = vst [vmem:[#allocation7_spill] sm:$0xff] %v4892_v50  ;;  %7407 = vst [vmem:[#allocation8_spill] sm:$0xff] %v4899_v51  ;;  %v4911_v53 = vld [vmem:[%s7248_s1 + $0x48] sm:$0xff]  ;;  %v4916_v54 = vld [vmem:[%s7248_s1 + $0x58] sm:$0xff] }
  0x14   :  { %99 = vmatprep.subr.mxu0 %v4815_v37  ;;  %170 = vmatprep.subr.mxu1 %v4820_v38  ;;  %7408 = vst [vmem:[#allocation9_spill] sm:$0xff] %v4904_v52  ;;  %7409 = vst [vmem:[#allocation10_spill] sm:$0xff] %v4911_v53  ;;  %v4923_v55 = vld [vmem:[%s7248_s1 + $0x40] sm:$0xff]  ;;  %v4928_v56 = vld [vmem:[%s7248_s1 + $0x50] sm:$0xff] }
  0x15   :  { %100 = vmatpush1.msra.mxu0 %v4827_v39  ;;  %171 = vmatpush1.msra.mxu1 %v4832_v40  ;;  %7410 = vst [vmem:[#allocation11_spill] sm:$0xff] %v4916_v54  ;;  %7411 = vst [vmem:[#allocation12_spill] sm:$0xff] %v4923_v55  ;;  %v4935_v57 = vld [vmem:[%s7248_s1 + $0x28] sm:$0xff]  ;;  %v4940_v58 = vld [vmem:[%s7248_s1 + $0x38] sm:$0xff] }
  0x16   :  { %101 = vmatprep.subr.mxu0 %v4839_v41  ;;  %172 = vmatprep.subr.mxu1 %v4844_v42  ;;  %7412 = vst [vmem:[#allocation13_spill] sm:$0xff] %v4928_v56  ;;  %7413 = vst [vmem:[#allocation14_spill] sm:$0xff] %v4935_v57  ;;  %v4947_v59 = vld [vmem:[%s7248_s1 + $0x20] sm:$0xff]  ;;  %v4952_v60 = vld [vmem:[%s7248_s1 + $0x30] sm:$0xff] }
  0x17   :  { %102 = vmatpush1.msra.mxu0 %v4851_v43  ;;  %173 = vmatpush1.msra.mxu1 %v4856_v44  ;;  %7414 = vst [vmem:[#allocation15_spill] sm:$0xff] %v4940_v58  ;;  %7415 = vst [vmem:[#allocation16_spill] sm:$0xff] %v4947_v59  ;;  %v4959_v61 = vld [vmem:[%s7248_s1 + $0x8] sm:$0xff]  ;;  %v4964_v62 = vld [vmem:[%s7248_s1 + $0x18] sm:$0xff] }
  0x18   :  { %103 = vmatprep.subr.mxu0 %v4863_v45  ;;  %174 = vmatprep.subr.mxu1 %v4868_v46  ;;  %7416 = vst [vmem:[#allocation17_spill] sm:$0xff] %v4952_v60  ;;  %7417 = vst [vmem:[#allocation18_spill] sm:$0xff] %v4959_v61  ;;  %v4971_v63 = vld [vmem:[%s7248_s1] sm:$0xff]  ;;  %v4976_v3 = vld [vmem:[%s7248_s1 + $0x10] sm:$0xff] }
  0x19   :  { %104 = vmatpush1.msra.mxu0 %v4875_v47  ;;  %175 = vmatpush1.msra.mxu1 %v4880_v48  ;;  %7418 = vst [vmem:[#allocation19_spill] sm:$0xff] %v4964_v62  ;;  %7419 = vst [vmem:[#allocation20_spill] sm:$0xff] %v4971_v63 }
  0x1a   :  { %105 = vmatprep.subr.mxu0 %v4887_v49  ;;  %176 = vmatprep.subr.mxu1 %v4892_v50  ;;  %7420 = vst [vmem:[#allocation21_spill] sm:$0xff] %v4976_v3 }
  0x1b   :  { %106 = vmatpush1.msra.mxu0 %v4899_v51  ;;  %177 = vmatpush1.msra.mxu1 %v4904_v52 }
  0x1c   :  { %107 = vmatprep.subr.mxu0 %v4911_v53  ;;  %178 = vmatprep.subr.mxu1 %v4916_v54 }
  0x1d   :  { %108 = vmatpush1.msra.mxu0 %v4923_v55  ;;  %179 = vmatpush1.msra.mxu1 %v4928_v56 }
  0x1e   :  { %109 = vmatprep.subr.mxu0 %v4935_v57  ;;  %180 = vmatprep.subr.mxu1 %v4940_v58  ;;  %v7421_v58 = vmov 0.0  }
  0x1f   :  { %110 = vmatpush1.msra.mxu0 %v4947_v59  ;;  %181 = vmatpush1.msra.mxu1 %v4952_v60 }
  0x20   :  { %111 = vmatprep.subr.mxu0 %v4959_v61  ;;  %182 = vmatprep.subr.mxu1 %v4964_v62 }
  0x21   :  { %112 = vmatpush1.msra.mxu0 %v4971_v63  ;;  %183 = vmatpush1.msra.mxu1 %v4976_v3 }
  0x22   :  { %146 = vmatmul.mubr.f32.vlgmr.msra.gmra.mxu0 %v7421_v58  ;;  %217 = vmatmul.mubr.f32.vlgmr.msra.gmra.mxu1 %v7421_v58 }
  0x23   :  { %344 = vmatprep.subr.mxu0 %v4601_v0  ;;  %415 = vmatprep.subr.mxu1 %v4606_v1 }
  0x24   :  { %345 = vmatpush1.msra.mxu0 %v4611_v2  ;;  %416 = vmatpush1.msra.mxu1 %v4620_v4 }
  0x25   :  { %346 = vmatprep.subr.mxu0 %v4625_v5  ;;  %417 = vmatprep.subr.mxu1 %v4630_v6 }
  0x26   :  { %347 = vmatpush1.msra.mxu0 %v4637_v7  ;;  %418 = vmatpush1.msra.mxu1 %v4642_v8 }
  0x27   :  { %348 = vmatprep.subr.mxu0 %v4647_v9  ;;  %419 = vmatprep.subr.mxu1 %v4654_v10 }
  0x28   :  { %349 = vmatpush1.msra.mxu0 %v4659_v11  ;;  %420 = vmatpush1.msra.mxu1 %v4664_v12 }
  0x29   :  { %350 = vmatprep.subr.mxu0 %v4671_v13  ;;  %421 = vmatprep.subr.mxu1 %v4676_v14 }
  0x2a   :  { %351 = vmatpush1.msra.mxu0 %v4683_v15  ;;  %422 = vmatpush1.msra.mxu1 %v4688_v16 }
  0x2b   :  { %352 = vmatprep.subr.mxu0 %v4695_v17  ;;  %423 = vmatprep.subr.mxu1 %v4700_v18 }
  0x2c   :  { %353 = vmatpush1.msra.mxu0 %v4707_v19  ;;  %424 = vmatpush1.msra.mxu1 %v4712_v20 }
  0x2d   :  { %354 = vmatprep.subr.mxu0 %v4719_v21  ;;  %425 = vmatprep.subr.mxu1 %v4724_v22 }
  0x2e   :  { %355 = vmatpush1.msra.mxu0 %v4731_v23  ;;  %426 = vmatpush1.msra.mxu1 %v4736_v24 }
  0x2f   :  { %356 = vmatprep.subr.mxu0 %v4743_v25  ;;  %427 = vmatprep.subr.mxu1 %v4748_v26 }
  0x30   :  { %357 = vmatpush1.msra.mxu0 %v4755_v27  ;;  %428 = vmatpush1.msra.mxu1 %v4760_v28 }
  0x31   :  { %358 = vmatprep.subr.mxu0 %v4767_v29  ;;  %429 = vmatprep.subr.mxu1 %v4772_v30 }
  0x32   :  { %359 = vmatpush1.msra.mxu0 %v4779_v31  ;;  %430 = vmatpush1.msra.mxu1 %v4784_v32 }
  0x33   :  { %360 = vmatprep.subr.mxu0 %v4791_v33  ;;  %431 = vmatprep.subr.mxu1 %v4796_v34 }
  0x34   :  { %361 = vmatpush1.msra.mxu0 %v4803_v35  ;;  %432 = vmatpush1.msra.mxu1 %v4808_v36 }
  0x35   :  { %362 = vmatprep.subr.mxu0 %v4815_v37  ;;  %433 = vmatprep.subr.mxu1 %v4820_v38 }
  0x36   :  { %363 = vmatpush1.msra.mxu0 %v4827_v39  ;;  %434 = vmatpush1.msra.mxu1 %v4832_v40 }
  0x37   :  { %364 = vmatprep.subr.mxu0 %v4839_v41  ;;  %435 = vmatprep.subr.mxu1 %v4844_v42 }
  0x38   :  { %365 = vmatpush1.msra.mxu0 %v4851_v43  ;;  %436 = vmatpush1.msra.mxu1 %v4856_v44 }
  0x39   :  { %366 = vmatprep.subr.mxu0 %v4863_v45  ;;  %437 = vmatprep.subr.mxu1 %v4868_v46 }
  0x3a   :  { %367 = vmatpush1.msra.mxu0 %v4875_v47  ;;  %438 = vmatpush1.msra.mxu1 %v4880_v48  ;;  %v7422_v47 = vld [vmem:[#allocation15_spill] sm:$0xff] }
  0x3b   :  { %368 = vmatprep.subr.mxu0 %v4887_v49  ;;  %439 = vmatprep.subr.mxu1 %v4892_v50 }
  0x3c   :  { %369 = vmatpush1.msra.mxu0 %v4899_v51  ;;  %440 = vmatpush1.msra.mxu1 %v4904_v52 }
  0x3d   :  { %370 = vmatprep.subr.mxu0 %v4911_v53  ;;  %441 = vmatprep.subr.mxu1 %v4916_v54 }
  0x3e   :  { %371 = vmatpush1.msra.mxu0 %v4923_v55  ;;  %442 = vmatpush1.msra.mxu1 %v4928_v56 }
  0x3f   :  { %372 = vmatprep.subr.mxu0 %v4935_v57  ;;  %443 = vmatprep.subr.mxu1 %v7422_v47  ;;  %v4572_v47 = vmov 1983009808   ;;  %v232_v57 = vlaneseq }
  0x40   :  { %373 = vmatpush1.msra.mxu0 %v4947_v59  ;;  %444 = vmatpush1.msra.mxu1 %v4952_v60  ;;  %v230_v59 = vunpack.c.l.s4 %v4572_v47 }
  0x41   :  { %374 = vmatprep.subr.mxu0 %v4959_v61  ;;  %445 = vmatprep.subr.mxu1 %v4964_v62  ;;  %v233_v56 = vshrl.u32 %v232_v57, 7 }
  0x42   :  { %375 = vmatpush1.msra.mxu0 %v4971_v63  ;;  %408 = vmatprep.mubr.f32.mxu0 %v7421_v58  ;;  %v231_v60 = vunpack.c.0.s8 %v230_v59 }
  0x43   :  { %446 = vmatpush1.msra.mxu1 %v4976_v3  ;;  %479 = vmatprep.mubr.f32.mxu1 %v7421_v58 }
  0x44   :  { %608 = vmatprep.subr.mxu0 %v4601_v0  ;;  %679 = vmatprep.subr.mxu1 %v4606_v1  ;;  %v5054_v62 = vsub.s32 %v231_v60, %v233_v56  ;;  %v16_v1 = vld [vmem:[%s7249_s0] sm:$0xff] }
  0x46   :  { %7423 = vst [vmem:[#allocation22_spill] sm:$0xff] %v5054_v62 }
  0xe2   :  { %v147_v61 = vpop.f32.mrf.mxu0  ;;  %v218_v55 = vpop.f32.mrf.mxu1 }
  0xe4   :  { %v149_v63 = vpop.f32.mrf.mxu0  ;;  %v220_v54 = vpop.f32.mrf.mxu1 }
  0xe5   :  { %v227_v53 = vcombine.low %v147_v61, %v149_v63  ;;  %v228_v52 = vcombine.low %v218_v55, %v220_v54 }
  0xe7   :  { %v235_v3 = vrot.slane %v227_v53, %v5054_v62  ;;  %v242_v58 = vrot.slane %v228_v52, %v5054_v62 }
  0xe9   :  { %v243_v47 = vcombine.low %v235_v3, %v242_v58 }
  0xeb   :  { %v245_v0 = vadd.f32 %v243_v47, %v16_v1 }
  0xed   :  { %v4237_v59 = vmul.f32 -1.442695, %v245_v0  ;;  %v253_v57 = vrot.slane %v245_v0, 2  ;;  %v264_v56 = vrot.slane %v245_v0, 6  ;;  %v261_v61 = vrot.slane %v245_v0, 4 }
  0xef   :  { %4315 = vpow2.f32 %v4237_v59  ;;  %v4238_v51 = vmul.f32 -1.442695, %v253_v57  ;;  %v4239_v60 = vmul.f32 -1.442695, %v264_v56  ;;  %v7424_v56 = vld [vmem:[#allocation4_spill] sm:$0xff] }
  0xf1   :  { %4317 = vpow2.f32 %v4238_v51 }
  0xf2   :  { %4319 = vpow2.f32 %v4239_v60  ;;  %v7425_v60 = vld [vmem:[#allocation7_spill] sm:$0xff] }
  0xfc   :  { %v4316_v50 = vpop.eup %4315 }
  0xfd   :  { %v249_v54 = vadd.f32 1.0, %v4316_v50 }
  0xfe   :  { %v4318_v55 = vpop.eup %4317 }
  0xff   :  { %4321 = vrcp.f32 %v249_v54  ;;  %v258_v52 = vadd.f32 1.0, %v4318_v55  ;;  %v4320_v53 = vpop.eup %4319  ;;  %v7427_v54 = vld [vmem:[#allocation9_spill] sm:$0xff]  ;;  %v7428_v55 = vld [vmem:[#allocation10_spill] sm:$0xff] }
 0x100   :  { %4323 = vtanh.f32 %v261_v61  ;;  %v269_v58 = vadd.f32 1.0, %v4320_v53  ;;  %v7426_v61 = vld [vmem:[#allocation8_spill] sm:$0xff] }
 0x101   :  { %4325 = vrcp.f32 %v258_v52  ;;  %v7429_v52 = vld [vmem:[#allocation11_spill] sm:$0xff]  ;;  %v7430_v53 = vld [vmem:[#allocation12_spill] sm:$0xff] }
 0x102   :  { %4327 = vrcp.f32 %v269_v58  ;;  %v7434_v58 = vld [vmem:[#allocation16_spill] sm:$0xff] }
 0x10c   :  { %v4322_v63 = vpop.eup %4321 }
 0x10d   :  { %v4324_v3 = vpop.eup %4323 }
 0x10e   :  { %v4326_v1 = vpop.eup %4325  ;;  %v273_v59 = vmul.f32 %v4324_v3, %v4322_v63  ;;  %v7431_v63 = vld [vmem:[#allocation13_spill] sm:$0xff]  ;;  %v7432_v3 = vld [vmem:[#allocation14_spill] sm:$0xff] }
 0x10f   :  { %v272_v47 = vmul.f32 0.0, %v4326_v1  ;;  %v4328_v0 = vpop.eup %4327  ;;  %v7433_v1 = vld [vmem:[#allocation15_spill] sm:$0xff] }
 0x111   :  { %v5061_v57 = vadd.f32 %v273_v59, %v272_v47  ;;  %v7435_v47 = vld [vmem:[#allocation17_spill] sm:$0xff]  ;;  %v7436_v59 = vld [vmem:[#allocation18_spill] sm:$0xff] }
 0x113   :  { %4329 = vtanh.f32 %v5061_v57 }
 0x120   :  { %v4330_v50 = vpop.eup %4329 }
 0x121   :  { %v276_v51 = vmul.f32 %v4330_v50, %v4328_v0  ;;  %v7437_v0 = vld [vmem:[#allocation19_spill] sm:$0xff]  ;;  %v7438_v50 = vld [vmem:[#allocation20_spill] sm:$0xff] }
 0x123   :  { %277 = vst [vmem:[%s7250_s3] sm:$0x3] %v276_v51  ;;  %409 = vmatmul.mubr.f32.vlgmr.msra.gmra.mxu0 %v276_v51  ;;  %480 = vmatmul.mubr.f32.vlgmr.msra.gmra.mxu1 %v276_v51  ;;  %v7439_v51 = vmov 0.0  }
 0x124   :  { %609 = vmatpush1.msra.mxu0 %v4611_v2  ;;  %680 = vmatpush1.msra.mxu1 %v4620_v4 }
 0x125   :  { %610 = vmatprep.subr.mxu0 %v4625_v5  ;;  %681 = vmatprep.subr.mxu1 %v4630_v6 }
 0x126   :  { %611 = vmatpush1.msra.mxu0 %v4637_v7  ;;  %682 = vmatpush1.msra.mxu1 %v4642_v8 }
 0x127   :  { %612 = vmatprep.subr.mxu0 %v4647_v9  ;;  %683 = vmatprep.subr.mxu1 %v4654_v10 }
 0x128   :  { %613 = vmatpush1.msra.mxu0 %v4659_v11  ;;  %684 = vmatpush1.msra.mxu1 %v4664_v12 }
 0x129   :  { %614 = vmatprep.subr.mxu0 %v4671_v13  ;;  %685 = vmatprep.subr.mxu1 %v4676_v14 }
 0x12a   :  { %615 = vmatpush1.msra.mxu0 %v4683_v15  ;;  %686 = vmatpush1.msra.mxu1 %v4688_v16 }
 0x12b   :  { %616 = vmatprep.subr.mxu0 %v4695_v17  ;;  %687 = vmatprep.subr.mxu1 %v4700_v18 }
 0x12c   :  { %617 = vmatpush1.msra.mxu0 %v4707_v19  ;;  %688 = vmatpush1.msra.mxu1 %v4712_v20 }
 0x12d   :  { %618 = vmatprep.subr.mxu0 %v4719_v21  ;;  %689 = vmatprep.subr.mxu1 %v4724_v22 }
 0x12e   :  { %619 = vmatpush1.msra.mxu0 %v4731_v23  ;;  %690 = vmatpush1.msra.mxu1 %v4736_v24 }
 0x12f   :  { %620 = vmatprep.subr.mxu0 %v4743_v25  ;;  %691 = vmatprep.subr.mxu1 %v4748_v26 }
 0x130   :  { %621 = vmatpush1.msra.mxu0 %v4755_v27  ;;  %692 = vmatpush1.msra.mxu1 %v4760_v28 }
 0x131   :  { %622 = vmatprep.subr.mxu0 %v4767_v29  ;;  %693 = vmatprep.subr.mxu1 %v4772_v30 }
 0x132   :  { %623 = vmatpush1.msra.mxu0 %v4779_v31  ;;  %694 = vmatpush1.msra.mxu1 %v4784_v32 }
 0x133   :  { %624 = vmatprep.subr.mxu0 %v4791_v33  ;;  %695 = vmatprep.subr.mxu1 %v4796_v34 }
 0x134   :  { %625 = vmatpush1.msra.mxu0 %v4803_v35  ;;  %696 = vmatpush1.msra.mxu1 %v4808_v36 }
 0x135   :  { %626 = vmatprep.subr.mxu0 %v4815_v37  ;;  %697 = vmatprep.subr.mxu1 %v4820_v38 }
 0x136   :  { %627 = vmatpush1.msra.mxu0 %v4827_v39  ;;  %698 = vmatpush1.msra.mxu1 %v4832_v40 }
 0x137   :  { %628 = vmatprep.subr.mxu0 %v4839_v41  ;;  %699 = vmatprep.subr.mxu1 %v4844_v42 }
 0x138   :  { %629 = vmatpush1.msra.mxu0 %v4851_v43  ;;  %700 = vmatpush1.msra.mxu1 %v4856_v44 }
 0x139   :  { %630 = vmatprep.subr.mxu0 %v4863_v45  ;;  %701 = vmatprep.subr.mxu1 %v4868_v46 }
 0x13a   :  { %631 = vmatpush1.msra.mxu0 %v7424_v56  ;;  %702 = vmatpush1.msra.mxu1 %v4880_v48 }
 0x13b   :  { %632 = vmatprep.subr.mxu0 %v4887_v49  ;;  %703 = vmatprep.subr.mxu1 %v7425_v60 }
 0x13c   :  { %633 = vmatpush1.msra.mxu0 %v7426_v61  ;;  %704 = vmatpush1.msra.mxu1 %v7427_v54 }
 0x13d   :  { %634 = vmatprep.subr.mxu0 %v7428_v55  ;;  %705 = vmatprep.subr.mxu1 %v7429_v52  ;;  %v7440_v52 = vld [vmem:[#allocation21_spill] sm:$0xff] }
 0x13e   :  { %635 = vmatpush1.msra.mxu0 %v7430_v53  ;;  %706 = vmatpush1.msra.mxu1 %v7431_v63  ;;  %v7441_v63 = vld [vmem:[#allocation2_spill] sm:$0xff] }
 0x13f   :  { %636 = vmatprep.subr.mxu0 %v7432_v3  ;;  %707 = vmatprep.subr.mxu1 %v7433_v1  ;;  %v7442_v3 = vld [vmem:[#allocation3_spill] sm:$0xff] }
 0x140   :  { %637 = vmatpush1.msra.mxu0 %v7434_v58  ;;  %708 = vmatpush1.msra.mxu1 %v7435_v47 }
 0x141   :  { %638 = vmatprep.subr.mxu0 %v7436_v59  ;;  %709 = vmatprep.subr.mxu1 %v7437_v0 }
 0x142   :  { %639 = vmatpush1.msra.mxu0 %v7438_v50  ;;  %672 = vmatprep.mubr.f32.mxu0 %v7439_v51 }
 0x143   :  { %710 = vmatpush1.msra.mxu1 %v7440_v52  ;;  %743 = vmatprep.mubr.f32.mxu1 %v7439_v51  ;;  %v4240_v52 = vld [vmem:[%s7249_s0 + $0x10] sm:$0xff] }
 0x144   :  { %872 = vmatprep.subr.mxu0 %v7441_v63  ;;  %943 = vmatprep.subr.mxu1 %v7442_v3 }
 0x1e3   :  { %v410_v1 = vpop.f32.mrf.mxu0  ;;  %v481_v58 = vpop.f32.mrf.mxu1 }
 0x1e5   :  { %v412_v53 = vpop.f32.mrf.mxu0  ;;  %v483_v47 = vpop.f32.mrf.mxu1 }
 0x1e6   :  { %v490_v55 = vcombine.low %v410_v1, %v412_v53  ;;  %v491_v59 = vcombine.low %v481_v58, %v483_v47 }
 0x1e8   :  { %v498_v0 = vrot.slane %v490_v55, %v5054_v62  ;;  %v505_v50 = vrot.slane %v491_v59, %v5054_v62 }
 0x1ea   :  { %v506_v54 = vcombine.low %v498_v0, %v505_v50 }
 0x1ec   :  { %v508_v51 = vadd.f32 %v4240_v52, %v506_v54 }
 0x1ee   :  { %v4241_v61 = vmul.f32 -1.442695, %v508_v51  ;;  %v516_v63 = vrot.slane %v508_v51, 2  ;;  %v527_v60 = vrot.slane %v508_v51, 6  ;;  %v524_v53 = vrot.slane %v508_v51, 4 }
 0x1f0   :  { %4331 = vpow2.f32 %v4241_v61  ;;  %v4242_v3 = vmul.f32 -1.442695, %v516_v63  ;;  %v4243_v49 = vmul.f32 -1.442695, %v527_v60 }
 0x1f2   :  { %4333 = vpow2.f32 %v4242_v3 }
 0x1f3   :  { %4335 = vpow2.f32 %v4243_v49 }
 0x1fd   :  { %v4332_v48 = vpop.eup %4331 }
 0x1fe   :  { %v512_v1 = vadd.f32 1.0, %v4332_v48 }
 0x1ff   :  { %v4334_v58 = vpop.eup %4333 }
 0x200   :  { %4337 = vrcp.f32 %v512_v1  ;;  %v521_v55 = vadd.f32 1.0, %v4334_v58  ;;  %v4336_v47 = vpop.eup %4335  ;;  %v5226_v58 = vld [vmem:[%s7248_s1 + $0x1e8] sm:$0xff] }
 0x201   :  { %4339 = vtanh.f32 %v524_v53  ;;  %v532_v52 = vadd.f32 1.0, %v4336_v47  ;;  %7461 = vst [vmem:[#allocation4_spill] sm:$0xff] %v5226_v58  ;;  %v5236_v47 = vld [vmem:[%s7248_s1 + $0x1e0] sm:$0xff] }
 0x202   :  { %4341 = vrcp.f32 %v521_v55  ;;  %v5231_v55 = vld [vmem:[%s7248_s1 + $0x1f8] sm:$0xff] }
 0x203   :  { %4343 = vrcp.f32 %v532_v52  ;;  %7462 = vst [vmem:[#allocation2_spill] sm:$0xff] %v5231_v55  ;;  %v5260_v52 = vld [vmem:[%s7248_s1 + $0x1c0] sm:$0xff] }
 0x20d   :  { %v4338_v59 = vpop.eup %4337 }
 0x20e   :  { %v4340_v0 = vpop.eup %4339 }
 0x20f   :  { %v4342_v54 = vpop.eup %4341  ;;  %v536_v50 = vmul.f32 %v4340_v0, %v4338_v59  ;;  %v5243_v59 = vld [vmem:[%s7248_s1 + $0x1f0] sm:$0xff]  ;;  %v5248_v0 = vld [vmem:[%s7248_s1 + $0x1c8] sm:$0xff] }
 0x210   :  { %v535_v61 = vmul.f32 %v4342_v54, %v5061_v57  ;;  %v4344_v48 = vpop.eup %4343  ;;  %v5253_v54 = vld [vmem:[%s7248_s1 + $0x1d8] sm:$0xff] }
 0x212   :  { %v5139_v63 = vadd.f32 %v536_v50, %v535_v61  ;;  %v5265_v61 = vld [vmem:[%s7248_s1 + $0x1d0] sm:$0xff]  ;;  %v5270_v50 = vld [vmem:[%s7248_s1 + $0x1a8] sm:$0xff] }
 0x214   :  { %4345 = vtanh.f32 %v5139_v63 }
 0x221   :  { %v4346_v60 = vpop.eup %4345 }
 0x222   :  { %v539_v49 = vmul.f32 %v4346_v60, %v4344_v48  ;;  %v5282_v48 = vld [vmem:[%s7248_s1 + $0x1a0] sm:$0xff]  ;;  %v5287_v60 = vld [vmem:[%s7248_s1 + $0x1b0] sm:$0xff] }
 0x224   :  { %4244 = vst [vmem:[%s7250_s3 + $0x2] sm:$0x3] %v539_v49  ;;  %673 = vmatmul.mubr.f32.vlgmr.msra.gmra.mxu0 %v539_v49  ;;  %744 = vmatmul.mubr.f32.vlgmr.msra.gmra.mxu1 %v539_v49  ;;  %v5294_v49 = vld [vmem:[%s7248_s1 + $0x188] sm:$0xff] }
 0x225   :  { %873 = vmatpush1.msra.mxu0 %v4611_v2  ;;  %944 = vmatpush1.msra.mxu1 %v4620_v4  ;;  %v7443_v2 = vld [vmem:[#allocation5_spill] sm:$0xff]  ;;  %v7444_v4 = vld [vmem:[#allocation6_spill] sm:$0xff] }
 0x226   :  { %874 = vmatprep.subr.mxu0 %v4625_v5  ;;  %945 = vmatprep.subr.mxu1 %v4630_v6  ;;  %v7445_v5 = vld [vmem:[#allocation7_spill] sm:$0xff]  ;;  %v7446_v6 = vld [vmem:[#allocation8_spill] sm:$0xff] }
 0x227   :  { %875 = vmatpush1.msra.mxu0 %v4637_v7  ;;  %946 = vmatpush1.msra.mxu1 %v4642_v8  ;;  %v7447_v7 = vld [vmem:[#allocation9_spill] sm:$0xff]  ;;  %v7448_v8 = vld [vmem:[#allocation10_spill] sm:$0xff] }
 0x228   :  { %876 = vmatprep.subr.mxu0 %v4647_v9  ;;  %947 = vmatprep.subr.mxu1 %v4654_v10  ;;  %v7449_v9 = vld [vmem:[#allocation11_spill] sm:$0xff]  ;;  %v7450_v10 = vld [vmem:[#allocation12_spill] sm:$0xff] }
 0x229   :  { %877 = vmatpush1.msra.mxu0 %v4659_v11  ;;  %948 = vmatpush1.msra.mxu1 %v4664_v12  ;;  %v7451_v11 = vld [vmem:[#allocation13_spill] sm:$0xff]  ;;  %v7452_v12 = vld [vmem:[#allocation14_spill] sm:$0xff] }
 0x22a   :  { %878 = vmatprep.subr.mxu0 %v4671_v13  ;;  %949 = vmatprep.subr.mxu1 %v4676_v14  ;;  %v7453_v13 = vld [vmem:[#allocation15_spill] sm:$0xff]  ;;  %v7454_v14 = vld [vmem:[#allocation16_spill] sm:$0xff] }
 0x22b   :  { %879 = vmatpush1.msra.mxu0 %v4683_v15  ;;  %950 = vmatpush1.msra.mxu1 %v4688_v16  ;;  %v7455_v15 = vld [vmem:[#allocation17_spill] sm:$0xff]  ;;  %v7456_v16 = vld [vmem:[#allocation18_spill] sm:$0xff] }
 0x22c   :  { %880 = vmatprep.subr.mxu0 %v4695_v17  ;;  %951 = vmatprep.subr.mxu1 %v4700_v18  ;;  %v7457_v17 = vld [vmem:[#allocation19_spill] sm:$0xff]  ;;  %v7458_v18 = vld [vmem:[#allocation20_spill] sm:$0xff] }
 0x22d   :  { %881 = vmatpush1.msra.mxu0 %v4707_v19  ;;  %952 = vmatpush1.msra.mxu1 %v4712_v20  ;;  %v7459_v19 = vmov 0.0   ;;  %v7460_v20 = vld [vmem:[#allocation21_spill] sm:$0xff] }
 0x22e   :  { %882 = vmatprep.subr.mxu0 %v4719_v21  ;;  %953 = vmatprep.subr.mxu1 %v4724_v22 }
 0x22f   :  { %883 = vmatpush1.msra.mxu0 %v4731_v23  ;;  %954 = vmatpush1.msra.mxu1 %v4736_v24 }
 0x230   :  { %884 = vmatprep.subr.mxu0 %v4743_v25  ;;  %955 = vmatprep.subr.mxu1 %v4748_v26 }
 0x231   :  { %885 = vmatpush1.msra.mxu0 %v4755_v27  ;;  %956 = vmatpush1.msra.mxu1 %v4760_v28 }
 0x232   :  { %886 = vmatprep.subr.mxu0 %v4767_v29  ;;  %957 = vmatprep.subr.mxu1 %v4772_v30  ;;  %v4245_v29 = vld [vmem:[%s7249_s0 + $0x20] sm:$0xff] }
 0x233   :  { %887 = vmatpush1.msra.mxu0 %v4779_v31  ;;  %958 = vmatpush1.msra.mxu1 %v4784_v32 }
 0x234   :  { %888 = vmatprep.subr.mxu0 %v4791_v33  ;;  %959 = vmatprep.subr.mxu1 %v4796_v34 }
 0x235   :  { %889 = vmatpush1.msra.mxu0 %v4803_v35  ;;  %960 = vmatpush1.msra.mxu1 %v4808_v36 }
 0x236   :  { %890 = vmatprep.subr.mxu0 %v4815_v37  ;;  %961 = vmatprep.subr.mxu1 %v4820_v38 }
 0x237   :  { %891 = vmatpush1.msra.mxu0 %v4827_v39  ;;  %962 = vmatpush1.msra.mxu1 %v4832_v40 }
 0x238   :  { %892 = vmatprep.subr.mxu0 %v4839_v41  ;;  %963 = vmatprep.subr.mxu1 %v4844_v42 }
 0x239   :  { %893 = vmatpush1.msra.mxu0 %v4851_v43  ;;  %964 = vmatpush1.msra.mxu1 %v4856_v44 }
 0x23a   :  { %894 = vmatprep.subr.mxu0 %v4863_v45  ;;  %965 = vmatprep.subr.mxu1 %v4868_v46 }
 0x23b   :  { %895 = vmatpush1.msra.mxu0 %v7424_v56  ;;  %966 = vmatpush1.msra.mxu1 %v7443_v2  ;;  %v5299_v2 = vld [vmem:[%s7248_s1 + $0x198] sm:$0xff] }
 0x23c   :  { %896 = vmatprep.subr.mxu0 %v7444_v4  ;;  %967 = vmatprep.subr.mxu1 %v7445_v5  ;;  %v5306_v4 = vld [vmem:[%s7248_s1 + $0x180] sm:$0xff]  ;;  %v5311_v5 = vld [vmem:[%s7248_s1 + $0x190] sm:$0xff] }
 0x23d   :  { %897 = vmatpush1.msra.mxu0 %v7446_v6  ;;  %968 = vmatpush1.msra.mxu1 %v7447_v7  ;;  %v5318_v6 = vld [vmem:[%s7248_s1 + $0x168] sm:$0xff]  ;;  %v5323_v7 = vld [vmem:[%s7248_s1 + $0x178] sm:$0xff] }
 0x23e   :  { %898 = vmatprep.subr.mxu0 %v7448_v8  ;;  %969 = vmatprep.subr.mxu1 %v7449_v9  ;;  %v5330_v8 = vld [vmem:[%s7248_s1 + $0x160] sm:$0xff]  ;;  %v5335_v9 = vld [vmem:[%s7248_s1 + $0x170] sm:$0xff] }
 0x23f   :  { %899 = vmatpush1.msra.mxu0 %v7450_v10  ;;  %970 = vmatpush1.msra.mxu1 %v7451_v11  ;;  %v5342_v10 = vld [vmem:[%s7248_s1 + $0x148] sm:$0xff]  ;;  %v5347_v11 = vld [vmem:[%s7248_s1 + $0x158] sm:$0xff] }
 0x240   :  { %900 = vmatprep.subr.mxu0 %v7452_v12  ;;  %971 = vmatprep.subr.mxu1 %v7453_v13  ;;  %v5354_v12 = vld [vmem:[%s7248_s1 + $0x140] sm:$0xff]  ;;  %v5359_v13 = vld [vmem:[%s7248_s1 + $0x150] sm:$0xff] }
 0x241   :  { %901 = vmatpush1.msra.mxu0 %v7454_v14  ;;  %972 = vmatpush1.msra.mxu1 %v7455_v15  ;;  %v5366_v14 = vld [vmem:[%s7248_s1 + $0x128] sm:$0xff]  ;;  %v5371_v15 = vld [vmem:[%s7248_s1 + $0x138] sm:$0xff] }
 0x242   :  { %902 = vmatprep.subr.mxu0 %v7456_v16  ;;  %973 = vmatprep.subr.mxu1 %v7457_v17  ;;  %v5378_v16 = vld [vmem:[%s7248_s1 + $0x120] sm:$0xff]  ;;  %v5383_v17 = vld [vmem:[%s7248_s1 + $0x130] sm:$0xff] }
 0x243   :  { %903 = vmatpush1.msra.mxu0 %v7458_v18  ;;  %936 = vmatprep.mubr.f32.mxu0 %v7459_v19  ;;  %v5390_v18 = vld [vmem:[%s7248_s1 + $0x108] sm:$0xff] }
 0x244   :  { %974 = vmatpush1.msra.mxu1 %v7460_v20  ;;  %1007 = vmatprep.mubr.f32.mxu1 %v7459_v19  ;;  %v5395_v20 = vld [vmem:[%s7248_s1 + $0x118] sm:$0xff] }
 0x245   :  { %1136 = vmatprep.subr.mxu0 %v5226_v58  ;;  %1207 = vmatprep.subr.mxu1 %v5231_v55 }
 0x2e4   :  { %v674_v21 = vpop.f32.mrf.mxu0  ;;  %v745_v22 = vpop.f32.mrf.mxu1 }
 0x2e6   :  { %v676_v23 = vpop.f32.mrf.mxu0  ;;  %v747_v24 = vpop.f32.mrf.mxu1 }
 0x2e7   :  { %v754_v25 = vcombine.low %v674_v21, %v676_v23  ;;  %v755_v26 = vcombine.low %v745_v22, %v747_v24  ;;  %v5402_v21 = vld [vmem:[%s7248_s1 + $0x100] sm:$0xff]  ;;  %v5407_v22 = vld [vmem:[%s7248_s1 + $0x110] sm:$0xff]  ;;  %v5414_v23 = vld [vmem:[%s7248_s1 + $0xe8] sm:$0xff] }
 0x2e8   :  { %v5419_v24 = vld [vmem:[%s7248_s1 + $0xf8] sm:$0xff] }
 0x2e9   :  { %v762_v27 = vrot.slane %v754_v25, %v5054_v62  ;;  %v769_v28 = vrot.slane %v755_v26, %v5054_v62  ;;  %v5426_v25 = vld [vmem:[%s7248_s1 + $0xe0] sm:$0xff]  ;;  %v5431_v26 = vld [vmem:[%s7248_s1 + $0xf0] sm:$0xff] }
 0x2eb   :  { %v770_v30 = vcombine.low %v762_v27, %v769_v28  ;;  %v5438_v27 = vld [vmem:[%s7248_s1 + $0xc8] sm:$0xff]  ;;  %v5443_v28 = vld [vmem:[%s7248_s1 + $0xd8] sm:$0xff] }
 0x2ed   :  { %v772_v31 = vadd.f32 %v4245_v29, %v770_v30  ;;  %v5450_v29 = vld [vmem:[%s7248_s1 + $0xc0] sm:$0xff]  ;;  %v5455_v30 = vld [vmem:[%s7248_s1 + $0xd0] sm:$0xff] }
 0x2ef   :  { %v4246_v32 = vmul.f32 -1.442695, %v772_v31  ;;  %v780_v33 = vrot.slane %v772_v31, 2  ;;  %v791_v35 = vrot.slane %v772_v31, 6  ;;  %v788_v38 = vrot.slane %v772_v31, 4  ;;  %v5462_v31 = vld [vmem:[%s7248_s1 + $0xa8] sm:$0xff] }
 0x2f1   :  { %4347 = vpow2.f32 %v4246_v32  ;;  %v4247_v34 = vmul.f32 -1.442695, %v780_v33  ;;  %v4248_v36 = vmul.f32 -1.442695, %v791_v35  ;;  %v5467_v32 = vld [vmem:[%s7248_s1 + $0xb8] sm:$0xff]  ;;  %v5474_v33 = vld [vmem:[%s7248_s1 + $0xa0] sm:$0xff] }
 0x2f2   :  { %v5486_v35 = vld [vmem:[%s7248_s1 + $0x88] sm:$0xff] }
 0x2f3   :  { %4349 = vpow2.f32 %v4247_v34  ;;  %v5479_v34 = vld [vmem:[%s7248_s1 + $0xb0] sm:$0xff] }
 0x2f4   :  { %4351 = vpow2.f32 %v4248_v36  ;;  %v5491_v36 = vld [vmem:[%s7248_s1 + $0x98] sm:$0xff] }
 0x2fe   :  { %v4348_v37 = vpop.eup %4347 }
 0x2ff   :  { %v776_v39 = vadd.f32 1.0, %v4348_v37  ;;  %v5498_v37 = vld [vmem:[%s7248_s1 + $0x80] sm:$0xff] }
 0x300   :  { %v4350_v40 = vpop.eup %4349 }
 0x301   :  { %4353 = vrcp.f32 %v776_v39  ;;  %v785_v41 = vadd.f32 1.0, %v4350_v40  ;;  %v4352_v42 = vpop.eup %4351  ;;  %v5510_v39 = vld [vmem:[%s7248_s1 + $0x68] sm:$0xff]  ;;  %v5515_v40 = vld [vmem:[%s7248_s1 + $0x78] sm:$0xff] }
 0x302   :  { %4355 = vtanh.f32 %v788_v38  ;;  %v796_v46 = vadd.f32 1.0, %v4352_v42  ;;  %v5503_v38 = vld [vmem:[%s7248_s1 + $0x90] sm:$0xff]  ;;  %7464 = vst [vmem:[#allocation5_spill] sm:$0xff] %v5510_v39  ;;  %7465 = vst [vmem:[#allocation6_spill] sm:$0xff] %v5515_v40 }
 0x303   :  { %4357 = vrcp.f32 %v785_v41  ;;  %7463 = vst [vmem:[#allocation3_spill] sm:$0xff] %v5503_v38  ;;  %v5522_v41 = vld [vmem:[%s7248_s1 + $0x60] sm:$0xff]  ;;  %v5527_v42 = vld [vmem:[%s7248_s1 + $0x70] sm:$0xff] }
 0x304   :  { %4359 = vrcp.f32 %v796_v46  ;;  %7466 = vst [vmem:[#allocation7_spill] sm:$0xff] %v5522_v41  ;;  %7467 = vst [vmem:[#allocation8_spill] sm:$0xff] %v5527_v42  ;;  %v5551_v46 = vld [vmem:[%s7248_s1 + $0x50] sm:$0xff] }
 0x305   :  { %7471 = vst [vmem:[#allocation12_spill] sm:$0xff] %v5551_v46 }
 0x30e   :  { %v4354_v43 = vpop.eup %4353 }
 0x30f   :  { %v4356_v44 = vpop.eup %4355 }
 0x310   :  { %v4358_v45 = vpop.eup %4357  ;;  %v800_v56 = vmul.f32 %v4356_v44, %v4354_v43  ;;  %v5534_v43 = vld [vmem:[%s7248_s1 + $0x48] sm:$0xff]  ;;  %v5539_v44 = vld [vmem:[%s7248_s1 + $0x58] sm:$0xff] }
 0x311   :  { %v799_v57 = vmul.f32 %v4358_v45, %v5139_v63  ;;  %v4360_v3 = vpop.eup %4359  ;;  %v5277_v63 = vld [vmem:[%s7248_s1 + $0x1b8] sm:$0xff]  ;;  %7468 = vst [vmem:[#allocation9_spill] sm:$0xff] %v5534_v43  ;;  %7469 = vst [vmem:[#allocation10_spill] sm:$0xff] %v5539_v44  ;;  %v5546_v45 = vld [vmem:[%s7248_s1 + $0x40] sm:$0xff] }
 0x312   :  { %7470 = vst [vmem:[#allocation11_spill] sm:$0xff] %v5546_v45 }
 0x313   :  { %v5215_v51 = vadd.f32 %v800_v56, %v799_v57  ;;  %v5558_v57 = vld [vmem:[%s7248_s1 + $0x28] sm:$0xff]  ;;  %v5563_v56 = vld [vmem:[%s7248_s1 + $0x38] sm:$0xff] }
 0x314   :  { %7472 = vst [vmem:[#allocation13_spill] sm:$0xff] %v5558_v57  ;;  %7473 = vst [vmem:[#allocation14_spill] sm:$0xff] %v5563_v56 }
 0x315   :  { %4361 = vtanh.f32 %v5215_v51 }
 0x322   :  { %v4362_v53 = vpop.eup %4361 }
 0x323   :  { %v803_v1 = vmul.f32 %v4362_v53, %v4360_v3  ;;  %v5570_v3 = vld [vmem:[%s7248_s1 + $0x20] sm:$0xff]  ;;  %v5575_v53 = vld [vmem:[%s7248_s1 + $0x30] sm:$0xff] }
 0x324   :  { %7474 = vst [vmem:[#allocation15_spill] sm:$0xff] %v5570_v3  ;;  %7475 = vst [vmem:[#allocation16_spill] sm:$0xff] %v5575_v53 }
 0x325   :  { %4249 = vst [vmem:[%s7250_s3 + $0x4] sm:$0x3] %v803_v1  ;;  %937 = vmatmul.mubr.f32.vlgmr.msra.gmra.mxu0 %v803_v1  ;;  %1008 = vmatmul.mubr.f32.vlgmr.msra.gmra.mxu1 %v803_v1  ;;  %v5582_v1 = vld [vmem:[%s7248_s1 + $0x8] sm:$0xff] }
 0x326   :  { %1200 = vmatprep.mubr.f32.mxu0 %v7459_v19  ;;  %1271 = vmatprep.mubr.f32.mxu1 %v7459_v19  ;;  %7476 = vst [vmem:[#allocation17_spill] sm:$0xff] %v5582_v1  ;;  %v5587_v19 = vld [vmem:[%s7248_s1 + $0x18] sm:$0xff] }
 0x327   :  { %1137 = vmatpush1.msra.mxu0 %v5236_v47  ;;  %1208 = vmatpush1.msra.mxu1 %v5243_v59  ;;  %7477 = vst [vmem:[#allocation18_spill] sm:$0xff] %v5587_v19 }
 0x328   :  { %1138 = vmatprep.subr.mxu0 %v5248_v0  ;;  %1209 = vmatprep.subr.mxu1 %v5253_v54 }
 0x329   :  { %1139 = vmatpush1.msra.mxu0 %v5260_v52  ;;  %1210 = vmatpush1.msra.mxu1 %v5265_v61 }
 0x32a   :  { %1140 = vmatprep.subr.mxu0 %v5270_v50  ;;  %1211 = vmatprep.subr.mxu1 %v5277_v63 }
 0x32b   :  { %1141 = vmatpush1.msra.mxu0 %v5282_v48  ;;  %1212 = vmatpush1.msra.mxu1 %v5287_v60 }
 0x32c   :  { %1142 = vmatprep.subr.mxu0 %v5294_v49  ;;  %1213 = vmatprep.subr.mxu1 %v5299_v2 }
 0x32d   :  { %1143 = vmatpush1.msra.mxu0 %v5306_v4  ;;  %1214 = vmatpush1.msra.mxu1 %v5311_v5 }
 0x32e   :  { %1144 = vmatprep.subr.mxu0 %v5318_v6  ;;  %1215 = vmatprep.subr.mxu1 %v5323_v7 }
 0x32f   :  { %1145 = vmatpush1.msra.mxu0 %v5330_v8  ;;  %1216 = vmatpush1.msra.mxu1 %v5335_v9 }
 0x330   :  { %1146 = vmatprep.subr.mxu0 %v5342_v10  ;;  %1217 = vmatprep.subr.mxu1 %v5347_v11 }
 0x331   :  { %1147 = vmatpush1.msra.mxu0 %v5354_v12  ;;  %1218 = vmatpush1.msra.mxu1 %v5359_v13 }
 0x332   :  { %1148 = vmatprep.subr.mxu0 %v5366_v14  ;;  %1219 = vmatprep.subr.mxu1 %v5371_v15 }
 0x333   :  { %1149 = vmatpush1.msra.mxu0 %v5378_v16  ;;  %1220 = vmatpush1.msra.mxu1 %v5383_v17 }
 0x334   :  { %1150 = vmatprep.subr.mxu0 %v5390_v18  ;;  %1221 = vmatprep.subr.mxu1 %v5395_v20 }
 0x335   :  { %1151 = vmatpush1.msra.mxu0 %v5402_v21  ;;  %1222 = vmatpush1.msra.mxu1 %v5407_v22 }
 0x336   :  { %1152 = vmatprep.subr.mxu0 %v5414_v23  ;;  %1223 = vmatprep.subr.mxu1 %v5419_v24 }
 0x337   :  { %1153 = vmatpush1.msra.mxu0 %v5426_v25  ;;  %1224 = vmatpush1.msra.mxu1 %v5431_v26 }
 0x338   :  { %1154 = vmatprep.subr.mxu0 %v5438_v27  ;;  %1225 = vmatprep.subr.mxu1 %v5443_v28 }
 0x339   :  { %1155 = vmatpush1.msra.mxu0 %v5450_v29  ;;  %1226 = vmatpush1.msra.mxu1 %v5455_v30 }
 0x33a   :  { %1156 = vmatprep.subr.mxu0 %v5462_v31  ;;  %1227 = vmatprep.subr.mxu1 %v5467_v32 }
 0x33b   :  { %1157 = vmatpush1.msra.mxu0 %v5474_v33  ;;  %1228 = vmatpush1.msra.mxu1 %v5479_v34 }
 0x33c   :  { %1158 = vmatprep.subr.mxu0 %v5486_v35  ;;  %1229 = vmatprep.subr.mxu1 %v5491_v36 }
 0x33d   :  { %1159 = vmatpush1.msra.mxu0 %v5498_v37  ;;  %1230 = vmatpush1.msra.mxu1 %v5503_v38 }
 0x33e   :  { %1160 = vmatprep.subr.mxu0 %v5510_v39  ;;  %1231 = vmatprep.subr.mxu1 %v5515_v40 }
 0x33f   :  { %1161 = vmatpush1.msra.mxu0 %v5522_v41  ;;  %1232 = vmatpush1.msra.mxu1 %v5527_v42 }
 0x340   :  { %1162 = vmatprep.subr.mxu0 %v5534_v43  ;;  %1233 = vmatprep.subr.mxu1 %v5539_v44 }
 0x341   :  { %1163 = vmatpush1.msra.mxu0 %v5546_v45  ;;  %1234 = vmatpush1.msra.mxu1 %v5551_v46  ;;  %v5594_v45 = vld [vmem:[%s7248_s1] sm:$0xff]  ;;  %v5599_v46 = vld [vmem:[%s7248_s1 + $0x10] sm:$0xff] }
 0x342   :  { %1164 = vmatprep.subr.mxu0 %v5558_v57  ;;  %1235 = vmatprep.subr.mxu1 %v5563_v56  ;;  %7478 = vst [vmem:[#allocation19_spill] sm:$0xff] %v5594_v45  ;;  %7479 = vst [vmem:[#allocation20_spill] sm:$0xff] %v5599_v46 }
 0x343   :  { %1165 = vmatpush1.msra.mxu0 %v5570_v3  ;;  %1236 = vmatpush1.msra.mxu1 %v5575_v53 }
 0x344   :  { %1166 = vmatprep.subr.mxu0 %v5582_v1  ;;  %1237 = vmatprep.subr.mxu1 %v5587_v19 }
 0x345   :  { %1167 = vmatpush1.msra.mxu0 %v5594_v45  ;;  %1238 = vmatpush1.msra.mxu1 %v5599_v46  ;;  %v4250_v45 = vld [vmem:[%s7249_s0 + $0x30] sm:$0xff] }
 0x346   :  { %1400 = vmatprep.subr.mxu0 %v5226_v58  ;;  %1471 = vmatprep.subr.mxu1 %v5231_v55 }
 0x3e5   :  { %v938_v56 = vpop.f32.mrf.mxu0  ;;  %v1009_v57 = vpop.f32.mrf.mxu1 }
 0x3e7   :  { %v940_v44 = vpop.f32.mrf.mxu0  ;;  %v1011_v43 = vpop.f32.mrf.mxu1 }
 0x3e8   :  { %v1018_v42 = vcombine.low %v938_v56, %v940_v44  ;;  %v1019_v3 = vcombine.low %v1009_v57, %v1011_v43 }
 0x3ea   :  { %v1026_v53 = vrot.slane %v1018_v42, %v5054_v62  ;;  %v1033_v1 = vrot.slane %v1019_v3, %v5054_v62 }
 0x3ec   :  { %v1034_v19 = vcombine.low %v1026_v53, %v1033_v1  ;;  %v7482_v1 = vld [vmem:[#allocation6_spill] sm:$0xff] }
 0x3ee   :  { %v1036_v46 = vadd.f32 %v4250_v45, %v1034_v19 }
 0x3f0   :  { %v4251_v41 = vmul.f32 -1.442695, %v1036_v46  ;;  %v1044_v58 = vrot.slane %v1036_v46, 2  ;;  %v1055_v40 = vrot.slane %v1036_v46, 6  ;;  %v1052_v44 = vrot.slane %v1036_v46, 4  ;;  %v7481_v46 = vld [vmem:[#allocation5_spill] sm:$0xff] }
 0x3f2   :  { %4363 = vpow2.f32 %v4251_v41  ;;  %v4252_v55 = vmul.f32 -1.442695, %v1044_v58  ;;  %v4253_v39 = vmul.f32 -1.442695, %v1055_v40 }
 0x3f4   :  { %4365 = vpow2.f32 %v4252_v55 }
 0x3f5   :  { %4367 = vpow2.f32 %v4253_v39 }
 0x3ff   :  { %v4364_v38 = vpop.eup %4363 }
 0x400   :  { %v1040_v43 = vadd.f32 1.0, %v4364_v38 }
 0x401   :  { %v4366_v57 = vpop.eup %4365 }
 0x402   :  { %4369 = vrcp.f32 %v1040_v43  ;;  %v1049_v42 = vadd.f32 1.0, %v4366_v57  ;;  %v4368_v56 = vpop.eup %4367  ;;  %v7484_v43 = vld [vmem:[#allocation8_spill] sm:$0xff]  ;;  %v7485_v57 = vld [vmem:[#allocation9_spill] sm:$0xff] }
 0x403   :  { %4371 = vtanh.f32 %v1052_v44  ;;  %v1060_v45 = vadd.f32 1.0, %v4368_v56  ;;  %v7483_v44 = vld [vmem:[#allocation7_spill] sm:$0xff] }
 0x404   :  { %4373 = vrcp.f32 %v1049_v42  ;;  %v7486_v42 = vld [vmem:[#allocation10_spill] sm:$0xff]  ;;  %v7487_v56 = vld [vmem:[#allocation11_spill] sm:$0xff] }
 0x405   :  { %4375 = vrcp.f32 %v1060_v45  ;;  %v7491_v45 = vld [vmem:[#allocation15_spill] sm:$0xff] }
 0x40f   :  { %v4370_v3 = vpop.eup %4369 }
 0x410   :  { %v4372_v53 = vpop.eup %4371 }
 0x411   :  { %v4374_v19 = vpop.eup %4373  ;;  %v1064_v58 = vmul.f32 %v4372_v53, %v4370_v3  ;;  %v7488_v3 = vld [vmem:[#allocation12_spill] sm:$0xff]  ;;  %v7489_v53 = vld [vmem:[#allocation13_spill] sm:$0xff] }
 0x412   :  { %v1063_v41 = vmul.f32 %v4374_v19, %v5215_v51  ;;  %v4376_v38 = vpop.eup %4375  ;;  %v7480_v51 = vld [vmem:[#allocation3_spill] sm:$0xff]  ;;  %v7490_v19 = vld [vmem:[#allocation14_spill] sm:$0xff] }
 0x414   :  { %v5615_v55 = vadd.f32 %v1064_v58, %v1063_v41  ;;  %v7492_v41 = vld [vmem:[#allocation16_spill] sm:$0xff]  ;;  %v7493_v58 = vld [vmem:[#allocation17_spill] sm:$0xff] }
 0x416   :  { %4377 = vtanh.f32 %v5615_v55 }
 0x423   :  { %v4378_v40 = vpop.eup %4377 }
 0x424   :  { %v1067_v39 = vmul.f32 %v4378_v40, %v4376_v38  ;;  %v7494_v38 = vld [vmem:[#allocation18_spill] sm:$0xff]  ;;  %v7495_v40 = vld [vmem:[#allocation19_spill] sm:$0xff] }
 0x426   :  { %4254 = vst [vmem:[%s7250_s3 + $0x6] sm:$0x3] %v1067_v39  ;;  %1201 = vmatmul.mubr.f32.vlgmr.msra.gmra.mxu0 %v1067_v39  ;;  %1272 = vmatmul.mubr.f32.vlgmr.msra.gmra.mxu1 %v1067_v39  ;;  %v7496_v39 = vmov 0.0  }
 0x427   :  { %1401 = vmatpush1.msra.mxu0 %v5236_v47  ;;  %1472 = vmatpush1.msra.mxu1 %v5243_v59 }
 0x428   :  { %1402 = vmatprep.subr.mxu0 %v5248_v0  ;;  %1473 = vmatprep.subr.mxu1 %v5253_v54 }
 0x429   :  { %1403 = vmatpush1.msra.mxu0 %v5260_v52  ;;  %1474 = vmatpush1.msra.mxu1 %v5265_v61 }
 0x42a   :  { %1404 = vmatprep.subr.mxu0 %v5270_v50  ;;  %1475 = vmatprep.subr.mxu1 %v5277_v63 }
 0x42b   :  { %1405 = vmatpush1.msra.mxu0 %v5282_v48  ;;  %1476 = vmatpush1.msra.mxu1 %v5287_v60 }
 0x42c   :  { %1406 = vmatprep.subr.mxu0 %v5294_v49  ;;  %1477 = vmatprep.subr.mxu1 %v5299_v2 }
 0x42d   :  { %1407 = vmatpush1.msra.mxu0 %v5306_v4  ;;  %1478 = vmatpush1.msra.mxu1 %v5311_v5 }
 0x42e   :  { %1408 = vmatprep.subr.mxu0 %v5318_v6  ;;  %1479 = vmatprep.subr.mxu1 %v5323_v7 }
 0x42f   :  { %1409 = vmatpush1.msra.mxu0 %v5330_v8  ;;  %1480 = vmatpush1.msra.mxu1 %v5335_v9 }
 0x430   :  { %1410 = vmatprep.subr.mxu0 %v5342_v10  ;;  %1481 = vmatprep.subr.mxu1 %v5347_v11 }
 0x431   :  { %1411 = vmatpush1.msra.mxu0 %v5354_v12  ;;  %1482 = vmatpush1.msra.mxu1 %v5359_v13 }
 0x432   :  { %1412 = vmatprep.subr.mxu0 %v5366_v14  ;;  %1483 = vmatprep.subr.mxu1 %v5371_v15 }
 0x433   :  { %1413 = vmatpush1.msra.mxu0 %v5378_v16  ;;  %1484 = vmatpush1.msra.mxu1 %v5383_v17 }
 0x434   :  { %1414 = vmatprep.subr.mxu0 %v5390_v18  ;;  %1485 = vmatprep.subr.mxu1 %v5395_v20 }
 0x435   :  { %1415 = vmatpush1.msra.mxu0 %v5402_v21  ;;  %1486 = vmatpush1.msra.mxu1 %v5407_v22 }
 0x436   :  { %1416 = vmatprep.subr.mxu0 %v5414_v23  ;;  %1487 = vmatprep.subr.mxu1 %v5419_v24 }
 0x437   :  { %1417 = vmatpush1.msra.mxu0 %v5426_v25  ;;  %1488 = vmatpush1.msra.mxu1 %v5431_v26 }
 0x438   :  { %1418 = vmatprep.subr.mxu0 %v5438_v27  ;;  %1489 = vmatprep.subr.mxu1 %v5443_v28 }
 0x439   :  { %1419 = vmatpush1.msra.mxu0 %v5450_v29  ;;  %1490 = vmatpush1.msra.mxu1 %v5455_v30 }
 0x43a   :  { %1420 = vmatprep.subr.mxu0 %v5462_v31  ;;  %1491 = vmatprep.subr.mxu1 %v5467_v32 }
 0x43b   :  { %1421 = vmatpush1.msra.mxu0 %v5474_v33  ;;  %1492 = vmatpush1.msra.mxu1 %v5479_v34 }
 0x43c   :  { %1422 = vmatprep.subr.mxu0 %v5486_v35  ;;  %1493 = vmatprep.subr.mxu1 %v5491_v36 }
 0x43d   :  { %1423 = vmatpush1.msra.mxu0 %v5498_v37  ;;  %1494 = vmatpush1.msra.mxu1 %v7480_v51 }
 0x43e   :  { %1424 = vmatprep.subr.mxu0 %v7481_v46  ;;  %1495 = vmatprep.subr.mxu1 %v7482_v1 }
 0x43f   :  { %1425 = vmatpush1.msra.mxu0 %v7483_v44  ;;  %1496 = vmatpush1.msra.mxu1 %v7484_v43 }
 0x440   :  { %1426 = vmatprep.subr.mxu0 %v7485_v57  ;;  %1497 = vmatprep.subr.mxu1 %v7486_v42  ;;  %v7497_v42 = vld [vmem:[#allocation20_spill] sm:$0xff] }
 0x441   :  { %1427 = vmatpush1.msra.mxu0 %v7487_v56  ;;  %1498 = vmatpush1.msra.mxu1 %v7488_v3  ;;  %v7498_v3 = vld [vmem:[#allocation4_spill] sm:$0xff] }
 0x442   :  { %1428 = vmatprep.subr.mxu0 %v7489_v53  ;;  %1499 = vmatprep.subr.mxu1 %v7490_v19  ;;  %v7499_v53 = vld [vmem:[#allocation2_spill] sm:$0xff] }
 0x443   :  { %1429 = vmatpush1.msra.mxu0 %v7491_v45  ;;  %1500 = vmatpush1.msra.mxu1 %v7492_v41 }
 0x444   :  { %1430 = vmatprep.subr.mxu0 %v7493_v58  ;;  %1501 = vmatprep.subr.mxu1 %v7494_v38 }
 0x445   :  { %1431 = vmatpush1.msra.mxu0 %v7495_v40  ;;  %1464 = vmatprep.mubr.f32.mxu0 %v7496_v39 }
 0x446   :  { %1502 = vmatpush1.msra.mxu1 %v7497_v42  ;;  %1535 = vmatprep.mubr.f32.mxu1 %v7496_v39  ;;  %v4255_v42 = vld [vmem:[%s7249_s0 + $0x40] sm:$0xff] }
 0x447   :  { %1664 = vmatprep.subr.mxu0 %v7498_v3  ;;  %1735 = vmatprep.subr.mxu1 %v7499_v53 }
 0x4e6   :  { %v1202_v19 = vpop.f32.mrf.mxu0  ;;  %v1273_v45 = vpop.f32.mrf.mxu1 }
 0x4e8   :  { %v1204_v56 = vpop.f32.mrf.mxu0  ;;  %v1275_v41 = vpop.f32.mrf.mxu1 }
 0x4e9   :  { %v1282_v57 = vcombine.low %v1202_v19, %v1204_v56  ;;  %v1283_v58 = vcombine.low %v1273_v45, %v1275_v41 }
 0x4eb   :  { %v1290_v38 = vrot.slane %v1282_v57, %v5054_v62  ;;  %v1297_v40 = vrot.slane %v1283_v58, %v5054_v62 }
 0x4ed   :  { %v1298_v43 = vcombine.low %v1290_v38, %v1297_v40  ;;  %v7501_v40 = vld [vmem:[#allocation5_spill] sm:$0xff] }
 0x4ef   :  { %v1300_v39 = vadd.f32 %v4255_v42, %v1298_v43 }
 0x4f1   :  { %v4256_v44 = vmul.f32 -1.442695, %v1300_v39  ;;  %v1308_v3 = vrot.slane %v1300_v39, 2  ;;  %v1319_v1 = vrot.slane %v1300_v39, 6  ;;  %v1316_v56 = vrot.slane %v1300_v39, 4  ;;  %v7502_v39 = vld [vmem:[#allocation6_spill] sm:$0xff] }
 0x4f3   :  { %4379 = vpow2.f32 %v4256_v44  ;;  %v4257_v53 = vmul.f32 -1.442695, %v1308_v3  ;;  %v4258_v46 = vmul.f32 -1.442695, %v1319_v1 }
 0x4f5   :  { %4381 = vpow2.f32 %v4257_v53 }
 0x4f6   :  { %4383 = vpow2.f32 %v4258_v46 }
 0x500   :  { %v4380_v51 = vpop.eup %4379 }
 0x501   :  { %v1304_v19 = vadd.f32 1.0, %v4380_v51 }
 0x502   :  { %v4382_v45 = vpop.eup %4381 }
 0x503   :  { %4385 = vrcp.f32 %v1304_v19  ;;  %v1313_v57 = vadd.f32 1.0, %v4382_v45  ;;  %v4384_v41 = vpop.eup %4383  ;;  %v7504_v19 = vld [vmem:[#allocation8_spill] sm:$0xff]  ;;  %v7505_v45 = vld [vmem:[#allocation9_spill] sm:$0xff] }
 0x504   :  { %4387 = vtanh.f32 %v1316_v56  ;;  %v1324_v42 = vadd.f32 1.0, %v4384_v41  ;;  %v7503_v56 = vld [vmem:[#allocation7_spill] sm:$0xff] }
 0x505   :  { %4389 = vrcp.f32 %v1313_v57  ;;  %v7506_v57 = vld [vmem:[#allocation10_spill] sm:$0xff]  ;;  %v7507_v41 = vld [vmem:[#allocation11_spill] sm:$0xff] }
 0x506   :  { %4391 = vrcp.f32 %v1324_v42  ;;  %v7511_v42 = vld [vmem:[#allocation15_spill] sm:$0xff] }
 0x510   :  { %v4386_v58 = vpop.eup %4385 }
 0x511   :  { %v4388_v38 = vpop.eup %4387 }
 0x512   :  { %v4390_v43 = vpop.eup %4389  ;;  %v1328_v3 = vmul.f32 %v4388_v38, %v4386_v58  ;;  %v7508_v58 = vld [vmem:[#allocation12_spill] sm:$0xff]  ;;  %v7509_v38 = vld [vmem:[#allocation13_spill] sm:$0xff] }
 0x513   :  { %v1327_v44 = vmul.f32 %v4390_v43, %v5615_v55  ;;  %v4392_v51 = vpop.eup %4391  ;;  %v7500_v55 = vld [vmem:[#allocation3_spill] sm:$0xff]  ;;  %v7510_v43 = vld [vmem:[#allocation14_spill] sm:$0xff] }
 0x515   :  { %v5693_v53 = vadd.f32 %v1328_v3, %v1327_v44  ;;  %v7512_v44 = vld [vmem:[#allocation16_spill] sm:$0xff]  ;;  %v7513_v3 = vld [vmem:[#allocation17_spill] sm:$0xff] }
 0x517   :  { %4393 = vtanh.f32 %v5693_v53 }
 0x524   :  { %v4394_v1 = vpop.eup %4393 }
 0x525   :  { %v1331_v46 = vmul.f32 %v4394_v1, %v4392_v51  ;;  %v7514_v51 = vld [vmem:[#allocation18_spill] sm:$0xff]  ;;  %v7515_v1 = vld [vmem:[#allocation19_spill] sm:$0xff] }
 0x527   :  { %4259 = vst [vmem:[%s7250_s3 + $0x8] sm:$0x3] %v1331_v46  ;;  %1465 = vmatmul.mubr.f32.vlgmr.msra.gmra.mxu0 %v1331_v46  ;;  %1536 = vmatmul.mubr.f32.vlgmr.msra.gmra.mxu1 %v1331_v46  ;;  %v7516_v46 = vmov 0.0  }
 0x528   :  { %1665 = vmatpush1.msra.mxu0 %v5236_v47  ;;  %1736 = vmatpush1.msra.mxu1 %v5243_v59 }
 0x529   :  { %1666 = vmatprep.subr.mxu0 %v5248_v0  ;;  %1737 = vmatprep.subr.mxu1 %v5253_v54 }
 0x52a   :  { %1667 = vmatpush1.msra.mxu0 %v5260_v52  ;;  %1738 = vmatpush1.msra.mxu1 %v5265_v61 }
 0x52b   :  { %1668 = vmatprep.subr.mxu0 %v5270_v50  ;;  %1739 = vmatprep.subr.mxu1 %v5277_v63 }
 0x52c   :  { %1669 = vmatpush1.msra.mxu0 %v5282_v48  ;;  %1740 = vmatpush1.msra.mxu1 %v5287_v60 }
 0x52d   :  { %1670 = vmatprep.subr.mxu0 %v5294_v49  ;;  %1741 = vmatprep.subr.mxu1 %v5299_v2 }
 0x52e   :  { %1671 = vmatpush1.msra.mxu0 %v5306_v4  ;;  %1742 = vmatpush1.msra.mxu1 %v5311_v5 }
 0x52f   :  { %1672 = vmatprep.subr.mxu0 %v5318_v6  ;;  %1743 = vmatprep.subr.mxu1 %v5323_v7 }
 0x530   :  { %1673 = vmatpush1.msra.mxu0 %v5330_v8  ;;  %1744 = vmatpush1.msra.mxu1 %v5335_v9 }
 0x531   :  { %1674 = vmatprep.subr.mxu0 %v5342_v10  ;;  %1745 = vmatprep.subr.mxu1 %v5347_v11 }
 0x532   :  { %1675 = vmatpush1.msra.mxu0 %v5354_v12  ;;  %1746 = vmatpush1.msra.mxu1 %v5359_v13 }
 0x533   :  { %1676 = vmatprep.subr.mxu0 %v5366_v14  ;;  %1747 = vmatprep.subr.mxu1 %v5371_v15 }
 0x534   :  { %1677 = vmatpush1.msra.mxu0 %v5378_v16  ;;  %1748 = vmatpush1.msra.mxu1 %v5383_v17 }
 0x535   :  { %1678 = vmatprep.subr.mxu0 %v5390_v18  ;;  %1749 = vmatprep.subr.mxu1 %v5395_v20 }
 0x536   :  { %1679 = vmatpush1.msra.mxu0 %v5402_v21  ;;  %1750 = vmatpush1.msra.mxu1 %v5407_v22 }
 0x537   :  { %1680 = vmatprep.subr.mxu0 %v5414_v23  ;;  %1751 = vmatprep.subr.mxu1 %v5419_v24 }
 0x538   :  { %1681 = vmatpush1.msra.mxu0 %v5426_v25  ;;  %1752 = vmatpush1.msra.mxu1 %v5431_v26 }
 0x539   :  { %1682 = vmatprep.subr.mxu0 %v5438_v27  ;;  %1753 = vmatprep.subr.mxu1 %v5443_v28 }
 0x53a   :  { %1683 = vmatpush1.msra.mxu0 %v5450_v29  ;;  %1754 = vmatpush1.msra.mxu1 %v5455_v30 }
 0x53b   :  { %1684 = vmatprep.subr.mxu0 %v5462_v31  ;;  %1755 = vmatprep.subr.mxu1 %v5467_v32 }
 0x53c   :  { %1685 = vmatpush1.msra.mxu0 %v5474_v33  ;;  %1756 = vmatpush1.msra.mxu1 %v5479_v34 }
 0x53d   :  { %1686 = vmatprep.subr.mxu0 %v5486_v35  ;;  %1757 = vmatprep.subr.mxu1 %v5491_v36 }
 0x53e   :  { %1687 = vmatpush1.msra.mxu0 %v5498_v37  ;;  %1758 = vmatpush1.msra.mxu1 %v7500_v55 }
 0x53f   :  { %1688 = vmatprep.subr.mxu0 %v7501_v40  ;;  %1759 = vmatprep.subr.mxu1 %v7502_v39 }
 0x540   :  { %1689 = vmatpush1.msra.mxu0 %v7503_v56  ;;  %1760 = vmatpush1.msra.mxu1 %v7504_v19 }
 0x541   :  { %1690 = vmatprep.subr.mxu0 %v7505_v45  ;;  %1761 = vmatprep.subr.mxu1 %v7506_v57  ;;  %v7517_v57 = vld [vmem:[#allocation20_spill] sm:$0xff] }
 0x542   :  { %1691 = vmatpush1.msra.mxu0 %v7507_v41  ;;  %1762 = vmatpush1.msra.mxu1 %v7508_v58  ;;  %v7518_v58 = vld [vmem:[#allocation4_spill] sm:$0xff] }
 0x543   :  { %1692 = vmatprep.subr.mxu0 %v7509_v38  ;;  %1763 = vmatprep.subr.mxu1 %v7510_v43  ;;  %v7519_v38 = vld [vmem:[#allocation2_spill] sm:$0xff] }
 0x544   :  { %1693 = vmatpush1.msra.mxu0 %v7511_v42  ;;  %1764 = vmatpush1.msra.mxu1 %v7512_v44 }
 0x545   :  { %1694 = vmatprep.subr.mxu0 %v7513_v3  ;;  %1765 = vmatprep.subr.mxu1 %v7514_v51 }
 0x546   :  { %1695 = vmatpush1.msra.mxu0 %v7515_v1  ;;  %1728 = vmatprep.mubr.f32.mxu0 %v7516_v46 }
 0x547   :  { %1766 = vmatpush1.msra.mxu1 %v7517_v57  ;;  %1799 = vmatprep.mubr.f32.mxu1 %v7516_v46  ;;  %v4260_v57 = vld [vmem:[%s7249_s0 + $0x50] sm:$0xff] }
 0x548   :  { %1928 = vmatprep.subr.mxu0 %v7518_v58  ;;  %1999 = vmatprep.subr.mxu1 %v7519_v38 }
 0x5e7   :  { %v1466_v43 = vpop.f32.mrf.mxu0  ;;  %v1537_v42 = vpop.f32.mrf.mxu1 }
 0x5e9   :  { %v1468_v41 = vpop.f32.mrf.mxu0  ;;  %v1539_v44 = vpop.f32.mrf.mxu1 }
 0x5ea   :  { %v1546_v45 = vcombine.low %v1466_v43, %v1468_v41  ;;  %v1547_v3 = vcombine.low %v1537_v42, %v1539_v44 }
 0x5ec   :  { %v1554_v51 = vrot.slane %v1546_v45, %v5054_v62  ;;  %v1561_v1 = vrot.slane %v1547_v3, %v5054_v62 }
 0x5ee   :  { %v1562_v19 = vcombine.low %v1554_v51, %v1561_v1 }
 0x5f0   :  { %v1564_v46 = vadd.f32 %v4260_v57, %v1562_v19 }
 0x5f2   :  { %v4261_v56 = vmul.f32 -1.442695, %v1564_v46  ;;  %v1572_v58 = vrot.slane %v1564_v46, 2  ;;  %v1583_v39 = vrot.slane %v1564_v46, 6  ;;  %v1580_v41 = vrot.slane %v1564_v46, 4 }
 0x5f4   :  { %4395 = vpow2.f32 %v4261_v56  ;;  %v4262_v38 = vmul.f32 -1.442695, %v1572_v58  ;;  %v4263_v40 = vmul.f32 -1.442695, %v1583_v39 }
 0x5f6   :  { %4397 = vpow2.f32 %v4262_v38 }
 0x5f7   :  { %4399 = vpow2.f32 %v4263_v40 }
 0x601   :  { %v4396_v55 = vpop.eup %4395 }
 0x602   :  { %v1568_v43 = vadd.f32 1.0, %v4396_v55 }
 0x603   :  { %v4398_v42 = vpop.eup %4397 }
 0x604   :  { %4401 = vrcp.f32 %v1568_v43  ;;  %v1577_v45 = vadd.f32 1.0, %v4398_v42  ;;  %v4400_v44 = vpop.eup %4399 }
 0x605   :  { %4403 = vtanh.f32 %v1580_v41  ;;  %v1588_v57 = vadd.f32 1.0, %v4400_v44  ;;  %v5865_v44 = vld [vmem:[%s7251_s2 + $0x1e0] sm:$0xff] }
 0x606   :  { %4405 = vrcp.f32 %v1577_v45 }
 0x607   :  { %4407 = vrcp.f32 %v1588_v57  ;;  %v5888_v57 = vld [vmem:[%s7251_s2 + $0x1c0] sm:$0xff] }
 0x611   :  { %v4402_v3 = vpop.eup %4401 }
 0x612   :  { %v4404_v51 = vpop.eup %4403 }
 0x613   :  { %v4406_v19 = vpop.eup %4405  ;;  %v1592_v1 = vmul.f32 %v4404_v51, %v4402_v3  ;;  %v5870_v3 = vld [vmem:[%s7251_s2 + $0x1f0] sm:$0xff]  ;;  %v5875_v51 = vld [vmem:[%s7251_s2 + $0x1c8] sm:$0xff] }
 0x614   :  { %v1591_v56 = vmul.f32 %v4406_v19, %v5693_v53  ;;  %v4408_v55 = vpop.eup %4407  ;;  %v5880_v19 = vld [vmem:[%s7251_s2 + $0x1d8] sm:$0xff] }
 0x616   :  { %v5771_v58 = vadd.f32 %v1592_v1, %v1591_v56  ;;  %v5893_v56 = vld [vmem:[%s7251_s2 + $0x1d0] sm:$0xff]  ;;  %v5900_v1 = vld [vmem:[%s7251_s2 + $0x1a8] sm:$0xff] }
 0x618   :  { %4409 = vtanh.f32 %v5771_v58 }
 0x625   :  { %v4410_v39 = vpop.eup %4409 }
 0x626   :  { %v1595_v40 = vmul.f32 %v4410_v39, %v4408_v55  ;;  %v5912_v55 = vld [vmem:[%s7251_s2 + $0x1a0] sm:$0xff]  ;;  %v5917_v39 = vld [vmem:[%s7251_s2 + $0x1b0] sm:$0xff] }
 0x628   :  { %4264 = vst [vmem:[%s7250_s3 + $0xa] sm:$0x3] %v1595_v40  ;;  %1729 = vmatmul.mubr.f32.vlgmr.msra.gmra.mxu0 %v1595_v40  ;;  %1800 = vmatmul.mubr.f32.vlgmr.msra.gmra.mxu1 %v1595_v40  ;;  %v5924_v40 = vld [vmem:[%s7251_s2 + $0x188] sm:$0xff] }
 0x629   :  { %1929 = vmatpush1.msra.mxu0 %v5236_v47  ;;  %2000 = vmatpush1.msra.mxu1 %v5243_v59  ;;  %v7520_v47 = vld [vmem:[#allocation3_spill] sm:$0xff]  ;;  %v7521_v59 = vld [vmem:[#allocation5_spill] sm:$0xff] }
 0x62a   :  { %1930 = vmatprep.subr.mxu0 %v5248_v0  ;;  %2001 = vmatprep.subr.mxu1 %v5253_v54  ;;  %v7522_v0 = vld [vmem:[#allocation6_spill] sm:$0xff]  ;;  %v7523_v54 = vld [vmem:[#allocation7_spill] sm:$0xff] }
 0x62b   :  { %1931 = vmatpush1.msra.mxu0 %v5260_v52  ;;  %2002 = vmatpush1.msra.mxu1 %v5265_v61  ;;  %v7524_v52 = vld [vmem:[#allocation8_spill] sm:$0xff]  ;;  %v7525_v61 = vld [vmem:[#allocation9_spill] sm:$0xff] }
 0x62c   :  { %1932 = vmatprep.subr.mxu0 %v5270_v50  ;;  %2003 = vmatprep.subr.mxu1 %v5277_v63  ;;  %v7526_v50 = vld [vmem:[#allocation10_spill] sm:$0xff]  ;;  %v7527_v63 = vld [vmem:[#allocation11_spill] sm:$0xff] }
 0x62d   :  { %1933 = vmatpush1.msra.mxu0 %v5282_v48  ;;  %2004 = vmatpush1.msra.mxu1 %v5287_v60  ;;  %v7528_v48 = vld [vmem:[#allocation12_spill] sm:$0xff]  ;;  %v7529_v60 = vld [vmem:[#allocation13_spill] sm:$0xff] }
 0x62e   :  { %1934 = vmatprep.subr.mxu0 %v5294_v49  ;;  %2005 = vmatprep.subr.mxu1 %v5299_v2  ;;  %v7530_v49 = vld [vmem:[#allocation14_spill] sm:$0xff]  ;;  %v7531_v2 = vld [vmem:[#allocation15_spill] sm:$0xff] }
 0x62f   :  { %1935 = vmatpush1.msra.mxu0 %v5306_v4  ;;  %2006 = vmatpush1.msra.mxu1 %v5311_v5  ;;  %v7532_v4 = vld [vmem:[#allocation16_spill] sm:$0xff]  ;;  %v7533_v5 = vld [vmem:[#allocation17_spill] sm:$0xff] }
 0x630   :  { %1936 = vmatprep.subr.mxu0 %v5318_v6  ;;  %2007 = vmatprep.subr.mxu1 %v5323_v7  ;;  %v7534_v6 = vld [vmem:[#allocation18_spill] sm:$0xff]  ;;  %v7535_v7 = vld [vmem:[#allocation19_spill] sm:$0xff] }
 0x631   :  { %1937 = vmatpush1.msra.mxu0 %v5330_v8  ;;  %2008 = vmatpush1.msra.mxu1 %v5335_v9  ;;  %v7536_v8 = vld [vmem:[#allocation20_spill] sm:$0xff]  ;;  %v7537_v9 = vmov 0.0  }
 0x632   :  { %1938 = vmatprep.subr.mxu0 %v5342_v10  ;;  %2009 = vmatprep.subr.mxu1 %v5347_v11  ;;  %v5844_v10 = vld [vmem:[%s7251_s2 + $0x1e8] sm:$0xff]  ;;  %v5849_v11 = vld [vmem:[%s7251_s2 + $0x1f8] sm:$0xff] }
 0x633   :  { %1939 = vmatpush1.msra.mxu0 %v5354_v12  ;;  %2010 = vmatpush1.msra.mxu1 %v5359_v13 }
 0x634   :  { %1940 = vmatprep.subr.mxu0 %v5366_v14  ;;  %2011 = vmatprep.subr.mxu1 %v5371_v15 }
 0x635   :  { %1941 = vmatpush1.msra.mxu0 %v5378_v16  ;;  %2012 = vmatpush1.msra.mxu1 %v5383_v17 }
 0x636   :  { %1942 = vmatprep.subr.mxu0 %v5390_v18  ;;  %2013 = vmatprep.subr.mxu1 %v5395_v20 }
 0x637   :  { %1943 = vmatpush1.msra.mxu0 %v5402_v21  ;;  %2014 = vmatpush1.msra.mxu1 %v5407_v22  ;;  %v4265_v21 = vld [vmem:[%s7249_s0 + $0x60] sm:$0xff] }
 0x638   :  { %1944 = vmatprep.subr.mxu0 %v5414_v23  ;;  %2015 = vmatprep.subr.mxu1 %v5419_v24 }
 0x639   :  { %1945 = vmatpush1.msra.mxu0 %v5426_v25  ;;  %2016 = vmatpush1.msra.mxu1 %v5431_v26 }
 0x63a   :  { %1946 = vmatprep.subr.mxu0 %v5438_v27  ;;  %2017 = vmatprep.subr.mxu1 %v5443_v28 }
 0x63b   :  { %1947 = vmatpush1.msra.mxu0 %v5450_v29  ;;  %2018 = vmatpush1.msra.mxu1 %v5455_v30 }
 0x63c   :  { %1948 = vmatprep.subr.mxu0 %v5462_v31  ;;  %2019 = vmatprep.subr.mxu1 %v5467_v32 }
 0x63d   :  { %1949 = vmatpush1.msra.mxu0 %v5474_v33  ;;  %2020 = vmatpush1.msra.mxu1 %v5479_v34 }
 0x63e   :  { %1950 = vmatprep.subr.mxu0 %v5486_v35  ;;  %2021 = vmatprep.subr.mxu1 %v5491_v36 }
 0x63f   :  { %1951 = vmatpush1.msra.mxu0 %v5498_v37  ;;  %2022 = vmatpush1.msra.mxu1 %v7520_v47  ;;  %v5929_v47 = vld [vmem:[%s7251_s2 + $0x198] sm:$0xff] }
 0x640   :  { %1952 = vmatprep.subr.mxu0 %v7521_v59  ;;  %2023 = vmatprep.subr.mxu1 %v7522_v0  ;;  %v5936_v59 = vld [vmem:[%s7251_s2 + $0x180] sm:$0xff]  ;;  %v5941_v0 = vld [vmem:[%s7251_s2 + $0x190] sm:$0xff] }
 0x641   :  { %1953 = vmatpush1.msra.mxu0 %v7523_v54  ;;  %2024 = vmatpush1.msra.mxu1 %v7524_v52  ;;  %v5948_v54 = vld [vmem:[%s7251_s2 + $0x168] sm:$0xff]  ;;  %v5953_v52 = vld [vmem:[%s7251_s2 + $0x178] sm:$0xff] }
 0x642   :  { %1954 = vmatprep.subr.mxu0 %v7525_v61  ;;  %2025 = vmatprep.subr.mxu1 %v7526_v50  ;;  %v5960_v61 = vld [vmem:[%s7251_s2 + $0x160] sm:$0xff]  ;;  %v5965_v50 = vld [vmem:[%s7251_s2 + $0x170] sm:$0xff] }
 0x643   :  { %1955 = vmatpush1.msra.mxu0 %v7527_v63  ;;  %2026 = vmatpush1.msra.mxu1 %v7528_v48  ;;  %v5972_v63 = vld [vmem:[%s7251_s2 + $0x148] sm:$0xff]  ;;  %v5977_v48 = vld [vmem:[%s7251_s2 + $0x158] sm:$0xff] }
 0x644   :  { %1956 = vmatprep.subr.mxu0 %v7529_v60  ;;  %2027 = vmatprep.subr.mxu1 %v7530_v49  ;;  %v5984_v60 = vld [vmem:[%s7251_s2 + $0x140] sm:$0xff]  ;;  %v5989_v49 = vld [vmem:[%s7251_s2 + $0x150] sm:$0xff] }
 0x645   :  { %1957 = vmatpush1.msra.mxu0 %v7531_v2  ;;  %2028 = vmatpush1.msra.mxu1 %v7532_v4  ;;  %v5996_v2 = vld [vmem:[%s7251_s2 + $0x128] sm:$0xff]  ;;  %v6001_v4 = vld [vmem:[%s7251_s2 + $0x138] sm:$0xff] }
 0x646   :  { %1958 = vmatprep.subr.mxu0 %v7533_v5  ;;  %2029 = vmatprep.subr.mxu1 %v7534_v6  ;;  %v6008_v5 = vld [vmem:[%s7251_s2 + $0x120] sm:$0xff]  ;;  %v6013_v6 = vld [vmem:[%s7251_s2 + $0x130] sm:$0xff] }
 0x647   :  { %1959 = vmatpush1.msra.mxu0 %v7535_v7  ;;  %2030 = vmatpush1.msra.mxu1 %v7536_v8  ;;  %v6020_v7 = vld [vmem:[%s7251_s2 + $0x108] sm:$0xff]  ;;  %v6025_v8 = vld [vmem:[%s7251_s2 + $0x118] sm:$0xff] }
 0x648   :  { %1992 = vmatprep.mubr.f32.mxu0 %v7537_v9  ;;  %2063 = vmatprep.mubr.f32.mxu1 %v7537_v9 }
 0x649   :  { %2191 = vmatprep.subr.mxu0 %v5844_v10  ;;  %2262 = vmatprep.subr.mxu1 %v5849_v11 }
 0x6e8   :  { %v1730_v12 = vpop.f32.mrf.mxu0  ;;  %v1801_v13 = vpop.f32.mrf.mxu1 }
 0x6ea   :  { %v1732_v14 = vpop.f32.mrf.mxu0  ;;  %v1803_v15 = vpop.f32.mrf.mxu1 }
 0x6eb   :  { %v1810_v16 = vcombine.low %v1730_v12, %v1732_v14  ;;  %v1811_v17 = vcombine.low %v1801_v13, %v1803_v15  ;;  %v6032_v12 = vld [vmem:[%s7251_s2 + $0x100] sm:$0xff]  ;;  %v6037_v13 = vld [vmem:[%s7251_s2 + $0x110] sm:$0xff]  ;;  %v6044_v14 = vld [vmem:[%s7251_s2 + $0xe8] sm:$0xff] }
 0x6ec   :  { %v6049_v15 = vld [vmem:[%s7251_s2 + $0xf8] sm:$0xff] }
 0x6ed   :  { %v1818_v18 = vrot.slane %v1810_v16, %v5054_v62  ;;  %v1825_v20 = vrot.slane %v1811_v17, %v5054_v62  ;;  %v6056_v16 = vld [vmem:[%s7251_s2 + $0xe0] sm:$0xff]  ;;  %v6061_v17 = vld [vmem:[%s7251_s2 + $0xf0] sm:$0xff] }
 0x6ee   :  { %v6224_v62 = vld [vmem:[%s7251_s2] sm:$0xff] }
 0x6ef   :  { %v1826_v22 = vcombine.low %v1818_v18, %v1825_v20  ;;  %v6068_v18 = vld [vmem:[%s7251_s2 + $0xc8] sm:$0xff]  ;;  %v6073_v20 = vld [vmem:[%s7251_s2 + $0xd8] sm:$0xff]  ;;  %7557 = vst [vmem:[#allocation20_spill] sm:$0xff] %v6224_v62 }
 0x6f1   :  { %v1828_v23 = vadd.f32 %v4265_v21, %v1826_v22  ;;  %v6080_v21 = vld [vmem:[%s7251_s2 + $0xc0] sm:$0xff]  ;;  %v6085_v22 = vld [vmem:[%s7251_s2 + $0xd0] sm:$0xff] }
 0x6f3   :  { %v4266_v24 = vmul.f32 -1.442695, %v1828_v23  ;;  %v1836_v25 = vrot.slane %v1828_v23, 2  ;;  %v1847_v27 = vrot.slane %v1828_v23, 6  ;;  %v1844_v30 = vrot.slane %v1828_v23, 4  ;;  %v6092_v23 = vld [vmem:[%s7251_s2 + $0xa8] sm:$0xff] }
 0x6f5   :  { %4411 = vpow2.f32 %v4266_v24  ;;  %v4267_v26 = vmul.f32 -1.442695, %v1836_v25  ;;  %v4268_v28 = vmul.f32 -1.442695, %v1847_v27  ;;  %v6097_v24 = vld [vmem:[%s7251_s2 + $0xb8] sm:$0xff]  ;;  %v6104_v25 = vld [vmem:[%s7251_s2 + $0xa0] sm:$0xff] }
 0x6f6   :  { %v6116_v27 = vld [vmem:[%s7251_s2 + $0x88] sm:$0xff] }
 0x6f7   :  { %4413 = vpow2.f32 %v4267_v26  ;;  %v6109_v26 = vld [vmem:[%s7251_s2 + $0xb0] sm:$0xff]  ;;  %7539 = vst [vmem:[#allocation4_spill] sm:$0xff] %v6116_v27 }
 0x6f8   :  { %4415 = vpow2.f32 %v4268_v28  ;;  %v6121_v28 = vld [vmem:[%s7251_s2 + $0x98] sm:$0xff] }
 0x6f9   :  { %7540 = vst [vmem:[#allocation2_spill] sm:$0xff] %v6121_v28 }
 0x702   :  { %v4412_v29 = vpop.eup %4411 }
 0x703   :  { %v1832_v31 = vadd.f32 1.0, %v4412_v29  ;;  %v6128_v29 = vld [vmem:[%s7251_s2 + $0x80] sm:$0xff] }
 0x704   :  { %v4414_v32 = vpop.eup %4413  ;;  %7541 = vst [vmem:[#allocation3_spill] sm:$0xff] %v6128_v29 }
 0x705   :  { %4417 = vrcp.f32 %v1832_v31  ;;  %v1841_v33 = vadd.f32 1.0, %v4414_v32  ;;  %v4416_v34 = vpop.eup %4415  ;;  %v6140_v31 = vld [vmem:[%s7251_s2 + $0x68] sm:$0xff]  ;;  %v6145_v32 = vld [vmem:[%s7251_s2 + $0x78] sm:$0xff] }
 0x706   :  { %4419 = vtanh.f32 %v1844_v30  ;;  %v1852_v53 = vadd.f32 1.0, %v4416_v34  ;;  %v6133_v30 = vld [vmem:[%s7251_s2 + $0x90] sm:$0xff]  ;;  %7543 = vst [vmem:[#allocation6_spill] sm:$0xff] %v6140_v31  ;;  %7544 = vst [vmem:[#allocation7_spill] sm:$0xff] %v6145_v32 }
 0x707   :  { %4421 = vrcp.f32 %v1841_v33  ;;  %7542 = vst [vmem:[#allocation5_spill] sm:$0xff] %v6133_v30  ;;  %v6152_v33 = vld [vmem:[%s7251_s2 + $0x60] sm:$0xff]  ;;  %v6157_v34 = vld [vmem:[%s7251_s2 + $0x70] sm:$0xff] }
 0x708   :  { %4423 = vrcp.f32 %v1852_v53  ;;  %7545 = vst [vmem:[#allocation8_spill] sm:$0xff] %v6152_v33  ;;  %7546 = vst [vmem:[#allocation9_spill] sm:$0xff] %v6157_v34  ;;  %v6181_v53 = vld [vmem:[%s7251_s2 + $0x50] sm:$0xff] }
 0x709   :  { %7550 = vst [vmem:[#allocation13_spill] sm:$0xff] %v6181_v53 }
 0x712   :  { %v4418_v35 = vpop.eup %4417 }
 0x713   :  { %v4420_v36 = vpop.eup %4419 }
 0x714   :  { %v4422_v37 = vpop.eup %4421  ;;  %v1856_v38 = vmul.f32 %v4420_v36, %v4418_v35  ;;  %v6164_v35 = vld [vmem:[%s7251_s2 + $0x48] sm:$0xff]  ;;  %v6169_v36 = vld [vmem:[%s7251_s2 + $0x58] sm:$0xff] }
 0x715   :  { %v1855_v46 = vmul.f32 %v4422_v37, %v5771_v58  ;;  %v4424_v43 = vpop.eup %4423  ;;  %v5905_v58 = vld [vmem:[%s7251_s2 + $0x1b8] sm:$0xff]  ;;  %7547 = vst [vmem:[#allocation10_spill] sm:$0xff] %v6164_v35  ;;  %7548 = vst [vmem:[#allocation11_spill] sm:$0xff] %v6169_v36  ;;  %v6176_v37 = vld [vmem:[%s7251_s2 + $0x40] sm:$0xff] }
 0x716   :  { %7549 = vst [vmem:[#allocation12_spill] sm:$0xff] %v6176_v37 }
 0x717   :  { %v5859_v41 = vadd.f32 %v1856_v38, %v1855_v46  ;;  %v6188_v46 = vld [vmem:[%s7251_s2 + $0x28] sm:$0xff]  ;;  %v6193_v38 = vld [vmem:[%s7251_s2 + $0x38] sm:$0xff] }
 0x718   :  { %7551 = vst [vmem:[#allocation14_spill] sm:$0xff] %v6188_v46  ;;  %7552 = vst [vmem:[#allocation15_spill] sm:$0xff] %v6193_v38 }
 0x719   :  { %7538 = vst [vmem:[#allocation21_spill] sm:$0xff] %v5859_v41  ;;  %4425 = vtanh.f32 %v5859_v41  ;;  %v6217_v41 = vld [vmem:[%s7251_s2 + $0x18] sm:$0xff] }
 0x71a   :  { %7556 = vst [vmem:[#allocation19_spill] sm:$0xff] %v6217_v41 }
 0x726   :  { %v4426_v42 = vpop.eup %4425 }
 0x727   :  { %v1859_v45 = vmul.f32 %v4426_v42, %v4424_v43  ;;  %v6200_v43 = vld [vmem:[%s7251_s2 + $0x20] sm:$0xff]  ;;  %v6205_v42 = vld [vmem:[%s7251_s2 + $0x30] sm:$0xff] }
 0x728   :  { %7553 = vst [vmem:[#allocation16_spill] sm:$0xff] %v6200_v43  ;;  %7554 = vst [vmem:[#allocation17_spill] sm:$0xff] %v6205_v42 }
 0x729   :  { %4269 = vst [vmem:[%s7250_s3 + $0xc] sm:$0x3] %v1859_v45  ;;  %1993 = vmatmul.mubr.f32.vlgmr.msra.gmra.mxu0 %v1859_v45  ;;  %2064 = vmatmul.mubr.f32.vlgmr.msra.gmra.mxu1 %v1859_v45  ;;  %v6212_v45 = vld [vmem:[%s7251_s2 + $0x8] sm:$0xff] }
 0x72a   :  { %2192 = vmatpush1.msra.mxu0 %v5865_v44  ;;  %2263 = vmatpush1.msra.mxu1 %v5870_v3  ;;  %7555 = vst [vmem:[#allocation18_spill] sm:$0xff] %v6212_v45 }
 0x72b   :  { %2193 = vmatprep.subr.mxu0 %v5875_v51  ;;  %2264 = vmatprep.subr.mxu1 %v5880_v19 }
 0x72c   :  { %2194 = vmatpush1.msra.mxu0 %v5888_v57  ;;  %2265 = vmatpush1.msra.mxu1 %v5893_v56 }
 0x72d   :  { %2195 = vmatprep.subr.mxu0 %v5900_v1  ;;  %2266 = vmatprep.subr.mxu1 %v5905_v58 }
 0x72e   :  { %2196 = vmatpush1.msra.mxu0 %v5912_v55  ;;  %2267 = vmatpush1.msra.mxu1 %v5917_v39 }
 0x72f   :  { %2197 = vmatprep.subr.mxu0 %v5924_v40  ;;  %2268 = vmatprep.subr.mxu1 %v5929_v47 }
 0x730   :  { %2198 = vmatpush1.msra.mxu0 %v5936_v59  ;;  %2269 = vmatpush1.msra.mxu1 %v5941_v0 }
 0x731   :  { %2199 = vmatprep.subr.mxu0 %v5948_v54  ;;  %2270 = vmatprep.subr.mxu1 %v5953_v52 }
 0x732   :  { %2200 = vmatpush1.msra.mxu0 %v5960_v61  ;;  %2271 = vmatpush1.msra.mxu1 %v5965_v50 }
 0x733   :  { %2201 = vmatprep.subr.mxu0 %v5972_v63  ;;  %2272 = vmatprep.subr.mxu1 %v5977_v48 }
 0x734   :  { %2202 = vmatpush1.msra.mxu0 %v5984_v60  ;;  %2273 = vmatpush1.msra.mxu1 %v5989_v49 }
 0x735   :  { %2203 = vmatprep.subr.mxu0 %v5996_v2  ;;  %2274 = vmatprep.subr.mxu1 %v6001_v4 }
 0x736   :  { %2204 = vmatpush1.msra.mxu0 %v6008_v5  ;;  %2275 = vmatpush1.msra.mxu1 %v6013_v6 }
 0x737   :  { %2205 = vmatprep.subr.mxu0 %v6020_v7  ;;  %2276 = vmatprep.subr.mxu1 %v6025_v8 }
 0x738   :  { %2206 = vmatpush1.msra.mxu0 %v6032_v12  ;;  %2277 = vmatpush1.msra.mxu1 %v6037_v13 }
 0x739   :  { %2207 = vmatprep.subr.mxu0 %v6044_v14  ;;  %2278 = vmatprep.subr.mxu1 %v6049_v15 }
 0x73a   :  { %2208 = vmatpush1.msra.mxu0 %v6056_v16  ;;  %2279 = vmatpush1.msra.mxu1 %v6061_v17 }
 0x73b   :  { %2209 = vmatprep.subr.mxu0 %v6068_v18  ;;  %2280 = vmatprep.subr.mxu1 %v6073_v20 }
 0x73c   :  { %2210 = vmatpush1.msra.mxu0 %v6080_v21  ;;  %2281 = vmatpush1.msra.mxu1 %v6085_v22 }
 0x73d   :  { %2211 = vmatprep.subr.mxu0 %v6092_v23  ;;  %2282 = vmatprep.subr.mxu1 %v6097_v24 }
 0x73e   :  { %2212 = vmatpush1.msra.mxu0 %v6104_v25  ;;  %2283 = vmatpush1.msra.mxu1 %v6109_v26 }
 0x73f   :  { %2213 = vmatprep.subr.mxu0 %v6116_v27  ;;  %2284 = vmatprep.subr.mxu1 %v6121_v28 }
 0x740   :  { %2214 = vmatpush1.msra.mxu0 %v6128_v29  ;;  %2285 = vmatpush1.msra.mxu1 %v6133_v30 }
 0x741   :  { %2215 = vmatprep.subr.mxu0 %v6140_v31  ;;  %2286 = vmatprep.subr.mxu1 %v6145_v32 }
 0x742   :  { %2216 = vmatpush1.msra.mxu0 %v6152_v33  ;;  %2287 = vmatpush1.msra.mxu1 %v6157_v34 }
 0x743   :  { %2217 = vmatprep.subr.mxu0 %v6164_v35  ;;  %2288 = vmatprep.subr.mxu1 %v6169_v36 }
 0x744   :  { %2218 = vmatpush1.msra.mxu0 %v6176_v37  ;;  %2289 = vmatpush1.msra.mxu1 %v6181_v53  ;;  %v6231_v53 = vld [vmem:[%s7251_s2 + $0x10] sm:$0xff] }
 0x745   :  { %2219 = vmatprep.subr.mxu0 %v6188_v46  ;;  %2290 = vmatprep.subr.mxu1 %v6193_v38  ;;  %7558 = vst [vmem:[#allocation23_spill] sm:$0xff] %v6231_v53 }
 0x746   :  { %2220 = vmatpush1.msra.mxu0 %v6200_v43  ;;  %2291 = vmatpush1.msra.mxu1 %v6205_v42 }
 0x747   :  { %2221 = vmatprep.subr.mxu0 %v6212_v45  ;;  %2292 = vmatprep.subr.mxu1 %v6217_v41 }
 0x748   :  { %2222 = vmatpush1.msra.mxu0 %v6224_v62  ;;  %2255 = vmatprep.mubr.f32.mxu0 %v7537_v9 }
 0x749   :  { %2293 = vmatpush1.msra.mxu1 %v6231_v53  ;;  %2326 = vmatprep.mubr.f32.mxu1 %v7537_v9 }
 0x74a   :  { %2256 = vmatmul.mubr.f32.vlgmr.msra.gmra.mxu0 %v7537_v9  ;;  %2327 = vmatmul.mubr.f32.vlgmr.msra.gmra.mxu1 %v7537_v9 }
 0x74b   :  { %2454 = vmatprep.subr.mxu0 %v5844_v10  ;;  %2525 = vmatprep.subr.mxu1 %v5849_v11 }
 0x74c   :  { %2455 = vmatpush1.msra.mxu0 %v5865_v44  ;;  %2526 = vmatpush1.msra.mxu1 %v5870_v3 }
 0x74d   :  { %2456 = vmatprep.subr.mxu0 %v5875_v51  ;;  %2527 = vmatprep.subr.mxu1 %v5880_v19 }
 0x74e   :  { %2457 = vmatpush1.msra.mxu0 %v5888_v57  ;;  %2528 = vmatpush1.msra.mxu1 %v5893_v56 }
 0x74f   :  { %2458 = vmatprep.subr.mxu0 %v5900_v1  ;;  %2529 = vmatprep.subr.mxu1 %v5905_v58 }
 0x750   :  { %2459 = vmatpush1.msra.mxu0 %v5912_v55  ;;  %2530 = vmatpush1.msra.mxu1 %v5917_v39 }
 0x751   :  { %2460 = vmatprep.subr.mxu0 %v5924_v40  ;;  %2531 = vmatprep.subr.mxu1 %v5929_v47 }
 0x752   :  { %2461 = vmatpush1.msra.mxu0 %v5936_v59  ;;  %2532 = vmatpush1.msra.mxu1 %v5941_v0 }
 0x753   :  { %2462 = vmatprep.subr.mxu0 %v5948_v54  ;;  %2533 = vmatprep.subr.mxu1 %v5953_v52 }
 0x754   :  { %2463 = vmatpush1.msra.mxu0 %v5960_v61  ;;  %2534 = vmatpush1.msra.mxu1 %v5965_v50 }
 0x755   :  { %2464 = vmatprep.subr.mxu0 %v5972_v63  ;;  %2535 = vmatprep.subr.mxu1 %v5977_v48 }
 0x756   :  { %2465 = vmatpush1.msra.mxu0 %v5984_v60  ;;  %2536 = vmatpush1.msra.mxu1 %v5989_v49 }
 0x757   :  { %2466 = vmatprep.subr.mxu0 %v5996_v2  ;;  %2537 = vmatprep.subr.mxu1 %v6001_v4 }
 0x758   :  { %2467 = vmatpush1.msra.mxu0 %v6008_v5  ;;  %2538 = vmatpush1.msra.mxu1 %v6013_v6 }
 0x759   :  { %2468 = vmatprep.subr.mxu0 %v6020_v7  ;;  %2539 = vmatprep.subr.mxu1 %v6025_v8 }
 0x75a   :  { %2469 = vmatpush1.msra.mxu0 %v6032_v12  ;;  %2540 = vmatpush1.msra.mxu1 %v6037_v13 }
 0x75b   :  { %2470 = vmatprep.subr.mxu0 %v6044_v14  ;;  %2541 = vmatprep.subr.mxu1 %v6049_v15 }
 0x75c   :  { %2471 = vmatpush1.msra.mxu0 %v6056_v16  ;;  %2542 = vmatpush1.msra.mxu1 %v6061_v17 }
 0x75d   :  { %2472 = vmatprep.subr.mxu0 %v6068_v18  ;;  %2543 = vmatprep.subr.mxu1 %v6073_v20 }
 0x75e   :  { %2473 = vmatpush1.msra.mxu0 %v6080_v21  ;;  %2544 = vmatpush1.msra.mxu1 %v6085_v22 }
 0x75f   :  { %2474 = vmatprep.subr.mxu0 %v6092_v23  ;;  %2545 = vmatprep.subr.mxu1 %v6097_v24 }
 0x760   :  { %2475 = vmatpush1.msra.mxu0 %v6104_v25  ;;  %2546 = vmatpush1.msra.mxu1 %v6109_v26 }
 0x761   :  { %2476 = vmatprep.subr.mxu0 %v6116_v27  ;;  %2547 = vmatprep.subr.mxu1 %v6121_v28  ;;  %v7559_v27 = vld [vmem:[#allocation13_spill] sm:$0xff] }
 0x762   :  { %2477 = vmatpush1.msra.mxu0 %v6128_v29  ;;  %2548 = vmatpush1.msra.mxu1 %v6133_v30  ;;  %v7561_v30 = vld [vmem:[#allocation21_spill] sm:$0xff] }
 0x763   :  { %2478 = vmatprep.subr.mxu0 %v6140_v31  ;;  %2549 = vmatprep.subr.mxu1 %v6145_v32 }
 0x764   :  { %2479 = vmatpush1.msra.mxu0 %v6152_v33  ;;  %2550 = vmatpush1.msra.mxu1 %v6157_v34 }
 0x765   :  { %2480 = vmatprep.subr.mxu0 %v6164_v35  ;;  %2551 = vmatprep.subr.mxu1 %v6169_v36 }
 0x766   :  { %2481 = vmatpush1.msra.mxu0 %v6176_v37  ;;  %2552 = vmatpush1.msra.mxu1 %v7559_v27  ;;  %v7560_v37 = vld [vmem:[#allocation22_spill] sm:$0xff] }
 0x767   :  { %2482 = vmatprep.subr.mxu0 %v6188_v46  ;;  %2553 = vmatprep.subr.mxu1 %v6193_v38 }
 0x768   :  { %2483 = vmatpush1.msra.mxu0 %v6200_v43  ;;  %2554 = vmatpush1.msra.mxu1 %v6205_v42 }
 0x769   :  { %2484 = vmatprep.subr.mxu0 %v6212_v45  ;;  %2555 = vmatprep.subr.mxu1 %v6217_v41 }
 0x76a   :  { %2485 = vmatpush1.msra.mxu0 %v6224_v62  ;;  %2518 = vmatprep.mubr.f32.mxu0 %v7537_v9 }
 0x76b   :  { %2556 = vmatpush1.msra.mxu1 %v6231_v53  ;;  %2589 = vmatprep.mubr.f32.mxu1 %v7537_v9  ;;  %v4270_v53 = vld [vmem:[%s7249_s0 + $0x70] sm:$0xff] }
 0x76c   :  { %2717 = vmatprep.subr.mxu0 %v5844_v10  ;;  %2788 = vmatprep.subr.mxu1 %v5849_v11 }
 0x7e9   :  { %v1994_v38 = vpop.f32.mrf.mxu0  ;;  %v2065_v43 = vpop.f32.mrf.mxu1 }
 0x7eb   :  { %v1996_v46 = vpop.f32.mrf.mxu0  ;;  %v2067_v42 = vpop.f32.mrf.mxu1 }
 0x7ec   :  { %v2074_v27 = vcombine.low %v1994_v38, %v1996_v46  ;;  %v2075_v45 = vcombine.low %v2065_v43, %v2067_v42 }
 0x7ee   :  { %v2082_v41 = vrot.slane %v2074_v27, %v7560_v37  ;;  %v2089_v62 = vrot.slane %v2075_v45, %v7560_v37 }
 0x7f0   :  { %v2090_v36 = vcombine.low %v2082_v41, %v2089_v62 }
 0x7f2   :  { %v2092_v9 = vadd.f32 %v4270_v53, %v2090_v36 }
 0x7f4   :  { %v4271_v35 = vmul.f32 -1.442695, %v2092_v9  ;;  %v2100_v10 = vrot.slane %v2092_v9, 2  ;;  %v2111_v34 = vrot.slane %v2092_v9, 6  ;;  %v2108_v46 = vrot.slane %v2092_v9, 4  ;;  %v4275_v9 = vld [vmem:[%s7249_s0 + $0x78] sm:$0xff] }
 0x7f6   :  { %4427 = vpow2.f32 %v4271_v35  ;;  %v4272_v11 = vmul.f32 -1.442695, %v2100_v10  ;;  %v4273_v33 = vmul.f32 -1.442695, %v2111_v34 }
 0x7f8   :  { %4429 = vpow2.f32 %v4272_v11 }
 0x7f9   :  { %4431 = vpow2.f32 %v4273_v33 }
 0x803   :  { %v4428_v32 = vpop.eup %4427 }
 0x804   :  { %v2096_v38 = vadd.f32 1.0, %v4428_v32 }
 0x805   :  { %v4430_v27 = vpop.eup %4429 }
 0x806   :  { %4433 = vrcp.f32 %v2096_v38  ;;  %v2105_v43 = vadd.f32 1.0, %v4430_v27  ;;  %v4432_v32 = vpop.eup %4431 }
 0x807   :  { %4435 = vtanh.f32 %v2108_v46  ;;  %v2116_v38 = vadd.f32 1.0, %v4432_v32 }
 0x808   :  { %4437 = vrcp.f32 %v2105_v43 }
 0x80a   :  { %v2257_v42 = vpop.f32.mrf.mxu0  ;;  %v2328_v45 = vpop.f32.mrf.mxu1 }
 0x80c   :  { %v2259_v62 = vpop.f32.mrf.mxu0  ;;  %v2330_v41 = vpop.f32.mrf.mxu1 }
 0x80d   :  { %v2337_v36 = vcombine.low %v2257_v42, %v2259_v62  ;;  %v2338_v53 = vcombine.low %v2328_v45, %v2330_v41 }
 0x80f   :  { %v2345_v35 = vrot.slane %v2337_v36, %v7560_v37  ;;  %v2352_v10 = vrot.slane %v2338_v53, %v7560_v37 }
 0x811   :  { %v2353_v33 = vcombine.low %v2345_v35, %v2352_v10 }
 0x813   :  { %v4434_v34 = vpop.eup %4433  ;;  %v2355_v11 = vadd.f32 %v4275_v9, %v2353_v33 }
 0x814   :  { %v4436_v46 = vpop.eup %4435 }
 0x815   :  { %v4438_v27 = vpop.eup %4437  ;;  %v4276_v43 = vmul.f32 -1.442695, %v2355_v11  ;;  %v2363_v31 = vrot.slane %v2355_v11, 2  ;;  %v2120_v45 = vmul.f32 %v4436_v46, %v4434_v34  ;;  %v2374_v36 = vrot.slane %v2355_v11, 6 }
 0x816   :  { %v2119_v42 = vmul.f32 %v4438_v27, %v7561_v30  ;;  %v2371_v35 = vrot.slane %v2355_v11, 4 }
 0x817   :  { %4439 = vpow2.f32 %v4276_v43  ;;  %v4277_v62 = vmul.f32 -1.442695, %v2363_v31  ;;  %v4278_v53 = vmul.f32 -1.442695, %v2374_v36 }
 0x818   :  { %4441 = vrcp.f32 %v2116_v38  ;;  %v2121_v41 = vadd.f32 %v2120_v45, %v2119_v42 }
 0x819   :  { %4443 = vpow2.f32 %v4277_v62 }
 0x81a   :  { %4445 = vtanh.f32 %v2121_v41 }
 0x81b   :  { %4447 = vpow2.f32 %v4278_v53 }
 0x824   :  { %v4440_v37 = vpop.eup %4439 }
 0x825   :  { %v4442_v10 = vpop.eup %4441  ;;  %v2359_v9 = vadd.f32 1.0, %v4440_v37 }
 0x826   :  { %v4444_v33 = vpop.eup %4443 }
 0x827   :  { %v4446_v32 = vpop.eup %4445  ;;  %4449 = vrcp.f32 %v2359_v9  ;;  %v2368_v29 = vadd.f32 1.0, %v4444_v33 }
 0x828   :  { %v2123_v28 = vmul.f32 %v4446_v32, %v4442_v10  ;;  %4451 = vtanh.f32 %v2371_v35  ;;  %v4448_v30 = vpop.eup %4447 }
 0x829   :  { %4453 = vrcp.f32 %v2368_v29  ;;  %v2379_v38 = vadd.f32 1.0, %v4448_v30 }
 0x82a   :  { %4274 = vst [vmem:[%s7250_s3 + $0xe] sm:$0x3] %v2123_v28 }
 0x82b   :  { %4455 = vrcp.f32 %v2379_v38  ;;  %v6427_v38 = vld [vmem:[%s7251_s2 + $0x1f0] sm:$0xff] }
 0x834   :  { %v4450_v31 = vpop.eup %4449 }
 0x835   :  { %v4452_v34 = vpop.eup %4451 }
 0x836   :  { %v4454_v46 = vpop.eup %4453  ;;  %v2383_v27 = vmul.f32 %v4452_v34, %v4450_v31  ;;  %v6410_v31 = vld [vmem:[%s7251_s2 + $0x1e8] sm:$0xff]  ;;  %v6415_v34 = vld [vmem:[%s7251_s2 + $0x1f8] sm:$0xff] }
 0x837   :  { %v2382_v11 = vmul.f32 0.0, %v4454_v46  ;;  %7584 = vst [vmem:[#allocation21_spill] sm:$0xff] %v6410_v31  ;;  %v6420_v46 = vld [vmem:[%s7251_s2 + $0x1e0] sm:$0xff] }
 0x838   :  { %v4456_v43 = vpop.eup %4455 }
 0x839   :  { %v6323_v37 = vadd.f32 %v2383_v27, %v2382_v11  ;;  %v6432_v11 = vld [vmem:[%s7251_s2 + $0x1c8] sm:$0xff]  ;;  %v6437_v27 = vld [vmem:[%s7251_s2 + $0x1d8] sm:$0xff] }
 0x83b   :  { %4457 = vtanh.f32 %v6323_v37 }
 0x848   :  { %v4458_v42 = vpop.eup %4457 }
 0x849   :  { %v2386_v45 = vmul.f32 %v4458_v42, %v4456_v43  ;;  %v6449_v43 = vld [vmem:[%s7251_s2 + $0x1d0] sm:$0xff]  ;;  %v6454_v42 = vld [vmem:[%s7251_s2 + $0x1a8] sm:$0xff] }
 0x84b   :  { %4279 = vst [vmem:[%s7252_s4 + $0xe] sm:$0x3] %v2386_v45  ;;  %2519 = vmatmul.mubr.f32.vlgmr.msra.gmra.mxu0 %v2386_v45  ;;  %2590 = vmatmul.mubr.f32.vlgmr.msra.gmra.mxu1 %v2386_v45  ;;  %v6461_v45 = vld [vmem:[%s7251_s2 + $0x1b8] sm:$0xff] }
 0x84c   :  { %2718 = vmatpush1.msra.mxu0 %v5865_v44  ;;  %2789 = vmatpush1.msra.mxu1 %v5870_v3  ;;  %v7562_v44 = vld [vmem:[#allocation4_spill] sm:$0xff]  ;;  %v7563_v3 = vld [vmem:[#allocation2_spill] sm:$0xff] }
 0x84d   :  { %2719 = vmatprep.subr.mxu0 %v5875_v51  ;;  %2790 = vmatprep.subr.mxu1 %v5880_v19  ;;  %v7564_v51 = vld [vmem:[#allocation3_spill] sm:$0xff]  ;;  %v7565_v19 = vld [vmem:[#allocation5_spill] sm:$0xff]  ;;  %7585 = vst [vmem:[#allocation4_spill] sm:$0xff] %v6415_v34 }
 0x84e   :  { %2720 = vmatpush1.msra.mxu0 %v5888_v57  ;;  %2791 = vmatpush1.msra.mxu1 %v5893_v56  ;;  %v7566_v57 = vld [vmem:[#allocation6_spill] sm:$0xff]  ;;  %v7567_v56 = vld [vmem:[#allocation7_spill] sm:$0xff] }
 0x84f   :  { %2721 = vmatprep.subr.mxu0 %v5900_v1  ;;  %2792 = vmatprep.subr.mxu1 %v5905_v58  ;;  %v7568_v1 = vld [vmem:[#allocation8_spill] sm:$0xff]  ;;  %v7569_v58 = vld [vmem:[#allocation9_spill] sm:$0xff] }
 0x850   :  { %2722 = vmatpush1.msra.mxu0 %v5912_v55  ;;  %2793 = vmatpush1.msra.mxu1 %v5917_v39  ;;  %v7570_v55 = vld [vmem:[#allocation10_spill] sm:$0xff]  ;;  %v7571_v39 = vld [vmem:[#allocation11_spill] sm:$0xff] }
 0x851   :  { %2723 = vmatprep.subr.mxu0 %v5924_v40  ;;  %2794 = vmatprep.subr.mxu1 %v5929_v47  ;;  %v7572_v40 = vld [vmem:[#allocation12_spill] sm:$0xff]  ;;  %v7573_v47 = vld [vmem:[#allocation13_spill] sm:$0xff] }
 0x852   :  { %2724 = vmatpush1.msra.mxu0 %v5936_v59  ;;  %2795 = vmatpush1.msra.mxu1 %v5941_v0  ;;  %v7574_v59 = vld [vmem:[#allocation14_spill] sm:$0xff]  ;;  %v7575_v0 = vld [vmem:[#allocation15_spill] sm:$0xff] }
 0x853   :  { %2725 = vmatprep.subr.mxu0 %v5948_v54  ;;  %2796 = vmatprep.subr.mxu1 %v5953_v52  ;;  %v7576_v54 = vld [vmem:[#allocation16_spill] sm:$0xff]  ;;  %v7577_v52 = vld [vmem:[#allocation17_spill] sm:$0xff] }
 0x854   :  { %2726 = vmatpush1.msra.mxu0 %v5960_v61  ;;  %2797 = vmatpush1.msra.mxu1 %v5965_v50  ;;  %v7578_v61 = vld [vmem:[#allocation18_spill] sm:$0xff]  ;;  %v7579_v50 = vld [vmem:[#allocation19_spill] sm:$0xff] }
 0x855   :  { %2727 = vmatprep.subr.mxu0 %v5972_v63  ;;  %2798 = vmatprep.subr.mxu1 %v5977_v48  ;;  %v7580_v63 = vld [vmem:[#allocation20_spill] sm:$0xff]  ;;  %v7581_v48 = vmov 0.0  }
 0x856   :  { %2728 = vmatpush1.msra.mxu0 %v5984_v60  ;;  %2799 = vmatpush1.msra.mxu1 %v5989_v49  ;;  %v7582_v60 = vld [vmem:[#allocation23_spill] sm:$0xff] }
 0x857   :  { %2729 = vmatprep.subr.mxu0 %v5996_v2  ;;  %2800 = vmatprep.subr.mxu1 %v6001_v4 }
 0x858   :  { %2730 = vmatpush1.msra.mxu0 %v6008_v5  ;;  %2801 = vmatpush1.msra.mxu1 %v6013_v6 }
 0x859   :  { %2731 = vmatprep.subr.mxu0 %v6020_v7  ;;  %2802 = vmatprep.subr.mxu1 %v6025_v8  ;;  %v7583_v8 = vld [vmem:[#allocation22_spill] sm:$0xff] }
 0x85a   :  { %2732 = vmatpush1.msra.mxu0 %v6032_v12  ;;  %2803 = vmatpush1.msra.mxu1 %v6037_v13 }
 0x85b   :  { %2733 = vmatprep.subr.mxu0 %v6044_v14  ;;  %2804 = vmatprep.subr.mxu1 %v6049_v15  ;;  %v4280_v14 = vld [vmem:[%s7249_s0 + $0x68] sm:$0xff] }
 0x85c   :  { %2734 = vmatpush1.msra.mxu0 %v6056_v16  ;;  %2805 = vmatpush1.msra.mxu1 %v6061_v17 }
 0x85d   :  { %2735 = vmatprep.subr.mxu0 %v6068_v18  ;;  %2806 = vmatprep.subr.mxu1 %v6073_v20 }
 0x85e   :  { %2736 = vmatpush1.msra.mxu0 %v6080_v21  ;;  %2807 = vmatpush1.msra.mxu1 %v6085_v22 }
 0x85f   :  { %2737 = vmatprep.subr.mxu0 %v6092_v23  ;;  %2808 = vmatprep.subr.mxu1 %v6097_v24 }
 0x860   :  { %2738 = vmatpush1.msra.mxu0 %v6104_v25  ;;  %2809 = vmatpush1.msra.mxu1 %v6109_v26 }
 0x861   :  { %2739 = vmatprep.subr.mxu0 %v7562_v44  ;;  %2810 = vmatprep.subr.mxu1 %v7563_v3  ;;  %v6466_v44 = vld [vmem:[%s7251_s2 + $0x1a0] sm:$0xff]  ;;  %v6471_v3 = vld [vmem:[%s7251_s2 + $0x1b0] sm:$0xff] }
 0x862   :  { %2740 = vmatpush1.msra.mxu0 %v7564_v51  ;;  %2811 = vmatpush1.msra.mxu1 %v7565_v19  ;;  %v6478_v51 = vld [vmem:[%s7251_s2 + $0x188] sm:$0xff]  ;;  %v6483_v19 = vld [vmem:[%s7251_s2 + $0x198] sm:$0xff] }
 0x863   :  { %2741 = vmatprep.subr.mxu0 %v7566_v57  ;;  %2812 = vmatprep.subr.mxu1 %v7567_v56  ;;  %v6490_v57 = vld [vmem:[%s7251_s2 + $0x180] sm:$0xff]  ;;  %v6495_v56 = vld [vmem:[%s7251_s2 + $0x190] sm:$0xff] }
 0x864   :  { %2742 = vmatpush1.msra.mxu0 %v7568_v1  ;;  %2813 = vmatpush1.msra.mxu1 %v7569_v58  ;;  %v6502_v1 = vld [vmem:[%s7251_s2 + $0x168] sm:$0xff]  ;;  %v6507_v58 = vld [vmem:[%s7251_s2 + $0x178] sm:$0xff] }
 0x865   :  { %2743 = vmatprep.subr.mxu0 %v7570_v55  ;;  %2814 = vmatprep.subr.mxu1 %v7571_v39  ;;  %v6514_v55 = vld [vmem:[%s7251_s2 + $0x160] sm:$0xff]  ;;  %v6519_v39 = vld [vmem:[%s7251_s2 + $0x170] sm:$0xff] }
 0x866   :  { %2744 = vmatpush1.msra.mxu0 %v7572_v40  ;;  %2815 = vmatpush1.msra.mxu1 %v7573_v47  ;;  %v6526_v40 = vld [vmem:[%s7251_s2 + $0x148] sm:$0xff]  ;;  %v6531_v47 = vld [vmem:[%s7251_s2 + $0x158] sm:$0xff] }
 0x867   :  { %2745 = vmatprep.subr.mxu0 %v7574_v59  ;;  %2816 = vmatprep.subr.mxu1 %v7575_v0  ;;  %v6538_v59 = vld [vmem:[%s7251_s2 + $0x140] sm:$0xff]  ;;  %v6543_v0 = vld [vmem:[%s7251_s2 + $0x150] sm:$0xff] }
 0x868   :  { %2746 = vmatpush1.msra.mxu0 %v7576_v54  ;;  %2817 = vmatpush1.msra.mxu1 %v7577_v52  ;;  %v6550_v54 = vld [vmem:[%s7251_s2 + $0x128] sm:$0xff]  ;;  %v6555_v52 = vld [vmem:[%s7251_s2 + $0x138] sm:$0xff] }
 0x869   :  { %2747 = vmatprep.subr.mxu0 %v7578_v61  ;;  %2818 = vmatprep.subr.mxu1 %v7579_v50  ;;  %v6562_v61 = vld [vmem:[%s7251_s2 + $0x120] sm:$0xff]  ;;  %v6567_v50 = vld [vmem:[%s7251_s2 + $0x130] sm:$0xff] }
 0x86a   :  { %2748 = vmatpush1.msra.mxu0 %v7580_v63  ;;  %2781 = vmatprep.mubr.f32.mxu0 %v7581_v48  ;;  %v6574_v63 = vld [vmem:[%s7251_s2 + $0x108] sm:$0xff] }
 0x86b   :  { %2819 = vmatpush1.msra.mxu1 %v7582_v60  ;;  %2852 = vmatprep.mubr.f32.mxu1 %v7581_v48  ;;  %v6579_v60 = vld [vmem:[%s7251_s2 + $0x118] sm:$0xff] }
 0x86c   :  { %2980 = vmatprep.subr.mxu0 %v6410_v31  ;;  %3051 = vmatprep.subr.mxu1 %v6415_v34 }
 0x90b   :  { %v2520_v49 = vpop.f32.mrf.mxu0  ;;  %v2591_v2 = vpop.f32.mrf.mxu1 }
 0x90d   :  { %v2522_v4 = vpop.f32.mrf.mxu0  ;;  %v2593_v5 = vpop.f32.mrf.mxu1 }
 0x90e   :  { %v2600_v6 = vcombine.low %v2520_v49, %v2522_v4  ;;  %v2601_v7 = vcombine.low %v2591_v2, %v2593_v5  ;;  %v6586_v49 = vld [vmem:[%s7251_s2 + $0x100] sm:$0xff]  ;;  %v6591_v2 = vld [vmem:[%s7251_s2 + $0x110] sm:$0xff]  ;;  %v6598_v4 = vld [vmem:[%s7251_s2 + $0xe8] sm:$0xff] }
 0x90f   :  { %v6603_v5 = vld [vmem:[%s7251_s2 + $0xf8] sm:$0xff] }
 0x910   :  { %v2608_v12 = vrot.slane %v2600_v6, %v7583_v8  ;;  %v2615_v13 = vrot.slane %v2601_v7, %v7583_v8  ;;  %v6610_v6 = vld [vmem:[%s7251_s2 + $0xe0] sm:$0xff]  ;;  %v6615_v7 = vld [vmem:[%s7251_s2 + $0xf0] sm:$0xff] }
 0x912   :  { %v2616_v15 = vcombine.low %v2608_v12, %v2615_v13  ;;  %v6622_v12 = vld [vmem:[%s7251_s2 + $0xc8] sm:$0xff]  ;;  %v6627_v13 = vld [vmem:[%s7251_s2 + $0xd8] sm:$0xff] }
 0x914   :  { %v2618_v16 = vadd.f32 %v4280_v14, %v2616_v15  ;;  %v6634_v14 = vld [vmem:[%s7251_s2 + $0xc0] sm:$0xff]  ;;  %v6639_v15 = vld [vmem:[%s7251_s2 + $0xd0] sm:$0xff] }
 0x916   :  { %v4281_v17 = vmul.f32 -1.442695, %v2618_v16  ;;  %v2626_v18 = vrot.slane %v2618_v16, 2  ;;  %v2637_v21 = vrot.slane %v2618_v16, 6  ;;  %v2634_v24 = vrot.slane %v2618_v16, 4  ;;  %v6646_v16 = vld [vmem:[%s7251_s2 + $0xa8] sm:$0xff] }
 0x918   :  { %4459 = vpow2.f32 %v4281_v17  ;;  %v4282_v20 = vmul.f32 -1.442695, %v2626_v18  ;;  %v4283_v22 = vmul.f32 -1.442695, %v2637_v21  ;;  %v6651_v17 = vld [vmem:[%s7251_s2 + $0xb8] sm:$0xff]  ;;  %v6658_v18 = vld [vmem:[%s7251_s2 + $0xa0] sm:$0xff] }
 0x919   :  { %v6670_v21 = vld [vmem:[%s7251_s2 + $0x88] sm:$0xff] }
 0x91a   :  { %4461 = vpow2.f32 %v4282_v20  ;;  %v6663_v20 = vld [vmem:[%s7251_s2 + $0xb0] sm:$0xff] }
 0x91b   :  { %4463 = vpow2.f32 %v4283_v22  ;;  %v6675_v22 = vld [vmem:[%s7251_s2 + $0x98] sm:$0xff] }
 0x925   :  { %v4460_v23 = vpop.eup %4459 }
 0x926   :  { %v2622_v25 = vadd.f32 1.0, %v4460_v23  ;;  %v6682_v23 = vld [vmem:[%s7251_s2 + $0x80] sm:$0xff] }
 0x927   :  { %v4462_v26 = vpop.eup %4461 }
 0x928   :  { %4465 = vrcp.f32 %v2622_v25  ;;  %v2631_v28 = vadd.f32 1.0, %v4462_v26  ;;  %v4464_v29 = vpop.eup %4463  ;;  %v6694_v25 = vld [vmem:[%s7251_s2 + $0x68] sm:$0xff]  ;;  %v6699_v26 = vld [vmem:[%s7251_s2 + $0x78] sm:$0xff] }
 0x929   :  { %4467 = vtanh.f32 %v2634_v24  ;;  %v2642_v53 = vadd.f32 1.0, %v4464_v29  ;;  %v6687_v24 = vld [vmem:[%s7251_s2 + $0x90] sm:$0xff]  ;;  %7587 = vst [vmem:[#allocation3_spill] sm:$0xff] %v6694_v25  ;;  %7588 = vst [vmem:[#allocation5_spill] sm:$0xff] %v6699_v26 }
 0x92a   :  { %4469 = vrcp.f32 %v2631_v28  ;;  %7586 = vst [vmem:[#allocation2_spill] sm:$0xff] %v6687_v24  ;;  %v6706_v28 = vld [vmem:[%s7251_s2 + $0x60] sm:$0xff]  ;;  %v6711_v29 = vld [vmem:[%s7251_s2 + $0x70] sm:$0xff] }
 0x92b   :  { %4471 = vrcp.f32 %v2642_v53  ;;  %7589 = vst [vmem:[#allocation6_spill] sm:$0xff] %v6706_v28  ;;  %7590 = vst [vmem:[#allocation7_spill] sm:$0xff] %v6711_v29  ;;  %v6735_v53 = vld [vmem:[%s7251_s2 + $0x50] sm:$0xff] }
 0x92c   :  { %7594 = vst [vmem:[#allocation11_spill] sm:$0xff] %v6735_v53 }
 0x935   :  { %v4466_v62 = vpop.eup %4465 }
 0x936   :  { %v4468_v41 = vpop.eup %4467 }
 0x937   :  { %v4470_v36 = vpop.eup %4469  ;;  %v2646_v10 = vmul.f32 %v4468_v41, %v4466_v62  ;;  %v6718_v62 = vld [vmem:[%s7251_s2 + $0x48] sm:$0xff]  ;;  %v6723_v41 = vld [vmem:[%s7251_s2 + $0x58] sm:$0xff] }
 0x938   :  { %v2645_v35 = vmul.f32 %v4470_v36, %v6323_v37  ;;  %v4472_v33 = vpop.eup %4471  ;;  %v6444_v37 = vld [vmem:[%s7251_s2 + $0x1c0] sm:$0xff]  ;;  %7591 = vst [vmem:[#allocation8_spill] sm:$0xff] %v6718_v62  ;;  %7592 = vst [vmem:[#allocation9_spill] sm:$0xff] %v6723_v41 }
 0x939   :  { %v6730_v36 = vld [vmem:[%s7251_s2 + $0x40] sm:$0xff] }
 0x93a   :  { %v6399_v9 = vadd.f32 %v2646_v10, %v2645_v35  ;;  %7593 = vst [vmem:[#allocation10_spill] sm:$0xff] %v6730_v36  ;;  %v6742_v35 = vld [vmem:[%s7251_s2 + $0x28] sm:$0xff]  ;;  %v6747_v10 = vld [vmem:[%s7251_s2 + $0x38] sm:$0xff] }
 0x93b   :  { %7595 = vst [vmem:[#allocation12_spill] sm:$0xff] %v6742_v35  ;;  %7596 = vst [vmem:[#allocation13_spill] sm:$0xff] %v6747_v10 }
 0x93c   :  { %4473 = vtanh.f32 %v6399_v9 }
 0x949   :  { %v4474_v32 = vpop.eup %4473 }
 0x94a   :  { %v2649_v30 = vmul.f32 %v4474_v32, %v4472_v33  ;;  %v6754_v33 = vld [vmem:[%s7251_s2 + $0x20] sm:$0xff]  ;;  %v6759_v32 = vld [vmem:[%s7251_s2 + $0x30] sm:$0xff] }
 0x94b   :  { %7597 = vst [vmem:[#allocation14_spill] sm:$0xff] %v6754_v33  ;;  %7598 = vst [vmem:[#allocation15_spill] sm:$0xff] %v6759_v32 }
 0x94c   :  { %4284 = vst [vmem:[%s7252_s4 + $0xc] sm:$0x3] %v2649_v30  ;;  %2782 = vmatmul.mubr.f32.vlgmr.msra.gmra.mxu0 %v2649_v30  ;;  %2853 = vmatmul.mubr.f32.vlgmr.msra.gmra.mxu1 %v2649_v30  ;;  %v6766_v30 = vld [vmem:[%s7251_s2 + $0x8] sm:$0xff] }
 0x94d   :  { %3044 = vmatprep.mubr.f32.mxu0 %v7581_v48  ;;  %3115 = vmatprep.mubr.f32.mxu1 %v7581_v48  ;;  %7599 = vst [vmem:[#allocation16_spill] sm:$0xff] %v6766_v30  ;;  %v6771_v48 = vld [vmem:[%s7251_s2 + $0x18] sm:$0xff] }
 0x94e   :  { %2981 = vmatpush1.msra.mxu0 %v6420_v46  ;;  %3052 = vmatpush1.msra.mxu1 %v6427_v38  ;;  %7600 = vst [vmem:[#allocation17_spill] sm:$0xff] %v6771_v48 }
 0x94f   :  { %2982 = vmatprep.subr.mxu0 %v6432_v11  ;;  %3053 = vmatprep.subr.mxu1 %v6437_v27 }
 0x950   :  { %2983 = vmatpush1.msra.mxu0 %v6444_v37  ;;  %3054 = vmatpush1.msra.mxu1 %v6449_v43 }
 0x951   :  { %2984 = vmatprep.subr.mxu0 %v6454_v42  ;;  %3055 = vmatprep.subr.mxu1 %v6461_v45 }
 0x952   :  { %2985 = vmatpush1.msra.mxu0 %v6466_v44  ;;  %3056 = vmatpush1.msra.mxu1 %v6471_v3 }
 0x953   :  { %2986 = vmatprep.subr.mxu0 %v6478_v51  ;;  %3057 = vmatprep.subr.mxu1 %v6483_v19 }
 0x954   :  { %2987 = vmatpush1.msra.mxu0 %v6490_v57  ;;  %3058 = vmatpush1.msra.mxu1 %v6495_v56 }
 0x955   :  { %2988 = vmatprep.subr.mxu0 %v6502_v1  ;;  %3059 = vmatprep.subr.mxu1 %v6507_v58 }
 0x956   :  { %2989 = vmatpush1.msra.mxu0 %v6514_v55  ;;  %3060 = vmatpush1.msra.mxu1 %v6519_v39 }
 0x957   :  { %2990 = vmatprep.subr.mxu0 %v6526_v40  ;;  %3061 = vmatprep.subr.mxu1 %v6531_v47 }
 0x958   :  { %2991 = vmatpush1.msra.mxu0 %v6538_v59  ;;  %3062 = vmatpush1.msra.mxu1 %v6543_v0 }
 0x959   :  { %2992 = vmatprep.subr.mxu0 %v6550_v54  ;;  %3063 = vmatprep.subr.mxu1 %v6555_v52 }
 0x95a   :  { %2993 = vmatpush1.msra.mxu0 %v6562_v61  ;;  %3064 = vmatpush1.msra.mxu1 %v6567_v50 }
 0x95b   :  { %2994 = vmatprep.subr.mxu0 %v6574_v63  ;;  %3065 = vmatprep.subr.mxu1 %v6579_v60 }
 0x95c   :  { %2995 = vmatpush1.msra.mxu0 %v6586_v49  ;;  %3066 = vmatpush1.msra.mxu1 %v6591_v2 }
 0x95d   :  { %2996 = vmatprep.subr.mxu0 %v6598_v4  ;;  %3067 = vmatprep.subr.mxu1 %v6603_v5 }
 0x95e   :  { %2997 = vmatpush1.msra.mxu0 %v6610_v6  ;;  %3068 = vmatpush1.msra.mxu1 %v6615_v7 }
 0x95f   :  { %2998 = vmatprep.subr.mxu0 %v6622_v12  ;;  %3069 = vmatprep.subr.mxu1 %v6627_v13 }
 0x960   :  { %2999 = vmatpush1.msra.mxu0 %v6634_v14  ;;  %3070 = vmatpush1.msra.mxu1 %v6639_v15 }
 0x961   :  { %3000 = vmatprep.subr.mxu0 %v6646_v16  ;;  %3071 = vmatprep.subr.mxu1 %v6651_v17 }
 0x962   :  { %3001 = vmatpush1.msra.mxu0 %v6658_v18  ;;  %3072 = vmatpush1.msra.mxu1 %v6663_v20 }
 0x963   :  { %3002 = vmatprep.subr.mxu0 %v6670_v21  ;;  %3073 = vmatprep.subr.mxu1 %v6675_v22 }
 0x964   :  { %3003 = vmatpush1.msra.mxu0 %v6682_v23  ;;  %3074 = vmatpush1.msra.mxu1 %v6687_v24 }
 0x965   :  { %3004 = vmatprep.subr.mxu0 %v6694_v25  ;;  %3075 = vmatprep.subr.mxu1 %v6699_v26 }
 0x966   :  { %3005 = vmatpush1.msra.mxu0 %v6706_v28  ;;  %3076 = vmatpush1.msra.mxu1 %v6711_v29 }
 0x967   :  { %3006 = vmatprep.subr.mxu0 %v6718_v62  ;;  %3077 = vmatprep.subr.mxu1 %v6723_v41 }
 0x968   :  { %3007 = vmatpush1.msra.mxu0 %v6730_v36  ;;  %3078 = vmatpush1.msra.mxu1 %v6735_v53  ;;  %v6778_v36 = vld [vmem:[%s7251_s2] sm:$0xff]  ;;  %v6783_v53 = vld [vmem:[%s7251_s2 + $0x10] sm:$0xff] }
 0x969   :  { %3008 = vmatprep.subr.mxu0 %v6742_v35  ;;  %3079 = vmatprep.subr.mxu1 %v6747_v10  ;;  %7601 = vst [vmem:[#allocation18_spill] sm:$0xff] %v6778_v36  ;;  %7602 = vst [vmem:[#allocation19_spill] sm:$0xff] %v6783_v53 }
 0x96a   :  { %3009 = vmatpush1.msra.mxu0 %v6754_v33  ;;  %3080 = vmatpush1.msra.mxu1 %v6759_v32 }
 0x96b   :  { %3010 = vmatprep.subr.mxu0 %v6766_v30  ;;  %3081 = vmatprep.subr.mxu1 %v6771_v48 }
 0x96c   :  { %3011 = vmatpush1.msra.mxu0 %v6778_v36  ;;  %3082 = vmatpush1.msra.mxu1 %v6783_v53  ;;  %v4285_v36 = vld [vmem:[%s7249_s0 + $0x58] sm:$0xff] }
 0x96d   :  { %3243 = vmatprep.subr.mxu0 %v6410_v31  ;;  %3314 = vmatprep.subr.mxu1 %v6415_v34 }
 0xa0c   :  { %v2783_v10 = vpop.f32.mrf.mxu0  ;;  %v2854_v35 = vpop.f32.mrf.mxu1 }
 0xa0e   :  { %v2785_v41 = vpop.f32.mrf.mxu0  ;;  %v2856_v62 = vpop.f32.mrf.mxu1 }
 0xa0f   :  { %v2863_v29 = vcombine.low %v2783_v10, %v2785_v41  ;;  %v2864_v33 = vcombine.low %v2854_v35, %v2856_v62 }
 0xa11   :  { %v2871_v32 = vrot.slane %v2863_v29, %v7583_v8  ;;  %v2878_v30 = vrot.slane %v2864_v33, %v7583_v8 }
 0xa13   :  { %v2879_v48 = vcombine.low %v2871_v32, %v2878_v30  ;;  %v7605_v30 = vld [vmem:[#allocation5_spill] sm:$0xff] }
 0xa15   :  { %v2881_v53 = vadd.f32 %v4285_v36, %v2879_v48 }
 0xa17   :  { %v4286_v28 = vmul.f32 -1.442695, %v2881_v53  ;;  %v2889_v31 = vrot.slane %v2881_v53, 2  ;;  %v2900_v26 = vrot.slane %v2881_v53, 6  ;;  %v2897_v41 = vrot.slane %v2881_v53, 4  ;;  %v7604_v53 = vld [vmem:[#allocation3_spill] sm:$0xff] }
 0xa19   :  { %4475 = vpow2.f32 %v4286_v28  ;;  %v4287_v34 = vmul.f32 -1.442695, %v2889_v31  ;;  %v4288_v25 = vmul.f32 -1.442695, %v2900_v26 }
 0xa1b   :  { %4477 = vpow2.f32 %v4287_v34 }
 0xa1c   :  { %4479 = vpow2.f32 %v4288_v25 }
 0xa26   :  { %v4476_v24 = vpop.eup %4475 }
 0xa27   :  { %v2885_v62 = vadd.f32 1.0, %v4476_v24 }
 0xa28   :  { %v4478_v35 = vpop.eup %4477 }
 0xa29   :  { %4481 = vrcp.f32 %v2885_v62  ;;  %v2894_v29 = vadd.f32 1.0, %v4478_v35  ;;  %v4480_v10 = vpop.eup %4479  ;;  %v7607_v62 = vld [vmem:[#allocation7_spill] sm:$0xff]  ;;  %v7608_v35 = vld [vmem:[#allocation8_spill] sm:$0xff] }
 0xa2a   :  { %4483 = vtanh.f32 %v2897_v41  ;;  %v2905_v36 = vadd.f32 1.0, %v4480_v10  ;;  %v7606_v41 = vld [vmem:[#allocation6_spill] sm:$0xff] }
 0xa2b   :  { %4485 = vrcp.f32 %v2894_v29  ;;  %v7609_v29 = vld [vmem:[#allocation9_spill] sm:$0xff]  ;;  %v7610_v10 = vld [vmem:[#allocation10_spill] sm:$0xff] }
 0xa2c   :  { %4487 = vrcp.f32 %v2905_v36  ;;  %v7614_v36 = vld [vmem:[#allocation14_spill] sm:$0xff] }
 0xa36   :  { %v4482_v33 = vpop.eup %4481 }
 0xa37   :  { %v4484_v32 = vpop.eup %4483 }
 0xa38   :  { %v4486_v48 = vpop.eup %4485  ;;  %v2909_v31 = vmul.f32 %v4484_v32, %v4482_v33  ;;  %v7611_v33 = vld [vmem:[#allocation11_spill] sm:$0xff]  ;;  %v7612_v32 = vld [vmem:[#allocation12_spill] sm:$0xff] }
 0xa39   :  { %v2908_v28 = vmul.f32 %v4486_v48, %v6399_v9  ;;  %v4488_v24 = vpop.eup %4487  ;;  %v7603_v9 = vld [vmem:[#allocation2_spill] sm:$0xff]  ;;  %v7613_v48 = vld [vmem:[#allocation13_spill] sm:$0xff] }
 0xa3b   :  { %v6799_v34 = vadd.f32 %v2909_v31, %v2908_v28  ;;  %v7615_v28 = vld [vmem:[#allocation15_spill] sm:$0xff]  ;;  %v7616_v31 = vld [vmem:[#allocation16_spill] sm:$0xff] }
 0xa3d   :  { %4489 = vtanh.f32 %v6799_v34 }
 0xa4a   :  { %v4490_v26 = vpop.eup %4489 }
 0xa4b   :  { %v2912_v25 = vmul.f32 %v4490_v26, %v4488_v24  ;;  %v7617_v24 = vld [vmem:[#allocation17_spill] sm:$0xff]  ;;  %v7618_v26 = vld [vmem:[#allocation18_spill] sm:$0xff] }
 0xa4d   :  { %4289 = vst [vmem:[%s7252_s4 + $0xa] sm:$0x3] %v2912_v25  ;;  %3045 = vmatmul.mubr.f32.vlgmr.msra.gmra.mxu0 %v2912_v25  ;;  %3116 = vmatmul.mubr.f32.vlgmr.msra.gmra.mxu1 %v2912_v25  ;;  %v7619_v25 = vmov 0.0  }
 0xa4e   :  { %3244 = vmatpush1.msra.mxu0 %v6420_v46  ;;  %3315 = vmatpush1.msra.mxu1 %v6427_v38 }
 0xa4f   :  { %3245 = vmatprep.subr.mxu0 %v6432_v11  ;;  %3316 = vmatprep.subr.mxu1 %v6437_v27 }
 0xa50   :  { %3246 = vmatpush1.msra.mxu0 %v6444_v37  ;;  %3317 = vmatpush1.msra.mxu1 %v6449_v43 }
 0xa51   :  { %3247 = vmatprep.subr.mxu0 %v6454_v42  ;;  %3318 = vmatprep.subr.mxu1 %v6461_v45 }
 0xa52   :  { %3248 = vmatpush1.msra.mxu0 %v6466_v44  ;;  %3319 = vmatpush1.msra.mxu1 %v6471_v3 }
 0xa53   :  { %3249 = vmatprep.subr.mxu0 %v6478_v51  ;;  %3320 = vmatprep.subr.mxu1 %v6483_v19 }
 0xa54   :  { %3250 = vmatpush1.msra.mxu0 %v6490_v57  ;;  %3321 = vmatpush1.msra.mxu1 %v6495_v56 }
 0xa55   :  { %3251 = vmatprep.subr.mxu0 %v6502_v1  ;;  %3322 = vmatprep.subr.mxu1 %v6507_v58 }
 0xa56   :  { %3252 = vmatpush1.msra.mxu0 %v6514_v55  ;;  %3323 = vmatpush1.msra.mxu1 %v6519_v39 }
 0xa57   :  { %3253 = vmatprep.subr.mxu0 %v6526_v40  ;;  %3324 = vmatprep.subr.mxu1 %v6531_v47 }
 0xa58   :  { %3254 = vmatpush1.msra.mxu0 %v6538_v59  ;;  %3325 = vmatpush1.msra.mxu1 %v6543_v0 }
 0xa59   :  { %3255 = vmatprep.subr.mxu0 %v6550_v54  ;;  %3326 = vmatprep.subr.mxu1 %v6555_v52 }
 0xa5a   :  { %3256 = vmatpush1.msra.mxu0 %v6562_v61  ;;  %3327 = vmatpush1.msra.mxu1 %v6567_v50 }
 0xa5b   :  { %3257 = vmatprep.subr.mxu0 %v6574_v63  ;;  %3328 = vmatprep.subr.mxu1 %v6579_v60 }
 0xa5c   :  { %3258 = vmatpush1.msra.mxu0 %v6586_v49  ;;  %3329 = vmatpush1.msra.mxu1 %v6591_v2 }
 0xa5d   :  { %3259 = vmatprep.subr.mxu0 %v6598_v4  ;;  %3330 = vmatprep.subr.mxu1 %v6603_v5 }
 0xa5e   :  { %3260 = vmatpush1.msra.mxu0 %v6610_v6  ;;  %3331 = vmatpush1.msra.mxu1 %v6615_v7 }
 0xa5f   :  { %3261 = vmatprep.subr.mxu0 %v6622_v12  ;;  %3332 = vmatprep.subr.mxu1 %v6627_v13 }
 0xa60   :  { %3262 = vmatpush1.msra.mxu0 %v6634_v14  ;;  %3333 = vmatpush1.msra.mxu1 %v6639_v15 }
 0xa61   :  { %3263 = vmatprep.subr.mxu0 %v6646_v16  ;;  %3334 = vmatprep.subr.mxu1 %v6651_v17 }
 0xa62   :  { %3264 = vmatpush1.msra.mxu0 %v6658_v18  ;;  %3335 = vmatpush1.msra.mxu1 %v6663_v20 }
 0xa63   :  { %3265 = vmatprep.subr.mxu0 %v6670_v21  ;;  %3336 = vmatprep.subr.mxu1 %v6675_v22 }
 0xa64   :  { %3266 = vmatpush1.msra.mxu0 %v6682_v23  ;;  %3337 = vmatpush1.msra.mxu1 %v7603_v9 }
 0xa65   :  { %3267 = vmatprep.subr.mxu0 %v7604_v53  ;;  %3338 = vmatprep.subr.mxu1 %v7605_v30 }
 0xa66   :  { %3268 = vmatpush1.msra.mxu0 %v7606_v41  ;;  %3339 = vmatpush1.msra.mxu1 %v7607_v62 }
 0xa67   :  { %3269 = vmatprep.subr.mxu0 %v7608_v35  ;;  %3340 = vmatprep.subr.mxu1 %v7609_v29  ;;  %v7620_v29 = vld [vmem:[#allocation19_spill] sm:$0xff] }
 0xa68   :  { %3270 = vmatpush1.msra.mxu0 %v7610_v10  ;;  %3341 = vmatpush1.msra.mxu1 %v7611_v33  ;;  %v7621_v33 = vld [vmem:[#allocation21_spill] sm:$0xff] }
 0xa69   :  { %3271 = vmatprep.subr.mxu0 %v7612_v32  ;;  %3342 = vmatprep.subr.mxu1 %v7613_v48  ;;  %v7622_v32 = vld [vmem:[#allocation4_spill] sm:$0xff] }
 0xa6a   :  { %3272 = vmatpush1.msra.mxu0 %v7614_v36  ;;  %3343 = vmatpush1.msra.mxu1 %v7615_v28 }
 0xa6b   :  { %3273 = vmatprep.subr.mxu0 %v7616_v31  ;;  %3344 = vmatprep.subr.mxu1 %v7617_v24 }
 0xa6c   :  { %3274 = vmatpush1.msra.mxu0 %v7618_v26  ;;  %3307 = vmatprep.mubr.f32.mxu0 %v7619_v25 }
 0xa6d   :  { %3345 = vmatpush1.msra.mxu1 %v7620_v29  ;;  %3378 = vmatprep.mubr.f32.mxu1 %v7619_v25  ;;  %v4290_v29 = vld [vmem:[%s7249_s0 + $0x48] sm:$0xff] }
 0xa6e   :  { %3506 = vmatprep.subr.mxu0 %v7621_v33  ;;  %3577 = vmatprep.subr.mxu1 %v7622_v32 }
 0xb0d   :  { %v3046_v48 = vpop.f32.mrf.mxu0  ;;  %v3117_v36 = vpop.f32.mrf.mxu1 }
 0xb0f   :  { %v3048_v10 = vpop.f32.mrf.mxu0  ;;  %v3119_v28 = vpop.f32.mrf.mxu1 }
 0xb10   :  { %v3126_v35 = vcombine.low %v3046_v48, %v3048_v10  ;;  %v3127_v31 = vcombine.low %v3117_v36, %v3119_v28 }
 0xb12   :  { %v3134_v24 = vrot.slane %v3126_v35, %v7583_v8  ;;  %v3141_v26 = vrot.slane %v3127_v31, %v7583_v8 }
 0xb14   :  { %v3142_v62 = vcombine.low %v3134_v24, %v3141_v26  ;;  %v7624_v26 = vld [vmem:[#allocation3_spill] sm:$0xff] }
 0xb16   :  { %v3144_v25 = vadd.f32 %v4290_v29, %v3142_v62 }
 0xb18   :  { %v4291_v41 = vmul.f32 -1.442695, %v3144_v25  ;;  %v3152_v33 = vrot.slane %v3144_v25, 2  ;;  %v3163_v30 = vrot.slane %v3144_v25, 6  ;;  %v3160_v10 = vrot.slane %v3144_v25, 4  ;;  %v7625_v25 = vld [vmem:[#allocation5_spill] sm:$0xff] }
 0xb1a   :  { %4491 = vpow2.f32 %v4291_v41  ;;  %v4292_v32 = vmul.f32 -1.442695, %v3152_v33  ;;  %v4293_v53 = vmul.f32 -1.442695, %v3163_v30 }
 0xb1c   :  { %4493 = vpow2.f32 %v4292_v32 }
 0xb1d   :  { %4495 = vpow2.f32 %v4293_v53 }
 0xb27   :  { %v4492_v9 = vpop.eup %4491 }
 0xb28   :  { %v3148_v48 = vadd.f32 1.0, %v4492_v9 }
 0xb29   :  { %v4494_v36 = vpop.eup %4493 }
 0xb2a   :  { %4497 = vrcp.f32 %v3148_v48  ;;  %v3157_v35 = vadd.f32 1.0, %v4494_v36  ;;  %v4496_v28 = vpop.eup %4495  ;;  %v7627_v48 = vld [vmem:[#allocation7_spill] sm:$0xff]  ;;  %v7628_v36 = vld [vmem:[#allocation8_spill] sm:$0xff] }
 0xb2b   :  { %4499 = vtanh.f32 %v3160_v10  ;;  %v3168_v29 = vadd.f32 1.0, %v4496_v28  ;;  %v7626_v10 = vld [vmem:[#allocation6_spill] sm:$0xff] }
 0xb2c   :  { %4501 = vrcp.f32 %v3157_v35  ;;  %v7629_v35 = vld [vmem:[#allocation9_spill] sm:$0xff]  ;;  %v7630_v28 = vld [vmem:[#allocation10_spill] sm:$0xff] }
 0xb2d   :  { %4503 = vrcp.f32 %v3168_v29  ;;  %v7634_v29 = vld [vmem:[#allocation14_spill] sm:$0xff] }
 0xb37   :  { %v4498_v31 = vpop.eup %4497 }
 0xb38   :  { %v4500_v24 = vpop.eup %4499 }
 0xb39   :  { %v4502_v62 = vpop.eup %4501  ;;  %v3172_v33 = vmul.f32 %v4500_v24, %v4498_v31  ;;  %v7631_v31 = vld [vmem:[#allocation11_spill] sm:$0xff]  ;;  %v7632_v24 = vld [vmem:[#allocation12_spill] sm:$0xff] }
 0xb3a   :  { %v3171_v41 = vmul.f32 %v4502_v62, %v6799_v34  ;;  %v4504_v9 = vpop.eup %4503  ;;  %v7623_v34 = vld [vmem:[#allocation2_spill] sm:$0xff]  ;;  %v7633_v62 = vld [vmem:[#allocation13_spill] sm:$0xff] }
 0xb3c   :  { %v6877_v32 = vadd.f32 %v3172_v33, %v3171_v41  ;;  %v7635_v41 = vld [vmem:[#allocation15_spill] sm:$0xff]  ;;  %v7636_v33 = vld [vmem:[#allocation16_spill] sm:$0xff] }
 0xb3e   :  { %4505 = vtanh.f32 %v6877_v32 }
 0xb4b   :  { %v4506_v30 = vpop.eup %4505 }
 0xb4c   :  { %v3175_v53 = vmul.f32 %v4506_v30, %v4504_v9  ;;  %v7637_v9 = vld [vmem:[#allocation17_spill] sm:$0xff]  ;;  %v7638_v30 = vld [vmem:[#allocation18_spill] sm:$0xff] }
 0xb4e   :  { %4294 = vst [vmem:[%s7252_s4 + $0x8] sm:$0x3] %v3175_v53  ;;  %3308 = vmatmul.mubr.f32.vlgmr.msra.gmra.mxu0 %v3175_v53  ;;  %3379 = vmatmul.mubr.f32.vlgmr.msra.gmra.mxu1 %v3175_v53  ;;  %v7639_v53 = vmov 0.0  }
 0xb4f   :  { %3507 = vmatpush1.msra.mxu0 %v6420_v46  ;;  %3578 = vmatpush1.msra.mxu1 %v6427_v38 }
 0xb50   :  { %3508 = vmatprep.subr.mxu0 %v6432_v11  ;;  %3579 = vmatprep.subr.mxu1 %v6437_v27 }
 0xb51   :  { %3509 = vmatpush1.msra.mxu0 %v6444_v37  ;;  %3580 = vmatpush1.msra.mxu1 %v6449_v43 }
 0xb52   :  { %3510 = vmatprep.subr.mxu0 %v6454_v42  ;;  %3581 = vmatprep.subr.mxu1 %v6461_v45 }
 0xb53   :  { %3511 = vmatpush1.msra.mxu0 %v6466_v44  ;;  %3582 = vmatpush1.msra.mxu1 %v6471_v3 }
 0xb54   :  { %3512 = vmatprep.subr.mxu0 %v6478_v51  ;;  %3583 = vmatprep.subr.mxu1 %v6483_v19 }
 0xb55   :  { %3513 = vmatpush1.msra.mxu0 %v6490_v57  ;;  %3584 = vmatpush1.msra.mxu1 %v6495_v56 }
 0xb56   :  { %3514 = vmatprep.subr.mxu0 %v6502_v1  ;;  %3585 = vmatprep.subr.mxu1 %v6507_v58 }
 0xb57   :  { %3515 = vmatpush1.msra.mxu0 %v6514_v55  ;;  %3586 = vmatpush1.msra.mxu1 %v6519_v39 }
 0xb58   :  { %3516 = vmatprep.subr.mxu0 %v6526_v40  ;;  %3587 = vmatprep.subr.mxu1 %v6531_v47 }
 0xb59   :  { %3517 = vmatpush1.msra.mxu0 %v6538_v59  ;;  %3588 = vmatpush1.msra.mxu1 %v6543_v0 }
 0xb5a   :  { %3518 = vmatprep.subr.mxu0 %v6550_v54  ;;  %3589 = vmatprep.subr.mxu1 %v6555_v52 }
 0xb5b   :  { %3519 = vmatpush1.msra.mxu0 %v6562_v61  ;;  %3590 = vmatpush1.msra.mxu1 %v6567_v50 }
 0xb5c   :  { %3520 = vmatprep.subr.mxu0 %v6574_v63  ;;  %3591 = vmatprep.subr.mxu1 %v6579_v60 }
 0xb5d   :  { %3521 = vmatpush1.msra.mxu0 %v6586_v49  ;;  %3592 = vmatpush1.msra.mxu1 %v6591_v2 }
 0xb5e   :  { %3522 = vmatprep.subr.mxu0 %v6598_v4  ;;  %3593 = vmatprep.subr.mxu1 %v6603_v5 }
 0xb5f   :  { %3523 = vmatpush1.msra.mxu0 %v6610_v6  ;;  %3594 = vmatpush1.msra.mxu1 %v6615_v7 }
 0xb60   :  { %3524 = vmatprep.subr.mxu0 %v6622_v12  ;;  %3595 = vmatprep.subr.mxu1 %v6627_v13 }
 0xb61   :  { %3525 = vmatpush1.msra.mxu0 %v6634_v14  ;;  %3596 = vmatpush1.msra.mxu1 %v6639_v15 }
 0xb62   :  { %3526 = vmatprep.subr.mxu0 %v6646_v16  ;;  %3597 = vmatprep.subr.mxu1 %v6651_v17 }
 0xb63   :  { %3527 = vmatpush1.msra.mxu0 %v6658_v18  ;;  %3598 = vmatpush1.msra.mxu1 %v6663_v20 }
 0xb64   :  { %3528 = vmatprep.subr.mxu0 %v6670_v21  ;;  %3599 = vmatprep.subr.mxu1 %v6675_v22 }
 0xb65   :  { %3529 = vmatpush1.msra.mxu0 %v6682_v23  ;;  %3600 = vmatpush1.msra.mxu1 %v7623_v34 }
 0xb66   :  { %3530 = vmatprep.subr.mxu0 %v7624_v26  ;;  %3601 = vmatprep.subr.mxu1 %v7625_v25 }
 0xb67   :  { %3531 = vmatpush1.msra.mxu0 %v7626_v10  ;;  %3602 = vmatpush1.msra.mxu1 %v7627_v48 }
 0xb68   :  { %3532 = vmatprep.subr.mxu0 %v7628_v36  ;;  %3603 = vmatprep.subr.mxu1 %v7629_v35  ;;  %v7640_v35 = vld [vmem:[#allocation19_spill] sm:$0xff] }
 0xb69   :  { %3533 = vmatpush1.msra.mxu0 %v7630_v28  ;;  %3604 = vmatpush1.msra.mxu1 %v7631_v31  ;;  %v7641_v31 = vld [vmem:[#allocation21_spill] sm:$0xff] }
 0xb6a   :  { %3534 = vmatprep.subr.mxu0 %v7632_v24  ;;  %3605 = vmatprep.subr.mxu1 %v7633_v62  ;;  %v7642_v24 = vld [vmem:[#allocation4_spill] sm:$0xff] }
 0xb6b   :  { %3535 = vmatpush1.msra.mxu0 %v7634_v29  ;;  %3606 = vmatpush1.msra.mxu1 %v7635_v41 }
 0xb6c   :  { %3536 = vmatprep.subr.mxu0 %v7636_v33  ;;  %3607 = vmatprep.subr.mxu1 %v7637_v9 }
 0xb6d   :  { %3537 = vmatpush1.msra.mxu0 %v7638_v30  ;;  %3570 = vmatprep.mubr.f32.mxu0 %v7639_v53 }
 0xb6e   :  { %3608 = vmatpush1.msra.mxu1 %v7640_v35  ;;  %3641 = vmatprep.mubr.f32.mxu1 %v7639_v53  ;;  %v4295_v35 = vld [vmem:[%s7249_s0 + $0x38] sm:$0xff] }
 0xb6f   :  { %3769 = vmatprep.subr.mxu0 %v7641_v31  ;;  %3840 = vmatprep.subr.mxu1 %v7642_v24 }
 0xc0e   :  { %v3309_v62 = vpop.f32.mrf.mxu0  ;;  %v3380_v29 = vpop.f32.mrf.mxu1 }
 0xc10   :  { %v3311_v28 = vpop.f32.mrf.mxu0  ;;  %v3382_v41 = vpop.f32.mrf.mxu1 }
 0xc11   :  { %v3389_v36 = vcombine.low %v3309_v62, %v3311_v28  ;;  %v3390_v33 = vcombine.low %v3380_v29, %v3382_v41 }
 0xc13   :  { %v3397_v9 = vrot.slane %v3389_v36, %v7583_v8  ;;  %v3404_v30 = vrot.slane %v3390_v33, %v7583_v8 }
 0xc15   :  { %v3405_v48 = vcombine.low %v3397_v9, %v3404_v30 }
 0xc17   :  { %v3407_v53 = vadd.f32 %v4295_v35, %v3405_v48 }
 0xc19   :  { %v4296_v10 = vmul.f32 -1.442695, %v3407_v53  ;;  %v3415_v31 = vrot.slane %v3407_v53, 2  ;;  %v3426_v25 = vrot.slane %v3407_v53, 6  ;;  %v3423_v28 = vrot.slane %v3407_v53, 4 }
 0xc1b   :  { %4507 = vpow2.f32 %v4296_v10  ;;  %v4297_v24 = vmul.f32 -1.442695, %v3415_v31  ;;  %v4298_v26 = vmul.f32 -1.442695, %v3426_v25 }
 0xc1d   :  { %4509 = vpow2.f32 %v4297_v24 }
 0xc1e   :  { %4511 = vpow2.f32 %v4298_v26 }
 0xc28   :  { %v4508_v34 = vpop.eup %4507 }
 0xc29   :  { %v3411_v62 = vadd.f32 1.0, %v4508_v34 }
 0xc2a   :  { %v4510_v29 = vpop.eup %4509 }
 0xc2b   :  { %4513 = vrcp.f32 %v3411_v62  ;;  %v3420_v36 = vadd.f32 1.0, %v4510_v29  ;;  %v4512_v41 = vpop.eup %4511  ;;  %v4029_v29 = vld [vmem:[%s7251_s2 + $0x1e8] sm:$0xff] }
 0xc2c   :  { %4515 = vtanh.f32 %v3423_v28  ;;  %v3431_v35 = vadd.f32 1.0, %v4512_v41  ;;  %v4028_v41 = vld [vmem:[%s7251_s2 + $0x1e0] sm:$0xff] }
 0xc2d   :  { %4517 = vrcp.f32 %v3420_v36  ;;  %v4031_v36 = vld [vmem:[%s7251_s2 + $0x1f8] sm:$0xff] }
 0xc2e   :  { %4519 = vrcp.f32 %v3431_v35  ;;  %v4024_v35 = vld [vmem:[%s7251_s2 + $0x1c0] sm:$0xff] }
 0xc38   :  { %v4514_v33 = vpop.eup %4513 }
 0xc39   :  { %v4516_v9 = vpop.eup %4515 }
 0xc3a   :  { %v4518_v48 = vpop.eup %4517  ;;  %v3435_v30 = vmul.f32 %v4516_v9, %v4514_v33  ;;  %v4030_v33 = vld [vmem:[%s7251_s2 + $0x1f0] sm:$0xff]  ;;  %v4025_v9 = vld [vmem:[%s7251_s2 + $0x1c8] sm:$0xff] }
 0xc3b   :  { %v3434_v10 = vmul.f32 %v4518_v48, %v6877_v32  ;;  %v4520_v34 = vpop.eup %4519  ;;  %v4027_v48 = vld [vmem:[%s7251_s2 + $0x1d8] sm:$0xff] }
 0xc3d   :  { %v6955_v31 = vadd.f32 %v3435_v30, %v3434_v10  ;;  %v4026_v10 = vld [vmem:[%s7251_s2 + $0x1d0] sm:$0xff]  ;;  %v4021_v30 = vld [vmem:[%s7251_s2 + $0x1a8] sm:$0xff] }
 0xc3f   :  { %4521 = vtanh.f32 %v6955_v31 }
 0xc4c   :  { %v4522_v25 = vpop.eup %4521 }
 0xc4d   :  { %v3438_v26 = vmul.f32 %v4522_v25, %v4520_v34  ;;  %v4020_v34 = vld [vmem:[%s7251_s2 + $0x1a0] sm:$0xff]  ;;  %v4022_v25 = vld [vmem:[%s7251_s2 + $0x1b0] sm:$0xff] }
 0xc4f   :  { %4299 = vst [vmem:[%s7252_s4 + $0x6] sm:$0x3] %v3438_v26  ;;  %3571 = vmatmul.mubr.f32.vlgmr.msra.gmra.mxu0 %v3438_v26  ;;  %3642 = vmatmul.mubr.f32.vlgmr.msra.gmra.mxu1 %v3438_v26  ;;  %v4017_v26 = vld [vmem:[%s7251_s2 + $0x188] sm:$0xff] }
 0xc50   :  { %3770 = vmatpush1.msra.mxu0 %v6420_v46  ;;  %3841 = vmatpush1.msra.mxu1 %v6427_v38  ;;  %v7643_v46 = vld [vmem:[#allocation2_spill] sm:$0xff]  ;;  %v7644_v38 = vld [vmem:[#allocation3_spill] sm:$0xff] }
 0xc51   :  { %3771 = vmatprep.subr.mxu0 %v6432_v11  ;;  %3842 = vmatprep.subr.mxu1 %v6437_v27  ;;  %v7645_v11 = vld [vmem:[#allocation5_spill] sm:$0xff]  ;;  %v7646_v27 = vld [vmem:[#allocation6_spill] sm:$0xff] }
 0xc52   :  { %3772 = vmatpush1.msra.mxu0 %v6444_v37  ;;  %3843 = vmatpush1.msra.mxu1 %v6449_v43  ;;  %v7647_v37 = vld [vmem:[#allocation7_spill] sm:$0xff]  ;;  %v7648_v43 = vld [vmem:[#allocation8_spill] sm:$0xff] }
 0xc53   :  { %3773 = vmatprep.subr.mxu0 %v6454_v42  ;;  %3844 = vmatprep.subr.mxu1 %v6461_v45  ;;  %v7649_v42 = vld [vmem:[#allocation9_spill] sm:$0xff]  ;;  %v7650_v45 = vld [vmem:[#allocation10_spill] sm:$0xff] }
 0xc54   :  { %3774 = vmatpush1.msra.mxu0 %v6466_v44  ;;  %3845 = vmatpush1.msra.mxu1 %v6471_v3  ;;  %v7651_v44 = vld [vmem:[#allocation11_spill] sm:$0xff]  ;;  %v7652_v3 = vld [vmem:[#allocation12_spill] sm:$0xff] }
 0xc55   :  { %3775 = vmatprep.subr.mxu0 %v6478_v51  ;;  %3846 = vmatprep.subr.mxu1 %v6483_v19  ;;  %v7653_v51 = vld [vmem:[#allocation13_spill] sm:$0xff]  ;;  %v7654_v19 = vld [vmem:[#allocation14_spill] sm:$0xff] }
 0xc56   :  { %3776 = vmatpush1.msra.mxu0 %v6490_v57  ;;  %3847 = vmatpush1.msra.mxu1 %v6495_v56  ;;  %v7655_v57 = vld [vmem:[#allocation15_spill] sm:$0xff]  ;;  %v7656_v56 = vld [vmem:[#allocation16_spill] sm:$0xff] }
 0xc57   :  { %3777 = vmatprep.subr.mxu0 %v6502_v1  ;;  %3848 = vmatprep.subr.mxu1 %v6507_v58  ;;  %v7657_v1 = vld [vmem:[#allocation17_spill] sm:$0xff]  ;;  %v7658_v58 = vld [vmem:[#allocation18_spill] sm:$0xff] }
 0xc58   :  { %3778 = vmatpush1.msra.mxu0 %v6514_v55  ;;  %3849 = vmatpush1.msra.mxu1 %v6519_v39  ;;  %v7659_v55 = vmov 0.0   ;;  %v7660_v39 = vld [vmem:[#allocation19_spill] sm:$0xff] }
 0xc59   :  { %3779 = vmatprep.subr.mxu0 %v6526_v40  ;;  %3850 = vmatprep.subr.mxu1 %v6531_v47 }
 0xc5a   :  { %3780 = vmatpush1.msra.mxu0 %v6538_v59  ;;  %3851 = vmatpush1.msra.mxu1 %v6543_v0 }
 0xc5b   :  { %3781 = vmatprep.subr.mxu0 %v6550_v54  ;;  %3852 = vmatprep.subr.mxu1 %v6555_v52 }
 0xc5c   :  { %3782 = vmatpush1.msra.mxu0 %v6562_v61  ;;  %3853 = vmatpush1.msra.mxu1 %v6567_v50 }
 0xc5d   :  { %3783 = vmatprep.subr.mxu0 %v6574_v63  ;;  %3854 = vmatprep.subr.mxu1 %v6579_v60  ;;  %v4300_v63 = vld [vmem:[%s7249_s0 + $0x28] sm:$0xff] }
 0xc5e   :  { %3784 = vmatpush1.msra.mxu0 %v6586_v49  ;;  %3855 = vmatpush1.msra.mxu1 %v6591_v2 }
 0xc5f   :  { %3785 = vmatprep.subr.mxu0 %v6598_v4  ;;  %3856 = vmatprep.subr.mxu1 %v6603_v5 }
 0xc60   :  { %3786 = vmatpush1.msra.mxu0 %v6610_v6  ;;  %3857 = vmatpush1.msra.mxu1 %v6615_v7 }
 0xc61   :  { %3787 = vmatprep.subr.mxu0 %v6622_v12  ;;  %3858 = vmatprep.subr.mxu1 %v6627_v13 }
 0xc62   :  { %3788 = vmatpush1.msra.mxu0 %v6634_v14  ;;  %3859 = vmatpush1.msra.mxu1 %v6639_v15 }
 0xc63   :  { %3789 = vmatprep.subr.mxu0 %v6646_v16  ;;  %3860 = vmatprep.subr.mxu1 %v6651_v17 }
 0xc64   :  { %3790 = vmatpush1.msra.mxu0 %v6658_v18  ;;  %3861 = vmatpush1.msra.mxu1 %v6663_v20 }
 0xc65   :  { %3791 = vmatprep.subr.mxu0 %v6670_v21  ;;  %3862 = vmatprep.subr.mxu1 %v6675_v22 }
 0xc66   :  { %3792 = vmatpush1.msra.mxu0 %v6682_v23  ;;  %3863 = vmatpush1.msra.mxu1 %v7643_v46  ;;  %v4019_v46 = vld [vmem:[%s7251_s2 + $0x198] sm:$0xff] }
 0xc67   :  { %3793 = vmatprep.subr.mxu0 %v7644_v38  ;;  %3864 = vmatprep.subr.mxu1 %v7645_v11  ;;  %v4016_v38 = vld [vmem:[%s7251_s2 + $0x180] sm:$0xff]  ;;  %v4018_v11 = vld [vmem:[%s7251_s2 + $0x190] sm:$0xff] }
 0xc68   :  { %3794 = vmatpush1.msra.mxu0 %v7646_v27  ;;  %3865 = vmatpush1.msra.mxu1 %v7647_v37  ;;  %v4013_v27 = vld [vmem:[%s7251_s2 + $0x168] sm:$0xff]  ;;  %v4015_v37 = vld [vmem:[%s7251_s2 + $0x178] sm:$0xff] }
 0xc69   :  { %3795 = vmatprep.subr.mxu0 %v7648_v43  ;;  %3866 = vmatprep.subr.mxu1 %v7649_v42  ;;  %v4012_v43 = vld [vmem:[%s7251_s2 + $0x160] sm:$0xff]  ;;  %v4014_v42 = vld [vmem:[%s7251_s2 + $0x170] sm:$0xff] }
 0xc6a   :  { %3796 = vmatpush1.msra.mxu0 %v7650_v45  ;;  %3867 = vmatpush1.msra.mxu1 %v7651_v44  ;;  %v4009_v45 = vld [vmem:[%s7251_s2 + $0x148] sm:$0xff]  ;;  %v4011_v44 = vld [vmem:[%s7251_s2 + $0x158] sm:$0xff] }
 0xc6b   :  { %3797 = vmatprep.subr.mxu0 %v7652_v3  ;;  %3868 = vmatprep.subr.mxu1 %v7653_v51  ;;  %v4008_v3 = vld [vmem:[%s7251_s2 + $0x140] sm:$0xff]  ;;  %v4010_v51 = vld [vmem:[%s7251_s2 + $0x150] sm:$0xff] }
 0xc6c   :  { %3798 = vmatpush1.msra.mxu0 %v7654_v19  ;;  %3869 = vmatpush1.msra.mxu1 %v7655_v57  ;;  %v4005_v19 = vld [vmem:[%s7251_s2 + $0x128] sm:$0xff]  ;;  %v4007_v57 = vld [vmem:[%s7251_s2 + $0x138] sm:$0xff] }
 0xc6d   :  { %3799 = vmatprep.subr.mxu0 %v7656_v56  ;;  %3870 = vmatprep.subr.mxu1 %v7657_v1  ;;  %v4004_v56 = vld [vmem:[%s7251_s2 + $0x120] sm:$0xff]  ;;  %v4006_v1 = vld [vmem:[%s7251_s2 + $0x130] sm:$0xff] }
 0xc6e   :  { %3800 = vmatpush1.msra.mxu0 %v7658_v58  ;;  %3833 = vmatprep.mubr.f32.mxu0 %v7659_v55  ;;  %v4001_v58 = vld [vmem:[%s7251_s2 + $0x108] sm:$0xff] }
 0xc6f   :  { %3871 = vmatpush1.msra.mxu1 %v7660_v39  ;;  %3904 = vmatprep.mubr.f32.mxu1 %v7659_v55  ;;  %v4000_v39 = vld [vmem:[%s7251_s2 + $0x100] sm:$0xff] }
 0xc70   :  { %4032 = vmatprep.subr.mxu0 %v4029_v29  ;;  %4103 = vmatprep.subr.mxu1 %v4031_v36  ;;  %v3968_v29 = vld [vmem:[%s7251_s2] sm:$0xff]  ;;  %v3970_v36 = vld [vmem:[%s7251_s2 + $0x10] sm:$0xff] }
 0xd0f   :  { %v3572_v40 = vpop.f32.mrf.mxu0  ;;  %v3643_v47 = vpop.f32.mrf.mxu1 }
 0xd11   :  { %v3574_v59 = vpop.f32.mrf.mxu0  ;;  %v3645_v0 = vpop.f32.mrf.mxu1 }
 0xd12   :  { %v3652_v54 = vcombine.low %v3572_v40, %v3574_v59  ;;  %v3653_v52 = vcombine.low %v3643_v47, %v3645_v0  ;;  %v4002_v40 = vld [vmem:[%s7251_s2 + $0x110] sm:$0xff]  ;;  %v3997_v47 = vld [vmem:[%s7251_s2 + $0xe8] sm:$0xff]  ;;  %v3999_v59 = vld [vmem:[%s7251_s2 + $0xf8] sm:$0xff] }
 0xd13   :  { %v3996_v0 = vld [vmem:[%s7251_s2 + $0xe0] sm:$0xff] }
 0xd14   :  { %v3660_v61 = vrot.slane %v3652_v54, %v7583_v8  ;;  %v3667_v50 = vrot.slane %v3653_v52, %v7583_v8  ;;  %v3998_v54 = vld [vmem:[%s7251_s2 + $0xf0] sm:$0xff]  ;;  %v3993_v52 = vld [vmem:[%s7251_s2 + $0xc8] sm:$0xff] }
 0xd16   :  { %v3668_v60 = vcombine.low %v3660_v61, %v3667_v50  ;;  %v3995_v61 = vld [vmem:[%s7251_s2 + $0xd8] sm:$0xff]  ;;  %v3992_v50 = vld [vmem:[%s7251_s2 + $0xc0] sm:$0xff] }
 0xd18   :  { %v3670_v49 = vadd.f32 %v4300_v63, %v3668_v60  ;;  %v3994_v63 = vld [vmem:[%s7251_s2 + $0xd0] sm:$0xff]  ;;  %v3989_v60 = vld [vmem:[%s7251_s2 + $0xa8] sm:$0xff] }
 0xd1a   :  { %v4301_v2 = vmul.f32 -1.442695, %v3670_v49  ;;  %v3678_v4 = vrot.slane %v3670_v49, 2  ;;  %v3689_v6 = vrot.slane %v3670_v49, 6  ;;  %v3686_v13 = vrot.slane %v3670_v49, 4  ;;  %v3991_v49 = vld [vmem:[%s7251_s2 + $0xb8] sm:$0xff] }
 0xd1c   :  { %4523 = vpow2.f32 %v4301_v2  ;;  %v4302_v5 = vmul.f32 -1.442695, %v3678_v4  ;;  %v4303_v7 = vmul.f32 -1.442695, %v3689_v6  ;;  %v3988_v2 = vld [vmem:[%s7251_s2 + $0xa0] sm:$0xff]  ;;  %v3990_v4 = vld [vmem:[%s7251_s2 + $0xb0] sm:$0xff] }
 0xd1d   :  { %v3987_v6 = vld [vmem:[%s7251_s2 + $0x98] sm:$0xff] }
 0xd1e   :  { %4525 = vpow2.f32 %v4302_v5  ;;  %v3985_v5 = vld [vmem:[%s7251_s2 + $0x88] sm:$0xff] }
 0xd1f   :  { %4527 = vpow2.f32 %v4303_v7  ;;  %v3984_v7 = vld [vmem:[%s7251_s2 + $0x80] sm:$0xff] }
 0xd29   :  { %v4524_v12 = vpop.eup %4523 }
 0xd2a   :  { %v3674_v14 = vadd.f32 1.0, %v4524_v12  ;;  %v3986_v12 = vld [vmem:[%s7251_s2 + $0x90] sm:$0xff] }
 0xd2b   :  { %v4526_v15 = vpop.eup %4525 }
 0xd2c   :  { %4529 = vrcp.f32 %v3674_v14  ;;  %v3683_v16 = vadd.f32 1.0, %v4526_v15  ;;  %v4528_v17 = vpop.eup %4527  ;;  %v3983_v14 = vld [vmem:[%s7251_s2 + $0x78] sm:$0xff]  ;;  %v3980_v15 = vld [vmem:[%s7251_s2 + $0x60] sm:$0xff] }
 0xd2d   :  { %4531 = vtanh.f32 %v3686_v13  ;;  %v3694_v22 = vadd.f32 1.0, %v4528_v17  ;;  %v3981_v13 = vld [vmem:[%s7251_s2 + $0x68] sm:$0xff] }
 0xd2e   :  { %4533 = vrcp.f32 %v3683_v16  ;;  %v3982_v16 = vld [vmem:[%s7251_s2 + $0x70] sm:$0xff]  ;;  %v3977_v17 = vld [vmem:[%s7251_s2 + $0x48] sm:$0xff] }
 0xd2f   :  { %4535 = vrcp.f32 %v3694_v22  ;;  %v3973_v22 = vld [vmem:[%s7251_s2 + $0x28] sm:$0xff] }
 0xd39   :  { %v4530_v18 = vpop.eup %4529 }
 0xd3a   :  { %v4532_v20 = vpop.eup %4531 }
 0xd3b   :  { %v4534_v21 = vpop.eup %4533  ;;  %v3698_v32 = vmul.f32 %v4532_v20, %v4530_v18  ;;  %v3979_v18 = vld [vmem:[%s7251_s2 + $0x58] sm:$0xff]  ;;  %v3976_v20 = vld [vmem:[%s7251_s2 + $0x40] sm:$0xff] }
 0xd3c   :  { %v3697_v23 = vmul.f32 %v4534_v21, %v6955_v31  ;;  %v4536_v24 = vpop.eup %4535  ;;  %v4023_v31 = vld [vmem:[%s7251_s2 + $0x1b8] sm:$0xff]  ;;  %v3978_v21 = vld [vmem:[%s7251_s2 + $0x50] sm:$0xff] }
 0xd3e   :  { %v7031_v53 = vadd.f32 %v3698_v32, %v3697_v23  ;;  %v3975_v23 = vld [vmem:[%s7251_s2 + $0x38] sm:$0xff]  ;;  %v3972_v32 = vld [vmem:[%s7251_s2 + $0x20] sm:$0xff] }
 0xd40   :  { %4537 = vtanh.f32 %v7031_v53 }
 0xd4d   :  { %v4538_v28 = vpop.eup %4537 }
 0xd4e   :  { %v3701_v62 = vmul.f32 %v4538_v28, %v4536_v24  ;;  %v3974_v24 = vld [vmem:[%s7251_s2 + $0x30] sm:$0xff]  ;;  %v3969_v28 = vld [vmem:[%s7251_s2 + $0x8] sm:$0xff] }
 0xd50   :  { %4304 = vst [vmem:[%s7252_s4 + $0x4] sm:$0x3] %v3701_v62  ;;  %3834 = vmatmul.mubr.f32.vlgmr.msra.gmra.mxu0 %v3701_v62  ;;  %3905 = vmatmul.mubr.f32.vlgmr.msra.gmra.mxu1 %v3701_v62  ;;  %v3971_v62 = vld [vmem:[%s7251_s2 + $0x18] sm:$0xff] }
 0xd51   :  { %4096 = vmatprep.mubr.f32.mxu0 %v7659_v55  ;;  %4167 = vmatprep.mubr.f32.mxu1 %v7659_v55  ;;  %v4003_v55 = vld [vmem:[%s7251_s2 + $0x118] sm:$0xff] }
 0xd52   :  { %4033 = vmatpush1.msra.mxu0 %v4028_v41  ;;  %4104 = vmatpush1.msra.mxu1 %v4030_v33 }
 0xd53   :  { %4034 = vmatprep.subr.mxu0 %v4025_v9  ;;  %4105 = vmatprep.subr.mxu1 %v4027_v48 }
 0xd54   :  { %4035 = vmatpush1.msra.mxu0 %v4024_v35  ;;  %4106 = vmatpush1.msra.mxu1 %v4026_v10 }
 0xd55   :  { %4036 = vmatprep.subr.mxu0 %v4021_v30  ;;  %4107 = vmatprep.subr.mxu1 %v4023_v31 }
 0xd56   :  { %4037 = vmatpush1.msra.mxu0 %v4020_v34  ;;  %4108 = vmatpush1.msra.mxu1 %v4022_v25  ;;  %v4305_v34 = vld [vmem:[%s7249_s0 + $0x18] sm:$0xff] }
 0xd57   :  { %4038 = vmatprep.subr.mxu0 %v4017_v26  ;;  %4109 = vmatprep.subr.mxu1 %v4019_v46 }
 0xd58   :  { %4039 = vmatpush1.msra.mxu0 %v4016_v38  ;;  %4110 = vmatpush1.msra.mxu1 %v4018_v11 }
 0xd59   :  { %4040 = vmatprep.subr.mxu0 %v4013_v27  ;;  %4111 = vmatprep.subr.mxu1 %v4015_v37 }
 0xd5a   :  { %4041 = vmatpush1.msra.mxu0 %v4012_v43  ;;  %4112 = vmatpush1.msra.mxu1 %v4014_v42 }
 0xd5b   :  { %4042 = vmatprep.subr.mxu0 %v4009_v45  ;;  %4113 = vmatprep.subr.mxu1 %v4011_v44 }
 0xd5c   :  { %4043 = vmatpush1.msra.mxu0 %v4008_v3  ;;  %4114 = vmatpush1.msra.mxu1 %v4010_v51 }
 0xd5d   :  { %4044 = vmatprep.subr.mxu0 %v4005_v19  ;;  %4115 = vmatprep.subr.mxu1 %v4007_v57 }
 0xd5e   :  { %4045 = vmatpush1.msra.mxu0 %v4004_v56  ;;  %4116 = vmatpush1.msra.mxu1 %v4006_v1 }
 0xd5f   :  { %4046 = vmatprep.subr.mxu0 %v4001_v58  ;;  %4117 = vmatprep.subr.mxu1 %v4003_v55 }
 0xd60   :  { %4047 = vmatpush1.msra.mxu0 %v4000_v39  ;;  %4118 = vmatpush1.msra.mxu1 %v4002_v40 }
 0xd61   :  { %4048 = vmatprep.subr.mxu0 %v3997_v47  ;;  %4119 = vmatprep.subr.mxu1 %v3999_v59 }
 0xd62   :  { %4049 = vmatpush1.msra.mxu0 %v3996_v0  ;;  %4120 = vmatpush1.msra.mxu1 %v3998_v54 }
 0xd63   :  { %4050 = vmatprep.subr.mxu0 %v3993_v52  ;;  %4121 = vmatprep.subr.mxu1 %v3995_v61 }
 0xd64   :  { %4051 = vmatpush1.msra.mxu0 %v3992_v50  ;;  %4122 = vmatpush1.msra.mxu1 %v3994_v63 }
 0xd65   :  { %4052 = vmatprep.subr.mxu0 %v3989_v60  ;;  %4123 = vmatprep.subr.mxu1 %v3991_v49  ;;  %v3967_v49 = vld [vmem:[%s7249_s0 + $0x8] sm:$0xff] }
 0xd66   :  { %4053 = vmatpush1.msra.mxu0 %v3988_v2  ;;  %4124 = vmatpush1.msra.mxu1 %v3990_v4 }
 0xd67   :  { %4054 = vmatprep.subr.mxu0 %v3985_v5  ;;  %4125 = vmatprep.subr.mxu1 %v3987_v6 }
 0xd68   :  { %4055 = vmatpush1.msra.mxu0 %v3984_v7  ;;  %4126 = vmatpush1.msra.mxu1 %v3986_v12 }
 0xd69   :  { %4056 = vmatprep.subr.mxu0 %v3981_v13  ;;  %4127 = vmatprep.subr.mxu1 %v3983_v14 }
 0xd6a   :  { %4057 = vmatpush1.msra.mxu0 %v3980_v15  ;;  %4128 = vmatpush1.msra.mxu1 %v3982_v16 }
 0xd6b   :  { %4058 = vmatprep.subr.mxu0 %v3977_v17  ;;  %4129 = vmatprep.subr.mxu1 %v3979_v18 }
 0xd6c   :  { %4059 = vmatpush1.msra.mxu0 %v3976_v20  ;;  %4130 = vmatpush1.msra.mxu1 %v3978_v21 }
 0xd6d   :  { %4060 = vmatprep.subr.mxu0 %v3973_v22  ;;  %4131 = vmatprep.subr.mxu1 %v3975_v23 }
 0xd6e   :  { %4061 = vmatpush1.msra.mxu0 %v3972_v32  ;;  %4132 = vmatpush1.msra.mxu1 %v3974_v24 }
 0xd6f   :  { %4062 = vmatprep.subr.mxu0 %v3969_v28  ;;  %4133 = vmatprep.subr.mxu1 %v3971_v62 }
 0xd70   :  { %4063 = vmatpush1.msra.mxu0 %v3968_v29  ;;  %4134 = vmatpush1.msra.mxu1 %v3970_v36 }
 0xe10   :  { %v3835_v41 = vpop.f32.mrf.mxu0  ;;  %v3906_v33 = vpop.f32.mrf.mxu1 }
 0xe12   :  { %v3837_v9 = vpop.f32.mrf.mxu0  ;;  %v3908_v48 = vpop.f32.mrf.mxu1 }
 0xe13   :  { %v3915_v35 = vcombine.low %v3835_v41, %v3837_v9  ;;  %v3916_v10 = vcombine.low %v3906_v33, %v3908_v48 }
 0xe15   :  { %v3923_v30 = vrot.slane %v3915_v35, %v7583_v8  ;;  %v3930_v31 = vrot.slane %v3916_v10, %v7583_v8 }
 0xe17   :  { %v3931_v25 = vcombine.low %v3923_v30, %v3930_v31 }
 0xe19   :  { %v3933_v26 = vadd.f32 %v4305_v34, %v3931_v25 }
 0xe1b   :  { %v4306_v46 = vmul.f32 -1.442695, %v3933_v26  ;;  %v3941_v38 = vrot.slane %v3933_v26, 2  ;;  %v3952_v27 = vrot.slane %v3933_v26, 6  ;;  %v3949_v42 = vrot.slane %v3933_v26, 4 }
 0xe1d   :  { %4539 = vpow2.f32 %v4306_v46  ;;  %v4307_v11 = vmul.f32 -1.442695, %v3941_v38  ;;  %v4308_v37 = vmul.f32 -1.442695, %v3952_v27 }
 0xe1f   :  { %4541 = vpow2.f32 %v4307_v11 }
 0xe20   :  { %4543 = vpow2.f32 %v4308_v37 }
 0xe2a   :  { %v4540_v43 = vpop.eup %4539 }
 0xe2b   :  { %v3937_v45 = vadd.f32 1.0, %v4540_v43 }
 0xe2c   :  { %v4542_v44 = vpop.eup %4541 }
 0xe2d   :  { %4545 = vrcp.f32 %v3937_v45  ;;  %v3946_v3 = vadd.f32 1.0, %v4542_v44  ;;  %v4544_v51 = vpop.eup %4543 }
 0xe2e   :  { %4547 = vtanh.f32 %v3949_v42  ;;  %v3957_v1 = vadd.f32 1.0, %v4544_v51 }
 0xe2f   :  { %4549 = vrcp.f32 %v3946_v3 }
 0xe30   :  { %4551 = vrcp.f32 %v3957_v1 }
 0xe3a   :  { %v4546_v19 = vpop.eup %4545 }
 0xe3b   :  { %v4548_v57 = vpop.eup %4547 }
 0xe3c   :  { %v4550_v56 = vpop.eup %4549  ;;  %v3961_v55 = vmul.f32 %v4548_v57, %v4546_v19 }
 0xe3d   :  { %v3960_v58 = vmul.f32 %v4550_v56, %v7031_v53  ;;  %v4552_v40 = vpop.eup %4551 }
 0xe3f   :  { %v3962_v39 = vadd.f32 %v3961_v55, %v3960_v58 }
 0xe41   :  { %4553 = vtanh.f32 %v3962_v39 }
 0xe4e   :  { %v4554_v47 = vpop.eup %4553 }
 0xe4f   :  { %v3964_v59 = vmul.f32 %v4554_v47, %v4552_v40 }
 0xe51   :  { %4309 = vst [vmem:[%s7252_s4 + $0x2] sm:$0x3] %v3964_v59  ;;  %4097 = vmatmul.mubr.f32.vlgmr.msra.gmra.mxu0 %v3964_v59  ;;  %4168 = vmatmul.mubr.f32.vlgmr.msra.gmra.mxu1 %v3964_v59 }
 0xf11   :  { %v4098_v0 = vpop.f32.mrf.mxu0  ;;  %v4169_v54 = vpop.f32.mrf.mxu1 }
 0xf13   :  { %v4100_v52 = vpop.f32.mrf.mxu0  ;;  %v4171_v61 = vpop.f32.mrf.mxu1 }
 0xf14   :  { %v4178_v50 = vcombine.low %v4098_v0, %v4100_v52  ;;  %v4179_v63 = vcombine.low %v4169_v54, %v4171_v61 }
 0xf16   :  { %v4186_v53 = vrot.slane %v4178_v50, %v7583_v8  ;;  %v4193_v60 = vrot.slane %v4179_v63, %v7583_v8 }
 0xf18   :  { %v4194_v2 = vcombine.low %v4186_v53, %v4193_v60 }
 0xf1a   :  { %v4196_v4 = vadd.f32 %v4194_v2, %v3967_v49 }
 0xf1c   :  { %v4310_v5 = vmul.f32 -1.442695, %v4196_v4  ;;  %v4204_v6 = vrot.slane %v4196_v4, 2  ;;  %v4215_v12 = vrot.slane %v4196_v4, 6  ;;  %v4212_v15 = vrot.slane %v4196_v4, 4 }
 0xf1e   :  { %4555 = vpow2.f32 %v4310_v5  ;;  %v4311_v7 = vmul.f32 -1.442695, %v4204_v6  ;;  %v4312_v13 = vmul.f32 -1.442695, %v4215_v12 }
 0xf20   :  { %4557 = vpow2.f32 %v4311_v7 }
 0xf21   :  { %4559 = vpow2.f32 %v4312_v13 }
 0xf2b   :  { %v4556_v14 = vpop.eup %4555 }
 0xf2c   :  { %v4200_v16 = vadd.f32 1.0, %v4556_v14 }
 0xf2d   :  { %v4558_v17 = vpop.eup %4557 }
 0xf2e   :  { %4561 = vrcp.f32 %v4200_v16  ;;  %v4209_v8 = vadd.f32 1.0, %v4558_v17  ;;  %v4560_v18 = vpop.eup %4559 }
 0xf2f   :  { %4563 = vtanh.f32 %v4212_v15  ;;  %v4220_v23 = vadd.f32 1.0, %v4560_v18 }
 0xf30   :  { %4565 = vrcp.f32 %v4209_v8 }
 0xf31   :  { %4567 = vrcp.f32 %v4220_v23 }
 0xf3b   :  { %v4562_v20 = vpop.eup %4561 }
 0xf3c   :  { %v4564_v21 = vpop.eup %4563 }
 0xf3d   :  { %v4566_v22 = vpop.eup %4565  ;;  %v4224_v24 = vmul.f32 %v4564_v21, %v4562_v20 }
 0xf3e   :  { %v4223_v32 = vmul.f32 %v4566_v22, %v3962_v39  ;;  %v4568_v62 = vpop.eup %4567 }
 0xf40   :  { %v4225_v28 = vadd.f32 %v4224_v24, %v4223_v32 }
 0xf42   :  { %4569 = vtanh.f32 %v4225_v28 }
 0xf4f   :  { %v4570_v29 = vpop.eup %4569 }
 0xf50   :  { %v4227_v36 = vmul.f32 %v4570_v29, %v4568_v62 }
 0xf52   :  { %4228 = vst [vmem:[%s7252_s4] sm:$0x3] %v4227_v36 }

</bundles_post_ra>
